<compile_context>
chip_gen: v7x
topology: tpu7x:2x2x1
jax: 0.10.0
libtpu: 0.0.40
codegen_flags: <defaults>
</compile_context>

<pallas_src>
import jax
import jax.numpy as jnp
from jax import lax
from jax.experimental import pallas as pl
from jax.experimental.pallas import tpu as pltpu

B = 2          # batch
N = 2048       # points per cloud (required by decoder's view(-1, 3, 2048))
LATENT = 16
TN = 512       # points processed per in-kernel chunk (N // TN fori_loop steps)
BN_EPS = 1e-5


# ---------------------------------------------------------------------------
# Kernel: full AutoEncoder forward for one batch element per grid step
# ---------------------------------------------------------------------------
def autoencoder_kernel(x_ref,
                       w1, b1, w2, b2, w3, b3, w4, b4, w5, b5,
                       d1w, d1b, d2w, d2b, d3w, d3b,
                       out_ref):
    """x_ref: (1, N, 3) channels-last points; out_ref: (1, 1, 3*N) output row.

    wK/bK : encoder Conv1d(k=1) weights with BatchNorm folded in
            (w1 kept f32 for the VPU-FMA first layer; w2..w5 are bf16).
    dKw/dKb: decoder fc weights (bf16) / biases (f32).
    """

    def dot_bf16(h, w_ref, b_ref):
        # bf16 MXU operands, f32 accumulation, f32 bias add.
        return jnp.dot(h.astype(jnp.bfloat16), w_ref[...],
                       preferred_element_type=jnp.float32) + b_ref[...]

    def chunk_body(i, running_max):
        start = pl.multiple_of(i * TN, TN)
        xc = x_ref[0, pl.ds(start, TN), :]                        # (TN, 3) f32
        # Layer 1 (Cin=3): three broadcast-FMAs on the VPU.
        h = (xc[:, 0:1] * w1[0:1, :]
             + xc[:, 1:2] * w1[1:2, :]
             + xc[:, 2:3] * w1[2:3, :]
             + b1[...])
        h = jnp.maximum(h, 0.0)                                   # (TN, 64)
        h = jnp.maximum(dot_bf16(h, w2, b2), 0.0)                 # (TN, 128)
        h = jnp.maximum(dot_bf16(h, w3, b3), 0.0)                 # (TN, 128)
        h = jnp.maximum(dot_bf16(h, w4, b4), 0.0)                 # (TN, 256)
        h = jnp.maximum(dot_bf16(h, w5, b5), 0.0)                 # (TN, 16)
        # torch.max(x, 2)[0]: running max over points (ReLU => values >= 0).
        return jnp.maximum(running_max, jnp.max(h, axis=0, keepdims=True))

    z = lax.fori_loop(0, N // TN, chunk_body,
                      jnp.zeros((1, LATENT), jnp.float32))        # (1, 16)

    # Fused decoder: fc1 + ReLU -> fc2 + ReLU -> fc3.
    h = jnp.maximum(dot_bf16(z, d1w, d1b), 0.0)                   # (1, 256)
    h = jnp.maximum(dot_bf16(h, d2w, d2b), 0.0)                   # (1, 256)
    out_ref[0] = dot_bf16(h, d3w, d3b)                            # (1, 6144)


# ---------------------------------------------------------------------------
# Wrapper
# ---------------------------------------------------------------------------
def autoencoder_forward(x_bcn, enc_params, dec_params):
    """x_bcn: (B, 3, N) NCW like PyTorch -> (B, 3, N) reconstruction."""
    x_bnc = jnp.transpose(x_bcn, (0, 2, 1))      # channels-last for the kernel
    batch = x_bnc.shape[0]

    flat_params = []
    for w, bias in list(enc_params) + list(dec_params):
        flat_params += [w, bias]

    def resident(a):
        # Full-array block with a constant block index: weight stays resident
        # in VMEM across grid steps (no re-DMA per batch element).
        return pl.BlockSpec(a.shape, lambda b, _nd=a.ndim: (0,) * _nd)

    in_specs = [pl.BlockSpec((1, N, 3), lambda b: (b, 0, 0))]
    in_specs += [resident(a) for a in flat_params]

    out = pl.pallas_call(
        autoencoder_kernel,
        out_shape=jax.ShapeDtypeStruct((batch, 1, 3 * N), jnp.float32),
        grid_spec=pltpu.PrefetchScalarGridSpec(
            num_scalar_prefetch=0,
            grid=(batch,),
            in_specs=in_specs,
            out_specs=pl.BlockSpec((1, 1, 3 * N), lambda b: (b, 0, 0)),
        ),
        compiler_params=pltpu.CompilerParams(
            # B=2 maps one batch element per TensorCore on megacore parts.
            dimension_semantics=("parallel",),
            # Explicit budget: ~6.7 MiB of (double-buffered) operands + loop
            # scratch fits easily under v7x's 64 MiB VMEM as well.
            vmem_limit_bytes=32 * 1024 * 1024,
        ),
    )(x_bnc, *flat_params)
    return out.reshape(batch, 3, N)


# ---------------------------------------------------------------------------
# Deterministic parameter construction (shapes from the module's __init__)
# ---------------------------------------------------------------------------
def init_params(key):
    keys = iter(jax.random.split(key, 40))

    def linear(cin, cout):
        bound = 1.0 / float(cin) ** 0.5
        w = jax.random.uniform(next(keys), (cin, cout), jnp.float32, -bound, bound)
        b = jax.random.uniform(next(keys), (1, cout), jnp.float32, -bound, bound)
        return w, b

    def batchnorm(c):
        gamma = jax.random.uniform(next(keys), (c,), jnp.float32, 0.5, 1.5)
        beta = 0.1 * jax.random.normal(next(keys), (c,), jnp.float32)
        mean = 0.1 * jax.random.normal(next(keys), (c,), jnp.float32)
        var = jax.random.uniform(next(keys), (c,), jnp.float32, 0.5, 1.5)
        return gamma, beta, mean, var

    def fold_bn(wb, bn):
        w, b = wb
        gamma, beta, mean, var = bn
        scale = gamma / jnp.sqrt(var + BN_EPS)
        return w * scale[None, :], (b - mean[None, :]) * scale[None, :] + beta[None, :]

    # Encoder: Conv1d(k=1) layers as (Cin, Cout) matrices, BN folded in.
    enc_dims = [(3, 64), (64, 128), (128, 128), (128, 256), (256, LATENT)]
    enc_params = []
    for li, (cin, cout) in enumerate(enc_dims):
        w, b = fold_bn(linear(cin, cout), batchnorm(cout))
        if li > 0:                       # layer 1 stays f32 (VPU-FMA path)
            w = w.astype(jnp.bfloat16)   # bf16 MXU operand
        enc_params.append((w, b))

    # Decoder: fc1, fc2, fc3 (bn1/bn2 unused in the PyTorch forward).
    dec_params = []
    for cin, cout in [(LATENT, 256), (256, 256), (256, 3 * N)]:
        w, b = linear(cin, cout)
        dec_params.append((w.astype(jnp.bfloat16), b))
    return enc_params, dec_params


# ---------------------------------------------------------------------------
# Pure-JAX reference mirroring the kernel's mixed precision
# (bf16 dot operands, f32 accumulation; layer 1 in f32).  The full-f32 module
# output differs from this only by bf16 operand rounding (~1e-2 relative).
# ---------------------------------------------------------------------------
def reference_forward(x_bcn, enc_params, dec_params):
    batch = x_bcn.shape[0]
    h = jnp.transpose(x_bcn, (0, 2, 1)).reshape(-1, 3)            # (B*N, 3)
    w1, b1 = enc_params[0]
    h = jnp.maximum(jnp.dot(h, w1, preferred_element_type=jnp.float32) + b1, 0.0)
    for w, b in enc_params[1:]:
        h = jnp.maximum(
            jnp.dot(h.astype(jnp.bfloat16), w,
                    preferred_element_type=jnp.float32) + b, 0.0)
    z = h.reshape(batch, N, LATENT).max(axis=1)                   # (B, 16)
    for idx, (w, b) in enumerate(dec_params):
        z = jnp.dot(z.astype(jnp.bfloat16), w,
                    preferred_element_type=jnp.float32) + b
        if idx < 2:
            z = jnp.maximum(z, 0.0)
    return z.reshape(batch, 3, N)


if __name__ == "__main__":
    key = jax.random.PRNGKey(0)
    k_param, k_x = jax.random.split(key)
    enc_params, dec_params = init_params(k_param)

    x = jax.random.normal(k_x, (B, 3, N), dtype=jnp.float32)      # NCW like PyTorch

    out = jax.block_until_ready(autoencoder_forward(x, enc_params, dec_params))
    assert out.shape == (B, 3, N), out.shape

    ref = jax.block_until_ready(reference_forward(x, enc_params, dec_params))
    if not jnp.allclose(out, ref, atol=5e-3, rtol=5e-3):
        raise AssertionError(
            f"mismatch vs reference: max abs err = {float(jnp.max(jnp.abs(out - ref)))}")

    print("KERNEL_OK")
</pallas_src>

<mosaic_0001>
module attributes {stable_mosaic.version = 11 : i64} {
  func.func @autoencoder_kernel(%arg0: i32, %arg1: memref<1x2048x3xf32, #tpu.memory_space<vmem>>, %arg2: memref<3x64xf32, #tpu.memory_space<vmem>>, %arg3: memref<1x64xf32, #tpu.memory_space<vmem>>, %arg4: memref<64x128xbf16, #tpu.memory_space<vmem>>, %arg5: memref<1x128xf32, #tpu.memory_space<vmem>>, %arg6: memref<128x128xbf16, #tpu.memory_space<vmem>>, %arg7: memref<1x128xf32, #tpu.memory_space<vmem>>, %arg8: memref<128x256xbf16, #tpu.memory_space<vmem>>, %arg9: memref<1x256xf32, #tpu.memory_space<vmem>>, %arg10: memref<256x16xbf16, #tpu.memory_space<vmem>>, %arg11: memref<1x16xf32, #tpu.memory_space<vmem>>, %arg12: memref<16x256xbf16, #tpu.memory_space<vmem>>, %arg13: memref<1x256xf32, #tpu.memory_space<vmem>>, %arg14: memref<256x256xbf16, #tpu.memory_space<vmem>>, %arg15: memref<1x256xf32, #tpu.memory_space<vmem>>, %arg16: memref<256x6144xbf16, #tpu.memory_space<vmem>>, %arg17: memref<1x6144xf32, #tpu.memory_space<vmem>>, %arg18: memref<1x1x6144xf32, #tpu.memory_space<vmem>>) attributes {dimension_semantics = [#tpu.dimension_semantics<parallel>], iteration_bounds = array<i64: 2>, scalar_prefetch = 0 : i64, scratch_operands = 0 : i64, tpu.core_type = #tpu.core_type<tc>, window_params = [{transform_indices = @transform_0, window_bounds = array<i64: 1, 2048, 3>}, {pipeline_mode = #tpu.pipeline_mode<synchronous>, transform_indices = @transform_1, window_bounds = array<i64: 3, 64>}, {pipeline_mode = #tpu.pipeline_mode<synchronous>, transform_indices = @transform_2, window_bounds = array<i64: 1, 64>}, {pipeline_mode = #tpu.pipeline_mode<synchronous>, transform_indices = @transform_3, window_bounds = array<i64: 64, 128>}, {pipeline_mode = #tpu.pipeline_mode<synchronous>, transform_indices = @transform_4, window_bounds = array<i64: 1, 128>}, {pipeline_mode = #tpu.pipeline_mode<synchronous>, transform_indices = @transform_5, window_bounds = array<i64: 128, 128>}, {pipeline_mode = #tpu.pipeline_mode<synchronous>, transform_indices = @transform_6, window_bounds = array<i64: 1, 128>}, {pipeline_mode = #tpu.pipeline_mode<synchronous>, transform_indices = @transform_7, window_bounds = array<i64: 128, 256>}, {pipeline_mode = #tpu.pipeline_mode<synchronous>, transform_indices = @transform_8, window_bounds = array<i64: 1, 256>}, {pipeline_mode = #tpu.pipeline_mode<synchronous>, transform_indices = @transform_9, window_bounds = array<i64: 256, 16>}, {pipeline_mode = #tpu.pipeline_mode<synchronous>, transform_indices = @transform_10, window_bounds = array<i64: 1, 16>}, {pipeline_mode = #tpu.pipeline_mode<synchronous>, transform_indices = @transform_11, window_bounds = array<i64: 16, 256>}, {pipeline_mode = #tpu.pipeline_mode<synchronous>, transform_indices = @transform_12, window_bounds = array<i64: 1, 256>}, {pipeline_mode = #tpu.pipeline_mode<synchronous>, transform_indices = @transform_13, window_bounds = array<i64: 256, 256>}, {pipeline_mode = #tpu.pipeline_mode<synchronous>, transform_indices = @transform_14, window_bounds = array<i64: 1, 256>}, {pipeline_mode = #tpu.pipeline_mode<synchronous>, transform_indices = @transform_15, window_bounds = array<i64: 256, 6144>}, {pipeline_mode = #tpu.pipeline_mode<synchronous>, transform_indices = @transform_16, window_bounds = array<i64: 1, 6144>}, {transform_indices = @transform_17, window_bounds = array<i64: 1, 1, 6144>}]} {
    %cst = arith.constant 0.000000e+00 : f32
    %0 = vector.broadcast %cst : f32 to vector<1x16xf32>
    %c0_i32 = arith.constant 0 : i32
    %c4_i32 = arith.constant 4 : i32
    %1 = arith.addi %c0_i32, %c4_i32 : i32
    %c1_i32 = arith.constant 1 : i32
    %2 = scf.for %arg19 = %c0_i32 to %1 step %c1_i32 iter_args(%arg20 = %0) -> (vector<1x16xf32>)  : i32 {
      %c512_i32 = arith.constant 512 : i32
      %25 = arith.muli %arg19, %c512_i32 : i32
      %26 = tpu.assume_multiple %25, 512 : i32
      %c0_20 = arith.constant 0 : index
      %27 = arith.index_cast %26 : i32 to index
      %c0_21 = arith.constant 0 : index
      %28 = vector.load %arg1[%c0_20, %27, %c0_21] : memref<1x2048x3xf32, #tpu.memory_space<vmem>>, vector<1x512x3xf32>
      %29 = vector.shape_cast %28 : vector<1x512x3xf32> to vector<512x3xf32>
      %30 = vector.extract_strided_slice %29 {offsets = [0, 0], sizes = [512, 1], strides = [1, 1]} : vector<512x3xf32> to vector<512x1xf32>
      %c0_22 = arith.constant 0 : index
      %c0_23 = arith.constant 0 : index
      %31 = vector.load %arg2[%c0_22, %c0_23] : memref<3x64xf32, #tpu.memory_space<vmem>>, vector<1x64xf32>
      %32 = vector.broadcast %30 : vector<512x1xf32> to vector<512x64xf32>
      %33 = vector.broadcast %31 : vector<1x64xf32> to vector<512x64xf32>
      %34 = arith.mulf %32, %33 : vector<512x64xf32>
      %35 = vector.extract_strided_slice %29 {offsets = [0, 1], sizes = [512, 1], strides = [1, 1]} : vector<512x3xf32> to vector<512x1xf32>
      %c1 = arith.constant 1 : index
      %c0_24 = arith.constant 0 : index
      %36 = vector.load %arg2[%c1, %c0_24] : memref<3x64xf32, #tpu.memory_space<vmem>>, vector<1x64xf32>
      %37 = vector.broadcast %35 : vector<512x1xf32> to vector<512x64xf32>
      %38 = vector.broadcast %36 : vector<1x64xf32> to vector<512x64xf32>
      %39 = arith.mulf %37, %38 : vector<512x64xf32>
      %40 = arith.addf %34, %39 : vector<512x64xf32>
      %41 = vector.extract_strided_slice %29 {offsets = [0, 2], sizes = [512, 1], strides = [1, 1]} : vector<512x3xf32> to vector<512x1xf32>
      %c2 = arith.constant 2 : index
      %c0_25 = arith.constant 0 : index
      %42 = vector.load %arg2[%c2, %c0_25] : memref<3x64xf32, #tpu.memory_space<vmem>>, vector<1x64xf32>
      %43 = vector.broadcast %41 : vector<512x1xf32> to vector<512x64xf32>
      %44 = vector.broadcast %42 : vector<1x64xf32> to vector<512x64xf32>
      %45 = arith.mulf %43, %44 : vector<512x64xf32>
      %46 = arith.addf %40, %45 : vector<512x64xf32>
      %c0_26 = arith.constant 0 : index
      %c0_27 = arith.constant 0 : index
      %47 = vector.load %arg3[%c0_26, %c0_27] : memref<1x64xf32, #tpu.memory_space<vmem>>, vector<1x64xf32>
      %48 = vector.broadcast %47 : vector<1x64xf32> to vector<512x64xf32>
      %49 = arith.addf %46, %48 : vector<512x64xf32>
      %cst_28 = arith.constant 0.000000e+00 : f32
      %50 = vector.broadcast %cst_28 : f32 to vector<512x64xf32>
      %51 = arith.maximumf %49, %50 : vector<512x64xf32>
      %52 = arith.truncf %51 : vector<512x64xf32> to vector<512x64xbf16>
      %c0_29 = arith.constant 0 : index
      %c0_30 = arith.constant 0 : index
      %53 = vector.load %arg4[%c0_29, %c0_30] : memref<64x128xbf16, #tpu.memory_space<vmem>>, vector<64x128xbf16>
      %cst_31 = arith.constant dense<0.000000e+00> : vector<512x128xf32>
      %54 = tpu.matmul %52, %53, %cst_31 {dimension_numbers = #tpu.dot_dimension_numbers<[1], [0], [0], [1], [0, 0, 1, 1], [], []>} : vector<512x64xbf16>, vector<64x128xbf16>, vector<512x128xf32> -> vector<512x128xf32>
      %c0_32 = arith.constant 0 : index
      %c0_33 = arith.constant 0 : index
      %55 = vector.load %arg5[%c0_32, %c0_33] : memref<1x128xf32, #tpu.memory_space<vmem>>, vector<1x128xf32>
      %56 = vector.broadcast %55 : vector<1x128xf32> to vector<512x128xf32>
      %57 = arith.addf %54, %56 : vector<512x128xf32>
      %cst_34 = arith.constant 0.000000e+00 : f32
      %58 = vector.broadcast %cst_34 : f32 to vector<512x128xf32>
      %59 = arith.maximumf %57, %58 : vector<512x128xf32>
      %60 = arith.truncf %59 : vector<512x128xf32> to vector<512x128xbf16>
      %c0_35 = arith.constant 0 : index
      %c0_36 = arith.constant 0 : index
      %61 = vector.load %arg6[%c0_35, %c0_36] : memref<128x128xbf16, #tpu.memory_space<vmem>>, vector<128x128xbf16>
      %cst_37 = arith.constant dense<0.000000e+00> : vector<512x128xf32>
      %62 = tpu.matmul %60, %61, %cst_37 {dimension_numbers = #tpu.dot_dimension_numbers<[1], [0], [0], [1], [0, 0, 1, 1], [], []>} : vector<512x128xbf16>, vector<128x128xbf16>, vector<512x128xf32> -> vector<512x128xf32>
      %c0_38 = arith.constant 0 : index
      %c0_39 = arith.constant 0 : index
      %63 = vector.load %arg7[%c0_38, %c0_39] : memref<1x128xf32, #tpu.memory_space<vmem>>, vector<1x128xf32>
      %64 = vector.broadcast %63 : vector<1x128xf32> to vector<512x128xf32>
      %65 = arith.addf %62, %64 : vector<512x128xf32>
      %cst_40 = arith.constant 0.000000e+00 : f32
      %66 = vector.broadcast %cst_40 : f32 to vector<512x128xf32>
      %67 = arith.maximumf %65, %66 : vector<512x128xf32>
      %68 = arith.truncf %67 : vector<512x128xf32> to vector<512x128xbf16>
      %c0_41 = arith.constant 0 : index
      %c0_42 = arith.constant 0 : index
      %69 = vector.load %arg8[%c0_41, %c0_42] : memref<128x256xbf16, #tpu.memory_space<vmem>>, vector<128x256xbf16>
      %cst_43 = arith.constant dense<0.000000e+00> : vector<512x256xf32>
      %70 = tpu.matmul %68, %69, %cst_43 {dimension_numbers = #tpu.dot_dimension_numbers<[1], [0], [0], [1], [0, 0, 1, 1], [], []>} : vector<512x128xbf16>, vector<128x256xbf16>, vector<512x256xf32> -> vector<512x256xf32>
      %c0_44 = arith.constant 0 : index
      %c0_45 = arith.constant 0 : index
      %71 = vector.load %arg9[%c0_44, %c0_45] : memref<1x256xf32, #tpu.memory_space<vmem>>, vector<1x256xf32>
      %72 = vector.broadcast %71 : vector<1x256xf32> to vector<512x256xf32>
      %73 = arith.addf %70, %72 : vector<512x256xf32>
      %cst_46 = arith.constant 0.000000e+00 : f32
      %74 = vector.broadcast %cst_46 : f32 to vector<512x256xf32>
      %75 = arith.maximumf %73, %74 : vector<512x256xf32>
      %76 = arith.truncf %75 : vector<512x256xf32> to vector<512x256xbf16>
      %c0_47 = arith.constant 0 : index
      %c0_48 = arith.constant 0 : index
      %77 = vector.load %arg10[%c0_47, %c0_48] : memref<256x16xbf16, #tpu.memory_space<vmem>>, vector<256x16xbf16>
      %cst_49 = arith.constant dense<0.000000e+00> : vector<512x16xf32>
      %78 = tpu.matmul %76, %77, %cst_49 {dimension_numbers = #tpu.dot_dimension_numbers<[1], [0], [0], [1], [0, 0, 1, 1], [], []>} : vector<512x256xbf16>, vector<256x16xbf16>, vector<512x16xf32> -> vector<512x16xf32>
      %c0_50 = arith.constant 0 : index
      %c0_51 = arith.constant 0 : index
      %79 = vector.load %arg11[%c0_50, %c0_51] : memref<1x16xf32, #tpu.memory_space<vmem>>, vector<1x16xf32>
      %80 = vector.broadcast %79 : vector<1x16xf32> to vector<512x16xf32>
      %81 = arith.addf %78, %80 : vector<512x16xf32>
      %cst_52 = arith.constant 0.000000e+00 : f32
      %82 = vector.broadcast %cst_52 : f32 to vector<512x16xf32>
      %83 = arith.maximumf %81, %82 : vector<512x16xf32>
      %cst_53 = arith.constant dense<0xFF800000> : vector<16xf32>
      %84 = vector.multi_reduction <maximumf>, %83, %cst_53 [0] : vector<512x16xf32> to vector<16xf32>
      %85 = vector.shape_cast %84 : vector<16xf32> to vector<1x16xf32>
      %86 = arith.maximumf %arg20, %85 : vector<1x16xf32>
      scf.yield %86 : vector<1x16xf32>
    }
    %c4_i32_0 = arith.constant 4 : i32
    %3 = arith.truncf %2 : vector<1x16xf32> to vector<1x16xbf16>
    %c0 = arith.constant 0 : index
    %c0_1 = arith.constant 0 : index
    %4 = vector.load %arg12[%c0, %c0_1] : memref<16x256xbf16, #tpu.memory_space<vmem>>, vector<16x256xbf16>
    %cst_2 = arith.constant dense<0.000000e+00> : vector<1x256xf32>
    %5 = tpu.matmul %3, %4, %cst_2 {dimension_numbers = #tpu.dot_dimension_numbers<[1], [0], [0], [1], [0, 0, 1, 1], [], []>} : vector<1x16xbf16>, vector<16x256xbf16>, vector<1x256xf32> -> vector<1x256xf32>
    %c0_3 = arith.constant 0 : index
    %c0_4 = arith.constant 0 : index
    %6 = vector.load %arg13[%c0_3, %c0_4] : memref<1x256xf32, #tpu.memory_space<vmem>>, vector<1x256xf32>
    %7 = arith.addf %5, %6 : vector<1x256xf32>
    %cst_5 = arith.constant 0.000000e+00 : f32
    %8 = vector.broadcast %cst_5 : f32 to vector<1x256xf32>
    %9 = arith.maximumf %7, %8 : vector<1x256xf32>
    %10 = arith.truncf %9 : vector<1x256xf32> to vector<1x256xbf16>
    %c0_6 = arith.constant 0 : index
    %c0_7 = arith.constant 0 : index
    %11 = vector.load %arg14[%c0_6, %c0_7] : memref<256x256xbf16, #tpu.memory_space<vmem>>, vector<256x256xbf16>
    %cst_8 = arith.constant dense<0.000000e+00> : vector<1x256xf32>
    %12 = tpu.matmul %10, %11, %cst_8 {dimension_numbers = #tpu.dot_dimension_numbers<[1], [0], [0], [1], [0, 0, 1, 1], [], []>} : vector<1x256xbf16>, vector<256x256xbf16>, vector<1x256xf32> -> vector<1x256xf32>
    %c0_9 = arith.constant 0 : index
    %c0_10 = arith.constant 0 : index
    %13 = vector.load %arg15[%c0_9, %c0_10] : memref<1x256xf32, #tpu.memory_space<vmem>>, vector<1x256xf32>
    %14 = arith.addf %12, %13 : vector<1x256xf32>
    %cst_11 = arith.constant 0.000000e+00 : f32
    %15 = vector.broadcast %cst_11 : f32 to vector<1x256xf32>
    %16 = arith.maximumf %14, %15 : vector<1x256xf32>
    %17 = arith.truncf %16 : vector<1x256xf32> to vector<1x256xbf16>
    %c0_12 = arith.constant 0 : index
    %c0_13 = arith.constant 0 : index
    %18 = vector.load %arg16[%c0_12, %c0_13] : memref<256x6144xbf16, #tpu.memory_space<vmem>>, vector<256x6144xbf16>
    %cst_14 = arith.constant dense<0.000000e+00> : vector<1x6144xf32>
    %19 = tpu.matmul %17, %18, %cst_14 {dimension_numbers = #tpu.dot_dimension_numbers<[1], [0], [0], [1], [0, 0, 1, 1], [], []>} : vector<1x256xbf16>, vector<256x6144xbf16>, vector<1x6144xf32> -> vector<1x6144xf32>
    %c0_15 = arith.constant 0 : index
    %c0_16 = arith.constant 0 : index
    %20 = vector.load %arg17[%c0_15, %c0_16] : memref<1x6144xf32, #tpu.memory_space<vmem>>, vector<1x6144xf32>
    %21 = arith.addf %19, %20 : vector<1x6144xf32>
    %c0_17 = arith.constant 0 : index
    %c0_18 = arith.constant 0 : index
    %c0_19 = arith.constant 0 : index
    %22 = vector.load %arg18[%c0_17, %c0_18, %c0_19] : memref<1x1x6144xf32, #tpu.memory_space<vmem>>, vector<1x1x6144xf32>
    %23 = vector.shape_cast %22 : vector<1x1x6144xf32> to vector<1x6144xf32>
    %24 = vector.shape_cast %21 : vector<1x6144xf32> to vector<1x1x6144xf32>
    tpu.vector_store %arg18[%c0_17, %c0_18, %c0_19], %24 {strides = array<i32>} : memref<1x1x6144xf32, #tpu.memory_space<vmem>>, vector<1x1x6144xf32>,
    return
  }
  func.func @transform_0(%arg0: i32) -> (i32, i32, i32) {
    %c0_i32 = arith.constant 0 : i32
    %c0_i32_0 = arith.constant 0 : i32
    %c0_i32_1 = arith.constant 0 : i32
    return %arg0, %c0_i32, %c0_i32_0 : i32, i32, i32
  }
  func.func @transform_1(%arg0: i32) -> (i32, i32) {
    %c0_i32 = arith.constant 0 : i32
    %c0_i32_0 = arith.constant 0 : i32
    %c0_i32_1 = arith.constant 0 : i32
    return %c0_i32, %c0_i32_0 : i32, i32
  }
  func.func @transform_2(%arg0: i32) -> (i32, i32) {
    %c0_i32 = arith.constant 0 : i32
    %c0_i32_0 = arith.constant 0 : i32
    %c0_i32_1 = arith.constant 0 : i32
    return %c0_i32, %c0_i32_0 : i32, i32
  }
  func.func @transform_3(%arg0: i32) -> (i32, i32) {
    %c0_i32 = arith.constant 0 : i32
    %c0_i32_0 = arith.constant 0 : i32
    %c0_i32_1 = arith.constant 0 : i32
    return %c0_i32, %c0_i32_0 : i32, i32
  }
  func.func @transform_4(%arg0: i32) -> (i32, i32) {
    %c0_i32 = arith.constant 0 : i32
    %c0_i32_0 = arith.constant 0 : i32
    %c0_i32_1 = arith.constant 0 : i32
    return %c0_i32, %c0_i32_0 : i32, i32
  }
  func.func @transform_5(%arg0: i32) -> (i32, i32) {
    %c0_i32 = arith.constant 0 : i32
    %c0_i32_0 = arith.constant 0 : i32
    %c0_i32_1 = arith.constant 0 : i32
    return %c0_i32, %c0_i32_0 : i32, i32
  }
  func.func @transform_6(%arg0: i32) -> (i32, i32) {
    %c0_i32 = arith.constant 0 : i32
    %c0_i32_0 = arith.constant 0 : i32
    %c0_i32_1 = arith.constant 0 : i32
    return %c0_i32, %c0_i32_0 : i32, i32
  }
  func.func @transform_7(%arg0: i32) -> (i32, i32) {
    %c0_i32 = arith.constant 0 : i32
    %c0_i32_0 = arith.constant 0 : i32
    %c0_i32_1 = arith.constant 0 : i32
    return %c0_i32, %c0_i32_0 : i32, i32
  }
  func.func @transform_8(%arg0: i32) -> (i32, i32) {
    %c0_i32 = arith.constant 0 : i32
    %c0_i32_0 = arith.constant 0 : i32
    %c0_i32_1 = arith.constant 0 : i32
    return %c0_i32, %c0_i32_0 : i32, i32
  }
  func.func @transform_9(%arg0: i32) -> (i32, i32) {
    %c0_i32 = arith.constant 0 : i32
    %c0_i32_0 = arith.constant 0 : i32
    %c0_i32_1 = arith.constant 0 : i32
    return %c0_i32, %c0_i32_0 : i32, i32
  }
  func.func @transform_10(%arg0: i32) -> (i32, i32) {
    %c0_i32 = arith.constant 0 : i32
    %c0_i32_0 = arith.constant 0 : i32
    %c0_i32_1 = arith.constant 0 : i32
    return %c0_i32, %c0_i32_0 : i32, i32
  }
  func.func @transform_11(%arg0: i32) -> (i32, i32) {
    %c0_i32 = arith.constant 0 : i32
    %c0_i32_0 = arith.constant 0 : i32
    %c0_i32_1 = arith.constant 0 : i32
    return %c0_i32, %c0_i32_0 : i32, i32
  }
  func.func @transform_12(%arg0: i32) -> (i32, i32) {
    %c0_i32 = arith.constant 0 : i32
    %c0_i32_0 = arith.constant 0 : i32
    %c0_i32_1 = arith.constant 0 : i32
    return %c0_i32, %c0_i32_0 : i32, i32
  }
  func.func @transform_13(%arg0: i32) -> (i32, i32) {
    %c0_i32 = arith.constant 0 : i32
    %c0_i32_0 = arith.constant 0 : i32
    %c0_i32_1 = arith.constant 0 : i32
    return %c0_i32, %c0_i32_0 : i32, i32
  }
  func.func @transform_14(%arg0: i32) -> (i32, i32) {
    %c0_i32 = arith.constant 0 : i32
    %c0_i32_0 = arith.constant 0 : i32
    %c0_i32_1 = arith.constant 0 : i32
    return %c0_i32, %c0_i32_0 : i32, i32
  }
  func.func @transform_15(%arg0: i32) -> (i32, i32) {
    %c0_i32 = arith.constant 0 : i32
    %c0_i32_0 = arith.constant 0 : i32
    %c0_i32_1 = arith.constant 0 : i32
    return %c0_i32, %c0_i32_0 : i32, i32
  }
  func.func @transform_16(%arg0: i32) -> (i32, i32) {
    %c0_i32 = arith.constant 0 : i32
    %c0_i32_0 = arith.constant 0 : i32
    %c0_i32_1 = arith.constant 0 : i32
    return %c0_i32, %c0_i32_0 : i32, i32
  }
  func.func @transform_17(%arg0: i32) -> (i32, i32, i32) {
    %c0_i32 = arith.constant 0 : i32
    %c0_i32_0 = arith.constant 0 : i32
    %c0_i32_1 = arith.constant 0 : i32
    return %arg0, %c0_i32, %c0_i32_0 : i32, i32, i32
  }
}

</mosaic_0001>

<bundles_post_ra>
// kernel: tpu_custom_call.1
= control target key start
LH: loop header
LB: loop body
LE: loop exit
PB: predicated region body
PF: predicated region fallthrough
CT: control target
= control target key end

     0   :  { %s15494_s0 = inlined_call_operand.vmem [shape: f32[2,2048,3], index: 0, kind: input, shape index: {}]   ;;  %s15495_s1 = inlined_call_operand.hbm [shape: f32[3,64], index: 1, kind: input, shape index: {}]   ;;  %s15496_s2 = inlined_call_operand.hbm [shape: f32[1,64], index: 2, kind: input, shape index: {}]   ;;  %s15497_s3 = inlined_call_operand.hbm [shape: bf16[64,128], index: 3, kind: input, shape index: {}]   ;;  %s15498_s4 = inlined_call_operand.hbm [shape: f32[1,128], index: 4, kind: input, shape index: {}]   ;;  %s15499_s5 = inlined_call_operand.hbm [shape: bf16[128,128], index: 5, kind: input, shape index: {}]   ;;  %s15500_s6 = inlined_call_operand.hbm [shape: f32[1,128], index: 6, kind: input, shape index: {}]   ;;  %s15501_s7 = inlined_call_operand.hbm [shape: bf16[128,256], index: 7, kind: input, shape index: {}]   ;;  %s15502_s8 = inlined_call_operand.hbm [shape: f32[1,256], index: 8, kind: input, shape index: {}]   ;;  %s15503_s9 = inlined_call_operand.vmem [shape: bf16[256,16], index: 9, kind: input, shape index: {}]   ;;  %s15504_s10 = inlined_call_operand.hbm [shape: f32[1,16], index: 10, kind: input, shape index: {}]   ;;  %s15505_s11 = inlined_call_operand.hbm [shape: bf16[16,256], index: 11, kind: input, shape index: {}]   ;;  %s15506_s12 = inlined_call_operand.hbm [shape: f32[1,256], index: 12, kind: input, shape index: {}]   ;;  %s15507_s13 = inlined_call_operand.hbm [shape: bf16[256,256], index: 13, kind: input, shape index: {}]   ;;  %s15508_s14 = inlined_call_operand.hbm [shape: f32[1,256], index: 14, kind: input, shape index: {}]   ;;  %s15509_s15 = inlined_call_operand.hbm [shape: bf16[256,6144], index: 15, kind: input, shape index: {}]   ;;  %s15510_s16 = inlined_call_operand.hbm [shape: f32[1,6144], index: 16, kind: input, shape index: {}]   ;;  %s15511_s17 = inlined_call_operand.hbm [shape: f32[2,1,6144], index: 17, kind: output, shape index: {}]  }
   0x1   :  { %15528 = sst [smem:[#allocation43_spill]] %s15494_s0 }
   0x2   :  { %15529 = sst [smem:[#allocation44_spill]] %s15495_s1 }
   0x3   :  { %15530 = sst [smem:[#allocation45_spill]] %s15496_s2 }
   0x4   :  { %15531 = sst [smem:[#allocation46_spill]] %s15498_s4 }
   0x5   :  { %15532 = sst [smem:[#allocation47_spill]] %s15500_s6 }
   0x6   :  { %15533 = sst [smem:[#allocation48_spill]] %s15502_s8 }
   0x7   :  { %15534 = sst [smem:[#allocation49_spill]] %s15503_s9 }
   0x8   :  { %15535 = sst [smem:[#allocation50_spill]] %s15505_s11 }
   0x9   :  { %15536 = sst [smem:[#allocation51_spill]] %s15511_s17 }
   0xa   :  { %22 = vsyncpa [#allocation3], 0 }
   0xb   :  { %23 = vsyncpa [#allocation6], 0 }
   0xc   :  { %24 = vsyncpa [#allocation9], 0 }
   0xd   :  { %25 = vsyncpa [#allocation12], 0 }
   0xe   :  { %26 = vsyncpa [#allocation15], 0 }
   0xf   :  { %27 = vsyncpa [#allocation18], 0 }
  0x10   :  { %28 = vsyncpa [#allocation21], 0 }
  0x11   :  { %29 = vsyncpa [#allocation24], 0 }
  0x12   :  { %30 = vsyncpa [#allocation4], 0 }
  0x13   :  { %32 = vsyncpa [#allocation4 + $0x1], 0  ;;  %s13416_s24 = smov 0   ;;  %s13418_s25 = smov 0  }
  0x14   :  { %s13420_s26 = smov 0   ;;  %s13422_s27 = smov 0  }
  0x15 LB: > { %15537 = sst [smem:[#allocation36_spill]] %s13277_s24  ;;  %s13437_s28 = sadd.s32 4294967295, %s13289_s27   ;;  %s13289_s27 = sphi %s13422_s27, %s15583_s27   ;;  %s13285_s26 = sphi %s13420_s26, %s15585_s26   ;;  %s13281_s25 = sphi %s13418_s25, %s15587_s25   ;;  %s13277_s24 = sphi %s13416_s24, %s15586_s24  }
  0x16   : > { %15538 = sst [smem:[#allocation37_spill]] %s13285_s26  ;;  %s11158_s29 = sadd.s32 4294967294, %s13289_s27  }
  0x17   : > { %15539 = sst [smem:[#allocation38_spill]] %s13289_s27  ;;  %s13441_s0 = sadd.s32 1, %s13289_s27  }
  0x18   : > { %15540 = sst [smem:[#allocation39_spill]] %s13441_s0  ;;  %s407_s30 = sadd.s32 1, %s13285_s26 }
  0x19   : > { %s404_s18 = ssub.s32 %s13289_s27, %s13441_s0  ;;  %p417_p0 = scmp.ne.s32.totalorder %s13285_s26, %s13281_s25 }
  0x1a   : > { %p405_p1 = scmp.eq.s32.totalorder %s404_s18, 0  ;;  %p418_p2 = scmp.eq.s32.totalorder %s13437_s28, 1 }
  0x1b   : > { %p423_p3 = scmp.ne.s32.totalorder %s13281_s25, %s13277_s24  ;;  %p424_p4 = scmp.eq.s32.totalorder %s11158_s29, 1 }
  0x1c   : > { %s13452_s19 = scalar_select %p405_p1, %s13285_s26, %s407_s30  }
  0x1d   : > { %p13454_p5 = por %p418_p2, %p417_p0  ;;  %p13458_p6 = por %p424_p4, %p423_p3 }
  0x1e   : > { %15541 = sst [smem:[#allocation40_spill]] %s13452_s19  ;;  %p11159_p7 = scmp.ge.s32.totalorder %s13289_s27, 1 }
  0x1f   : > { %s15542_s1 = scalar_select %p13454_p5, 1, 0 }
  0x20   : > { %s15544_s20 = scalar_select %p13458_p6, 1, 0 }
  0x21   : > { %15543 = sst [smem:[#allocation41_spill]] %s15542_s1  ;;  %p431_p8 = scmp.lt.s32.totalorder %s13289_s27, 3 }
  0x22   : > { %15545 = sst [smem:[#allocation42_spill]] %s15544_s20  ;;  %p15520_p9 = scmp.eq.s32.totalorder %s13437_s28, 0 }
  0x23   : > { %p13465_p10 = pnand %p11159_p7, %p431_p8  ;;  %s13299_s22 = smov [#allocation5]  }
  0x24   : > { %s455_s23 = sshll.u32 %s13299_s22, 4  ;;  %s13300_s29 = smov [#allocation8]   ;;  %s456_s23 = int_to_ptr.vmem [resolvable:$true] %s455_s23 }
  0x25   : > { %s15546_s21 = scalar_select %p13465_p10, 1, 0 }
  0x26   : > { %p12409_p11 = pneg %p13465_p10  ;;  %s479_s30 = sshll.u32 %s13300_s29, 4  ;;  %s13477_s30 = int_to_ptr.vmem [resolvable:$true] %s479_s30 }
  0x27   : > { %s13301_s19 = smov [#allocation11]   ;;  %s15548_s2 = sld [smem:[#allocation45_spill]] }
  0x28   : > { %p13473_p12 = pnand %p15520_p9, %p12409_p11  ;;  %s503_s26 = sshll.u32 %s13301_s19, 4  ;;  %s13479_s26 = int_to_ptr.vmem [resolvable:$true] %s503_s26 }
  0x2a   : > { %p13489_p0 = pneg %p13473_p12 }
  0x2d   : > { %s12767_s22 = scalar_lea.hbm %s15548_s2, 16 }
  0x2e   : > { %p12768_p13 = scmp.ne.s32.totalorder %s15548_s2, %s12767_s22  ;;  %p12774_p3 = scmp.lt.u32.totalorder %s12767_s22, %s15548_s2 }
  0x30   : > { %p12770_p1 = pnand %p13489_p0, %p12768_p13 }
  0x32   : > { %p12771_p2 = pneg %p12770_p1 }
  0x34   : > { %p12776_p4 = pnand %p12774_p3, %p12771_p2 }
  0x36   : > { %12779 = shalt.err (!%p12776_p4)
}
  0x37   : > { %s12780_s0 = scalar_lea.vmem %s456_s23, 16  ;;  %s12787_s24 = scalar_lea.vmem %s456_s23, 32 }
  0x38   : > { %p12781_p7 = scmp.ne.s32.totalorder %s456_s23, %s12780_s0  ;;  %p12788_p9 = scmp.lt.s32.totalorder %s456_s23, %s456_s23 }
  0x39   : > { %p12789_p6 = scmp.lt.s32.totalorder %s12787_s24, %s12780_s0 }
  0x3a   : > { %p12783_p8 = pnand %p12781_p7, %p13489_p0 }
  0x3b   : > { %p12790_p5 = por %p12789_p6, %p12788_p9 }
  0x3c   : > { %p12784_p11 = pneg %p12783_p8 }
  0x3e   : > { %p12791_p10 = pnand %p12790_p5, %p12784_p11 }
  0x40   : > { %12794 = shalt.err (!%p12791_p10)
}
  0x41   : > { %12415 = dma.hbm_to_vmem [thread:$0]  (!%p13473_p12), %s15548_s2, 16, %s456_s23, [#allocation6]  }
  0x42   : > { %s15550_s4 = sld [smem:[#allocation46_spill]] }
  0x48   : > { %s12795_s19 = scalar_lea.hbm %s15550_s4, 16 }
  0x49   : > { %p12796_p13 = scmp.ne.s32.totalorder %s15550_s4, %s12795_s19  ;;  %p12802_p5 = scmp.lt.u32.totalorder %s12795_s19, %s15550_s4 }
  0x4b   : > { %p12798_p1 = pnand %p12796_p13, %p13489_p0 }
  0x4d   : > { %p12799_p6 = pneg %p12798_p1 }
  0x4f   : > { %p12804_p9 = pnand %p12802_p5, %p12799_p6 }
  0x51   : > { %12807 = shalt.err (!%p12804_p9)
}
  0x52   : > { %s12808_s23 = scalar_lea.vmem %s13477_s30, 16  ;;  %s12815_s9 = scalar_lea.vmem %s13477_s30, 32 }
  0x53   : > { %p12809_p10 = scmp.ne.s32.totalorder %s13477_s30, %s12808_s23  ;;  %p12816_p4 = scmp.lt.s32.totalorder %s13477_s30, %s13477_s30 }
  0x54   : > { %p12817_p7 = scmp.lt.s32.totalorder %s12815_s9, %s12808_s23 }
  0x55   : > { %p12811_p2 = pnand %p12809_p10, %p13489_p0 }
  0x56   : > { %p12818_p8 = por %p12817_p7, %p12816_p4 }
  0x57   : > { %p12812_p3 = pneg %p12811_p2 }
  0x59   : > { %p12819_p11 = pnand %p12818_p8, %p12812_p3 }
  0x5b   : > { %12822 = shalt.err (!%p12819_p11)
}
  0x5c   : > { %12421 = dma.hbm_to_vmem [thread:$0]  (!%p13473_p12), %s15550_s4, 16, %s13477_s30, [#allocation9]  }
  0x5d   : > { %s15551_s6 = sld [smem:[#allocation47_spill]] }
  0x63   : > { %s12823_s22 = scalar_lea.hbm %s15551_s6, 16 }
  0x64   : > { %p12824_p13 = scmp.ne.s32.totalorder %s15551_s6, %s12823_s22  ;;  %p12830_p5 = scmp.lt.u32.totalorder %s12823_s22, %s15551_s6 }
  0x66   : > { %p12826_p1 = pnand %p12824_p13, %p13489_p0 }
  0x68   : > { %p12827_p6 = pneg %p12826_p1 }
  0x6a   : > { %p12832_p9 = pnand %p12830_p5, %p12827_p6 }
  0x6c   : > { %12835 = shalt.err (!%p12832_p9)
}
  0x6d   : > { %s12836_s30 = scalar_lea.vmem %s13479_s26, 16  ;;  %s12843_s9 = scalar_lea.vmem %s13479_s26, 32 }
  0x6e   : > { %p12837_p10 = scmp.ne.s32.totalorder %s13479_s26, %s12836_s30  ;;  %p12844_p4 = scmp.lt.s32.totalorder %s13479_s26, %s13479_s26 }
  0x6f   : > { %p12845_p7 = scmp.lt.s32.totalorder %s12843_s9, %s12836_s30 }
  0x70   : > { %p12839_p2 = pnand %p12837_p10, %p13489_p0 }
  0x71   : > { %p12846_p8 = por %p12845_p7, %p12844_p4 }
  0x72   : > { %p12840_p3 = pneg %p12839_p2 }
  0x74   : > { %p12847_p11 = pnand %p12846_p8, %p12840_p3 }
  0x76   : > { %12850 = shalt.err (!%p12847_p11)
}
  0x77   : > { %12427 = dma.hbm_to_vmem [thread:$0]  (!%p13473_p12), %s15551_s6, 16, %s13479_s26, [#allocation12]  }
  0x78   : > { %s13302_s20 = smov [#allocation14]   ;;  %s15552_s8 = sld [smem:[#allocation48_spill]] }
  0x79   : > { %s527_s17 = sshll.u32 %s13302_s20, 4  ;;  %s528_s17 = int_to_ptr.vmem [resolvable:$true] %s527_s17 }
  0x7e   : > { %s12851_s0 = scalar_lea.hbm %s15552_s8, 32 }
  0x7f   : > { %p12852_p13 = scmp.ne.s32.totalorder %s15552_s8, %s12851_s0  ;;  %p12858_p5 = scmp.lt.u32.totalorder %s12851_s0, %s15552_s8 }
  0x81   : > { %p12854_p1 = pnand %p12852_p13, %p13489_p0 }
  0x83   : > { %p12855_p6 = pneg %p12854_p1 }
  0x85   : > { %p12860_p9 = pnand %p12858_p5, %p12855_p6 }
  0x87   : > { %12863 = shalt.err (!%p12860_p9)
}
  0x88   : > { %s12864_s26 = scalar_lea.vmem %s528_s17, 32  ;;  %p12872_p4 = scmp.lt.s32.totalorder %s528_s17, %s528_s17 }
  0x89   : > { %p12865_p10 = scmp.ne.s32.totalorder %s528_s17, %s12864_s26  ;;  %p12873_p7 = scmp.lt.s32.totalorder %s12864_s26, %s12864_s26 }
  0x8b   : > { %p12867_p2 = pnand %p12865_p10, %p13489_p0  ;;  %p12874_p8 = por %p12873_p7, %p12872_p4 }
  0x8d   : > { %p12868_p3 = pneg %p12867_p2 }
  0x8f   : > { %p12875_p11 = pnand %p12874_p8, %p12868_p3 }
  0x91   : > { %12878 = shalt.err (!%p12875_p11)
}
  0x92   : > { %12433 = dma.hbm_to_vmem [thread:$0]  (!%p13473_p12), %s15552_s8, 32, %s528_s17, [#allocation15]  }
  0x93   : > { %s13303_s20 = smov [#allocation17]   ;;  %s13304_s19 = smov [#allocation20]  }
  0x94   : > { %s551_s22 = sshll.u32 %s13303_s20, 4  ;;  %s575_s0 = sshll.u32 %s13304_s19, 4  ;;  %s552_s22 = int_to_ptr.vmem [resolvable:$true] %s551_s22  ;;  %s13571_s0 = int_to_ptr.vmem [resolvable:$true] %s575_s0 }
  0x95   : > { %s15553_s11 = sld [smem:[#allocation50_spill]] }
  0x9b   : > { %s12879_s30 = scalar_lea.hbm %s15553_s11, 256 }
  0x9c   : > { %p12880_p13 = scmp.ne.s32.totalorder %s15553_s11, %s12879_s30  ;;  %p12886_p5 = scmp.lt.u32.totalorder %s12879_s30, %s15553_s11 }
  0x9e   : > { %p12882_p1 = pnand %p12880_p13, %p13489_p0 }
  0xa0   : > { %p12883_p6 = pneg %p12882_p1 }
  0xa2   : > { %p12888_p9 = pnand %p12886_p5, %p12883_p6 }
  0xa4   : > { %12891 = shalt.err (!%p12888_p9)
}
  0xa5   : > { %s12892_s27 = scalar_lea.vmem %s552_s22, 256  ;;  %p12900_p4 = scmp.lt.s32.totalorder %s552_s22, %s552_s22 }
  0xa6   : > { %p12893_p10 = scmp.ne.s32.totalorder %s552_s22, %s12892_s27  ;;  %p12901_p7 = scmp.lt.s32.totalorder %s12892_s27, %s12892_s27 }
  0xa8   : > { %p12895_p2 = pnand %p12893_p10, %p13489_p0  ;;  %p12902_p8 = por %p12901_p7, %p12900_p4 }
  0xaa   : > { %p12896_p3 = pneg %p12895_p2 }
  0xac   : > { %p12903_p11 = pnand %p12902_p8, %p12896_p3 }
  0xae   : > { %12906 = shalt.err (!%p12903_p11)
}
  0xaf   : > { %s15526_s20 = smov 128   ;;  %s15527_s19 = smov 8  }
  0xb0   : > { %12439 = dma.hbm_to_vmem [thread:$0]  (!%p13473_p12), %s15553_s11, 256, %s552_s22, [#allocation18], %s15526_s20, %s15526_s20, %s15527_s19  }
  0xb1   : > { %s12907_s26 = scalar_lea.hbm %s15507_s13, 4096 }
  0xb2   : > { %p12908_p13 = scmp.ne.s32.totalorder %s15507_s13, %s12907_s26  ;;  %p12914_p5 = scmp.lt.u32.totalorder %s12907_s26, %s15507_s13 }
  0xb4   : > { %p12910_p1 = pnand %p12908_p13, %p13489_p0 }
  0xb6   : > { %p12911_p6 = pneg %p12910_p1 }
  0xb8   : > { %p12916_p9 = pnand %p12914_p5, %p12911_p6 }
  0xba   : > { %12919 = shalt.err (!%p12916_p9)
}
  0xbb   : > { %s12920_s22 = scalar_lea.vmem %s13571_s0, 4096  ;;  %p12928_p4 = scmp.lt.s32.totalorder %s13571_s0, %s13571_s0 }
  0xbc   : > { %p12921_p10 = scmp.ne.s32.totalorder %s13571_s0, %s12920_s22  ;;  %p12929_p7 = scmp.lt.s32.totalorder %s12920_s22, %s12920_s22 }
  0xbe   : > { %p12923_p2 = pnand %p12921_p10, %p13489_p0  ;;  %p12930_p8 = por %p12929_p7, %p12928_p4 }
  0xc0   : > { %p12924_p3 = pneg %p12923_p2 }
  0xc2   : > { %p12931_p11 = pnand %p12930_p8, %p12924_p3 }
  0xc4   : > { %12934 = shalt.err (!%p12931_p11)
}
  0xc5   : > { %12445 = dma.hbm_to_vmem [thread:$0]  (!%p13473_p12), %s15507_s13, 4096, %s13571_s0, [#allocation21], %s15526_s20, %s15526_s20, %s15527_s19  }
  0xc6   : > { %s13307_s23 = smov [#allocation23]   ;;  %s12935_s1 = scalar_lea.hbm %s15509_s15, 98304 }
  0xc7   : > { %s599_s30 = sshll.u32 %s13307_s23, 4  ;;  %p12936_p13 = scmp.ne.s32.totalorder %s15509_s15, %s12935_s1  ;;  %s600_s30 = int_to_ptr.vmem [resolvable:$true] %s599_s30 }
  0xc8   : > { %p12942_p5 = scmp.lt.u32.totalorder %s12935_s1, %s15509_s15 }
  0xc9   : > { %p12938_p1 = pnand %p12936_p13, %p13489_p0 }
  0xcb   : > { %p12939_p6 = pneg %p12938_p1 }
  0xcd   : > { %p12944_p9 = pnand %p12942_p5, %p12939_p6 }
  0xcf   : > { %12947 = shalt.err (!%p12944_p9)
}
  0xd0   : > { %s12948_s0 = scalar_lea.vmem %s600_s30, 98304  ;;  %p12956_p4 = scmp.lt.s32.totalorder %s600_s30, %s600_s30 }
  0xd1   : > { %p12949_p10 = scmp.ne.s32.totalorder %s600_s30, %s12948_s0  ;;  %p12957_p7 = scmp.lt.s32.totalorder %s12948_s0, %s12948_s0 }
  0xd3   : > { %p12951_p2 = pnand %p12949_p10, %p13489_p0  ;;  %p12958_p8 = por %p12957_p7, %p12956_p4 }
  0xd5   : > { %p12952_p3 = pneg %p12951_p2 }
  0xd7   : > { %p12959_p11 = pnand %p12958_p8, %p12952_p3 }
  0xd9   : > { %12962 = shalt.err (!%p12959_p11)
}
  0xda   : > { %s13308_s2 = smov 3072   ;;  %s13309_s24 = smov 192  }
  0xdb   : > { %12451 = dma.hbm_to_vmem [thread:$0]  (!%p13473_p12), %s15509_s15, 98304, %s600_s30, [#allocation24], %s13308_s2, %s13308_s2, %s13309_s24  }
  0xdc   : > { %s13310_s9 = smov [#allocation2]   ;;  %s13311_s1 = smov [#allocation7]  }
  0xdd   : > { %s444_s26 = sshll.u32 %s13310_s9, 4  ;;  %s465_s17 = sshll.u32 %s13311_s1, 4  ;;  %s445_s26 = int_to_ptr.vmem [resolvable:$true] %s444_s26  ;;  %s466_s17 = int_to_ptr.vmem [resolvable:$true] %s465_s17 }
  0xde   : > { %s15554_s0 = sld [smem:[#allocation44_spill]] }
  0xe4   : > { %s12963_s20 = scalar_lea.hbm %s15554_s0, 64 }
  0xe5   : > { %p12964_p13 = scmp.ne.s32.totalorder %s15554_s0, %s12963_s20  ;;  %p12970_p5 = scmp.lt.u32.totalorder %s12963_s20, %s15554_s0 }
  0xe7   : > { %p12966_p1 = pnand %p12964_p13, %p13489_p0 }
  0xe9   : > { %p12967_p6 = pneg %p12966_p1 }
  0xeb   : > { %p12972_p9 = pnand %p12970_p5, %p12967_p6 }
  0xed   : > { %12975 = shalt.err (!%p12972_p9)
}
  0xee   : > { %s12976_s30 = scalar_lea.vmem %s445_s26, 64  ;;  %p12984_p4 = scmp.lt.s32.totalorder %s445_s26, %s445_s26 }
  0xef   : > { %p12977_p10 = scmp.ne.s32.totalorder %s445_s26, %s12976_s30  ;;  %p12985_p7 = scmp.lt.s32.totalorder %s12976_s30, %s12976_s30 }
  0xf1   : > { %p12979_p2 = pnand %p12977_p10, %p13489_p0  ;;  %p12986_p8 = por %p12985_p7, %p12984_p4 }
  0xf3   : > { %p12980_p3 = pneg %p12979_p2 }
  0xf5   : > { %p12987_p11 = pnand %p12986_p8, %p12980_p3 }
  0xf7   : > { %12990 = shalt.err (!%p12987_p11)
}
  0xf8   : > { %12412 = dma.hbm_to_vmem [thread:$0]  (!%p13473_p12), %s15554_s0, 64, %s445_s26, [#allocation3]  }
  0xf9   : > { %s12991_s20 = scalar_lea.hbm %s15497_s3, 512 }
  0xfa   : > { %p12992_p13 = scmp.ne.s32.totalorder %s15497_s3, %s12991_s20  ;;  %p12998_p5 = scmp.lt.u32.totalorder %s12991_s20, %s15497_s3 }
  0xfc   : > { %p12994_p1 = pnand %p12992_p13, %p13489_p0 }
  0xfe   : > { %p12995_p6 = pneg %p12994_p1 }
 0x100   : > { %p13000_p9 = pnand %p12998_p5, %p12995_p6 }
 0x102   : > { %13003 = shalt.err (!%p13000_p9)
}
 0x103   : > { %s13004_s9 = scalar_lea.vmem %s466_s17, 512  ;;  %p13012_p4 = scmp.lt.s32.totalorder %s466_s17, %s466_s17 }
 0x104   : > { %p13005_p10 = scmp.ne.s32.totalorder %s466_s17, %s13004_s9  ;;  %p13013_p7 = scmp.lt.s32.totalorder %s13004_s9, %s13004_s9 }
 0x106   : > { %p13007_p2 = pnand %p13005_p10, %p13489_p0  ;;  %p13014_p8 = por %p13013_p7, %p13012_p4 }
 0x108   : > { %p13008_p3 = pneg %p13007_p2 }
 0x10a   : > { %p13015_p11 = pnand %p13014_p8, %p13008_p3 }
 0x10c   : > { %13018 = shalt.err (!%p13015_p11)
}
 0x10d   : > { %s13312_s26 = smov 64   ;;  %s13313_s1 = smov 4  }
 0x10e   : > { %12418 = dma.hbm_to_vmem [thread:$0]  (!%p13473_p12), %s15497_s3, 512, %s466_s17, [#allocation6], %s13312_s26, %s13312_s26, %s13313_s1  }
 0x10f   : > { %s13314_s30 = smov [#allocation10]   ;;  %s13315_s19 = smov [#allocation13]  }
 0x110   : > { %s489_s6 = sshll.u32 %s13314_s30, 4  ;;  %s513_s8 = sshll.u32 %s13315_s19, 4  ;;  %s490_s6 = int_to_ptr.vmem [resolvable:$true] %s489_s6  ;;  %s514_s8 = int_to_ptr.vmem [resolvable:$true] %s513_s8 }
 0x111   : > { %s13019_s2 = scalar_lea.hbm %s15499_s5, 1024 }
 0x112   : > { %p13020_p13 = scmp.ne.s32.totalorder %s15499_s5, %s13019_s2  ;;  %p13026_p5 = scmp.lt.u32.totalorder %s13019_s2, %s15499_s5 }
 0x114   : > { %p13022_p1 = pnand %p13020_p13, %p13489_p0 }
 0x116   : > { %p13023_p6 = pneg %p13022_p1 }
 0x118   : > { %p13028_p9 = pnand %p13026_p5, %p13023_p6 }
 0x11a   : > { %13031 = shalt.err (!%p13028_p9)
}
 0x11b   : > { %s13032_s17 = scalar_lea.vmem %s490_s6, 1024  ;;  %p13040_p4 = scmp.lt.s32.totalorder %s490_s6, %s490_s6 }
 0x11c   : > { %p13033_p10 = scmp.ne.s32.totalorder %s490_s6, %s13032_s17  ;;  %p13041_p7 = scmp.lt.s32.totalorder %s13032_s17, %s13032_s17 }
 0x11e   : > { %p13035_p2 = pnand %p13033_p10, %p13489_p0  ;;  %p13042_p8 = por %p13041_p7, %p13040_p4 }
 0x120   : > { %p13036_p3 = pneg %p13035_p2 }
 0x122   : > { %p13043_p11 = pnand %p13042_p8, %p13036_p3 }
 0x124   : > { %13046 = shalt.err (!%p13043_p11)
}
 0x125   : > { %12424 = dma.hbm_to_vmem [thread:$0]  (!%p13473_p12), %s15499_s5, 1024, %s490_s6, [#allocation9], %s13312_s26, %s13312_s26, %s13313_s1  }
 0x126   : > { %s13047_s11 = scalar_lea.hbm %s15501_s7, 2048 }
 0x127   : > { %p13048_p13 = scmp.ne.s32.totalorder %s15501_s7, %s13047_s11  ;;  %p13054_p5 = scmp.lt.u32.totalorder %s13047_s11, %s15501_s7 }
 0x129   : > { %p13050_p1 = pnand %p13048_p13, %p13489_p0 }
 0x12b   : > { %p13051_p6 = pneg %p13050_p1 }
 0x12d   : > { %p13056_p9 = pnand %p13054_p5, %p13051_p6 }
 0x12f   : > { %13059 = shalt.err (!%p13056_p9)
}
 0x130   : > { %s13060_s23 = scalar_lea.vmem %s514_s8, 2048  ;;  %p13068_p4 = scmp.lt.s32.totalorder %s514_s8, %s514_s8 }
 0x131   : > { %p13061_p10 = scmp.ne.s32.totalorder %s514_s8, %s13060_s23  ;;  %p13069_p7 = scmp.lt.s32.totalorder %s13060_s23, %s13060_s23 }
 0x133   : > { %p13063_p2 = pnand %p13061_p10, %p13489_p0  ;;  %p13070_p8 = por %p13069_p7, %p13068_p4 }
 0x135   : > { %p13064_p3 = pneg %p13063_p2 }
 0x137   : > { %p13071_p11 = pnand %p13070_p8, %p13064_p3 }
 0x139   : > { %13074 = shalt.err (!%p13071_p11)
}
 0x13a   : > { %s15555_s26 = smov 8   ;;  %s15556_s1 = smov 128  }
 0x13b   : > { %12430 = dma.hbm_to_vmem [thread:$0]  (!%p13473_p12), %s15501_s7, 2048, %s514_s8, [#allocation12], %s15556_s1, %s15556_s1, %s15555_s26  }
 0x13c   : > { %s13316_s17 = smov [#allocation16]   ;;  %s13317_s22 = smov [#allocation19]  }
 0x13d   : > { %s541_s27 = sshll.u32 %s13316_s17, 4  ;;  %s565_s30 = sshll.u32 %s13317_s22, 4  ;;  %s542_s27 = int_to_ptr.vmem [resolvable:$true] %s541_s27  ;;  %s566_s30 = int_to_ptr.vmem [resolvable:$true] %s565_s30 }
 0x13e   : > { %s13075_s20 = scalar_lea.hbm %s15504_s10, 16 }
 0x13f   : > { %p13076_p13 = scmp.ne.s32.totalorder %s15504_s10, %s13075_s20  ;;  %p13082_p5 = scmp.lt.u32.totalorder %s13075_s20, %s15504_s10 }
 0x141   : > { %p13078_p1 = pnand %p13076_p13, %p13489_p0 }
 0x143   : > { %p13079_p6 = pneg %p13078_p1 }
 0x145   : > { %p13084_p9 = pnand %p13082_p5, %p13079_p6 }
 0x147   : > { %13087 = shalt.err (!%p13084_p9)
}
 0x148   : > { %s13088_s8 = scalar_lea.vmem %s542_s27, 16  ;;  %s13095_s26 = scalar_lea.vmem %s542_s27, 32 }
 0x149   : > { %p13089_p10 = scmp.ne.s32.totalorder %s542_s27, %s13088_s8  ;;  %p13096_p4 = scmp.lt.s32.totalorder %s542_s27, %s542_s27 }
 0x14a   : > { %p13097_p7 = scmp.lt.s32.totalorder %s13095_s26, %s13088_s8 }
 0x14b   : > { %p13091_p2 = pnand %p13089_p10, %p13489_p0 }
 0x14c   : > { %p13098_p8 = por %p13097_p7, %p13096_p4 }
 0x14d   : > { %p13092_p3 = pneg %p13091_p2 }
 0x14f   : > { %p13099_p11 = pnand %p13098_p8, %p13092_p3 }
 0x151   : > { %13102 = shalt.err (!%p13099_p11)
}
 0x152   : > { %12436 = dma.hbm_to_vmem [thread:$0]  (!%p13473_p12), %s15504_s10, 16, %s542_s27, [#allocation15]  }
 0x153   : > { %s13103_s22 = scalar_lea.hbm %s15506_s12, 32 }
 0x154   : > { %p13104_p13 = scmp.ne.s32.totalorder %s15506_s12, %s13103_s22  ;;  %p13110_p5 = scmp.lt.u32.totalorder %s13103_s22, %s15506_s12 }
 0x156   : > { %p13106_p1 = pnand %p13104_p13, %p13489_p0 }
 0x158   : > { %p13107_p6 = pneg %p13106_p1 }
 0x15a   : > { %p13112_p9 = pnand %p13110_p5, %p13107_p6 }
 0x15c   : > { %13115 = shalt.err (!%p13112_p9)
}
 0x15d   : > { %s13116_s24 = scalar_lea.vmem %s566_s30, 32  ;;  %p13124_p4 = scmp.lt.s32.totalorder %s566_s30, %s566_s30 }
 0x15e   : > { %p13117_p10 = scmp.ne.s32.totalorder %s566_s30, %s13116_s24  ;;  %p13125_p7 = scmp.lt.s32.totalorder %s13116_s24, %s13116_s24 }
 0x160   : > { %p13119_p2 = pnand %p13117_p10, %p13489_p0  ;;  %p13126_p8 = por %p13125_p7, %p13124_p4 }
 0x162   : > { %p13120_p3 = pneg %p13119_p2 }
 0x164   : > { %p13127_p11 = pnand %p13126_p8, %p13120_p3 }
 0x166   : > { %13130 = shalt.err (!%p13127_p11)
}
 0x167   : > { %12442 = dma.hbm_to_vmem [thread:$0]  (!%p13473_p12), %s15506_s12, 32, %s566_s30, [#allocation18]  }
 0x168   : > { %s13318_s23 = smov [#allocation22]   ;;  %s13319_s26 = smov [#allocation25]  }
 0x169   : > { %s589_s8 = sshll.u32 %s13318_s23, 4  ;;  %s613_s1 = sshll.u32 %s13319_s26, 4  ;;  %s590_s8 = int_to_ptr.vmem [resolvable:$true] %s589_s8  ;;  %s614_s1 = int_to_ptr.vmem [resolvable:$true] %s613_s1 }
 0x16a   : > { %s13131_s17 = scalar_lea.hbm %s15508_s14, 32 }
 0x16b   : > { %p13132_p13 = scmp.ne.s32.totalorder %s15508_s14, %s13131_s17  ;;  %p13138_p5 = scmp.lt.u32.totalorder %s13131_s17, %s15508_s14 }
 0x16d   : > { %p13134_p1 = pnand %p13132_p13, %p13489_p0 }
 0x16f   : > { %p13135_p6 = pneg %p13134_p1 }
 0x171   : > { %p13140_p9 = pnand %p13138_p5, %p13135_p6 }
 0x173   : > { %13143 = shalt.err (!%p13140_p9)
}
 0x174   : > { %s13144_s30 = scalar_lea.vmem %s590_s8, 32  ;;  %p13152_p4 = scmp.lt.s32.totalorder %s590_s8, %s590_s8 }
 0x175   : > { %p13145_p10 = scmp.ne.s32.totalorder %s590_s8, %s13144_s30  ;;  %p13153_p7 = scmp.lt.s32.totalorder %s13144_s30, %s13144_s30 }
 0x177   : > { %p13147_p2 = pnand %p13145_p10, %p13489_p0  ;;  %p13154_p8 = por %p13153_p7, %p13152_p4 }
 0x179   : > { %p13148_p3 = pneg %p13147_p2 }
 0x17b   : > { %p13155_p11 = pnand %p13154_p8, %p13148_p3 }
 0x17d   : > { %13158 = shalt.err (!%p13155_p11)
}
 0x17e   : > { %12448 = dma.hbm_to_vmem [thread:$0]  (!%p13473_p12), %s15508_s14, 32, %s590_s8, [#allocation21]  }
 0x17f   : > { %s13159_s23 = scalar_lea.hbm %s15510_s16, 768 }
 0x180   : > { %p13160_p13 = scmp.ne.s32.totalorder %s15510_s16, %s13159_s23  ;;  %p13166_p5 = scmp.lt.u32.totalorder %s13159_s23, %s15510_s16 }
 0x182   : > { %p13162_p1 = pnand %p13160_p13, %p13489_p0 }
 0x184   : > { %p13163_p6 = pneg %p13162_p1 }
 0x186   : > { %p13168_p9 = pnand %p13166_p5, %p13163_p6 }
 0x188   : > { %13171 = shalt.err (!%p13168_p9)
}
 0x189   : > { %s13172_s22 = scalar_lea.vmem %s614_s1, 768  ;;  %p13180_p4 = scmp.lt.s32.totalorder %s614_s1, %s614_s1 }
 0x18a   : > { %p13173_p10 = scmp.ne.s32.totalorder %s614_s1, %s13172_s22  ;;  %p13181_p7 = scmp.lt.s32.totalorder %s13172_s22, %s13172_s22 }
 0x18c   : > { %p13175_p2 = pnand %p13173_p10, %p13489_p0  ;;  %p13182_p8 = por %p13181_p7, %p13180_p4 }
 0x18e   : > { %p13176_p3 = pneg %p13175_p2 }
 0x190   : > { %p13183_p11 = pnand %p13182_p8, %p13176_p3 }
 0x192   : > { %13186 = shalt.err (!%p13183_p11)
}
 0x193   : > { %12454 = dma.hbm_to_vmem [thread:$0]  (!%p13473_p12), %s15510_s16, 768, %s614_s1, [#allocation24]  }
 0x194   : > { %p15557_p13 = scmp.ne.s32.totalorder %s15546_s21, 0 }
 0x195   : > { %p15558_p1 = scmp.eq.s32.totalorder (!%p15557_p13), %s13437_s28, 0 }
 0x196   : > { %634 = sbr.rel (%p15557_p13) target bundleno = 3429 (0xd65), region = 88 }
 0x19d   : > { %13240 = dma.done.wait (%p15558_p1), [#allocation3], 64   ;;  %p15559_p0 = pmov %p15558_p1 }
 0x19f   : > { %13242 = vsyncadd (%p15559_p0), [#allocation3], 4294967232  ;;  %p15560_p6 = pmov %p15559_p0 }
 0x1a0   : > { %p15561_p5 = pmov %p15559_p0 }
 0x1a1   : > { %13244 = dma.done.wait (%p15560_p6), [#allocation6], 528  }
 0x1a2   : > { %13246 = vsyncadd (%p15561_p5), [#allocation6], 4294966768  ;;  %p15562_p9 = pmov %p15559_p0 }
 0x1a3   : > { %p15563_p12 = pmov %p15559_p0 }
 0x1a4   : > { %13248 = dma.done.wait (%p15562_p9), [#allocation9], 1040  }
 0x1a5   : > { %13250 = vsyncadd (%p15563_p12), [#allocation9], 4294966256  ;;  %p15564_p10 = pmov %p15559_p0 }
 0x1a6   : > { %p15565_p2 = pmov %p15559_p0 }
 0x1a7   : > { %13252 = dma.done.wait (%p15564_p10), [#allocation12], 2064  }
 0x1a8   : > { %13254 = vsyncadd (%p15565_p2), [#allocation12], 4294965232  ;;  %p15566_p3 = pmov %p15559_p0 }
 0x1a9   : > { %p15567_p4 = pmov %p15559_p0 }
 0x1aa   : > { %13256 = dma.done.wait (%p15566_p3), [#allocation15], 48  }
 0x1ab   : > { %13258 = vsyncadd (%p15567_p4), [#allocation15], 4294967248  ;;  %p15568_p7 = pmov %p15559_p0 }
 0x1ac   : > { %p15569_p8 = pmov %p15559_p0 }
 0x1ad   : > { %13260 = dma.done.wait (%p15568_p7), [#allocation18], 288  }
 0x1ae   : > { %13262 = vsyncadd (%p15569_p8), [#allocation18], 4294967008  ;;  %p15570_p11 = pmov %p15559_p0 }
 0x1af   : > { %p15571_p13 = pmov %p15559_p0 }
 0x1b0   : > { %13264 = dma.done.wait (%p15570_p11), [#allocation21], 4128  }
 0x1b1   : > { %13266 = vsyncadd (%p15571_p13), [#allocation21], 4294963168  ;;  %p15572_p1 = pmov %p15559_p0 }
 0x1b3   : > { %13268 = dma.done.wait (%p15572_p1), [#allocation24], 99072  }
 0x1b4   : > { %13270 = vsyncadd (%p15559_p0), [#allocation24], 4294868224  ;;  %s739_s21 = sand.u32 1, %s13281_s25   ;;  %p742_p6 = scmp.lt.s32.totalorder %s13437_s28, 1  ;;  %v13831_v0 = vmov 0.0  }
 0x1b5   : > { %s12345_s18 = smul.u32 48, %s739_s21  ;;  %s15573_s30 = sld [smem:[#allocation43_spill]] }
 0x1b6   : > { %s743_s29 = scalar_select %p742_p6, %s13437_s28, 1 }
 0x1b7   : > { %s13829_s24 = scalar_lea.vmem [#allocation26], %s12345_s18  ;;  %s13833_s27 = smov 0  }
 0x1b8   : > { %s12084_s1 = sshll.u32 %s743_s29, 11 }
 0x1bb   : > { %s13827_s2 = scalar_lea.vmem %s15573_s30, %s12084_s1 }
 0x1bc LB: >> { %v13320_v1 = vmov 2   ;;  %v13321_v2 = vmov 1   ;;  %s11194_s4 = sshll.u32 %s13297_s27, 9  ;;  %v13322_v8 = vmov 0   ;;  %v12653_v18 = vld [vmem:[#allocation7] sm:$0xff]   ;;  %v12654_v19 = vld [vmem:[#allocation7 + $0x8] sm:$0xff]   ;;  %s13297_s27 = sphi %s13833_s27, %s753_s27   ;;  %v13293_v0 = vphi %v13831_v0, %v15575_v0  }
 0x1bd   : >> { %12568 = vset.pattern.permute.xlu0 %v13320_v1  ;;  %12564 = vset.pattern.permute.xlu1 %v13321_v2  ;;  %s13845_s23 = scalar_lea.vmem %s13827_s2, %s11194_s4  ;;  %v12655_v20 = vld [vmem:[#allocation7 + $0x10] sm:$0xff]   ;;  %v12656_v22 = vld [vmem:[#allocation7 + $0x18] sm:$0xff]   ;;  %vm2194_vm0 = vcmask 523264   ;;  %s15574_s9 = sld [smem:[#allocation49_spill]]  ;;  %vm4273_vm1 = vcmask 130048  }
 0x1be   : >> { %v758_v3 = vld [vmem:[%s13845_s23 + $0x8] sm:$0xff]  ;;  %v757_v4 = vld [vmem:[%s13845_s23] sm:$0xff]  ;;  %v764_v6 = vld [vmem:[%s13845_s23 + $0x38] sm:$0xff]  ;;  %12161 = vmatprep.subr.bf16.mxu0 %v12653_v18  ;;  %s753_s27 = sadd.s32 1, %s13297_s27  }
 0x1bf   : >> { %1605 = vperm.xlu0 %12568, %v758_v3   ;;  %1212 = vperm.xlu1 %12564, %v757_v4   ;;  %v761_v5 = vld [vmem:[%s13845_s23 + $0x20] sm:$0xff]  ;;  %v760_v7 = vld [vmem:[%s13845_s23 + $0x18] sm:$0xff]  ;;  %v13854_v9 = vld [vmem:[%s13845_s23 + $0x48] sm:$0xff]  ;;  %p750_p5 = scmp.ge.s32.totalorder %s753_s27, 4  }
 0x1c0   : >> { %v759_v10 = vld [vmem:[%s13845_s23 + $0x10] sm:$0xff]  ;;  %v762_v11 = vld [vmem:[%s13845_s23 + $0x28] sm:$0xff]  ;;  %v13867_v13 = vld [vmem:[%s13845_s23 + $0x60] sm:$0xff]  ;;  %12162 = vmatpush3.bf16.msra.mxu0 %v12653_v18  ;;  %s15576_s2 = sld [smem:[#allocation41_spill]] (%p750_p5)  ;;  %s12346_s27 = smul.u32 (%p750_p5), 768, %s13437_s28 }
 0x1c1   : >> { %v767_v12 = vld [vmem:[%s13845_s23 + $0x50] sm:$0xff]  ;;  %v13873_v15 = vld [vmem:[%s13845_s23 + $0x88] sm:$0xff]  ;;  %v13882_v17 = vld [vmem:[%s13845_s23 + $0xa0] sm:$0xff]  ;;  %12163 = vmatprep.subr.bf16.mxu0 %v12654_v19  ;;  %s10944_s8 = sshll.u32 (%p750_p5), %s13829_s24, 4  ;;  %s15577_s29 = sld [smem:[#allocation51_spill]] (%p750_p5)  ;;  %s15451_s8 = int_to_ptr.vmem [resolvable:$true] %s10944_s8 }
 0x1c2   : >> { %v763_v14 = vld [vmem:[%s13845_s23 + $0x30] sm:$0xff]  ;;  %v765_v21 = vld [vmem:[%s13845_s23 + $0x40] sm:$0xff]  ;;  %v770_v23 = vld [vmem:[%s13845_s23 + $0x68] sm:$0xff]  ;;  %s10930_s11 = scalar_lea.sflag (%p750_p5), [#allocation4], %s739_s21  ;;  %s13187_s28 = scalar_lea.vmem (%p750_p5), %s15451_s8, 768 }
 0x1c3   : >> { %1617 = vperm.xlu0 %12568, %v761_v5   ;;  %1216 = vperm.xlu1 %12564, %v758_v3   ;;  %v13877_v16 = vld [vmem:[%s13845_s23 + $0x90] sm:$0xff]  ;;  %v768_v25 = vld [vmem:[%s13845_s23 + $0x58] sm:$0xff]  ;;  %v13898_v26 = vld [vmem:[%s13845_s23 + $0xa8] sm:$0xff]  ;;  %p13188_p9 = scmp.ne.s32.totalorder (%p750_p5), %s15451_s8, %s13187_s28  ;;  %s13325_s20 = smov (%p750_p5), [#allocation26]  }
 0x1c4   : >> { %12164 = vmatpush3.bf16.msra.mxu0 %v12654_v19  ;;  %v771_v24 = vld [vmem:[%s13845_s23 + $0x70] sm:$0xff]  ;;  %v13911_v29 = vld [vmem:[%s13845_s23 + $0xe8] sm:$0xff]  ;;  %v772_v32 = vld [vmem:[%s13845_s23 + $0x78] sm:$0xff]  ;;  %s13191_s30 = sshll.u32 (%p750_p5), %s13325_s20, 4  ;;  %s13192_s30 = int_to_ptr.vmem [resolvable:$false] %s13191_s30 }
 0x1c5   : >> { %12165 = vmatprep.subr.bf16.mxu0 %v12655_v20  ;;  %v13902_v27 = vld [vmem:[%s13845_s23 + $0xb0] sm:$0xff]  ;;  %v13933_v33 = vld [vmem:[%s13845_s23 + $0xb8] sm:$0xff]  ;;  %v13938_v36 = vld [vmem:[%s13845_s23 + $0xc8] sm:$0xff]  ;;  %s13193_s4 = scalar_lea.vmem (%p750_p5), %s13192_s30, 1536  ;;  %p13194_p3 = scmp.lt.s32.totalorder (%p750_p5), %s15451_s8, %s13192_s30 }
 0x1c6   : >> { %v13907_v28 = vld [vmem:[%s13845_s23 + $0xd0] sm:$0xff]  ;;  %v773_v39 = vld [vmem:[%s13845_s23 + $0x80] sm:$0xff]  ;;  %v13954_v43 = vld [vmem:[%s13845_s23 + $0xf8] sm:$0xff]  ;;  %p15578_p12 = scmp.ne.s32.totalorder (%p750_p5), %s15576_s2, 0  ;;  %p13195_p4 = scmp.lt.s32.totalorder (%p750_p5), %s13193_s4, %s13187_s28 }
 0x1c7   : >> { %1629 = vperm.xlu0 %12568, %v764_v6   ;;  %12565 = vset.pattern.permute.xlu1 %v13322_v8  ;;  %v13915_v30 = vld [vmem:[%s13845_s23 + $0xf0] sm:$0xff]  ;;  %v13945_v40 = vld [vmem:[%s13845_s23 + $0xe0] sm:$0xff]  ;;  %v13961_v45 = vld [vmem:[%s13845_s23 + $0x108] sm:$0xff]  ;;  %s15449_s1 = scalar_lea.hbm (%p750_p5), %s15577_s29, %s12346_s27 }
 0x1c8   : >> { %839 = vperm.xlu1 %12565, %v760_v7   ;;  %12166 = vmatpush3.bf16.msra.mxu0 %v12655_v20  ;;  %v13920_v31 = vld [vmem:[%s13845_s23 + $0x110] sm:$0xff]  ;;  %v13965_v47 = vld [vmem:[#allocation2 + $0x1] ss:$0 sm:$0xff]  ;;  %v13968_v48 = vld [vmem:[#allocation2 + $0x2] ss:$0 sm:$0xff]  ;;  %p13189_p10 = pnand (%p750_p5), %p13188_p9, %p15578_p12  ;;  %p13196_p7 = por (%p750_p5), %p13195_p4, %p13194_p3 }
 0x1c9   : >> { %12167 = vmatprep.subr.bf16.mxu0 %v12656_v22  ;;  %v13970_v49 = vld [vmem:[#allocation2] ss:$0 sm:$0xff]  ;;  %v776_v55 = vld [vmem:[%s13845_s23 + $0x98] sm:$0xff] }
 0x1ca   : >> { %v13974_v51 = vld [vmem:[%s13845_s23 + $0x120] sm:$0xff]  ;;  %v13983_v59 = vld [vmem:[%s13845_s23 + $0x138] sm:$0xff]  ;;  %p13190_p2 = pneg (%p750_p5), %p13189_p10 }
 0x1cb   : >> { %1637 = vperm.xlu0 %12568, %v13854_v9  }
 0x1cc   : >> { %12566 = vset.pattern.permute.xlu1 %v13321_v2  ;;  %12168 = vmatpush3.bf16.msra.mxu0 %v12656_v22  ;;  %p13197_p8 = pnand (%p750_p5), %p13196_p7, %p13190_p2 }
 0x1cd   : >> { %1224 = vperm.xlu1 %12566, %v760_v7  }
 0x1cf   : >> { %12579 = vset.pattern.permute.xlu0 %v13322_v8 }
 0x1d0   : >> { %824 = vperm.xlu0 %12579, %v757_v4  }
 0x1d1   : >> { %12567 = vset.pattern.permute.xlu1 %v13320_v1 }
 0x1d2   : >> { %1601 = vperm.xlu1 %12567, %v757_v4   ;;  %v13990_v4 = vld [vmem:[#allocation5] ss:$0 sm:$0xff] }
 0x1d4   : >> { %829 = vperm.xlu0 %12579, %v758_v3  }
 0x1d6   : >> { %1609 = vperm.xlu1 %12567, %v759_v10  }
 0x1d8   : >> { %834 = vperm.xlu0 %12579, %v759_v10  }
 0x1da   : >> { %1613 = vperm.xlu1 %12567, %v760_v7   ;;  %v13994_v7 = vld [vmem:[%s13845_s23 + $0x148] sm:$0xff] }
 0x1dc   : >> { %844 = vperm.xlu0 %12579, %v761_v5  }
 0x1de   : >> { %12569 = vset.pattern.permute.xlu1 %v13322_v8 }
 0x1df   : >> { %849 = vperm.xlu1 %12569, %v762_v11  }
 0x1e0   : >> { %869 = vperm.xlu0 %12579, %v13854_v9  }
 0x1e3   : >> { %12570 = vset.pattern.permute.xlu1 %v13321_v2 }
 0x1e4   : >> { %874 = vperm.xlu0 %12579, %v767_v12   ;;  %1228 = vperm.xlu1 %12570, %v761_v5  }
 0x1e8   : >> { %884 = vperm.xlu0 %12579, %v13867_v13   ;;  %12571 = vset.pattern.permute.xlu1 %v13322_v8 }
 0x1e9   : >> { %854 = vperm.xlu1 %12571, %v763_v14  }
 0x1ec   : >> { %909 = vperm.xlu0 %12579, %v13873_v15  }
 0x1ed   : >> { %859 = vperm.xlu1 %12571, %v764_v6  }
 0x1f0   : >> { %914 = vperm.xlu0 %12579, %v13877_v16  }
 0x1f1   : >> { %12572 = vset.pattern.permute.xlu1 %v13321_v2 }
 0x1f2   : >> { %1240 = vperm.xlu1 %12572, %v764_v6  }
 0x1f4   : >> { %924 = vperm.xlu0 %12579, %v13882_v17  }
 0x1f6   : >> { %12573 = vset.pattern.permute.xlu1 %v13320_v1 }
 0x1f7   : >> { %1621 = vperm.xlu1 %12573, %v762_v11  }
 0x1f8   : >> { %12590 = vset.pattern.permute.xlu0 %v13321_v2 }
 0x1f9   : >> { %1220 = vperm.xlu0 %12590, %v759_v10  }
 0x1fb   : >> { %1625 = vperm.xlu1 %12573, %v763_v14  }
 0x1fd   : >> { %1232 = vperm.xlu0 %12590, %v762_v11  }
 0x1ff   : >> { %12574 = vset.pattern.permute.xlu1 %v13322_v8 }
 0x200   : >> { %864 = vperm.xlu1 %12574, %v765_v21  }
 0x201   : >> { %1236 = vperm.xlu0 %12590, %v763_v14  }
 0x204   : >> { %12575 = vset.pattern.permute.xlu1 %v13321_v2 }
 0x205   : >> { %1252 = vperm.xlu0 %12590, %v767_v12   ;;  %1244 = vperm.xlu1 %12575, %v765_v21  }
 0x209   : >> { %1264 = vperm.xlu0 %12590, %v770_v23   ;;  %1248 = vperm.xlu1 %12575, %v13854_v9  }
 0x20d   : >> { %1268 = vperm.xlu0 %12590, %v771_v24   ;;  %12576 = vset.pattern.permute.xlu1 %v13322_v8 }
 0x20e   : >> { %879 = vperm.xlu1 %12576, %v768_v25  }
 0x211   : >> { %1284 = vperm.xlu0 %12590, %v13877_v16  }
 0x212   : >> { %12577 = vset.pattern.permute.xlu1 %v13321_v2 }
 0x213   : >> { %1256 = vperm.xlu1 %12577, %v768_v25  }
 0x215   : >> { %1296 = vperm.xlu0 %12590, %v13898_v26  }
 0x217   : >> { %12578 = vset.pattern.permute.xlu1 %v13320_v1 }
 0x218   : >> { %1633 = vperm.xlu1 %12578, %v765_v21  }
 0x219   : >> { %1300 = vperm.xlu0 %12590, %v13902_v27  }
 0x21c   : >> { %1641 = vperm.xlu1 %12578, %v767_v12  }
 0x21d   : >> { %1316 = vperm.xlu0 %12590, %v13907_v28  }
 0x220   : >> { %1645 = vperm.xlu1 %12578, %v768_v25  }
 0x221   : >> { %1328 = vperm.xlu0 %12590, %v13911_v29  }
 0x224   : >> { %12580 = vset.pattern.permute.xlu1 %v13322_v8 }
 0x225   : >> { %1332 = vperm.xlu0 %12590, %v13915_v30   ;;  %889 = vperm.xlu1 %12580, %v770_v23  }
 0x229   : >> { %1348 = vperm.xlu0 %12590, %v13920_v31   ;;  %12581 = vset.pattern.permute.xlu1 %v13321_v2 }
 0x22a   : >> { %1260 = vperm.xlu1 %12581, %v13867_v13  }
 0x22d   : >> { %12609 = vset.pattern.permute.xlu0 %v13320_v1 }
 0x22e   : >> { %1649 = vperm.xlu0 %12609, %v13867_v13   ;;  %12582 = vset.pattern.permute.xlu1 %v13322_v8 }
 0x22f   : >> { %894 = vperm.xlu1 %12582, %v771_v24  }
 0x232   : >> { %1661 = vperm.xlu0 %12609, %v772_v32  }
 0x233   : >> { %899 = vperm.xlu1 %12582, %v772_v32  }
 0x236   : >> { %1669 = vperm.xlu0 %12609, %v13873_v15  }
 0x237   : >> { %12583 = vset.pattern.permute.xlu1 %v13321_v2 }
 0x238   : >> { %1272 = vperm.xlu1 %12583, %v772_v32  }
 0x23a   : >> { %1681 = vperm.xlu0 %12609, %v13882_v17  }
 0x23c   : >> { %12584 = vset.pattern.permute.xlu1 %v13320_v1 }
 0x23d   : >> { %1653 = vperm.xlu1 %12584, %v770_v23  }
 0x23e   : >> { %v1213_v34 = vpop.permute.xlu1 %1212  ;;  %v1606_v35 = vpop.permute.xlu0 %1605  ;;  %1693 = vperm.xlu0 %12609, %v13933_v33  }
 0x23f   : >> { %v1471_v52 = vmul.f32 %v13965_v47, %v1213_v34  ;;  %v1861_v60 = vmul.f32 %v13968_v48, %v1606_v35 }
 0x241   : >> { %1657 = vperm.xlu1 %12584, %v771_v24  }
 0x242   : >> { %v1217_v37 = vpop.permute.xlu1 %1216  ;;  %v13940_v38 = vpop.permute.xlu0 %1617  ;;  %1701 = vperm.xlu0 %12609, %v13938_v36  }
 0x243   : >> { %v1472_v61 = vmul.f32 %v13965_v47, %v1217_v37 }
 0x245   : >> { %12585 = vset.pattern.permute.xlu1 %v13322_v8 }
 0x246   : >> { %904 = vperm.xlu1 %12585, %v773_v39   ;;  %v13948_v41 = vpop.permute.xlu0 %1629  ;;  %1713 = vperm.xlu0 %12609, %v13945_v40  }
 0x247   : >> { %v13951_v42 = vpop.permute.xlu1 %839 }
 0x24a   : >> { %12586 = vset.pattern.permute.xlu1 %v13321_v2  ;;  %v13957_v44 = vpop.permute.xlu0 %1637  ;;  %1725 = vperm.xlu0 %12609, %v13954_v43  }
 0x24b   : >> { %1276 = vperm.xlu1 %12586, %v773_v39  }
 0x24c   : >> { %v13963_v46 = vpop.permute.xlu1 %1224 }
 0x24d   : >> { %v1474_v35 = vmul.f32 %v13965_v47, %v13963_v46 }
 0x24e   : >> { %1733 = vperm.xlu0 %12609, %v13961_v45  }
 0x24f   : >> { %v825_v50 = vpop.permute.xlu0 %824  ;;  %1280 = vperm.xlu1 %12586, %v13873_v15  }
 0x250   : >> { %v1146_v53 = vmul.f32 %v13970_v49, %v825_v50 }
 0x251   : >> { %v1602_v54 = vpop.permute.xlu1 %1601 }
 0x252   : >> { %v1535_v56 = vadd.f32 %v1471_v52, %v1146_v53  ;;  %v1860_v57 = vmul.f32 %v13968_v48, %v1602_v54  ;;  %1745 = vperm.xlu0 %12609, %v13974_v51  }
 0x253   : >> { %v830_v58 = vpop.permute.xlu0 %829  ;;  %12587 = vset.pattern.permute.xlu1 %v13322_v8 }
 0x254   : >> { %v1924_v62 = vadd.f32 %v1860_v57, %v1535_v56  ;;  %v1147_v63 = vmul.f32 %v13970_v49, %v830_v58  ;;  %919 = vperm.xlu1 %12587, %v776_v55   ;;  %v14040_v58 = vld [vmem:[%s13845_s23 + $0x150] sm:$0xff] }
 0x255   : >> { %v13988_v3 = vpop.permute.xlu1 %1609 }
 0x256   : >> { %v1536_v5 = vadd.f32 %v1472_v61, %v1147_v63  ;;  %1757 = vperm.xlu0 %12609, %v13983_v59   ;;  %v1995_v10 = vadd.f32 %v13990_v4, %v1924_v62  ;;  %v1862_v63 = vmul.f32 %v13968_v48, %v13988_v3 }
 0x257   : >> { %v835_v6 = vpop.permute.xlu0 %834 }
 0x258   : >> { %v1925_v9 = vadd.f32 %v1861_v60, %v1536_v5  ;;  %12588 = vset.pattern.permute.xlu1 %v13321_v2  ;;  %v2059_v14 = vmax.f32 %v1995_v10, 0.0  ;;  %v1148_v54 = vmul.f32 %v13970_v49, %v835_v6 }
 0x259   : >> { %1288 = vperm.xlu1 %12588, %v776_v55   ;;  %v1614_v11 = vpop.permute.xlu1 %1613 }
 0x25a   : >> { %v1996_v12 = vadd.f32 %v13990_v4, %v1925_v9  ;;  %1765 = vperm.xlu0 %12609, %v13994_v7   ;;  %v1863_v50 = vmul.f32 %v13968_v48, %v1614_v11 }
 0x25b   : >> { %v845_v13 = vpop.permute.xlu0 %844 }
 0x25c   : >> { %v2060_v15 = vmax.f32 %v1996_v12, 0.0  ;;  %v1150_v52 = vmul.f32 %v13970_v49, %v845_v13  ;;  %v14053_v12 = vld [vmem:[%s13845_s23 + $0x160] sm:$0xff] }
 0x25d   : >> { %12589 = vset.pattern.permute.xlu1 %v13320_v1 }
 0x25e   : >> { %1665 = vperm.xlu1 %12589, %v773_v39   ;;  %v850_v18 = vpop.permute.xlu1 %849  ;;  %v2123_v19 = vpack.c.bf16 %v2060_v15, %v2059_v14  ;;  %12622 = vset.pattern.permute.xlu0 %v13322_v8  ;;  %v1149_v39 = vmul.f32 %v13970_v49, %v13951_v42 }
 0x25f   : >> { %v14002_v20 = vpop.permute.xlu0 %869  ;;  %949 = vperm.xlu0 %12622, %v13938_v36   ;;  %v1151_v13 = vmul.f32 %v13970_v49, %v850_v18 }
 0x260   : >> { %12169 = vmatprep.mubr.msk.bf16.mxu0 %vm2194_vm0, %v2123_v19 }
 0x262   : >> { %1673 = vperm.xlu1 %12589, %v13877_v16  }
 0x263   : >> { %v1229_v21 = vpop.permute.xlu1 %1228  ;;  %v14007_v22 = vpop.permute.xlu0 %874  ;;  %954 = vperm.xlu0 %12622, %v13907_v28  }
 0x264   : >> { %v1475_v53 = vmul.f32 %v13965_v47, %v1229_v21 }
 0x266   : >> { %1677 = vperm.xlu1 %12589, %v776_v55   ;;  %v1864_v55 = vmul.f32 %v13968_v48, %v13940_v38  ;;  %v1539_v56 = vadd.f32 %v1475_v53, %v1150_v52  ;;  %v1867_v38 = vmul.f32 %v13968_v48, %v13948_v41 }
 0x267   : >> { %v14010_v23 = vpop.permute.xlu0 %884  ;;  %964 = vperm.xlu0 %12622, %v13945_v40  }
 0x268   : >> { %v855_v24 = vpop.permute.xlu1 %854  ;;  %v1928_v10 = vadd.f32 %v1864_v55, %v1539_v56 }
 0x269   : >> { %v1152_v18 = vmul.f32 %v13970_v49, %v855_v24 }
 0x26a   : >> { %12591 = vset.pattern.permute.xlu1 %v13322_v8 }
 0x26b   : >> { %929 = vperm.xlu1 %12591, %v13898_v26   ;;  %v14015_v25 = vpop.permute.xlu0 %909  ;;  %989 = vperm.xlu0 %12622, %v13961_v45  }
 0x26c   : >> { %v860_v16 = vpop.permute.xlu1 %859 }
 0x26d   : >> { %v1153_v5 = vmul.f32 %v13970_v49, %v860_v16 }
 0x26f   : >> { %12592 = vset.pattern.permute.xlu1 %v13321_v2  ;;  %v14019_v32 = vpop.permute.xlu0 %914  ;;  %994 = vperm.xlu0 %12622, %v13920_v31  }
 0x270   : >> { %1292 = vperm.xlu1 %12592, %v13882_v17   ;;  %v1538_v17 = vadd.f32 %v1474_v35, %v1149_v39  ;;  %v1999_v35 = vadd.f32 %v13990_v4, %v1928_v10 }
 0x271   : >> { %v1241_v34 = vpop.permute.xlu1 %1240 }
 0x272   : >> { %v1927_v42 = vadd.f32 %v1863_v50, %v1538_v17  ;;  %v1478_v60 = vmul.f32 %v13965_v47, %v1241_v34  ;;  %v14065_v50 = vld [vmem:[%s13845_s23 + $0x188] sm:$0xff] }
 0x273   : >> { %v14025_v37 = vpop.permute.xlu0 %924  ;;  %1004 = vperm.xlu0 %12622, %v13974_v51  }
 0x274   : >> { %12593 = vset.pattern.permute.xlu1 %v13322_v8  ;;  %v1998_v9 = vadd.f32 %v13990_v4, %v1927_v42  ;;  %v1542_v14 = vadd.f32 %v1478_v60, %v1153_v5 }
 0x275   : >> { %934 = vperm.xlu1 %12593, %v13902_v27  }
 0x276   : >> { %v1622_v46 = vpop.permute.xlu1 %1621  ;;  %v2062_v34 = vmax.f32 %v1998_v9, 0.0  ;;  %v1931_v52 = vadd.f32 %v1867_v38, %v1542_v14 }
 0x277   : >> { %1029 = vperm.xlu0 %12622, %v13994_v7   ;;  %v1865_v19 = vmul.f32 %v13968_v48, %v1622_v46 }
 0x278   : >> { %v1221_v57 = vpop.permute.xlu0 %1220  ;;  %v2002_v60 = vadd.f32 %v13990_v4, %v1931_v52  ;;  %v1156_v52 = vmul.f32 %v13970_v49, %v14007_v22 }
 0x279   : >> { %v1473_v61 = vmul.f32 %v13965_v47, %v1221_v57  ;;  %939 = vperm.xlu1 %12593, %v13933_v33   ;;  %v2063_v57 = vmax.f32 %v1999_v35, 0.0 }
 0x27a   : >> { %v1626_v62 = vpop.permute.xlu1 %1625  ;;  %v2066_v9 = vmax.f32 %v2002_v60, 0.0 }
 0x27b   : >> { %v1537_v6 = vadd.f32 %v1473_v61, %v1148_v54  ;;  %1034 = vperm.xlu0 %12622, %v14040_v58   ;;  %v1866_v46 = vmul.f32 %v13968_v48, %v1626_v62  ;;  %v14076_v62 = vld [vmem:[%s13845_s23 + $0x190] sm:$0xff] }
 0x27c   : >> { %v1233_v11 = vpop.permute.xlu0 %1232 }
 0x27d   : >> { %v1926_v15 = vadd.f32 %v1862_v63, %v1537_v6  ;;  %v1476_v3 = vmul.f32 %v13965_v47, %v1233_v11  ;;  %12594 = vset.pattern.permute.xlu1 %v13321_v2  ;;  %v781_v11 = vld [vmem:[%s13845_s23 + $0xc0] sm:$0xff] }
 0x27e   : >> { %1304 = vperm.xlu1 %12594, %v13933_v33  }
 0x27f   : >> { %v1997_v41 = vadd.f32 %v13990_v4, %v1926_v15  ;;  %v1540_v21 = vadd.f32 %v1476_v3, %v1151_v13  ;;  %v865_v16 = vpop.permute.xlu1 %864  ;;  %1044 = vperm.xlu0 %12622, %v14053_v12   ;;  %v14086_v13 = vld [vmem:[%s13845_s23 + $0x128] sm:$0xff]  ;;  %v1155_v3 = vmul.f32 %v13970_v49, %v14002_v20 }
 0x280   : >> { %v1237_v39 = vpop.permute.xlu0 %1236 }
 0x281   : >> { %v2061_v53 = vmax.f32 %v1997_v41, 0.0  ;;  %v1929_v17 = vadd.f32 %v1865_v19, %v1540_v21  ;;  %v1477_v33 = vmul.f32 %v13965_v47, %v1237_v39  ;;  %v14098_v41 = vld [vmem:[%s13845_s23 + $0x130] sm:$0xff] }
 0x282   : >> { %12595 = vset.pattern.permute.xlu1 %v13320_v1 }
 0x283   : >> { %v2000_v54 = vadd.f32 %v13990_v4, %v1929_v17  ;;  %v1541_v55 = vadd.f32 %v1477_v33, %v1152_v18  ;;  %1685 = vperm.xlu1 %12595, %v13898_v26   ;;  %v2124_v42 = vpack.c.bf16 %v2062_v34, %v2061_v53  ;;  %1069 = vperm.xlu0 %12622, %v14065_v50  }
 0x284   : >> { %v1245_v24 = vpop.permute.xlu1 %1244  ;;  %v1253_v56 = vpop.permute.xlu0 %1252  ;;  %v1869_v34 = vmul.f32 %v13968_v48, %v13957_v44  ;;  %v1154_v53 = vmul.f32 %v13970_v49, %v865_v16  ;;  %v784_v44 = vld [vmem:[%s13845_s23 + $0xd8] sm:$0xff] }
 0x285   : >> { %v2064_v61 = vmax.f32 %v2000_v54, 0.0  ;;  %v1930_v63 = vadd.f32 %v1866_v46, %v1541_v55  ;;  %12170 = vmatmul.mubr.msk.bf16.vlgmr.msra.gmra.mrb[0].mxu0 %vm2194_vm0, %v2124_v42  ;;  %v1479_v39 = vmul.f32 %v13965_v47, %v1245_v24  ;;  %v1481_v17 = vmul.f32 %v13965_v47, %v1253_v56 }
 0x287   : >> { %v2001_v5 = vadd.f32 %v13990_v4, %v1930_v63  ;;  %1689 = vperm.xlu1 %12595, %v13902_v27   ;;  %v2125_v26 = vpack.c.bf16 %v2064_v61, %v2063_v57  ;;  %1074 = vperm.xlu0 %12622, %v14076_v62   ;;  %v1543_v54 = vadd.f32 %v1479_v39, %v1154_v53 }
 0x288   : >> { %v1249_v6 = vpop.permute.xlu1 %1248  ;;  %v14080_v38 = vpop.permute.xlu0 %1264 }
 0x289   : >> { %v2065_v10 = vmax.f32 %v2001_v5, 0.0  ;;  %12173 = vmatprep.mubr.msk.bf16.mxu0 %vm2194_vm0, %v2125_v26  ;;  %v1480_v19 = vmul.f32 %v13965_v47, %v1249_v6 }
 0x28b   : >> { %12596 = vset.pattern.permute.xlu1 %v13322_v8  ;;  %v2126_v14 = vpack.c.bf16 %v2066_v9, %v2065_v10  ;;  %12630 = vset.pattern.permute.xlu0 %v13321_v2  ;;  %v1544_v35 = vadd.f32 %v1480_v19, %v1155_v3 }
 0x28c   : >> { %944 = vperm.xlu1 %12596, %v781_v11   ;;  %v14089_v15 = vpop.permute.xlu0 %1268  ;;  %1360 = vperm.xlu0 %12630, %v14086_v13  }
 0x28d   : >> { %12174 = vmatmul.mubr.msk.bf16.gmra.mrb[4].mxu0 %vm2194_vm0, %v2126_v14  ;;  %v880_v27 = vpop.permute.xlu1 %879  ;;  %v1933_v33 = vadd.f32 %v1869_v34, %v1544_v35 }
 0x28e   : >> { %v1157_v5 = vmul.f32 %v13970_v49, %v880_v27 }
 0x28f   : >> { %v2004_v24 = vadd.f32 %v13990_v4, %v1933_v33 }
 0x290   : >> { %12597 = vset.pattern.permute.xlu1 %v13321_v2  ;;  %v14101_v21 = vpop.permute.xlu0 %1284  ;;  %1364 = vperm.xlu0 %12630, %v14098_v41  }
 0x291   : >> { %1308 = vperm.xlu1 %12597, %v781_v11   ;;  %v2068_v63 = vmax.f32 %v2004_v24, 0.0 }
 0x292   : >> { %v1257_v18 = vpop.permute.xlu1 %1256 }
 0x293   : >> { %v1482_v16 = vmul.f32 %v13965_v47, %v1257_v18 }
 0x294   : >> { %v14107_v20 = vpop.permute.xlu0 %1296  ;;  %1380 = vperm.xlu0 %12630, %v14040_v58  }
 0x295   : >> { %1312 = vperm.xlu1 %12597, %v13938_v36   ;;  %v1545_v36 = vadd.f32 %v1481_v17, %v1156_v52  ;;  %v1546_v10 = vadd.f32 %v1482_v16, %v1157_v5 }
 0x297   : >> { %v1634_v46 = vpop.permute.xlu1 %1633 }
 0x298   : >> { %v1868_v55 = vmul.f32 %v13968_v48, %v1634_v46  ;;  %v14117_v42 = vpop.permute.xlu0 %1300 }
 0x299   : >> { %12598 = vset.pattern.permute.xlu1 %v13322_v8 }
 0x29a   : >> { %v1932_v57 = vadd.f32 %v1868_v55, %v1543_v54  ;;  %959 = vperm.xlu1 %12598, %v784_v44   ;;  %v14142_v55 = vld [vmem:[%s13845_s23 + $0x168] sm:$0xff] }
 0x29b   : >> { %v1642_v22 = vpop.permute.xlu1 %1641  ;;  %1392 = vperm.xlu0 %12630, %v14142_v55  }
 0x29c   : >> { %v2003_v56 = vadd.f32 %v13990_v4, %v1932_v57  ;;  %v1870_v60 = vmul.f32 %v13968_v48, %v1642_v22  ;;  %v14124_v61 = vpop.permute.xlu0 %1316 }
 0x29e   : >> { %v2067_v26 = vmax.f32 %v2003_v56, 0.0  ;;  %v1934_v6 = vadd.f32 %v1870_v60, %v1545_v36  ;;  %12599 = vset.pattern.permute.xlu1 %v13321_v2  ;;  %v14148_v36 = vld [vmem:[%s13845_s23 + $0x170] sm:$0xff]  ;;  %v1484_v60 = vmul.f32 %v13965_v47, %v14080_v38  ;;  %v1485_v38 = vmul.f32 %v13965_v47, %v14089_v15 }
 0x29f   : >> { %1320 = vperm.xlu1 %12599, %v784_v44   ;;  %v1646_v9 = vpop.permute.xlu1 %1645  ;;  %1396 = vperm.xlu0 %12630, %v14148_v36  }
 0x2a0   : >> { %v1871_v14 = vmul.f32 %v13968_v48, %v1646_v9  ;;  %v2127_v3 = vpack.c.bf16 %v2068_v63, %v2067_v26  ;;  %v2005_v19 = vadd.f32 %v13990_v4, %v1934_v6  ;;  %v14130_v35 = vpop.permute.xlu0 %1328 }
 0x2a2   : >> { %v1935_v34 = vadd.f32 %v1871_v14, %v1546_v10  ;;  %12177 = vmatprep.mubr.msk.bf16.mxu0 %vm2194_vm0, %v2127_v3  ;;  %v2069_v39 = vmax.f32 %v2005_v19, 0.0 }
 0x2a3   : >> { %12600 = vset.pattern.permute.xlu1 %v13320_v1  ;;  %1412 = vperm.xlu0 %12630, %v14076_v62  }
 0x2a4   : >> { %v2006_v27 = vadd.f32 %v13990_v4, %v1935_v34  ;;  %1697 = vperm.xlu1 %12600, %v781_v11   ;;  %v890_v18 = vpop.permute.xlu1 %889  ;;  %v14135_v53 = vpop.permute.xlu0 %1332  ;;  %v14175_v34 = vld [vmem:[%s13845_s23 + $0x1b0] sm:$0xff] }
 0x2a6   : >> { %v2070_v52 = vmax.f32 %v2006_v27, 0.0 }
 0x2a8   : >> { %1705 = vperm.xlu1 %12600, %v13907_v28   ;;  %v2128_v17 = vpack.c.bf16 %v2070_v52, %v2069_v39  ;;  %v14139_v46 = vpop.permute.xlu0 %1348 }
 0x2a9   : >> { %v1261_v33 = vpop.permute.xlu1 %1260 }
 0x2aa   : >> { %12178 = vmatmul.mubr.msk.bf16.gmra.mrb[8].mxu0 %vm2194_vm0, %v2128_v17  ;;  %v1483_v24 = vmul.f32 %v13965_v47, %v1261_v33 }
 0x2ac   : >> { %1709 = vperm.xlu1 %12600, %v784_v44   ;;  %v1158_v44 = vmul.f32 %v13970_v49, %v14010_v23  ;;  %v1159_v23 = vmul.f32 %v13970_v49, %v890_v18 }
 0x2ad   : >> { %v1650_v28 = vpop.permute.xlu0 %1649 }
 0x2ae   : >> { %v895_v54 = vpop.permute.xlu1 %894  ;;  %v1872_v57 = vmul.f32 %v13968_v48, %v1650_v28  ;;  %v1547_v63 = vadd.f32 %v1483_v24, %v1158_v44  ;;  %v1548_v14 = vadd.f32 %v1484_v60, %v1159_v23 }
 0x2af   : >> { %v1160_v3 = vmul.f32 %v13970_v49, %v895_v54 }
 0x2b0   : >> { %12601 = vset.pattern.permute.xlu1 %v13322_v8  ;;  %v1936_v26 = vadd.f32 %v1872_v57, %v1547_v63  ;;  %v12659_v63 = vld [vmem:[#allocation10 + $0x10] sm:$0xff]  }
 0x2b1   : >> { %969 = vperm.xlu1 %12601, %v13911_v29   ;;  %v1662_v56 = vpop.permute.xlu0 %1661  ;;  %v1549_v17 = vadd.f32 %v1485_v38, %v1160_v3 }
 0x2b2   : >> { %v900_v11 = vpop.permute.xlu1 %899  ;;  %v1875_v9 = vmul.f32 %v13968_v48, %v1662_v56  ;;  %v2007_v27 = vadd.f32 %v13990_v4, %v1936_v26  ;;  %v12658_v56 = vld [vmem:[#allocation10 + $0x8] sm:$0xff]   ;;  %v14193_v26 = vld [vmem:[%s13845_s23 + $0x178] sm:$0xff] }
 0x2b3   : >> { %v1161_v5 = vmul.f32 %v13970_v49, %v900_v11  ;;  %v12657_v11 = vld [vmem:[#allocation10] sm:$0xff]  }
 0x2b4   : >> { %v2071_v54 = vmax.f32 %v2007_v27, 0.0  ;;  %12233 = vmatprep.subr.bf16.mxu1 %v12657_v11 }
 0x2b5   : >> { %12602 = vset.pattern.permute.xlu1 %v13321_v2  ;;  %12234 = vmatpush3.bf16.msra.mxu1 %v12657_v11  ;;  %v1670_v3 = vpop.permute.xlu0 %1669 }
 0x2b6   : >> { %1324 = vperm.xlu1 %12602, %v13945_v40   ;;  %v14165_v40 = vld [vmem:[%s13845_s23 + $0x1a8] sm:$0xff]  ;;  %12235 = vmatprep.subr.bf16.mxu1 %v12658_v56 }
 0x2b7   : >> { %v1273_v22 = vpop.permute.xlu1 %1272  ;;  %1424 = vperm.xlu0 %12630, %v14165_v40  }
 0x2b8   : >> { %v1486_v16 = vmul.f32 %v13965_v47, %v1273_v22 }
 0x2b9   : >> { %12236 = vmatpush3.bf16.msra.mxu1 %v12658_v56 }
 0x2ba   : >> { %12603 = vset.pattern.permute.xlu1 %v13322_v8  ;;  %v1550_v6 = vadd.f32 %v1486_v16, %v1161_v5  ;;  %12237 = vmatprep.subr.bf16.mxu1 %v12659_v63 }
 0x2bb   : >> { %974 = vperm.xlu1 %12603, %v13915_v30   ;;  %1428 = vperm.xlu0 %12630, %v14175_v34  }
 0x2bc   : >> { %v1654_v10 = vpop.permute.xlu1 %1653  ;;  %v1939_v18 = vadd.f32 %v1875_v9, %v1550_v6  ;;  %v12660_v6 = vld [vmem:[#allocation10 + $0x18] sm:$0xff]  }
 0x2bd   : >> { %v1873_v19 = vmul.f32 %v13968_v48, %v1654_v10  ;;  %12238 = vmatpush3.bf16.msra.mxu1 %v12659_v63  ;;  %v14198_v10 = vld [vmem:[%s13845_s23 + $0x100] sm:$0xff] }
 0x2be   : >> { %v2010_v28 = vadd.f32 %v13990_v4, %v1939_v18  ;;  %12239 = vmatprep.subr.bf16.mxu1 %v12660_v6  ;;  %v1877_v18 = vmul.f32 %v13968_v48, %v1670_v3 }
 0x2bf   : >> { %v1937_v39 = vadd.f32 %v1873_v19, %v1548_v14  ;;  %979 = vperm.xlu1 %12603, %v13954_v43   ;;  %12637 = vset.pattern.permute.xlu0 %v13320_v1  ;;  %v1163_v14 = vmul.f32 %v13970_v49, %v14015_v25  ;;  %v12662_v19 = vld [vmem:[#allocation10 + $0x28] sm:$0xff]   ;;  %v1164_v25 = vmul.f32 %v13970_v49, %v14019_v32 }
 0x2c0   : >> { %v1658_v52 = vpop.permute.xlu1 %1657  ;;  %1777 = vperm.xlu0 %12637, %v14053_v12   ;;  %v2074_v60 = vmax.f32 %v2010_v28, 0.0  ;;  %v792_v28 = vld [vmem:[%s13845_s23 + $0x118] sm:$0xff] }
 0x2c1   : >> { %v2008_v33 = vadd.f32 %v13990_v4, %v1937_v39  ;;  %v1874_v15 = vmul.f32 %v13968_v48, %v1658_v52  ;;  %12240 = vmatpush3.bf16.msra.mxu1 %v12660_v6  ;;  %v12663_v52 = vld [vmem:[#allocation10 + $0x30] sm:$0xff]  }
 0x2c3   : >> { %v2072_v44 = vmax.f32 %v2008_v33, 0.0  ;;  %v1938_v24 = vadd.f32 %v1874_v15, %v1549_v17  ;;  %12604 = vset.pattern.permute.xlu1 %v13321_v2  ;;  %v1489_v33 = vmul.f32 %v13965_v47, %v14101_v21  ;;  %v1682_v21 = vpop.permute.xlu0 %1681 }
 0x2c4   : >> { %1336 = vperm.xlu1 %12604, %v13954_v43   ;;  %1789 = vperm.xlu0 %12637, %v14193_v26  }
 0x2c5   : >> { %v2009_v57 = vadd.f32 %v13990_v4, %v1938_v24  ;;  %v905_v22 = vpop.permute.xlu1 %904  ;;  %v2129_v16 = vpack.c.bf16 %v2072_v44, %v2071_v54  ;;  %v12664_v44 = vld [vmem:[#allocation10 + $0x38] sm:$0xff]  }
 0x2c6   : >> { %v1162_v15 = vmul.f32 %v13970_v49, %v905_v22 }
 0x2c7   : >> { %v2073_v23 = vmax.f32 %v2009_v57, 0.0  ;;  %12181 = vmatprep.mubr.msk.bf16.mxu0 %vm2194_vm0, %v2129_v16  ;;  %v1694_v3 = vpop.permute.xlu0 %1693 }
 0x2c8   : >> { %12605 = vset.pattern.permute.xlu1 %v13320_v1  ;;  %1797 = vperm.xlu0 %12637, %v14065_v50  }
 0x2c9   : >> { %1717 = vperm.xlu1 %12605, %v13911_v29   ;;  %v2130_v43 = vpack.c.bf16 %v2074_v60, %v2073_v23  ;;  %v12661_v29 = vld [vmem:[#allocation10 + $0x20] sm:$0xff]  }
 0x2ca   : >> { %v1277_v5 = vpop.permute.xlu1 %1276  ;;  %12241 = vmatprep.subr.bf16.mxu1 %v12661_v29 }
 0x2cb   : >> { %12182 = vmatmul.mubr.msk.bf16.gmra.mrb[12].mxu0 %vm2194_vm0, %v2130_v43  ;;  %12242 = vmatpush3.bf16.msra.mxu1 %v12661_v29  ;;  %v1487_v17 = vmul.f32 %v13965_v47, %v1277_v5 }
 0x2cc   : >> { %12243 = vmatprep.subr.bf16.mxu1 %v12662_v19 }
 0x2cd   : >> { %1721 = vperm.xlu1 %12605, %v13915_v30   ;;  %v1551_v24 = vadd.f32 %v1487_v17, %v1162_v15  ;;  %v14232_v17 = vpop.permute.xlu0 %1701 }
 0x2ce   : >> { %v1281_v9 = vpop.permute.xlu1 %1280 }
 0x2cf   : >> { %v1488_v30 = vmul.f32 %v13965_v47, %v1281_v9  ;;  %12244 = vmatpush3.bf16.msra.mxu1 %v12662_v19 }
 0x2d0   : >> { %12245 = vmatprep.subr.bf16.mxu1 %v12663_v52 }
 0x2d1   : >> { %12606 = vset.pattern.permute.xlu1 %v13322_v8  ;;  %v1552_v27 = vadd.f32 %v1488_v30, %v1163_v14  ;;  %v14236_v15 = vpop.permute.xlu0 %1713 }
 0x2d2   : >> { %984 = vperm.xlu1 %12606, %v14198_v10  }
 0x2d3   : >> { %v920_v38 = vpop.permute.xlu1 %919  ;;  %v1941_v11 = vadd.f32 %v1877_v18, %v1552_v27  ;;  %12246 = vmatpush3.bf16.msra.mxu1 %v12663_v52 }
 0x2d4   : >> { %12247 = vmatprep.subr.bf16.mxu1 %v12664_v44  ;;  %v1165_v63 = vmul.f32 %v13970_v49, %v920_v38 }
 0x2d5   : >> { %v2012_v16 = vadd.f32 %v13990_v4, %v1941_v11 }
 0x2d6   : >> { %12607 = vset.pattern.permute.xlu1 %v13321_v2 }
 0x2d7   : >> { %1340 = vperm.xlu1 %12607, %v14198_v10   ;;  %12248 = vmatpush3.bf16.msra.mxu1 %v12664_v44  ;;  %v2076_v43 = vmax.f32 %v2012_v16, 0.0 }
 0x2d8   : >> { %v1289_v39 = vpop.permute.xlu1 %1288  ;;  %12313 = vmatprep.subr.bf16.mxu1 %v13322_v8 }
 0x2d9   : >> { %v1490_v22 = vmul.f32 %v13965_v47, %v1289_v39 }
 0x2db   : >> { %1344 = vperm.xlu1 %12607, %v13961_v45   ;;  %v1553_v45 = vadd.f32 %v1489_v33, %v1164_v25  ;;  %v1554_v29 = vadd.f32 %v1490_v22, %v1165_v63  ;;  %v14267_v63 = vld [vmem:[%s13845_s23 + $0x1c8] sm:$0xff] }
 0x2dd   : >> { %v1666_v54 = vpop.permute.xlu1 %1665 }
 0x2de   : >> { %v1876_v57 = vmul.f32 %v13968_v48, %v1666_v54  ;;  %v1166_v54 = vmul.f32 %v13970_v49, %v14025_v37  ;;  %v14254_v37 = vld [vmem:[%s13845_s23 + $0x1b8] sm:$0xff] }
 0x2df   : >> { %12608 = vset.pattern.permute.xlu1 %v13322_v8 }
 0x2e0   : >> { %v1940_v32 = vadd.f32 %v1876_v57, %v1551_v24  ;;  %999 = vperm.xlu1 %12608, %v792_v28   ;;  %v14246_v24 = vld [vmem:[%s13845_s23 + $0x1a0] sm:$0xff]  ;;  %v1880_v57 = vmul.f32 %v13968_v48, %v1682_v21  ;;  %v1883_v21 = vmul.f32 %v13968_v48, %v1694_v3 }
 0x2e1   : >> { %v1674_v56 = vpop.permute.xlu1 %1673  ;;  %1809 = vperm.xlu0 %12637, %v14246_v24  }
 0x2e2   : >> { %v2011_v60 = vadd.f32 %v13990_v4, %v1940_v32  ;;  %v1878_v23 = vmul.f32 %v13968_v48, %v1674_v56  ;;  %v1492_v32 = vmul.f32 %v13965_v47, %v14107_v20  ;;  %v1493_v20 = vmul.f32 %v13965_v47, %v14117_v42 }
 0x2e4   : >> { %v2075_v5 = vmax.f32 %v2011_v60, 0.0  ;;  %v1942_v6 = vadd.f32 %v1878_v23, %v1553_v45  ;;  %12610 = vset.pattern.permute.xlu1 %v13321_v2 }
 0x2e5   : >> { %1352 = vperm.xlu1 %12610, %v792_v28   ;;  %v1678_v9 = vpop.permute.xlu1 %1677  ;;  %1821 = vperm.xlu0 %12637, %v14254_v37  }
 0x2e6   : >> { %v1879_v14 = vmul.f32 %v13968_v48, %v1678_v9  ;;  %v2131_v30 = vpack.c.bf16 %v2076_v43, %v2075_v5  ;;  %v2013_v19 = vadd.f32 %v13990_v4, %v1942_v6 }
 0x2e8   : >> { %v1943_v27 = vadd.f32 %v1879_v14, %v1554_v29  ;;  %12185 = vmatprep.mubr.msk.bf16.mxu0 %vm2194_vm0, %v2131_v30  ;;  %v2077_v39 = vmax.f32 %v2013_v19, 0.0 }
 0x2e9   : >> { %12611 = vset.pattern.permute.xlu1 %v13320_v1  ;;  %1829 = vperm.xlu0 %12637, %v14267_v63  }
 0x2ea   : >> { %v2014_v38 = vadd.f32 %v13990_v4, %v1943_v27  ;;  %1729 = vperm.xlu1 %12611, %v14198_v10   ;;  %v930_v18 = vpop.permute.xlu1 %929 }
 0x2eb   : >> { %v1167_v56 = vmul.f32 %v13970_v49, %v930_v18 }
 0x2ec   : >> { %v2078_v52 = vmax.f32 %v2014_v38, 0.0 }
 0x2ed   : >> { %v1556_v5 = vadd.f32 %v1492_v32, %v1167_v56  ;;  %12645 = vset.pattern.permute.xlu0 %v13322_v8  ;;  %v797_v32 = vld [vmem:[%s13845_s23 + $0x140] sm:$0xff] }
 0x2ee   : >> { %1737 = vperm.xlu1 %12611, %v13920_v31   ;;  %v2132_v25 = vpack.c.bf16 %v2078_v52, %v2077_v39  ;;  %v14243_v31 = vpop.permute.xlu0 %1725  ;;  %1084 = vperm.xlu0 %12645, %v14246_v24  }
 0x2ef   : >> { %v1293_v33 = vpop.permute.xlu1 %1292 }
 0x2f0   : >> { %12186 = vmatmul.mubr.msk.bf16.gmra.mrb[16].mxu0 %vm2194_vm0, %v2132_v25  ;;  %v1491_v44 = vmul.f32 %v13965_v47, %v1293_v33 }
 0x2f2   : >> { %1741 = vperm.xlu1 %12611, %v792_v28   ;;  %v1555_v28 = vadd.f32 %v1491_v44, %v1166_v54  ;;  %v14260_v60 = vpop.permute.xlu0 %1733  ;;  %1109 = vperm.xlu0 %12645, %v14267_v63  }
 0x2f4   : >> { %v935_v11 = vpop.permute.xlu1 %934 }
 0x2f5   : >> { %v1168_v6 = vmul.f32 %v13970_v49, %v935_v11 }
 0x2f6   : >> { %12612 = vset.pattern.permute.xlu1 %v13322_v8  ;;  %v14276_v3 = vpop.permute.xlu0 %1745 }
 0x2f7   : >> { %1009 = vperm.xlu1 %12612, %v14086_v13   ;;  %v1557_v27 = vadd.f32 %v1493_v20, %v1168_v6 }
 0x2f8   : >> { %v940_v10 = vpop.permute.xlu1 %939 }
 0x2f9   : >> { %v1169_v22 = vmul.f32 %v13970_v49, %v940_v10 }
 0x2fa   : >> { %v14286_v10 = vpop.permute.xlu0 %1757 }
 0x2fb   : >> { %12613 = vset.pattern.permute.xlu1 %v13321_v2 }
 0x2fc   : >> { %1356 = vperm.xlu1 %12613, %v13974_v51   ;;  %v1944_v51 = vadd.f32 %v1880_v57, %v1555_v28 }
 0x2fd   : >> { %v1305_v45 = vpop.permute.xlu1 %1304 }
 0x2fe   : >> { %v1494_v16 = vmul.f32 %v13965_v47, %v1305_v45  ;;  %v2015_v29 = vadd.f32 %v13990_v4, %v1944_v51 }
 0x300   : >> { %12614 = vset.pattern.permute.xlu1 %v13322_v8  ;;  %v1558_v23 = vadd.f32 %v1494_v16, %v1169_v22  ;;  %v2079_v18 = vmax.f32 %v2015_v29, 0.0 }
 0x301   : >> { %1014 = vperm.xlu1 %12614, %v14098_v41  }
 0x302   : >> { %v1686_v43 = vpop.permute.xlu1 %1685  ;;  %v1947_v14 = vadd.f32 %v1883_v21, %v1558_v23  ;;  %v1885_v21 = vmul.f32 %v13968_v48, %v14232_v17 }
 0x303   : >> { %v1881_v9 = vmul.f32 %v13968_v48, %v1686_v43 }
 0x304   : >> { %v2018_v39 = vadd.f32 %v13990_v4, %v1947_v14 }
 0x305   : >> { %v1945_v30 = vadd.f32 %v1881_v9, %v1556_v5  ;;  %1019 = vperm.xlu1 %12614, %v13983_v59   ;;  %v1497_v5 = vmul.f32 %v13965_v47, %v14124_v61 }
 0x306   : >> { %v1690_v19 = vpop.permute.xlu1 %1689  ;;  %v2082_v44 = vmax.f32 %v2018_v39, 0.0 }
 0x307   : >> { %v2016_v38 = vadd.f32 %v13990_v4, %v1945_v30  ;;  %v1882_v42 = vmul.f32 %v13968_v48, %v1690_v19  ;;  %v800_v30 = vld [vmem:[%s13845_s23 + $0x158] sm:$0xff] }
 0x309   : >> { %v2080_v52 = vmax.f32 %v2016_v38, 0.0  ;;  %v1946_v25 = vadd.f32 %v1882_v42, %v1557_v27  ;;  %12615 = vset.pattern.permute.xlu1 %v13321_v2 }
 0x30a   : >> { %1368 = vperm.xlu1 %12615, %v13983_v59   ;;  %v14292_v59 = vpop.permute.xlu0 %1765 }
 0x30b   : >> { %v2017_v33 = vadd.f32 %v13990_v4, %v1946_v25  ;;  %v945_v11 = vpop.permute.xlu1 %944  ;;  %v2133_v54 = vpack.c.bf16 %v2080_v52, %v2079_v18 }
 0x30c   : >> { %v1170_v6 = vmul.f32 %v13970_v49, %v945_v11 }
 0x30d   : >> { %v2081_v28 = vmax.f32 %v2017_v33, 0.0  ;;  %12189 = vmatprep.mubr.msk.bf16.mxu0 %vm2194_vm0, %v2133_v54 }
 0x30e   : >> { %12616 = vset.pattern.permute.xlu1 %v13320_v1  ;;  %v950_v56 = vpop.permute.xlu0 %949 }
 0x30f   : >> { %1749 = vperm.xlu1 %12616, %v14086_v13   ;;  %v2134_v57 = vpack.c.bf16 %v2082_v44, %v2081_v28  ;;  %v1171_v51 = vmul.f32 %v13970_v49, %v950_v56 }
 0x310   : >> { %v1309_v45 = vpop.permute.xlu1 %1308 }
 0x311   : >> { %12190 = vmatmul.mubr.msk.bf16.gmra.mrb[20].mxu0 %vm2194_vm0, %v2134_v57  ;;  %v1495_v20 = vmul.f32 %v13965_v47, %v1309_v45 }
 0x312   : >> { %v955_v43 = vpop.permute.xlu0 %954 }
 0x313   : >> { %1753 = vperm.xlu1 %12616, %v14098_v41   ;;  %v1172_v29 = vmul.f32 %v13970_v49, %v955_v43  ;;  %v1559_v19 = vadd.f32 %v1495_v20, %v1170_v6  ;;  %v14330_v43 = vld [vmem:[%s13845_s23 + $0x1e0] sm:$0xff] }
 0x314   : >> { %v1313_v16 = vpop.permute.xlu1 %1312 }
 0x315   : >> { %v1496_v13 = vmul.f32 %v13965_v47, %v1313_v16  ;;  %v1561_v42 = vadd.f32 %v1497_v5, %v1172_v29 }
 0x317   : >> { %12617 = vset.pattern.permute.xlu1 %v13322_v8  ;;  %v1560_v23 = vadd.f32 %v1496_v13, %v1171_v51 }
 0x318   : >> { %1024 = vperm.xlu1 %12617, %v797_v32  }
 0x319   : >> { %v960_v22 = vpop.permute.xlu1 %959  ;;  %v1949_v9 = vadd.f32 %v1885_v21, %v1560_v23  ;;  %v14325_v23 = vld [vmem:[%s13845_s23 + $0x1d0] sm:$0xff] }
 0x31a   : >> { %v1173_v25 = vmul.f32 %v13970_v49, %v960_v22  ;;  %1114 = vperm.xlu0 %12645, %v14325_v23  }
 0x31b   : >> { %v2020_v27 = vadd.f32 %v13990_v4, %v1949_v9  ;;  %v1888_v9 = vmul.f32 %v13968_v48, %v14236_v15 }
 0x31c   : >> { %12618 = vset.pattern.permute.xlu1 %v13321_v2 }
 0x31d   : >> { %1372 = vperm.xlu1 %12618, %v797_v32   ;;  %v2084_v52 = vmax.f32 %v2020_v27, 0.0 }
 0x31e   : >> { %v1321_v41 = vpop.permute.xlu1 %1320  ;;  %1124 = vperm.xlu0 %12645, %v14330_v43  }
 0x31f   : >> { %v1498_v61 = vmul.f32 %v13965_v47, %v1321_v41 }
 0x321   : >> { %1376 = vperm.xlu1 %12618, %v13994_v7   ;;  %v1562_v44 = vadd.f32 %v1498_v61, %v1173_v25  ;;  %v14360_v61 = vld [vmem:[#allocation2] ss:$0 sm:$0xff] }
 0x322   : >> { %12646 = vset.pattern.permute.xlu0 %v13321_v2 }
 0x323   : >> { %v1698_v14 = vpop.permute.xlu1 %1697  ;;  %1444 = vperm.xlu0 %12646, %v14325_v23  }
 0x324   : >> { %v1884_v17 = vmul.f32 %v13968_v48, %v1698_v14 }
 0x325   : >> { %12619 = vset.pattern.permute.xlu1 %v13322_v8 }
 0x326   : >> { %v1948_v38 = vadd.f32 %v1884_v17, %v1559_v19  ;;  %1039 = vperm.xlu1 %12619, %v800_v30   ;;  %v1500_v19 = vmul.f32 %v13965_v47, %v14130_v35 }
 0x327   : >> { %v1706_v7 = vpop.permute.xlu1 %1705 }
 0x328   : >> { %v2019_v18 = vadd.f32 %v13990_v4, %v1948_v38  ;;  %v1886_v39 = vmul.f32 %v13968_v48, %v1706_v7  ;;  %v14350_v38 = vld [vmem:[%s13845_s23 + $0x1e8] sm:$0xff] }
 0x329   : >> { %1456 = vperm.xlu0 %12646, %v14350_v38  }
 0x32a   : >> { %v2083_v33 = vmax.f32 %v2019_v18, 0.0  ;;  %v1950_v11 = vadd.f32 %v1886_v39, %v1561_v42  ;;  %12620 = vset.pattern.permute.xlu1 %v13321_v2  ;;  %v14363_v39 = vld [vmem:[#allocation2 + $0x2] ss:$0 sm:$0xff] }
 0x32b   : >> { %1384 = vperm.xlu1 %12620, %v800_v30   ;;  %v1710_v54 = vpop.permute.xlu1 %1709 }
 0x32c   : >> { %v1887_v28 = vmul.f32 %v13968_v48, %v1710_v54  ;;  %v2135_v57 = vpack.c.bf16 %v2084_v52, %v2083_v33  ;;  %v2021_v45 = vadd.f32 %v13990_v4, %v1950_v11 }
 0x32e   : >> { %v1951_v16 = vadd.f32 %v1887_v28, %v1562_v44  ;;  %12193 = vmatprep.mubr.msk.bf16.mxu0 %vm2194_vm0, %v2135_v57  ;;  %v2085_v51 = vmax.f32 %v2021_v45, 0.0 }
 0x32f   : >> { %12621 = vset.pattern.permute.xlu1 %v13320_v1 }
 0x330   : >> { %v2022_v56 = vadd.f32 %v13990_v4, %v1951_v16  ;;  %1761 = vperm.xlu1 %12621, %v797_v32   ;;  %v970_v22 = vpop.permute.xlu1 %969  ;;  %v965_v32 = vpop.permute.xlu0 %964 }
 0x331   : >> { %v1174_v5 = vmul.f32 %v13970_v49, %v965_v32  ;;  %v1175_v17 = vmul.f32 %v13970_v49, %v970_v22  ;;  %v14388_v32 = vld [vmem:[%s13845_s23 + $0x1f8] sm:$0xff] }
 0x332   : >> { %v2086_v13 = vmax.f32 %v2022_v56, 0.0  ;;  %v14379_v56 = vld [vmem:[#allocation5] ss:$0 sm:$0xff] }
 0x333   : >> { %v1564_v35 = vadd.f32 %v1500_v19, %v1175_v17  ;;  %v14397_v17 = vld [vmem:[%s13845_s23 + $0x180] sm:$0xff] }
 0x334   : >> { %1769 = vperm.xlu1 %12621, %v14040_v58   ;;  %v2136_v21 = vpack.c.bf16 %v2086_v13, %v2085_v51 }
 0x335   : >> { %v1325_v41 = vpop.permute.xlu1 %1324 }
 0x336   : >> { %12194 = vmatmul.mubr.msk.bf16.gmra.mrb[24].mxu0 %vm2194_vm0, %v2136_v21  ;;  %v1499_v6 = vmul.f32 %v13965_v47, %v1325_v41 }
 0x338   : >> { %1773 = vperm.xlu1 %12621, %v800_v30   ;;  %v1563_v29 = vadd.f32 %v1499_v6, %v1174_v5 }
 0x33a   : >> { %v975_v20 = vpop.permute.xlu1 %974  ;;  %v1952_v15 = vadd.f32 %v1888_v9, %v1563_v29 }
 0x33b   : >> { %v1176_v18 = vmul.f32 %v14360_v61, %v975_v20 }
 0x33c   : >> { %12623 = vset.pattern.permute.xlu1 %v13322_v8  ;;  %v2023_v52 = vadd.f32 %v13990_v4, %v1952_v15 }
 0x33d   : >> { %1049 = vperm.xlu1 %12623, %v14142_v55  }
 0x33e   : >> { %v980_v58 = vpop.permute.xlu1 %979  ;;  %v2087_v28 = vmax.f32 %v2023_v52, 0.0 }
 0x33f   : >> { %v1177_v27 = vmul.f32 %v13970_v49, %v980_v58  ;;  %v990_v58 = vpop.permute.xlu0 %989 }
 0x341   : >> { %12624 = vset.pattern.permute.xlu1 %v13321_v2 }
 0x342   : >> { %1388 = vperm.xlu1 %12624, %v14053_v12   ;;  %v1891_v12 = vmul.f32 %v13968_v48, %v14243_v31  ;;  %v14367_v31 = vld [vmem:[%s13845_s23 + $0x1f0] sm:$0xff] }
 0x343   : >> { %v1337_v14 = vpop.permute.xlu1 %1336  ;;  %1460 = vperm.xlu0 %12646, %v14367_v31  }
 0x344   : >> { %v1502_v30 = vmul.f32 %v13965_v47, %v1337_v14  ;;  %v14356_v47 = vld [vmem:[#allocation2 + $0x1] ss:$0 sm:$0xff] }
 0x345   : >> { %v1501_v49 = vmul.f32 %v14356_v47, %v14135_v53 }
 0x346   : >> { %12625 = vset.pattern.permute.xlu1 %v13322_v8  ;;  %v1566_v42 = vadd.f32 %v1502_v30, %v1177_v27 }
 0x347   : >> { %1054 = vperm.xlu1 %12625, %v14148_v36   ;;  %v1565_v11 = vadd.f32 %v1501_v49, %v1176_v18  ;;  %12651 = vset.pattern.permute.xlu0 %v13320_v1  ;;  %v1179_v18 = vmul.f32 %v14360_v61, %v990_v58 }
 0x348   : >> { %v1718_v7 = vpop.permute.xlu1 %1717  ;;  %v1955_v25 = vadd.f32 %v1891_v12, %v1566_v42  ;;  %1841 = vperm.xlu0 %12651, %v14330_v43  }
 0x349   : >> { %v1889_v48 = vmul.f32 %v14363_v39, %v1718_v7  ;;  %v995_v7 = vpop.permute.xlu0 %994 }
 0x34a   : >> { %v2026_v57 = vadd.f32 %v13990_v4, %v1955_v25 }
 0x34b   : >> { %v1953_v33 = vadd.f32 %v1889_v48, %v1564_v35  ;;  %1059 = vperm.xlu1 %12625, %v14193_v26  }
 0x34c   : >> { %v1722_v53 = vpop.permute.xlu1 %1721  ;;  %v2090_v21 = vmax.f32 %v2026_v57, 0.0  ;;  %1853 = vperm.xlu0 %12651, %v14388_v32   ;;  %v1893_v57 = vmul.f32 %v14363_v39, %v14260_v60 }
 0x34d   : >> { %v2024_v54 = vadd.f32 %v13990_v4, %v1953_v33  ;;  %v1890_v44 = vmul.f32 %v14363_v39, %v1722_v53 }
 0x34f   : >> { %v2088_v45 = vmax.f32 %v2024_v54, 0.0  ;;  %v1954_v16 = vadd.f32 %v1890_v44, %v1565_v11  ;;  %12626 = vset.pattern.permute.xlu1 %v13321_v2 }
 0x350   : >> { %1400 = vperm.xlu1 %12626, %v14193_v26   ;;  %v14385_v26 = vld [vmem:[#allocation8] ss:$0 sm:$0xff] }
 0x351   : >> { %v2025_v22 = vadd.f32 %v14379_v56, %v1954_v16  ;;  %v985_v51 = vpop.permute.xlu1 %984  ;;  %v2137_v13 = vpack.c.bf16 %v2088_v45, %v2087_v28  ;;  %v14411_v16 = vpop.permute.xlu0 %1004 }
 0x353   : >> { %v2089_v41 = vmax.f32 %v2025_v22, 0.0  ;;  %12197 = vmatprep.mubr.msk.bf16.mxu0 %vm2194_vm0, %v2137_v13 }
 0x354   : >> { %12627 = vset.pattern.permute.xlu1 %v13320_v1 }
 0x355   : >> { %1781 = vperm.xlu1 %12627, %v14142_v55   ;;  %v2138_v4 = vpack.c.bf16 %v2090_v21, %v2089_v41 }
 0x356   : >> { %v1341_v20 = vpop.permute.xlu1 %1340 }
 0x357   : >> { %12198 = vmatmul.mubr.msk.bf16.gmra.mrb[28].mxu0 %vm2194_vm0, %v2138_v4  ;;  %v1503_v4 = vmul.f32 %v14356_v47, %v1341_v20 }
 0x358   : >> { %v12171_v5 = vpop.f32.mrb[0].mxu0 }
 0x359   : >> { %v2334_v6 = vadd.f32 %v12171_v5, %v14385_v26  ;;  %v2325_v9 = vpop.f32.mrb[1].mxu0  ;;  %1785 = vperm.xlu1 %12627, %v14148_v36  }
 0x35a   : >> { %v2326_v55 = vadd.f32 %v14385_v26, %v2325_v9  ;;  %v12172_v29 = vpop.f32.mrb[2].mxu0  ;;  %v1345_v14 = vpop.permute.xlu1 %1344  ;;  %v1178_v9 = vmul.f32 %v14360_v61, %v985_v51 }
 0x35b   : >> { %v2337_v30 = vadd.f32 %v12172_v29, %v14385_v26  ;;  %v2328_v19 = vpop.f32.mrb[3].mxu0  ;;  %v2582_v12 = vmax.f32 %v2334_v6, 0.0  ;;  %v1504_v48 = vmul.f32 %v14356_v47, %v1345_v14  ;;  %v808_v14 = vld [vmem:[%s13845_s23 + $0x198] sm:$0xff] }
 0x35c   : >> { %v2329_v27 = vadd.f32 %v14385_v26, %v2328_v19  ;;  %v2580_v42 = vmax.f32 %v2326_v55, 0.0  ;;  %v1567_v19 = vadd.f32 %v1503_v4, %v1178_v9 }
 0x35d   : >> { %v2583_v15 = vmax.f32 %v2337_v30, 0.0  ;;  %12628 = vset.pattern.permute.xlu1 %v13322_v8  ;;  %v1568_v45 = vadd.f32 %v1504_v48, %v1179_v18  ;;  %v1505_v30 = vmul.f32 %v14356_v47, %v14139_v46 }
 0x35e   : >> { %v2581_v49 = vmax.f32 %v2329_v27, 0.0  ;;  %1064 = vperm.xlu1 %12628, %v14397_v17   ;;  %v1180_v27 = vmul.f32 %v14360_v61, %v995_v7 }
 0x35f   : >> { %v2645_v36 = vpack.c.bf16 %v2583_v15, %v2582_v12  ;;  %v1000_v35 = vpop.permute.xlu1 %999  ;;  %v1957_v55 = vadd.f32 %v1893_v57, %v1568_v45  ;;  %v14421_v12 = vpop.permute.xlu0 %1029 }
 0x360   : >> { %v12175_v52 = vpop.f32.mrb[4].mxu0  ;;  %v2644_v25 = vpack.c.bf16 %v2581_v49, %v2580_v42  ;;  %v1569_v42 = vadd.f32 %v1505_v30, %v1180_v27  ;;  %v1181_v18 = vmul.f32 %v14360_v61, %v1000_v35 }
 0x361   : >> { %v2350_v33 = vadd.f32 %v12175_v52, %v14385_v26  ;;  %v2341_v53 = vpop.f32.mrb[5].mxu0 }
 0x362   : >> { %v2342_v11 = vadd.f32 %v14385_v26, %v2341_v53  ;;  %v12176_v54 = vpop.f32.mrb[6].mxu0  ;;  %12249 = vmatprep.mubr.bf16.mxu1 %v2644_v25  ;;  %12629 = vset.pattern.permute.xlu1 %v13321_v2 }
 0x363   : >> { %v2353_v44 = vadd.f32 %v12176_v54, %v14385_v26  ;;  %v2344_v28 = vpop.f32.mrb[7].mxu0  ;;  %12250 = vmatmul.mubr.bf16.vlgmr.msra.gmra.mrb[0].mxu1 %v2645_v36  ;;  %1404 = vperm.xlu1 %12629, %v14397_v17   ;;  %v2586_v21 = vmax.f32 %v2350_v33, 0.0  ;;  %v14430_v48 = vpop.permute.xlu0 %1034 }
 0x364   : >> { %v2345_v22 = vadd.f32 %v14385_v26, %v2344_v28  ;;  %v1353_v13 = vpop.permute.xlu1 %1352  ;;  %v2584_v58 = vmax.f32 %v2342_v11, 0.0 }
 0x365   : >> { %v2587_v41 = vmax.f32 %v2353_v44, 0.0  ;;  %v1506_v49 = vmul.f32 %v14356_v47, %v1353_v13 }
 0x366   : >> { %v2585_v5 = vmax.f32 %v2345_v22, 0.0 }
 0x367   : >> { %v2647_v6 = vpack.c.bf16 %v2587_v41, %v2586_v21  ;;  %1408 = vperm.xlu1 %12629, %v14065_v50   ;;  %v2028_v50 = vadd.f32 %v14379_v56, %v1957_v55  ;;  %v1570_v53 = vadd.f32 %v1506_v49, %v1181_v18  ;;  %v14437_v35 = vpop.permute.xlu0 %1044 }
 0x368   : >> { %v2646_v60 = vpack.c.bf16 %v2585_v5, %v2584_v58 }
 0x369   : >> { %v1730_v29 = vpop.permute.xlu1 %1729  ;;  %v2092_v36 = vmax.f32 %v2028_v50, 0.0 }
 0x36a   : >> { %v1892_v20 = vmul.f32 %v14363_v39, %v1730_v29  ;;  %12253 = vmatprep.mubr.bf16.mxu1 %v2646_v60 }
 0x36b   : >> { %12254 = vmatmul.mubr.bf16.gmra.mrb[4].mxu1 %v2647_v6  ;;  %12631 = vset.pattern.permute.xlu1 %v13322_v8  ;;  %v14442_v4 = vpop.permute.xlu0 %1069 }
 0x36c   : >> { %v1956_v51 = vadd.f32 %v1892_v20, %v1567_v19  ;;  %1079 = vperm.xlu1 %12631, %v808_v14  }
 0x36d   : >> { %v1738_v15 = vpop.permute.xlu1 %1737 }
 0x36e   : >> { %v2027_v46 = vadd.f32 %v14379_v56, %v1956_v51  ;;  %v1894_v7 = vmul.f32 %v14363_v39, %v1738_v15  ;;  %v1182_v15 = vmul.f32 %v14360_v61, %v14411_v16 }
 0x36f   : >> { %v14449_v30 = vpop.permute.xlu0 %1074 }
 0x370   : >> { %v2091_v52 = vmax.f32 %v2027_v46, 0.0  ;;  %v1958_v25 = vadd.f32 %v1894_v7, %v1569_v42  ;;  %12632 = vset.pattern.permute.xlu1 %v13321_v2  ;;  %v1896_v7 = vmul.f32 %v14363_v39, %v14276_v3 }
 0x371   : >> { %1416 = vperm.xlu1 %12632, %v808_v14   ;;  %v1742_v33 = vpop.permute.xlu1 %1741 }
 0x372   : >> { %v1895_v11 = vmul.f32 %v14363_v39, %v1742_v33  ;;  %v2139_v54 = vpack.c.bf16 %v2092_v36, %v2091_v52  ;;  %v2029_v44 = vadd.f32 %v14379_v56, %v1958_v25 }
 0x373   : >> { %v1361_v46 = vpop.permute.xlu0 %1360 }
 0x374   : >> { %v1959_v28 = vadd.f32 %v1895_v11, %v1570_v53  ;;  %12201 = vmatprep.mubr.msk.bf16.mxu0 %vm2194_vm0, %v2139_v54  ;;  %v2093_v22 = vmax.f32 %v2029_v44, 0.0  ;;  %v1508_v25 = vmul.f32 %v14356_v47, %v1361_v46  ;;  %v1899_v11 = vmul.f32 %v14363_v39, %v14286_v10 }
 0x375   : >> { %12633 = vset.pattern.permute.xlu1 %v13320_v1 }
 0x376   : >> { %v2030_v57 = vadd.f32 %v14379_v56, %v1959_v28  ;;  %1793 = vperm.xlu1 %12633, %v14397_v17   ;;  %v1010_v45 = vpop.permute.xlu1 %1009 }
 0x377   : >> { %v1183_v16 = vmul.f32 %v14360_v61, %v1010_v45  ;;  %v1365_v53 = vpop.permute.xlu0 %1364 }
 0x378   : >> { %v2094_v13 = vmax.f32 %v2030_v57, 0.0  ;;  %v1509_v28 = vmul.f32 %v14356_v47, %v1365_v53 }
 0x379   : >> { %v1572_v44 = vadd.f32 %v1508_v25, %v1183_v16 }
 0x37a   : >> { %1801 = vperm.xlu1 %12633, %v14076_v62   ;;  %v2140_v21 = vpack.c.bf16 %v2094_v13, %v2093_v22 }
 0x37b   : >> { %v1357_v41 = vpop.permute.xlu1 %1356 }
 0x37c   : >> { %12202 = vmatmul.mubr.msk.bf16.gmra.mrb[32].mxu0 %vm2194_vm0, %v2140_v21  ;;  %v1507_v42 = vmul.f32 %v14356_v47, %v1357_v41 }
 0x37d   : >> { %v12179_v58 = vpop.f32.mrb[8].mxu0 }
 0x37e   : >> { %v2366_v5 = vadd.f32 %v12179_v58, %v14385_v26  ;;  %v2357_v6 = vpop.f32.mrb[9].mxu0  ;;  %1805 = vperm.xlu1 %12633, %v808_v14   ;;  %v1571_v36 = vadd.f32 %v1507_v42, %v1182_v15 }
 0x37f   : >> { %v2358_v9 = vadd.f32 %v14385_v26, %v2357_v6  ;;  %v12180_v55 = vpop.f32.mrb[10].mxu0 }
 0x380   : >> { %v2369_v17 = vadd.f32 %v12180_v55, %v14385_v26  ;;  %v2360_v60 = vpop.f32.mrb[11].mxu0  ;;  %v1015_v29 = vpop.permute.xlu1 %1014  ;;  %v2590_v19 = vmax.f32 %v2366_v5, 0.0 }
 0x381   : >> { %v2361_v62 = vadd.f32 %v14385_v26, %v2360_v60  ;;  %v2588_v20 = vmax.f32 %v2358_v9, 0.0  ;;  %v1184_v57 = vmul.f32 %v14360_v61, %v1015_v29 }
 0x382   : >> { %v2591_v27 = vmax.f32 %v2369_v17, 0.0  ;;  %12634 = vset.pattern.permute.xlu1 %v13322_v8 }
 0x383   : >> { %v2589_v50 = vmax.f32 %v2361_v62, 0.0  ;;  %1089 = vperm.xlu1 %12634, %v14165_v40   ;;  %v1573_v10 = vadd.f32 %v1509_v28, %v1184_v57  ;;  %v1901_v28 = vmul.f32 %v14363_v39, %v14292_v59 }
 0x384   : >> { %v2649_v14 = vpack.c.bf16 %v2591_v27, %v2590_v19  ;;  %v1020_v51 = vpop.permute.xlu1 %1019 }
 0x385   : >> { %v2648_v49 = vpack.c.bf16 %v2589_v50, %v2588_v20  ;;  %v1185_v33 = vmul.f32 %v14360_v61, %v1020_v51 }
 0x387   : >> { %12257 = vmatprep.mubr.bf16.mxu1 %v2648_v49  ;;  %12635 = vset.pattern.permute.xlu1 %v13321_v2 }
 0x388   : >> { %12258 = vmatmul.mubr.bf16.gmra.mrb[8].mxu1 %v2649_v14  ;;  %1420 = vperm.xlu1 %12635, %v14246_v24   ;;  %v1960_v24 = vadd.f32 %v1896_v7, %v1571_v36  ;;  %v813_v36 = vld [vmem:[%s13845_s23 + $0x1c0] sm:$0xff] }
 0x389   : >> { %v1369_v18 = vpop.permute.xlu1 %1368 }
 0x38a   : >> { %v1510_v52 = vmul.f32 %v14356_v47, %v1369_v18  ;;  %v2031_v22 = vadd.f32 %v14379_v56, %v1960_v24 }
 0x38c   : >> { %12636 = vset.pattern.permute.xlu1 %v13322_v8  ;;  %v1574_v54 = vadd.f32 %v1510_v52, %v1185_v33  ;;  %v2095_v6 = vmax.f32 %v2031_v22, 0.0 }
 0x38d   : >> { %1094 = vperm.xlu1 %12636, %v14175_v34  }
 0x38e   : >> { %v1750_v3 = vpop.permute.xlu1 %1749  ;;  %v1963_v13 = vadd.f32 %v1899_v11, %v1574_v54  ;;  %v1381_v54 = vpop.permute.xlu0 %1380 }
 0x38f   : >> { %v1897_v45 = vmul.f32 %v14363_v39, %v1750_v3 }
 0x390   : >> { %v2034_v9 = vadd.f32 %v14379_v56, %v1963_v13 }
 0x391   : >> { %v1961_v21 = vadd.f32 %v1897_v45, %v1572_v44  ;;  %1099 = vperm.xlu1 %12636, %v14254_v37   ;;  %v1188_v45 = vmul.f32 %v14360_v61, %v14430_v48 }
 0x392   : >> { %v1754_v41 = vpop.permute.xlu1 %1753  ;;  %v2098_v19 = vmax.f32 %v2034_v9, 0.0 }
 0x393   : >> { %v2032_v58 = vadd.f32 %v14379_v56, %v1961_v21  ;;  %v1898_v5 = vmul.f32 %v14363_v39, %v1754_v41  ;;  %v1513_v21 = vmul.f32 %v14356_v47, %v1381_v54 }
 0x395   : >> { %v2096_v55 = vmax.f32 %v2032_v58, 0.0  ;;  %v1962_v17 = vadd.f32 %v1898_v5, %v1573_v10  ;;  %12638 = vset.pattern.permute.xlu1 %v13321_v2  ;;  %v816_v10 = vld [vmem:[%s13845_s23 + $0x1d8] sm:$0xff] }
 0x396   : >> { %1432 = vperm.xlu1 %12638, %v14254_v37  }
 0x397   : >> { %v2141_v60 = vpack.c.bf16 %v2096_v55, %v2095_v6  ;;  %v2033_v29 = vadd.f32 %v14379_v56, %v1962_v17  ;;  %v1025_v62 = vpop.permute.xlu1 %1024 }
 0x398   : >> { %v1186_v22 = vmul.f32 %v14360_v61, %v1025_v62 }
 0x399   : >> { %v2097_v27 = vmax.f32 %v2033_v29, 0.0  ;;  %12205 = vmatprep.mubr.msk.bf16.mxu0 %vm2194_vm0, %v2141_v60 }
 0x39a   : >> { %12639 = vset.pattern.permute.xlu1 %v13320_v1 }
 0x39b   : >> { %v2142_v20 = vpack.c.bf16 %v2098_v19, %v2097_v27  ;;  %1813 = vperm.xlu1 %12639, %v14165_v40  }
 0x39c   : >> { %v1373_v50 = vpop.permute.xlu1 %1372 }
 0x39d   : >> { %12206 = vmatmul.mubr.msk.bf16.gmra.mrb[36].mxu0 %vm2194_vm0, %v2142_v20  ;;  %v1511_v57 = vmul.f32 %v14356_v47, %v1373_v50 }
 0x39e   : >> { %v12183_v14 = vpop.f32.mrb[12].mxu0 }
 0x39f   : >> { %v2382_v37 = vadd.f32 %v12183_v14, %v14385_v26  ;;  %v2373_v51 = vpop.f32.mrb[13].mxu0  ;;  %1817 = vperm.xlu1 %12639, %v14175_v34   ;;  %v1187_v34 = vmul.f32 %v14360_v61, %v14421_v12  ;;  %v14498_v12 = vpop.permute.xlu0 %1392  ;;  %v1575_v58 = vadd.f32 %v1511_v57, %v1186_v22 }
 0x3a0   : >> { %v2374_v15 = vadd.f32 %v14385_v26, %v2373_v51  ;;  %v12184_v42 = vpop.f32.mrb[14].mxu0  ;;  %v1377_v49 = vpop.permute.xlu1 %1376 }
 0x3a1   : >> { %v2385_v46 = vadd.f32 %v12184_v42, %v14385_v26  ;;  %v2376_v7 = vpop.f32.mrb[15].mxu0  ;;  %v2594_v40 = vmax.f32 %v2382_v37, 0.0  ;;  %v1512_v11 = vmul.f32 %v14356_v47, %v1377_v49 }
 0x3a2   : >> { %v2377_v18 = vadd.f32 %v14385_v26, %v2376_v7  ;;  %v2592_v25 = vmax.f32 %v2374_v15, 0.0 }
 0x3a3   : >> { %v2595_v52 = vmax.f32 %v2385_v46, 0.0  ;;  %12640 = vset.pattern.permute.xlu1 %v13322_v8  ;;  %v1576_v3 = vadd.f32 %v1512_v11, %v1187_v34  ;;  %v14508_v9 = vpop.permute.xlu0 %1396 }
 0x3a4   : >> { %v2593_v16 = vmax.f32 %v2377_v18, 0.0  ;;  %1104 = vperm.xlu1 %12640, %v813_v36  }
 0x3a5   : >> { %v2651_v33 = vpack.c.bf16 %v2595_v52, %v2594_v40  ;;  %v1040_v53 = vpop.permute.xlu1 %1039  ;;  %v1965_v13 = vadd.f32 %v1901_v28, %v1576_v3 }
 0x3a6   : >> { %v2650_v24 = vpack.c.bf16 %v2593_v16, %v2592_v25  ;;  %v1189_v62 = vmul.f32 %v14360_v61, %v1040_v53 }
 0x3a7   : >> { %v2036_v59 = vadd.f32 %v14379_v56, %v1965_v13  ;;  %v14516_v51 = vpop.permute.xlu0 %1412 }
 0x3a8   : >> { %12261 = vmatprep.mubr.bf16.mxu1 %v2650_v24  ;;  %12641 = vset.pattern.permute.xlu1 %v13321_v2 }
 0x3a9   : >> { %12262 = vmatmul.mubr.bf16.gmra.mrb[12].mxu1 %v2651_v33  ;;  %1436 = vperm.xlu1 %12641, %v813_v36   ;;  %v2100_v29 = vmax.f32 %v2036_v59, 0.0 }
 0x3aa   : >> { %v1385_v44 = vpop.permute.xlu1 %1384 }
 0x3ab   : >> { %v1514_v55 = vmul.f32 %v14356_v47, %v1385_v44  ;;  %v14522_v40 = vpop.permute.xlu0 %1424 }
 0x3ad   : >> { %1440 = vperm.xlu1 %12641, %v14267_v63   ;;  %v1577_v63 = vadd.f32 %v1513_v21, %v1188_v45  ;;  %v1578_v50 = vadd.f32 %v1514_v55, %v1189_v62  ;;  %v1190_v21 = vmul.f32 %v14360_v61, %v14437_v35  ;;  %v1516_v35 = vmul.f32 %v14356_v47, %v14498_v12 }
 0x3af   : >> { %v1762_v41 = vpop.permute.xlu1 %1761  ;;  %v14527_v34 = vpop.permute.xlu0 %1428 }
 0x3b0   : >> { %v1900_v5 = vmul.f32 %v14363_v39, %v1762_v41 }
 0x3b1   : >> { %12642 = vset.pattern.permute.xlu1 %v13322_v8 }
 0x3b2   : >> { %v1964_v6 = vadd.f32 %v1900_v5, %v1575_v58  ;;  %1119 = vperm.xlu1 %12642, %v816_v10  }
 0x3b3   : >> { %v1770_v48 = vpop.permute.xlu1 %1769  ;;  %v1778_v58 = vpop.permute.xlu0 %1777 }
 0x3b4   : >> { %v2035_v17 = vadd.f32 %v14379_v56, %v1964_v6  ;;  %v1902_v60 = vmul.f32 %v14363_v39, %v1770_v48  ;;  %v1904_v59 = vmul.f32 %v14363_v39, %v1778_v58  ;;  %v12677_v58 = vld [vmem:[#allocation13 + $0x40] ss:$8 sps:$4 sm:$0xff]  }
 0x3b6   : >> { %v2099_v19 = vmax.f32 %v2035_v17, 0.0  ;;  %v1966_v27 = vadd.f32 %v1902_v60, %v1577_v63  ;;  %12643 = vset.pattern.permute.xlu1 %v13321_v2 }
 0x3b7   : >> { %1448 = vperm.xlu1 %12643, %v816_v10   ;;  %v1774_v20 = vpop.permute.xlu1 %1773  ;;  %v1790_v48 = vpop.permute.xlu0 %1789 }
 0x3b8   : >> { %v2143_v14 = vpack.c.bf16 %v2100_v29, %v2099_v19  ;;  %v1903_v37 = vmul.f32 %v14363_v39, %v1774_v20  ;;  %v2037_v15 = vadd.f32 %v14379_v56, %v1966_v27  ;;  %v1517_v19 = vmul.f32 %v14356_v47, %v14508_v9 }
 0x3ba   : >> { %v1967_v42 = vadd.f32 %v1903_v37, %v1578_v50  ;;  %12209 = vmatprep.mubr.msk.bf16.mxu0 %vm2194_vm0, %v2143_v14  ;;  %v2101_v7 = vmax.f32 %v2037_v15, 0.0  ;;  %v12667_v50 = vld [vmem:[#allocation13 + $0x4] ss:$8 sps:$4 sm:$0xff]   ;;  %v12665_v14 = vld [vmem:[#allocation13] ss:$8 sps:$4 sm:$0xff]  }
 0x3bb   : >> { %12644 = vset.pattern.permute.xlu1 %v13320_v1  ;;  %3240 = vmatprep.subr.bf16.mxu0 %v12667_v50 }
 0x3bc   : >> { %v2038_v49 = vadd.f32 %v14379_v56, %v1967_v42  ;;  %1825 = vperm.xlu1 %12644, %v813_v36   ;;  %v1050_v46 = vpop.permute.xlu1 %1049  ;;  %3241 = vmatpush1.bf16.msra.mxu0 %v12665_v14 }
 0x3bd   : >> { %v1191_v55 = vmul.f32 %v14360_v61, %v1050_v46 }
 0x3be   : >> { %v2102_v18 = vmax.f32 %v2038_v49, 0.0 }
 0x3bf   : >> { %v1580_v27 = vadd.f32 %v1516_v35, %v1191_v55 }
 0x3c0   : >> { %v2144_v52 = vpack.c.bf16 %v2102_v18, %v2101_v7  ;;  %1833 = vperm.xlu1 %12644, %v14325_v23   ;;  %v12670_v18 = vld [vmem:[#allocation13 + $0x14] ss:$8 sps:$4 sm:$0xff]  }
 0x3c1   : >> { %v1389_v25 = vpop.permute.xlu1 %1388  ;;  %3242 = vmatprep.subr.bf16.mxu0 %v12670_v18 }
 0x3c2   : >> { %12210 = vmatmul.mubr.msk.bf16.gmra.mrb[40].mxu0 %vm2194_vm0, %v2144_v52  ;;  %v1515_v41 = vmul.f32 %v14356_v47, %v1389_v25  ;;  %v12668_v52 = vld [vmem:[#allocation13 + $0x10] ss:$8 sps:$4 sm:$0xff]  }
 0x3c3   : >> { %v12187_v16 = vpop.f32.mrb[16].mxu0  ;;  %3243 = vmatpush1.bf16.msra.mxu0 %v12668_v52 }
 0x3c4   : >> { %v2398_v33 = vadd.f32 %v12187_v16, %v14385_v26  ;;  %v2389_v53 = vpop.f32.mrb[17].mxu0  ;;  %1837 = vperm.xlu1 %12644, %v816_v10   ;;  %v1579_v5 = vadd.f32 %v1515_v41, %v1190_v21  ;;  %v12679_v21 = vld [vmem:[#allocation13 + $0x44] ss:$8 sps:$4 sm:$0xff]  }
 0x3c5   : >> { %v2390_v36 = vadd.f32 %v14385_v26, %v2389_v53  ;;  %v12188_v11 = vpop.f32.mrb[18].mxu0 }
 0x3c6   : >> { %v2401_v24 = vadd.f32 %v12188_v11, %v14385_v26  ;;  %v2392_v54 = vpop.f32.mrb[19].mxu0  ;;  %v1055_v3 = vpop.permute.xlu1 %1054  ;;  %v2598_v23 = vmax.f32 %v2398_v33, 0.0  ;;  %v1968_v60 = vadd.f32 %v1904_v59, %v1579_v5 }
 0x3c7   : >> { %v2393_v44 = vadd.f32 %v14385_v26, %v2392_v54  ;;  %v2596_v57 = vmax.f32 %v2390_v36, 0.0  ;;  %v1192_v20 = vmul.f32 %v14360_v61, %v1055_v3  ;;  %v12673_v54 = vld [vmem:[#allocation13 + $0x24] ss:$8 sps:$4 sm:$0xff]   ;;  %v12671_v3 = vld [vmem:[#allocation13 + $0x20] ss:$8 sps:$4 sm:$0xff]  }
 0x3c8   : >> { %v2599_v28 = vmax.f32 %v2401_v24, 0.0  ;;  %12647 = vset.pattern.permute.xlu1 %v13322_v8  ;;  %v2039_v37 = vadd.f32 %v14379_v56, %v1968_v60  ;;  %3244 = vmatprep.subr.bf16.mxu0 %v12673_v54 }
 0x3c9   : >> { %v2597_v45 = vmax.f32 %v2393_v44, 0.0  ;;  %1129 = vperm.xlu1 %12647, %v14350_v38   ;;  %v1581_v46 = vadd.f32 %v1517_v19, %v1192_v20  ;;  %3245 = vmatpush1.bf16.msra.mxu0 %v12671_v3  ;;  %v12685_v19 = vld [vmem:[#allocation13 + $0x64] ss:$8 sps:$4 sm:$0xff]   ;;  %v12683_v20 = vld [vmem:[#allocation13 + $0x60] ss:$8 sps:$4 sm:$0xff]  }
 0x3ca   : >> { %v2653_v22 = vpack.c.bf16 %v2599_v28, %v2598_v23  ;;  %v1060_v13 = vpop.permute.xlu1 %1059  ;;  %v2103_v25 = vmax.f32 %v2039_v37, 0.0  ;;  %v12688_v37 = vld [vmem:[#allocation13 + $0x74] ss:$8 sps:$4 sm:$0xff]  }
 0x3cb   : >> { %v2652_v10 = vpack.c.bf16 %v2597_v45, %v2596_v57  ;;  %v1193_v17 = vmul.f32 %v14360_v61, %v1060_v13  ;;  %v12674_v57 = vld [vmem:[#allocation13 + $0x30] ss:$8 sps:$4 sm:$0xff]  }
 0x3cd   : >> { %12265 = vmatprep.mubr.bf16.mxu1 %v2652_v10  ;;  %12648 = vset.pattern.permute.xlu1 %v13321_v2 }
 0x3ce   : >> { %12266 = vmatmul.mubr.bf16.gmra.mrb[16].mxu1 %v2653_v22  ;;  %1452 = vperm.xlu1 %12648, %v14330_v43   ;;  %v1907_v43 = vmul.f32 %v14363_v39, %v1790_v48  ;;  %v12682_v48 = vld [vmem:[#allocation13 + $0x54] ss:$8 sps:$4 sm:$0xff]  }
 0x3cf   : >> { %v1401_v63 = vpop.permute.xlu1 %1400 }
 0x3d0   : >> { %v1518_v6 = vmul.f32 %v14356_v47, %v1401_v63 }
 0x3d2   : >> { %12649 = vset.pattern.permute.xlu1 %v13322_v8  ;;  %v1582_v29 = vadd.f32 %v1518_v6, %v1193_v17  ;;  %v12680_v17 = vld [vmem:[#allocation13 + $0x50] ss:$8 sps:$4 sm:$0xff]  }
 0x3d3   : >> { %1134 = vperm.xlu1 %12649, %v14367_v31  }
 0x3d4   : >> { %v1782_v62 = vpop.permute.xlu1 %1781  ;;  %v1971_v15 = vadd.f32 %v1907_v43, %v1582_v29 }
 0x3d5   : >> { %v1905_v12 = vmul.f32 %v14363_v39, %v1782_v62  ;;  %v1798_v62 = vpop.permute.xlu0 %1797 }
 0x3d6   : >> { %v2042_v16 = vadd.f32 %v14379_v56, %v1971_v15  ;;  %v1909_v50 = vmul.f32 %v14363_v39, %v1798_v62 }
 0x3d7   : >> { %v1969_v42 = vadd.f32 %v1905_v12, %v1580_v27  ;;  %1139 = vperm.xlu1 %12649, %v14388_v32   ;;  %v1195_v27 = vmul.f32 %v14360_v61, %v14442_v4  ;;  %v1196_v4 = vmul.f32 %v14360_v61, %v14449_v30 }
 0x3d8   : >> { %v1786_v49 = vpop.permute.xlu1 %1785  ;;  %v2106_v44 = vmax.f32 %v2042_v16, 0.0 }
 0x3d9   : >> { %v2040_v7 = vadd.f32 %v14379_v56, %v1969_v42  ;;  %v1906_v9 = vmul.f32 %v14363_v39, %v1786_v49  ;;  %v12686_v42 = vld [vmem:[#allocation13 + $0x70] ss:$8 sps:$4 sm:$0xff]  }
 0x3db   : >> { %v2104_v33 = vmax.f32 %v2040_v7, 0.0  ;;  %v1970_v53 = vadd.f32 %v1906_v9, %v1581_v46  ;;  %12650 = vset.pattern.permute.xlu1 %v13321_v2  ;;  %v12676_v2 = vld [vmem:[#allocation13 + $0x34] ss:$8 sps:$4 sm:$0xff]   ;;  %v1521_v9 = vmul.f32 %v14356_v47, %v14516_v51  ;;  %v1810_v51 = vpop.permute.xlu0 %1809 }
 0x3dc   : >> { %1464 = vperm.xlu1 %12650, %v14388_v32   ;;  %3246 = vmatprep.subr.bf16.mxu0 %v12676_v2 }
 0x3dd   : >> { %v2145_v36 = vpack.c.bf16 %v2104_v33, %v2103_v25  ;;  %v2041_v11 = vadd.f32 %v14379_v56, %v1970_v53  ;;  %v1065_v24 = vpop.permute.xlu1 %1064  ;;  %3247 = vmatpush1.bf16.msra.mxu0 %v12674_v57  ;;  %v1585_v53 = vadd.f32 %v1521_v9, %v1196_v4  ;;  %v1524_v4 = vmul.f32 %v14356_v47, %v14522_v40 }
 0x3de   : >> { %3248 = vmatprep.subr.bf16.mxu0 %v12679_v21  ;;  %v1194_v49 = vmul.f32 %v14360_v61, %v1065_v24 }
 0x3df   : >> { %v2105_v23 = vmax.f32 %v2041_v11, 0.0  ;;  %12213 = vmatprep.mubr.msk.bf16.mxu0 %vm2194_vm0, %v2145_v36 }
 0x3e0   : >> { %12652 = vset.pattern.permute.xlu1 %v13320_v1 }
 0x3e1   : >> { %v2146_v28 = vpack.c.bf16 %v2106_v44, %v2105_v23  ;;  %1845 = vperm.xlu1 %12652, %v14350_v38   ;;  %3249 = vmatpush1.bf16.msra.mxu0 %v12677_v58 }
 0x3e2   : >> { %v1405_v32 = vpop.permute.xlu1 %1404  ;;  %3250 = vmatprep.subr.bf16.mxu0 %v12682_v48 }
 0x3e3   : >> { %12214 = vmatmul.mubr.msk.bf16.gmra.mrb[44].mxu0 %vm2194_vm0, %v2146_v28  ;;  %v1519_v15 = vmul.f32 %v14356_v47, %v1405_v32 }
 0x3e4   : >> { %v12191_v45 = vpop.f32.mrb[20].mxu0 }
 0x3e5   : >> { %v2414_v22 = vadd.f32 %v12191_v45, %v14385_v26  ;;  %v2405_v13 = vpop.f32.mrb[21].mxu0  ;;  %1849 = vperm.xlu1 %12652, %v14367_v31   ;;  %3251 = vmatpush1.bf16.msra.mxu0 %v12680_v17  ;;  %v1583_v18 = vadd.f32 %v1519_v15, %v1194_v49 }
 0x3e6   : >> { %v2406_v1 = vadd.f32 %v14385_v26, %v2405_v13  ;;  %v12192_v41 = vpop.f32.mrb[22].mxu0  ;;  %v1409_v10 = vpop.permute.xlu1 %1408  ;;  %3252 = vmatprep.subr.bf16.mxu0 %v12685_v19 }
 0x3e7   : >> { %v2417_v38 = vadd.f32 %v12192_v41, %v14385_v26  ;;  %v2408_v5 = vpop.f32.mrb[23].mxu0  ;;  %v2602_v63 = vmax.f32 %v2414_v22, 0.0  ;;  %v1520_v29 = vmul.f32 %v14356_v47, %v1409_v10  ;;  %v1822_v13 = vpop.permute.xlu0 %1821 }
 0x3e8   : >> { %v2409_v59 = vadd.f32 %v14385_v26, %v2408_v5  ;;  %v2600_v35 = vmax.f32 %v2406_v1, 0.0  ;;  %v1915_v9 = vmul.f32 %v14363_v39, %v1822_v13 }
 0x3e9   : >> { %v2603_v6 = vmax.f32 %v2417_v38, 0.0  ;;  %v1584_v12 = vadd.f32 %v1520_v29, %v1195_v27  ;;  %3253 = vmatpush1.bf16.msra.mxu0 %v12683_v20 }
 0x3ea   : >> { %v2601_v55 = vmax.f32 %v2409_v59, 0.0  ;;  %3254 = vmatprep.subr.bf16.mxu0 %v12688_v37  ;;  %v1912_v37 = vmul.f32 %v14363_v39, %v1810_v51 }
 0x3eb   : >> { %v2655_v31 = vpack.c.bf16 %v2603_v6, %v2602_v63  ;;  %v1080_v60 = vpop.permute.xlu1 %1079  ;;  %v1973_v46 = vadd.f32 %v1909_v50, %v1584_v12  ;;  %v14590_v38 = vpop.permute.xlu0 %1829 }
 0x3ec   : >> { %v2654_v43 = vpack.c.bf16 %v2601_v55, %v2600_v35  ;;  %v1197_v30 = vmul.f32 %v14360_v61, %v1080_v60 }
 0x3ed   : >> { %3255 = vmatpush1.bf16.msra.mxu0 %v12686_v42  ;;  %v2044_v25 = vadd.f32 %v14379_v56, %v1973_v46 }
 0x3ee   : >> { %12269 = vmatprep.mubr.bf16.mxu1 %v2654_v43  ;;  %3920 = vmatprep.subr.bf16.mxu0 %v13322_v8 }
 0x3ef   : >> { %12270 = vmatmul.mubr.bf16.gmra.mrb[20].mxu1 %v2655_v31  ;;  %v2108_v54 = vmax.f32 %v2044_v25, 0.0  ;;  %v1085_v60 = vpop.permute.xlu0 %1084 }
 0x3f0   : >> { %v1417_v14 = vpop.permute.xlu1 %1416  ;;  %v1198_v12 = vmul.f32 %v14360_v61, %v1085_v60 }
 0x3f1   : >> { %v1522_v36 = vmul.f32 %v14356_v47, %v1417_v14 }
 0x3f3   : >> { %v1586_v28 = vadd.f32 %v1522_v36, %v1197_v30  ;;  %v1525_v36 = vmul.f32 %v14356_v47, %v14527_v34 }
 0x3f5   : >> { %v1794_v7 = vpop.permute.xlu1 %1793 }
 0x3f6   : >> { %v1908_v52 = vmul.f32 %v14363_v39, %v1794_v7 }
 0x3f8   : >> { %v1972_v16 = vadd.f32 %v1908_v52, %v1583_v18 }
 0x3f9   : >> { %v1802_v33 = vpop.permute.xlu1 %1801 }
 0x3fa   : >> { %v2043_v11 = vadd.f32 %v14379_v56, %v1972_v16  ;;  %v1910_v24 = vmul.f32 %v14363_v39, %v1802_v33 }
 0x3fc   : >> { %v2107_v3 = vmax.f32 %v2043_v11, 0.0  ;;  %v1974_v44 = vadd.f32 %v1910_v24, %v1585_v53 }
 0x3fd   : >> { %v1806_v23 = vpop.permute.xlu1 %1805 }
 0x3fe   : >> { %v2147_v2 = vpack.c.bf16 %v2108_v54, %v2107_v3  ;;  %v1911_v32 = vmul.f32 %v14363_v39, %v1806_v23  ;;  %v2045_v57 = vadd.f32 %v14379_v56, %v1974_v44 }
 0x400   : >> { %v1975_v45 = vadd.f32 %v1911_v32, %v1586_v28  ;;  %12217 = vmatprep.mubr.msk.bf16.mxu0 %vm2194_vm0, %v2147_v2  ;;  %v2109_v1 = vmax.f32 %v2045_v57, 0.0 }
 0x402   : >> { %v2046_v22 = vadd.f32 %v14379_v56, %v1975_v45  ;;  %v1090_v21 = vpop.permute.xlu1 %1089 }
 0x403   : >> { %v1199_v46 = vmul.f32 %v14360_v61, %v1090_v21 }
 0x404   : >> { %v2110_v41 = vmax.f32 %v2046_v22, 0.0  ;;  %v1110_v22 = vpop.permute.xlu0 %1109 }
 0x405   : >> { %v1588_v16 = vadd.f32 %v1524_v4, %v1199_v46 }
 0x406   : >> { %v2148_v10 = vpack.c.bf16 %v2110_v41, %v2109_v1 }
 0x407   : >> { %v1421_v58 = vpop.permute.xlu1 %1420 }
 0x408   : >> { %12218 = vmatmul.mubr.msk.bf16.gmra.mrb[48].mxu0 %vm2194_vm0, %v2148_v10  ;;  %v1523_v50 = vmul.f32 %v14356_v47, %v1421_v58  ;;  %v1115_v41 = vpop.permute.xlu0 %1114 }
 0x409   : >> { %v12195_v5 = vpop.f32.mrb[24].mxu0 }
 0x40a   : >> { %v2430_v59 = vadd.f32 %v12195_v5, %v14385_v26  ;;  %v2421_v63 = vpop.f32.mrb[25].mxu0  ;;  %v1587_v15 = vadd.f32 %v1523_v50, %v1198_v12 }
 0x40b   : >> { %v2422_v6 = vadd.f32 %v14385_v26, %v2421_v63  ;;  %v12196_v48 = vpop.f32.mrb[26].mxu0 }
 0x40c   : >> { %v2433_v35 = vadd.f32 %v12196_v48, %v14385_v26  ;;  %v2424_v55 = vpop.f32.mrb[27].mxu0  ;;  %v1095_v17 = vpop.permute.xlu1 %1094  ;;  %v2606_v29 = vmax.f32 %v2430_v59, 0.0  ;;  %v1976_v18 = vadd.f32 %v1912_v37, %v1587_v15 }
 0x40d   : >> { %v2425_v31 = vadd.f32 %v14385_v26, %v2424_v55  ;;  %v2604_v62 = vmax.f32 %v2422_v6, 0.0  ;;  %v1200_v33 = vmul.f32 %v14360_v61, %v1095_v17  ;;  %v14621_v60 = vpop.permute.xlu0 %1124 }
 0x40e   : >> { %v2607_v43 = vmax.f32 %v2433_v35, 0.0  ;;  %v2047_v11 = vadd.f32 %v14379_v56, %v1976_v18 }
 0x40f   : >> { %v2605_v19 = vmax.f32 %v2425_v31, 0.0  ;;  %v1589_v3 = vadd.f32 %v1525_v36, %v1200_v33 }
 0x410   : >> { %v2657_v27 = vpack.c.bf16 %v2607_v43, %v2606_v29  ;;  %v1100_v20 = vpop.permute.xlu1 %1099  ;;  %v2111_v51 = vmax.f32 %v2047_v11, 0.0  ;;  %v14623_v29 = vld [vmem:[#allocation2] ss:$0 sm:$0xff] }
 0x411   : >> { %v2656_v14 = vpack.c.bf16 %v2605_v19, %v2604_v62  ;;  %v1201_v7 = vmul.f32 %v14360_v61, %v1100_v20  ;;  %v1203_v43 = vmul.f32 %v14623_v29, %v1110_v22  ;;  %v14626_v62 = vld [vmem:[#allocation2 + $0x1] ss:$0 sm:$0xff]  ;;  %v14629_v20 = vld [vmem:[#allocation11] ss:$0 sm:$0xff]  ;;  %v1445_v15 = vpop.permute.xlu0 %1444 }
 0x413   : >> { %12273 = vmatprep.mubr.bf16.mxu1 %v2656_v14 }
 0x414   : >> { %12274 = vmatmul.mubr.bf16.gmra.mrb[24].mxu1 %v2657_v27 }
 0x415   : >> { %v1433_v42 = vpop.permute.xlu1 %1432 }
 0x416   : >> { %v1526_v49 = vmul.f32 %v14356_v47, %v1433_v42  ;;  %v14632_v42 = vld [vmem:[#allocation2 + $0x2] ss:$0 sm:$0xff] }
 0x418   : >> { %v1590_v52 = vadd.f32 %v1526_v49, %v1201_v7  ;;  %v1917_v49 = vmul.f32 %v14632_v42, %v14590_v38 }
 0x41a   : >> { %v1814_v25 = vpop.permute.xlu1 %1813  ;;  %v1979_v24 = vadd.f32 %v1915_v9, %v1590_v52  ;;  %v1204_v9 = vmul.f32 %v14623_v29, %v1115_v41 }
 0x41b   : >> { %v1913_v53 = vmul.f32 %v14363_v39, %v1814_v25 }
 0x41c   : >> { %v2050_v23 = vadd.f32 %v14379_v56, %v1979_v24 }
 0x41d   : >> { %v1977_v54 = vadd.f32 %v1913_v53, %v1588_v16  ;;  %v1529_v53 = vmul.f32 %v14626_v62, %v1445_v15  ;;  %v1457_v15 = vpop.permute.xlu0 %1456 }
 0x41e   : >> { %v1818_v30 = vpop.permute.xlu1 %1817  ;;  %v2114_v47 = vmax.f32 %v2050_v23, 0.0 }
 0x41f   : >> { %v2048_v40 = vadd.f32 %v14379_v56, %v1977_v54  ;;  %v1914_v44 = vmul.f32 %v14363_v39, %v1818_v30 }
 0x421   : >> { %v2112_v28 = vmax.f32 %v2048_v40, 0.0  ;;  %v1978_v61 = vadd.f32 %v1914_v44, %v1589_v3  ;;  %v14646_v44 = vld [vmem:[#allocation5] ss:$0 sm:$0xff] }
 0x423   : >> { %v2149_v2 = vpack.c.bf16 %v2112_v28, %v2111_v51  ;;  %v2049_v32 = vadd.f32 %v14379_v56, %v1978_v61  ;;  %v1105_v57 = vpop.permute.xlu1 %1104  ;;  %v1593_v61 = vadd.f32 %v1529_v53, %v1204_v9 }
 0x424   : >> { %v1202_v25 = vmul.f32 %v14623_v29, %v1105_v57 }
 0x425   : >> { %v2113_v34 = vmax.f32 %v2049_v32, 0.0  ;;  %12221 = vmatprep.mubr.msk.bf16.mxu0 %vm2194_vm0, %v2149_v2 }
 0x427   : >> { %v2150_v45 = vpack.c.bf16 %v2114_v47, %v2113_v34 }
 0x428   : >> { %v1437_v13 = vpop.permute.xlu1 %1436 }
 0x429   : >> { %12222 = vmatmul.mubr.msk.bf16.gmra.mrb[52].mxu0 %vm2194_vm0, %v2150_v45  ;;  %v1527_v46 = vmul.f32 %v14626_v62, %v1437_v13 }
 0x42a   : >> { %v12199_v21 = vpop.f32.mrb[28].mxu0 }
 0x42b   : >> { %v2446_v39 = vadd.f32 %v12199_v21, %v14385_v26  ;;  %v2437_v1 = vpop.f32.mrb[29].mxu0  ;;  %v1591_v24 = vadd.f32 %v1527_v46, %v1202_v25 }
 0x42c   : >> { %v2438_v10 = vadd.f32 %v14385_v26, %v2437_v1  ;;  %v12200_v58 = vpop.f32.mrb[30].mxu0  ;;  %v1441_v5 = vpop.permute.xlu1 %1440 }
 0x42d   : >> { %v2449_v56 = vadd.f32 %v12200_v58, %v14385_v26  ;;  %v2440_v59 = vpop.f32.mrb[31].mxu0  ;;  %v2610_v6 = vmax.f32 %v2446_v39, 0.0  ;;  %v1528_v19 = vmul.f32 %v14626_v62, %v1441_v5 }
 0x42e   : >> { %v2441_v63 = vadd.f32 %v14385_v26, %v2440_v59  ;;  %v2608_v35 = vmax.f32 %v2438_v10, 0.0 }
 0x42f   : >> { %v2611_v48 = vmax.f32 %v2449_v56, 0.0  ;;  %v1592_v26 = vadd.f32 %v1528_v19, %v1203_v43 }
 0x430   : >> { %v2609_v55 = vmax.f32 %v2441_v63, 0.0 }
 0x431   : >> { %v2659_v17 = vpack.c.bf16 %v2611_v48, %v2610_v6  ;;  %v1120_v31 = vpop.permute.xlu1 %1119  ;;  %v1981_v16 = vadd.f32 %v1917_v49, %v1592_v26 }
 0x432   : >> { %v2658_v27 = vpack.c.bf16 %v2609_v55, %v2608_v35  ;;  %v1205_v39 = vmul.f32 %v14623_v29, %v1120_v31 }
 0x433   : >> { %v2052_v51 = vadd.f32 %v14646_v44, %v1981_v16 }
 0x434   : >> { %12277 = vmatprep.mubr.bf16.mxu1 %v2658_v27 }
 0x435   : >> { %12278 = vmatmul.mubr.bf16.gmra.mrb[28].mxu1 %v2659_v17  ;;  %v2116_v10 = vmax.f32 %v2052_v51, 0.0 }
 0x436   : >> { %v12251_v12 = vpop.f32.mrb[0].mxu1  ;;  %v1449_v50 = vpop.permute.xlu1 %1448 }
 0x437   : >> { %v2790_v14 = vadd.f32 %v12251_v12, %v14629_v20  ;;  %v2781_v37 = vpop.f32.mrb[1].mxu1  ;;  %v1530_v32 = vmul.f32 %v14626_v62, %v1449_v50 }
 0x438   : >> { %v2782_v7 = vadd.f32 %v14629_v20, %v2781_v37  ;;  %v12252_v4 = vpop.f32.mrb[2].mxu1 }
 0x439   : >> { %v2793_v18 = vadd.f32 %v12252_v4, %v14629_v20  ;;  %v2784_v52 = vpop.f32.mrb[3].mxu1  ;;  %v3038_v36 = vmax.f32 %v2790_v14, 0.0  ;;  %v1594_v59 = vadd.f32 %v1530_v32, %v1205_v39  ;;  %v14668_v4 = vld [vmem:[#allocation8] ss:$0 sm:$0xff]  ;;  %v1206_v32 = vmul.f32 %v14623_v29, %v14621_v60 }
 0x43a   : >> { %v2785_v33 = vadd.f32 %v14629_v20, %v2784_v52  ;;  %v3036_v54 = vmax.f32 %v2782_v7, 0.0  ;;  %v1461_v52 = vpop.permute.xlu0 %1460 }
 0x43b   : >> { %v3039_v11 = vmax.f32 %v2793_v18, 0.0  ;;  %v1826_v38 = vpop.permute.xlu1 %1825 }
 0x43c   : >> { %v3037_v30 = vmax.f32 %v2785_v33, 0.0  ;;  %v1916_v3 = vmul.f32 %v14632_v42, %v1826_v38 }
 0x43d   : >> { %v14644_v40 = vpack.c.bf16 %v3039_v11, %v3038_v36 }
 0x43e   : >> { %v14649_v23 = vpack.c.bf16 %v3037_v30, %v3036_v54  ;;  %v1980_v28 = vadd.f32 %v1916_v3, %v1591_v24  ;;  %v12255_v2 = vpop.f32.mrb[4].mxu1 }
 0x43f   : >> { %v2806_v57 = vadd.f32 %v12255_v2, %v14629_v20  ;;  %v2797_v47 = vpop.f32.mrb[5].mxu1  ;;  %v1834_v34 = vpop.permute.xlu1 %1833 }
 0x440   : >> { %v2051_v45 = vadd.f32 %v14646_v44, %v1980_v28  ;;  %v2798_v22 = vadd.f32 %v14629_v20, %v2797_v47  ;;  %v1918_v13 = vmul.f32 %v14632_v42, %v1834_v34  ;;  %v12256_v21 = vpop.f32.mrb[6].mxu1  ;;  %v1842_v2 = vpop.permute.xlu0 %1841 }
 0x441   : >> { %v2809_v1 = vadd.f32 %v12256_v21, %v14629_v20  ;;  %v2800_v41 = vpop.f32.mrb[7].mxu1  ;;  %v3042_v63 = vmax.f32 %v2806_v57, 0.0  ;;  %v1920_v47 = vmul.f32 %v14632_v42, %v1842_v2 }
 0x442   : >> { %v2115_v58 = vmax.f32 %v2051_v45, 0.0  ;;  %v1982_v5 = vadd.f32 %v1918_v13, %v1593_v61  ;;  %v2801_v56 = vadd.f32 %v14629_v20, %v2800_v41  ;;  %v3040_v55 = vmax.f32 %v2798_v22, 0.0 }
 0x443   : >> { %v3043_v6 = vmax.f32 %v2809_v1, 0.0  ;;  %v1838_v48 = vpop.permute.xlu1 %1837  ;;  %v1532_v22 = vmul.f32 %v14626_v62, %v1457_v15 }
 0x444   : >> { %v2151_v35 = vpack.c.bf16 %v2116_v10, %v2115_v58  ;;  %v3041_v17 = vmax.f32 %v2801_v56, 0.0  ;;  %v1919_v43 = vmul.f32 %v14632_v42, %v1838_v48  ;;  %v2053_v31 = vadd.f32 %v14646_v44, %v1982_v5  ;;  %v1854_v41 = vpop.permute.xlu0 %1853 }
 0x445   : >> { %v14660_v19 = vpack.c.bf16 %v3043_v6, %v3042_v63  ;;  %v1923_v6 = vmul.f32 %v14632_v42, %v1854_v41 }
 0x446   : >> { %v14663_v27 = vpack.c.bf16 %v3041_v17, %v3040_v55  ;;  %v1983_v26 = vadd.f32 %v1919_v43, %v1594_v59  ;;  %12225 = vmatprep.mubr.msk.bf16.mxu0 %vm2194_vm0, %v2151_v35  ;;  %v2117_v14 = vmax.f32 %v2053_v31, 0.0  ;;  %v1533_v55 = vmul.f32 %v14626_v62, %v1461_v52 }
 0x448   : >> { %v2054_v12 = vadd.f32 %v14646_v44, %v1983_v26  ;;  %v1130_v50 = vpop.permute.xlu1 %1129 }
 0x449   : >> { %v1207_v13 = vmul.f32 %v14623_v29, %v1130_v50 }
 0x44a   : >> { %v2118_v37 = vmax.f32 %v2054_v12, 0.0 }
 0x44b   : >> { %v1596_v35 = vadd.f32 %v1532_v22, %v1207_v13 }
 0x44c   : >> { %v2152_v49 = vpack.c.bf16 %v2118_v37, %v2117_v14 }
 0x44d   : >> { %v1453_v46 = vpop.permute.xlu1 %1452 }
 0x44e   : >> { %12226 = vmatmul.mubr.msk.bf16.gmra.mrb[56].mxu0 %vm2194_vm0, %v2152_v49  ;;  %v1531_v28 = vmul.f32 %v14626_v62, %v1453_v46 }
 0x44f   : >> { %v12203_v7 = vpop.f32.mrb[32].mxu0 }
 0x450   : >> { %v2462_v9 = vadd.f32 %v14668_v4, %v12203_v7  ;;  %v2453_v18 = vpop.f32.mrb[33].mxu0  ;;  %v1595_v57 = vadd.f32 %v1531_v28, %v1206_v32 }
 0x451   : >> { %v2454_v25 = vadd.f32 %v14668_v4, %v2453_v18  ;;  %v12204_v16 = vpop.f32.mrb[34].mxu0 }
 0x452   : >> { %v2465_v33 = vadd.f32 %v14668_v4, %v12204_v16  ;;  %v2456_v53 = vpop.f32.mrb[35].mxu0  ;;  %v1135_v36 = vpop.permute.xlu1 %1134  ;;  %v2614_v38 = vmax.f32 %v2462_v9, 0.0  ;;  %v1984_v59 = vadd.f32 %v1920_v47, %v1595_v57 }
 0x453   : >> { %v2457_v11 = vadd.f32 %v14668_v4, %v2456_v53  ;;  %v2612_v54 = vmax.f32 %v2454_v25, 0.0  ;;  %v1208_v26 = vmul.f32 %v14623_v29, %v1135_v36 }
 0x454   : >> { %v2615_v24 = vmax.f32 %v2465_v33, 0.0  ;;  %v2055_v15 = vadd.f32 %v14646_v44, %v1984_v59 }
 0x455   : >> { %v2613_v30 = vmax.f32 %v2457_v11, 0.0  ;;  %v1597_v18 = vadd.f32 %v1533_v55, %v1208_v26 }
 0x456   : >> { %v2661_v3 = vpack.c.bf16 %v2615_v24, %v2614_v38  ;;  %v1140_v51 = vpop.permute.xlu1 %1139  ;;  %v2119_v25 = vmax.f32 %v2055_v15, 0.0 }
 0x457   : >> { %v2660_v61 = vpack.c.bf16 %v2613_v30, %v2612_v54  ;;  %v1209_v10 = vmul.f32 %v14623_v29, %v1140_v51 }
 0x459   : >> { %12281 = vmatprep.mubr.bf16.mxu1 %v2660_v61 }
 0x45a   : >> { %12282 = vmatmul.mubr.bf16.gmra.mrb[32].mxu1 %v2661_v3 }
 0x45b   : >> { %v12259_v34 = vpop.f32.mrb[8].mxu1  ;;  %v1465_v45 = vpop.permute.xlu1 %1464 }
 0x45c   : >> { %v2822_v21 = vadd.f32 %v12259_v34, %v14629_v20  ;;  %v1534_v39 = vmul.f32 %v14626_v62, %v1465_v45  ;;  %v2813_v1 = vpop.f32.mrb[9].mxu1 }
 0x45d   : >> { %v2814_v60 = vadd.f32 %v14629_v20, %v2813_v1  ;;  %v12260_v58 = vpop.f32.mrb[10].mxu1 }
 0x45e   : >> { %v2825_v5 = vadd.f32 %v12260_v58, %v14629_v20  ;;  %v2816_v56 = vpop.f32.mrb[11].mxu1  ;;  %v1598_v63 = vadd.f32 %v1534_v39, %v1209_v10  ;;  %v3046_v17 = vmax.f32 %v2822_v21, 0.0 }
 0x45f   : >> { %v2817_v48 = vadd.f32 %v14629_v20, %v2816_v56  ;;  %v3044_v12 = vmax.f32 %v2814_v60, 0.0 }
 0x460   : >> { %v3047_v43 = vmax.f32 %v2825_v5, 0.0  ;;  %v1846_v31 = vpop.permute.xlu1 %1845  ;;  %v1987_v49 = vadd.f32 %v1923_v6, %v1598_v63 }
 0x461   : >> { %v3045_v50 = vmax.f32 %v2817_v48, 0.0  ;;  %v1921_v14 = vmul.f32 %v14632_v42, %v1846_v31 }
 0x462   : >> { %v14690_v37 = vpack.c.bf16 %v3047_v43, %v3046_v17  ;;  %v2058_v29 = vadd.f32 %v14646_v44, %v1987_v49  ;;  %v12690_v49 = vld [vmem:[%s15574_s9 + $0x8] sm:$0xff]  }
 0x463   : >> { %v3104_v46 = vpack.c.bf16 %v3045_v50, %v3044_v12  ;;  %v1985_v7 = vadd.f32 %v1921_v14, %v1596_v35 }
 0x464   : >> { %v1850_v9 = vpop.permute.xlu1 %1849  ;;  %v2122_v11 = vmax.f32 %v2058_v29, 0.0 }
 0x465   : >> { %v2056_v62 = vadd.f32 %v14646_v44, %v1985_v7  ;;  %v1922_v52 = vmul.f32 %v14632_v42, %v1850_v9 }
 0x467   : >> { %v2120_v16 = vmax.f32 %v2056_v62, 0.0  ;;  %v1986_v33 = vadd.f32 %v1922_v52, %v1597_v18 }
 0x469   : >> { %v2153_v53 = vpack.c.bf16 %v2120_v16, %v2119_v25  ;;  %v2057_v36 = vadd.f32 %v14646_v44, %v1986_v33  ;;  %v12691_v25 = vld [vmem:[%s15574_s9 + $0x10] sm:$0xff]  }
 0x46b   : >> { %v2121_v38 = vmax.f32 %v2057_v36, 0.0  ;;  %12229 = vmatprep.mubr.msk.bf16.mxu0 %vm2194_vm0, %v2153_v53 }
 0x46d   : >> { %v2154_v24 = vpack.c.bf16 %v2122_v11, %v2121_v38  ;;  %v12692_v38 = vld [vmem:[%s15574_s9 + $0x18] sm:$0xff]  }
 0x46f   : >> { %12230 = vmatmul.mubr.msk.bf16.gmra.mrb[60].mxu0 %vm2194_vm0, %v2154_v24 }
 0x470   : >> { %v12207_v54 = vpop.f32.mrb[36].mxu0  ;;  %3272 = vmatprep.mubr.bf16.mxu0 %v13322_v8 }
 0x471   : >> { %v2478_v42 = vadd.f32 %v14668_v4, %v12207_v54  ;;  %v2469_v30 = vpop.f32.mrb[37].mxu0  ;;  %v12693_v54 = vld [vmem:[%s15574_s9 + $0x20] sm:$0xff]  }
 0x472   : >> { %v2470_v3 = vadd.f32 %v14668_v4, %v2469_v30  ;;  %v12208_v51 = vpop.f32.mrb[38].mxu0  ;;  %v12695_v30 = vld [vmem:[%s15574_s9 + $0x30] sm:$0xff]  }
 0x473   : >> { %v2481_v28 = vadd.f32 %v14668_v4, %v12208_v51  ;;  %v2472_v61 = vpop.f32.mrb[39].mxu0  ;;  %v2618_v2 = vmax.f32 %v2478_v42, 0.0  ;;  %v12694_v42 = vld [vmem:[%s15574_s9 + $0x28] sm:$0xff]  }
 0x474   : >> { %v2473_v44 = vadd.f32 %v14668_v4, %v2472_v61  ;;  %v2616_v57 = vmax.f32 %v2470_v3, 0.0  ;;  %v12696_v61 = vld [vmem:[%s15574_s9 + $0x38] sm:$0xff]  }
 0x475   : >> { %v2619_v32 = vmax.f32 %v2481_v28, 0.0 }
 0x476   : >> { %v2617_v47 = vmax.f32 %v2473_v44, 0.0 }
 0x477   : >> { %v2663_v34 = vpack.c.bf16 %v2619_v32, %v2618_v2  ;;  %3273 = vmatmul.mubr.bf16.vlgmr.msra.gmra.mrb[64].mxu0 %v14649_v23 }
 0x478   : >> { %v2662_v45 = vpack.c.bf16 %v2617_v47, %v2616_v57  ;;  %3282 = vmatprep.mubr.bf16.mxu0 %v13322_v8 }
 0x47a   : >> { %12285 = vmatprep.mubr.bf16.mxu1 %v2662_v45 }
 0x47b   : >> { %12286 = vmatmul.mubr.bf16.gmra.mrb[36].mxu1 %v2663_v34  ;;  %v12697_v34 = vld [vmem:[%s15574_s9 + $0x40] sm:$0xff]  }
 0x47c   : >> { %v12263_v22 = vpop.f32.mrb[12].mxu1 }
 0x47d   : >> { %v2838_v13 = vadd.f32 %v12263_v22, %v14629_v20  ;;  %v2829_v21 = vpop.f32.mrb[13].mxu1 }
 0x47e   : >> { %v2830_v39 = vadd.f32 %v14629_v20, %v2829_v21  ;;  %v12264_v1 = vpop.f32.mrb[14].mxu1 }
 0x47f   : >> { %v2841_v41 = vadd.f32 %v12264_v1, %v14629_v20  ;;  %v2832_v10 = vpop.f32.mrb[15].mxu1  ;;  %3283 = vmatmul.mubr.bf16.gmra.mrb[68].mxu0 %v14644_v40  ;;  %v3050_v23 = vmax.f32 %v2838_v13, 0.0 }
 0x480   : >> { %v2833_v60 = vadd.f32 %v14629_v20, %v2832_v10  ;;  %3292 = vmatprep.mubr.bf16.mxu0 %v13322_v8  ;;  %v3048_v5 = vmax.f32 %v2830_v39, 0.0 }
 0x481   : >> { %v3051_v58 = vmax.f32 %v2841_v41, 0.0  ;;  %v12698_v41 = vld [vmem:[%s15574_s9 + $0x48] sm:$0xff]  }
 0x482   : >> { %v3049_v56 = vmax.f32 %v2833_v60, 0.0 }
 0x483   : >> { %v14712_v59 = vpack.c.bf16 %v3051_v58, %v3050_v23 }
 0x484   : >> { %v3106_v63 = vpack.c.bf16 %v3049_v56, %v3048_v5  ;;  %v12699_v56 = vld [vmem:[%s15574_s9 + $0x50] sm:$0xff]  }
 0x487   : >> { %3293 = vmatmul.mubr.bf16.gmra.mrb[72].mxu0 %v14663_v27 }
 0x488   : >> { %3302 = vmatprep.mubr.bf16.mxu0 %v13322_v8 }
 0x48f   : >> { %3303 = vmatmul.mubr.bf16.gmra.mrb[76].mxu0 %v14660_v19  ;;  %v12689_v19 = vld [vmem:[%s15574_s9] sm:$0xff]  }
 0x490   : >> { %3312 = vmatprep.mubr.bf16.mxu0 %v13322_v8  ;;  %12329 = vmatpush1.bf16.msra.mxu1 %v12689_v19 }
 0x491   : >> { %3921 = vmatpush1.bf16.msra.mxu0 %v12689_v19  ;;  %12314 = vmatprep.subr.bf16.mxu1 %v13322_v8  ;;  %v12703_v19 = vld [vmem:[%s15574_s9 + $0x70] sm:$0xff]  }
 0x492   : >> { %3922 = vmatprep.subr.bf16.mxu0 %v13322_v8 }
 0x494   : >> { %12330 = vmatpush1.bf16.msra.mxu1 %v12690_v49 }
 0x495   : >> { %v12211_v40 = vpop.f32.mrb[40].mxu0  ;;  %3923 = vmatpush1.bf16.msra.mxu0 %v12690_v49  ;;  %12315 = vmatprep.subr.bf16.mxu1 %v13322_v8 }
 0x496   : >> { %v2494_v6 = vadd.f32 %v14668_v4, %v12211_v40  ;;  %v2485_v48 = vpop.f32.mrb[41].mxu0  ;;  %3924 = vmatprep.subr.bf16.mxu0 %v13322_v8 }
 0x497   : >> { %v2486_v35 = vadd.f32 %v14668_v4, %v2485_v48  ;;  %v12212_v55 = vpop.f32.mrb[42].mxu0  ;;  %3313 = vmatmul.mubr.bf16.gmra.mrb[80].mxu0 %v3104_v46 }
 0x498   : >> { %v2497_v17 = vadd.f32 %v14668_v4, %v12212_v55  ;;  %v2488_v43 = vpop.f32.mrb[43].mxu0  ;;  %3322 = vmatprep.mubr.bf16.mxu0 %v13322_v8  ;;  %v2622_v31 = vmax.f32 %v2494_v6, 0.0  ;;  %12331 = vmatpush1.bf16.msra.mxu1 %v12691_v25 }
 0x499   : >> { %v2489_v27 = vadd.f32 %v14668_v4, %v2488_v43  ;;  %v2620_v12 = vmax.f32 %v2486_v35, 0.0  ;;  %3925 = vmatpush1.bf16.msra.mxu0 %v12691_v25  ;;  %12316 = vmatprep.subr.bf16.mxu1 %v13322_v8 }
 0x49a   : >> { %v2623_v26 = vmax.f32 %v2497_v17, 0.0  ;;  %3926 = vmatprep.subr.bf16.mxu0 %v13322_v8  ;;  %v12700_v17 = vld [vmem:[%s15574_s9 + $0x58] sm:$0xff]  }
 0x49b   : >> { %v2621_v50 = vmax.f32 %v2489_v27, 0.0 }
 0x49c   : >> { %v2665_v14 = vpack.c.bf16 %v2623_v26, %v2622_v31  ;;  %12332 = vmatpush1.bf16.msra.mxu1 %v12692_v38  ;;  %v12701_v31 = vld [vmem:[%s15574_s9 + $0x60] sm:$0xff]   ;;  %v12702_v26 = vld [vmem:[%s15574_s9 + $0x68] sm:$0xff]  }
 0x49d   : >> { %v2664_v15 = vpack.c.bf16 %v2621_v50, %v2620_v12  ;;  %3927 = vmatpush1.bf16.msra.mxu0 %v12692_v38  ;;  %12317 = vmatprep.subr.bf16.mxu1 %v13322_v8  ;;  %v12704_v12 = vld [vmem:[%s15574_s9 + $0x78] sm:$0xff]  }
 0x49e   : >> { %3928 = vmatprep.subr.bf16.mxu0 %v13322_v8 }
 0x49f   : >> { %12289 = vmatprep.mubr.bf16.mxu1 %v2664_v15  ;;  %3323 = vmatmul.mubr.bf16.gmra.mrb[84].mxu0 %v14690_v37 }
 0x4a0   : >> { %12290 = vmatmul.mubr.bf16.gmra.mrb[40].mxu1 %v2665_v14  ;;  %3332 = vmatprep.mubr.bf16.mxu0 %v13322_v8 }
 0x4a1   : >> { %v12267_v46 = vpop.f32.mrb[16].mxu1  ;;  %12333 = vmatpush1.bf16.msra.mxu1 %v12693_v54  ;;  %3929 = vmatpush1.bf16.msra.mxu0 %v12693_v54 }
 0x4a2   : >> { %v2854_v7 = vadd.f32 %v12267_v46, %v14629_v20  ;;  %v2845_v9 = vpop.f32.mrb[17].mxu1  ;;  %12318 = vmatprep.subr.bf16.mxu1 %v13322_v8  ;;  %3930 = vmatprep.subr.bf16.mxu0 %v13322_v8 }
 0x4a3   : >> { %v2846_v18 = vadd.f32 %v14629_v20, %v2845_v9  ;;  %v12268_v62 = vpop.f32.mrb[18].mxu1 }
 0x4a4   : >> { %v2857_v37 = vadd.f32 %v12268_v62, %v14629_v20  ;;  %v2848_v52 = vpop.f32.mrb[19].mxu1  ;;  %v3054_v16 = vmax.f32 %v2854_v7, 0.0 }
 0x4a5   : >> { %v2849_v29 = vadd.f32 %v14629_v20, %v2848_v52  ;;  %v3052_v53 = vmax.f32 %v2846_v18, 0.0  ;;  %12334 = vmatpush1.bf16.msra.mxu1 %v12694_v42  ;;  %3931 = vmatpush1.bf16.msra.mxu0 %v12694_v42 }
 0x4a6   : >> { %v3055_v33 = vmax.f32 %v2857_v37, 0.0  ;;  %12319 = vmatprep.subr.bf16.mxu1 %v13322_v8  ;;  %3932 = vmatprep.subr.bf16.mxu0 %v13322_v8 }
 0x4a7   : >> { %v3053_v36 = vmax.f32 %v2849_v29, 0.0  ;;  %3333 = vmatmul.mubr.bf16.gmra.mrb[88].mxu0 %v3106_v63 }
 0x4a8   : >> { %v3109_v11 = vpack.c.bf16 %v3055_v33, %v3054_v16  ;;  %3342 = vmatprep.mubr.bf16.mxu0 %v13322_v8 }
 0x4a9   : >> { %v3108_v24 = vpack.c.bf16 %v3053_v36, %v3052_v53  ;;  %12335 = vmatpush1.bf16.msra.mxu1 %v12695_v30  ;;  %3933 = vmatpush1.bf16.msra.mxu0 %v12695_v30 }
 0x4aa   : >> { %12320 = vmatprep.subr.bf16.mxu1 %v13322_v8  ;;  %3934 = vmatprep.subr.bf16.mxu0 %v13322_v8 }
 0x4ad   : >> { %12336 = vmatpush1.bf16.msra.mxu1 %v12696_v61  ;;  %3935 = vmatpush1.bf16.msra.mxu0 %v12696_v61 }
 0x4ae   : >> { %12321 = vmatprep.subr.bf16.mxu1 %v13322_v8  ;;  %3936 = vmatprep.subr.bf16.mxu0 %v13322_v8 }
 0x4af   : >> { %3343 = vmatmul.mubr.bf16.gmra.mrb[92].mxu0 %v14712_v59 }
 0x4b0   : >> { %3352 = vmatprep.mubr.bf16.mxu0 %v13322_v8 }
 0x4b1   : >> { %12337 = vmatpush1.bf16.msra.mxu1 %v12697_v34  ;;  %3937 = vmatpush1.bf16.msra.mxu0 %v12697_v34 }
 0x4b2   : >> { %12322 = vmatprep.subr.bf16.mxu1 %v13322_v8  ;;  %3938 = vmatprep.subr.bf16.mxu0 %v13322_v8 }
 0x4b5   : >> { %12338 = vmatpush1.bf16.msra.mxu1 %v12698_v41  ;;  %3939 = vmatpush1.bf16.msra.mxu0 %v12698_v41 }
 0x4b6   : >> { %v12215_v3 = vpop.f32.mrb[44].mxu0  ;;  %12323 = vmatprep.subr.bf16.mxu1 %v13322_v8  ;;  %3940 = vmatprep.subr.bf16.mxu0 %v13322_v8 }
 0x4b7   : >> { %v2510_v51 = vadd.f32 %v14668_v4, %v12215_v3  ;;  %v2501_v28 = vpop.f32.mrb[45].mxu0  ;;  %3353 = vmatmul.mubr.bf16.gmra.mrb[96].mxu0 %v3108_v24 }
 0x4b8   : >> { %v2502_v44 = vadd.f32 %v14668_v4, %v2501_v28  ;;  %v12216_v2 = vpop.f32.mrb[46].mxu0  ;;  %3362 = vmatprep.mubr.bf16.mxu0 %v13322_v8 }
 0x4b9   : >> { %v2513_v32 = vadd.f32 %v14668_v4, %v12216_v2  ;;  %v2504_v57 = vpop.f32.mrb[47].mxu0  ;;  %v2626_v45 = vmax.f32 %v2510_v51, 0.0  ;;  %12339 = vmatpush1.bf16.msra.mxu1 %v12699_v56  ;;  %3941 = vmatpush1.bf16.msra.mxu0 %v12699_v56 }
 0x4ba   : >> { %v2505_v47 = vadd.f32 %v14668_v4, %v2504_v57  ;;  %v2624_v13 = vmax.f32 %v2502_v44, 0.0  ;;  %12324 = vmatprep.subr.bf16.mxu1 %v13322_v8  ;;  %3942 = vmatprep.subr.bf16.mxu0 %v13322_v8 }
 0x4bb   : >> { %v2627_v22 = vmax.f32 %v2513_v32, 0.0 }
 0x4bc   : >> { %v2625_v21 = vmax.f32 %v2505_v47, 0.0 }
 0x4bd   : >> { %v2667_v39 = vpack.c.bf16 %v2627_v22, %v2626_v45  ;;  %12340 = vmatpush1.bf16.msra.mxu1 %v12700_v17  ;;  %3943 = vmatpush1.bf16.msra.mxu0 %v12700_v17 }
 0x4be   : >> { %v2666_v1 = vpack.c.bf16 %v2625_v21, %v2624_v13  ;;  %12325 = vmatprep.subr.bf16.mxu1 %v13322_v8  ;;  %3944 = vmatprep.subr.bf16.mxu0 %v13322_v8 }
 0x4bf   : >> { %3363 = vmatmul.mubr.bf16.gmra.mrb[100].mxu0 %v3109_v11 }
 0x4c0   : >> { %12293 = vmatprep.mubr.bf16.mxu1 %v2666_v1  ;;  %3372 = vmatprep.mubr.bf16.mxu0 %v13322_v8 }
 0x4c1   : >> { %12294 = vmatmul.mubr.bf16.gmra.mrb[44].mxu1 %v2667_v39  ;;  %3945 = vmatpush1.bf16.msra.mxu0 %v12701_v31 }
 0x4c2   : >> { %v12271_v10 = vpop.f32.mrb[20].mxu1  ;;  %12341 = vmatpush1.bf16.msra.mxu1 %v12701_v31  ;;  %3946 = vmatprep.subr.bf16.mxu0 %v13322_v8 }
 0x4c3   : >> { %v2870_v60 = vadd.f32 %v12271_v10, %v14629_v20  ;;  %v2861_v23 = vpop.f32.mrb[21].mxu1  ;;  %12326 = vmatprep.subr.bf16.mxu1 %v13322_v8 }
 0x4c4   : >> { %v2862_v58 = vadd.f32 %v14629_v20, %v2861_v23  ;;  %v12272_v5 = vpop.f32.mrb[22].mxu1 }
 0x4c5   : >> { %v2873_v59 = vadd.f32 %v12272_v5, %v14629_v20  ;;  %v2864_v63 = vpop.f32.mrb[23].mxu1  ;;  %v3058_v6 = vmax.f32 %v2870_v60, 0.0  ;;  %3947 = vmatpush1.bf16.msra.mxu0 %v12702_v26 }
 0x4c6   : >> { %v2865_v40 = vadd.f32 %v14629_v20, %v2864_v63  ;;  %v3056_v35 = vmax.f32 %v2862_v58, 0.0  ;;  %12342 = vmatpush1.bf16.msra.mxu1 %v12702_v26  ;;  %3948 = vmatprep.subr.bf16.mxu0 %v13322_v8 }
 0x4c7   : >> { %v3059_v48 = vmax.f32 %v2873_v59, 0.0  ;;  %12327 = vmatprep.subr.bf16.mxu1 %v13322_v8 }
 0x4c8   : >> { %v3057_v55 = vmax.f32 %v2865_v40, 0.0 }
 0x4c9   : >> { %v3111_v43 = vpack.c.bf16 %v3059_v48, %v3058_v6  ;;  %3949 = vmatpush1.bf16.msra.mxu0 %v12703_v19 }
 0x4ca   : >> { %v3110_v27 = vpack.c.bf16 %v3057_v55, %v3056_v35  ;;  %12343 = vmatpush1.bf16.msra.mxu1 %v12703_v19  ;;  %3950 = vmatprep.subr.bf16.mxu0 %v13322_v8 }
 0x4cb   : >> { %12328 = vmatprep.subr.bf16.mxu1 %v13322_v8 }
 0x4cc   : >> { %3373 = vmatmul.mubr.bf16.gmra.mrb[104].mxu0 %v3110_v27 }
 0x4cd   : >> { %3382 = vmatprep.mubr.bf16.mxu0 %v13322_v8  ;;  %3951 = vmatpush1.bf16.msra.mxu0 %v12704_v12 }
 0x4ce   : >> { %12344 = vmatpush1.bf16.msra.mxu1 %v12704_v12 }
 0x4d4   : >> { %3383 = vmatmul.mubr.bf16.gmra.mrb[108].mxu0 %v3111_v43 }
 0x4d5   : >> { %3392 = vmatprep.mubr.bf16.mxu0 %v13322_v8 }
 0x4db   : >> { %v12219_v50 = vpop.f32.mrb[48].mxu0 }
 0x4dc   : >> { %v2526_v14 = vadd.f32 %v14668_v4, %v12219_v50  ;;  %v2517_v15 = vpop.f32.mrb[49].mxu0 }
 0x4dd   : >> { %v2518_v49 = vadd.f32 %v14668_v4, %v2517_v15  ;;  %v12220_v46 = vpop.f32.mrb[50].mxu0 }
 0x4de   : >> { %v2529_v7 = vadd.f32 %v14668_v4, %v12220_v46  ;;  %v2520_v9 = vpop.f32.mrb[51].mxu0  ;;  %v2630_v62 = vmax.f32 %v2526_v14, 0.0 }
 0x4df   : >> { %v2521_v18 = vadd.f32 %v14668_v4, %v2520_v9  ;;  %v2628_v52 = vmax.f32 %v2518_v49, 0.0 }
 0x4e0   : >> { %v2631_v37 = vmax.f32 %v2529_v7, 0.0 }
 0x4e1   : >> { %v2629_v25 = vmax.f32 %v2521_v18, 0.0 }
 0x4e2   : >> { %v2669_v29 = vpack.c.bf16 %v2631_v37, %v2630_v62 }
 0x4e3   : >> { %v2668_v16 = vpack.c.bf16 %v2629_v25, %v2628_v52 }
 0x4e5   : >> { %12297 = vmatprep.mubr.bf16.mxu1 %v2668_v16 }
 0x4e6   : >> { %12298 = vmatmul.mubr.bf16.gmra.mrb[48].mxu1 %v2669_v29 }
 0x4e7   : >> { %v12275_v33 = vpop.f32.mrb[24].mxu1 }
 0x4e8   : >> { %v2886_v53 = vadd.f32 %v12275_v33, %v14629_v20  ;;  %v2877_v36 = vpop.f32.mrb[25].mxu1 }
 0x4e9   : >> { %v2878_v11 = vadd.f32 %v14629_v20, %v2877_v36  ;;  %v12276_v38 = vpop.f32.mrb[26].mxu1 }
 0x4ea   : >> { %v2889_v24 = vadd.f32 %v12276_v38, %v14629_v20  ;;  %v2880_v54 = vpop.f32.mrb[27].mxu1  ;;  %v3062_v30 = vmax.f32 %v2886_v53, 0.0 }
 0x4eb   : >> { %v2881_v42 = vadd.f32 %v14629_v20, %v2880_v54  ;;  %v3060_v51 = vmax.f32 %v2878_v11, 0.0 }
 0x4ec   : >> { %v3063_v3 = vmax.f32 %v2889_v24, 0.0 }
 0x4ed   : >> { %v3061_v28 = vmax.f32 %v2881_v42, 0.0 }
 0x4ee   : >> { %v3113_v61 = vpack.c.bf16 %v3063_v3, %v3062_v30 }
 0x4ef   : >> { %v3112_v44 = vpack.c.bf16 %v3061_v28, %v3060_v51  ;;  %v3150_v51 = vlaneseq }
 0x4f1   : >> { %3393 = vmatmul.mubr.bf16.gmra.mrb[112].mxu0 %v3112_v44  ;;  %v14851_v28 = vshrl.u32 %v3150_v51, 7 }
 0x4f2   : >> { %3402 = vmatprep.mubr.bf16.mxu0 %v13322_v8 }
 0x4f9   : >> { %3403 = vmatmul.mubr.bf16.gmra.mrb[116].mxu0 %v3113_v61 }
 0x4fa   : >> { %3412 = vmatprep.mubr.bf16.mxu0 %v13322_v8 }
 0x4fc   : >> { %v12223_v2 = vpop.f32.mrb[52].mxu0 }
 0x4fd   : >> { %v2542_v32 = vadd.f32 %v14668_v4, %v12223_v2  ;;  %v2533_v57 = vpop.f32.mrb[53].mxu0 }
 0x4fe   : >> { %v2534_v47 = vadd.f32 %v14668_v4, %v2533_v57  ;;  %v12224_v34 = vpop.f32.mrb[54].mxu0 }
 0x4ff   : >> { %v2545_v45 = vadd.f32 %v14668_v4, %v12224_v34  ;;  %v2536_v22 = vpop.f32.mrb[55].mxu0  ;;  %v2634_v21 = vmax.f32 %v2542_v32, 0.0  ;;  %v14856_v32 = vsub.s32 0, %v14851_v28  ;;  %v3148_v34 = vld [vmem:[#allocation14] sm:$0x3] }
 0x500   : >> { %v2537_v13 = vadd.f32 %v14668_v4, %v2536_v22  ;;  %v2632_v1 = vmax.f32 %v2534_v47, 0.0 }
 0x501   : >> { %v2635_v39 = vmax.f32 %v2545_v45, 0.0  ;;  %v14860_v45 = vsub.s32 1, %v14851_v28 }
 0x502   : >> { %v2633_v41 = vmax.f32 %v2537_v13, 0.0 }
 0x503   : >> { %v2671_v10 = vpack.c.bf16 %v2635_v39, %v2634_v21 }
 0x504   : >> { %v2670_v60 = vpack.c.bf16 %v2633_v41, %v2632_v1  ;;  %v14865_v41 = vrot.slane %v3148_v34, %v14856_v32 }
 0x506   : >> { %12301 = vmatprep.mubr.bf16.mxu1 %v2670_v60 }
 0x507   : >> { %12302 = vmatmul.mubr.bf16.gmra.mrb[52].mxu1 %v2671_v10 }
 0x508   : >> { %v12279_v23 = vpop.f32.mrb[28].mxu1 }
 0x509   : >> { %v2902_v58 = vadd.f32 %v12279_v23, %v14629_v20  ;;  %v2893_v5 = vpop.f32.mrb[29].mxu1  ;;  %v14868_v23 = vrot.slane %v3148_v34, %v14860_v45 }
 0x50a   : >> { %v2894_v56 = vadd.f32 %v14629_v20, %v2893_v5  ;;  %v12280_v59 = vpop.f32.mrb[30].mxu1 }
 0x50b   : >> { %v2905_v63 = vadd.f32 %v12280_v59, %v14629_v20  ;;  %v2896_v40 = vpop.f32.mrb[31].mxu1  ;;  %v3066_v48 = vmax.f32 %v2902_v58, 0.0 }
 0x50c   : >> { %v2897_v6 = vadd.f32 %v14629_v20, %v2896_v40  ;;  %v3064_v55 = vmax.f32 %v2894_v56, 0.0 }
 0x50d   : >> { %v3067_v35 = vmax.f32 %v2905_v63, 0.0 }
 0x50e   : >> { %v3065_v17 = vmax.f32 %v2897_v6, 0.0 }
 0x50f   : >> { %v3115_v43 = vpack.c.bf16 %v3067_v35, %v3066_v48 }
 0x510   : >> { %v3114_v27 = vpack.c.bf16 %v3065_v17, %v3064_v55 }
 0x512   : >> { %3413 = vmatmul.mubr.bf16.gmra.mrb[120].mxu0 %v3114_v27 }
 0x513   : >> { %3422 = vmatprep.mubr.bf16.mxu0 %v13322_v8 }
 0x51a   : >> { %3423 = vmatmul.mubr.bf16.gmra.mrb[124].mxu0 %v3115_v43 }
 0x51b   : >> { %3432 = vmatprep.mubr.bf16.mxu0 %v13322_v8 }
 0x521   : >> { %v12227_v31 = vpop.f32.mrb[56].mxu0 }
 0x522   : >> { %v2558_v26 = vadd.f32 %v14668_v4, %v12227_v31  ;;  %v2549_v19 = vpop.f32.mrb[57].mxu0 }
 0x523   : >> { %v2550_v12 = vadd.f32 %v14668_v4, %v2549_v19  ;;  %v12228_v50 = vpop.f32.mrb[58].mxu0 }
 0x524   : >> { %v2561_v14 = vadd.f32 %v14668_v4, %v12228_v50  ;;  %v2552_v15 = vpop.f32.mrb[59].mxu0  ;;  %v2638_v46 = vmax.f32 %v2558_v26, 0.0 }
 0x525   : >> { %v2553_v49 = vadd.f32 %v14668_v4, %v2552_v15  ;;  %v2636_v9 = vmax.f32 %v2550_v12, 0.0 }
 0x526   : >> { %v2639_v7 = vmax.f32 %v2561_v14, 0.0 }
 0x527   : >> { %v2637_v18 = vmax.f32 %v2553_v49, 0.0 }
 0x528   : >> { %v2673_v62 = vpack.c.bf16 %v2639_v7, %v2638_v46 }
 0x529   : >> { %v2672_v37 = vpack.c.bf16 %v2637_v18, %v2636_v9 }
 0x52b   : >> { %12305 = vmatprep.mubr.bf16.mxu1 %v2672_v37 }
 0x52c   : >> { %12306 = vmatmul.mubr.bf16.gmra.mrb[56].mxu1 %v2673_v62 }
 0x52d   : >> { %v12283_v52 = vpop.f32.mrb[32].mxu1 }
 0x52e   : >> { %v2918_v25 = vadd.f32 %v12283_v52, %v14629_v20  ;;  %v2909_v29 = vpop.f32.mrb[33].mxu1 }
 0x52f   : >> { %v2910_v16 = vadd.f32 %v14629_v20, %v2909_v29  ;;  %v12284_v33 = vpop.f32.mrb[34].mxu1 }
 0x530   : >> { %v2921_v53 = vadd.f32 %v12284_v33, %v14629_v20  ;;  %v2912_v36 = vpop.f32.mrb[35].mxu1  ;;  %v3070_v38 = vmax.f32 %v2918_v25, 0.0 }
 0x531   : >> { %v2913_v11 = vadd.f32 %v14629_v20, %v2912_v36  ;;  %v3068_v54 = vmax.f32 %v2910_v16, 0.0 }
 0x532   : >> { %v3071_v24 = vmax.f32 %v2921_v53, 0.0 }
 0x533   : >> { %v3069_v42 = vmax.f32 %v2913_v11, 0.0 }
 0x534   : >> { %v3117_v30 = vpack.c.bf16 %v3071_v24, %v3070_v38 }
 0x535   : >> { %v3116_v3 = vpack.c.bf16 %v3069_v42, %v3068_v54 }
 0x537   : >> { %3433 = vmatmul.mubr.bf16.gmra.mrb[128].mxu0 %v3116_v3 }
 0x538   : >> { %3442 = vmatprep.mubr.bf16.mxu0 %v13322_v8 }
 0x53f   : >> { %3443 = vmatmul.mubr.bf16.gmra.mrb[132].mxu0 %v3117_v30 }
 0x540   : >> { %3452 = vmatprep.mubr.bf16.mxu0 %v13322_v8 }
 0x542   : >> { %v12231_v61 = vpop.f32.mrb[60].mxu0 }
 0x543   : >> { %v2574_v44 = vadd.f32 %v14668_v4, %v12231_v61  ;;  %v2565_v2 = vpop.f32.mrb[61].mxu0 }
 0x544   : >> { %v2566_v57 = vadd.f32 %v14668_v4, %v2565_v2  ;;  %v12232_v47 = vpop.f32.mrb[62].mxu0 }
 0x545   : >> { %v2577_v22 = vadd.f32 %v14668_v4, %v12232_v47  ;;  %v2568_v13 = vpop.f32.mrb[63].mxu0  ;;  %v2642_v39 = vmax.f32 %v2574_v44, 0.0 }
 0x546   : >> { %v2569_v21 = vadd.f32 %v14668_v4, %v2568_v13  ;;  %v2640_v10 = vmax.f32 %v2566_v57, 0.0 }
 0x547   : >> { %v2643_v1 = vmax.f32 %v2577_v22, 0.0 }
 0x548   : >> { %v2641_v60 = vmax.f32 %v2569_v21, 0.0 }
 0x549   : >> { %v2675_v58 = vpack.c.bf16 %v2643_v1, %v2642_v39 }
 0x54a   : >> { %v2674_v5 = vpack.c.bf16 %v2641_v60, %v2640_v10  ;;  %v3274_v56 = vpop.f32.mrb[64].mxu0 }
 0x54b   : >> { %v3275_v59 = vadd.f32 %v3274_v56, %v14865_v41  ;;  %v3276_v63 = vpop.f32.mrb[65].mxu0 }
 0x54c   : >> { %v3277_v40 = vadd.f32 %v3276_v63, %v14868_v23  ;;  %12309 = vmatprep.mubr.bf16.mxu1 %v2674_v5  ;;  %v3278_v4 = vpop.f32.mrb[66].mxu0 }
 0x54d   : >> { %v3279_v6 = vadd.f32 %v3278_v4, %v14865_v41  ;;  %12310 = vmatmul.mubr.bf16.gmra.mrb[60].mxu1 %v2675_v58  ;;  %v3280_v48 = vpop.f32.mrb[67].mxu0  ;;  %v3593_v17 = vmax.f32 %v3275_v59, 0.0 }
 0x54e   : >> { %v3281_v35 = vadd.f32 %v3280_v48, %v14868_v23  ;;  %v12287_v55 = vpop.f32.mrb[36].mxu1  ;;  %v3594_v26 = vmax.f32 %v3277_v40, 0.0 }
 0x54f   : >> { %v3595_v43 = vmax.f32 %v3279_v6, 0.0  ;;  %v2934_v27 = vadd.f32 %v12287_v55, %v14629_v20  ;;  %v2925_v31 = vpop.f32.mrb[37].mxu1 }
 0x550   : >> { %v3596_v19 = vmax.f32 %v3281_v35, 0.0  ;;  %v2926_v12 = vadd.f32 %v14629_v20, %v2925_v31  ;;  %v12288_v50 = vpop.f32.mrb[38].mxu1 }
 0x551   : >> { %v14876_v14 = vpack.c.bf16 %v3595_v43, %v3593_v17  ;;  %v2937_v15 = vadd.f32 %v12288_v50, %v14629_v20  ;;  %v2928_v49 = vpop.f32.mrb[39].mxu1  ;;  %v3074_v18 = vmax.f32 %v2934_v27, 0.0 }
 0x552   : >> { %v14879_v46 = vpack.c.bf16 %v3596_v19, %v3594_v26  ;;  %v2929_v7 = vadd.f32 %v14629_v20, %v2928_v49  ;;  %v3284_v9 = vpop.f32.mrb[68].mxu0  ;;  %v3072_v25 = vmax.f32 %v2926_v12, 0.0 }
 0x553   : >> { %v3075_v62 = vmax.f32 %v2937_v15, 0.0  ;;  %v3285_v37 = vadd.f32 %v3284_v9, %v14865_v41  ;;  %v3286_v52 = vpop.f32.mrb[69].mxu0 }
 0x554   : >> { %v3073_v29 = vmax.f32 %v2929_v7, 0.0  ;;  %v3287_v16 = vadd.f32 %v3286_v52, %v14868_v23  ;;  %v3288_v33 = vpop.f32.mrb[70].mxu0 }
 0x555   : >> { %v3119_v53 = vpack.c.bf16 %v3075_v62, %v3074_v18  ;;  %v3289_v36 = vadd.f32 %v3288_v33, %v14865_v41  ;;  %v3290_v11 = vpop.f32.mrb[71].mxu0  ;;  %v3597_v54 = vmax.f32 %v3285_v37, 0.0 }
 0x556   : >> { %v3118_v38 = vpack.c.bf16 %v3073_v29, %v3072_v25  ;;  %v3291_v24 = vadd.f32 %v3290_v11, %v14868_v23  ;;  %v3598_v42 = vmax.f32 %v3287_v16, 0.0  ;;  %v14901_v11 = vld [vmem:[#allocation11] ss:$0 sm:$0xff] }
 0x557   : >> { %v3599_v20 = vmax.f32 %v3289_v36, 0.0 }
 0x558   : >> { %v3600_v30 = vmax.f32 %v3291_v24, 0.0  ;;  %3453 = vmatmul.mubr.bf16.gmra.mrb[136].mxu0 %v3118_v38 }
 0x559   : >> { %v3723_v3 = vpack.c.bf16 %v3599_v20, %v3597_v54  ;;  %3462 = vmatprep.mubr.bf16.mxu0 %v13322_v8 }
 0x55a   : >> { %v3724_v51 = vpack.c.bf16 %v3600_v30, %v3598_v42  ;;  %v3294_v61 = vpop.f32.mrb[72].mxu0 }
 0x55b   : >> { %v3295_v44 = vadd.f32 %v3294_v61, %v14865_v41  ;;  %v3296_v2 = vpop.f32.mrb[73].mxu0 }
 0x55c   : >> { %v3297_v57 = vadd.f32 %v3296_v2, %v14868_v23  ;;  %v3298_v47 = vpop.f32.mrb[74].mxu0  ;;  %3960 = vmatprep.mubr.bf16.mxu1 %v3724_v51 }
 0x55d   : >> { %v3299_v34 = vadd.f32 %v3298_v47, %v14865_v41  ;;  %v3300_v22 = vpop.f32.mrb[75].mxu0  ;;  %3961 = vmatmul.mubr.bf16.vlgmr.msra.gmra.mrb[64].mxu1 %v3723_v3  ;;  %v3601_v21 = vmax.f32 %v3295_v44, 0.0 }
 0x55e   : >> { %v3301_v13 = vadd.f32 %v3300_v22, %v14868_v23  ;;  %v3602_v1 = vmax.f32 %v3297_v57, 0.0 }
 0x55f   : >> { %v3603_v39 = vmax.f32 %v3299_v34, 0.0 }
 0x560   : >> { %v3604_v10 = vmax.f32 %v3301_v13, 0.0  ;;  %3463 = vmatmul.mubr.bf16.gmra.mrb[140].mxu0 %v3119_v53 }
 0x561   : >> { %v3725_v60 = vpack.c.bf16 %v3603_v39, %v3601_v21  ;;  %3472 = vmatprep.mubr.bf16.mxu0 %v13322_v8 }
 0x562   : >> { %v3726_v58 = vpack.c.bf16 %v3604_v10, %v3602_v1  ;;  %v3304_v5 = vpop.f32.mrb[76].mxu0 }
 0x563   : >> { %v3305_v56 = vadd.f32 %v3304_v5, %v14865_v41  ;;  %v3306_v59 = vpop.f32.mrb[77].mxu0 }
 0x564   : >> { %v3307_v63 = vadd.f32 %v3306_v59, %v14868_v23  ;;  %v3308_v40 = vpop.f32.mrb[78].mxu0  ;;  %3968 = vmatprep.mubr.bf16.mxu1 %v3726_v58 }
 0x565   : >> { %v3309_v4 = vadd.f32 %v3308_v40, %v14865_v41  ;;  %v3310_v6 = vpop.f32.mrb[79].mxu0  ;;  %3969 = vmatmul.mubr.bf16.gmra.mrb[68].mxu1 %v3725_v60  ;;  %v3605_v35 = vmax.f32 %v3305_v56, 0.0 }
 0x566   : >> { %v3311_v48 = vadd.f32 %v3310_v6, %v14868_v23  ;;  %v3606_v17 = vmax.f32 %v3307_v63, 0.0 }
 0x567   : >> { %v3607_v55 = vmax.f32 %v3309_v4, 0.0 }
 0x568   : >> { %v3608_v43 = vmax.f32 %v3311_v48, 0.0 }
 0x569   : >> { %v3727_v27 = vpack.c.bf16 %v3607_v55, %v3605_v35 }
 0x56a   : >> { %v3728_v31 = vpack.c.bf16 %v3608_v43, %v3606_v17  ;;  %v3314_v26 = vpop.f32.mrb[80].mxu0 }
 0x56b   : >> { %v3315_v19 = vadd.f32 %v3314_v26, %v14865_v41  ;;  %v3316_v12 = vpop.f32.mrb[81].mxu0 }
 0x56c   : >> { %v3317_v50 = vadd.f32 %v3316_v12, %v14868_v23  ;;  %v3318_v15 = vpop.f32.mrb[82].mxu0  ;;  %3976 = vmatprep.mubr.bf16.mxu1 %v3728_v31 }
 0x56d   : >> { %v3319_v49 = vadd.f32 %v3318_v15, %v14865_v41  ;;  %v3320_v7 = vpop.f32.mrb[83].mxu0  ;;  %3977 = vmatmul.mubr.bf16.gmra.mrb[72].mxu1 %v3727_v27  ;;  %v3609_v18 = vmax.f32 %v3315_v19, 0.0 }
 0x56e   : >> { %v3321_v9 = vadd.f32 %v3320_v7, %v14868_v23  ;;  %v3610_v37 = vmax.f32 %v3317_v50, 0.0 }
 0x56f   : >> { %v3611_v62 = vmax.f32 %v3319_v49, 0.0 }
 0x570   : >> { %v3612_v52 = vmax.f32 %v3321_v9, 0.0 }
 0x571   : >> { %v3729_v25 = vpack.c.bf16 %v3611_v62, %v3609_v18 }
 0x572   : >> { %v3730_v29 = vpack.c.bf16 %v3612_v52, %v3610_v37  ;;  %v3324_v16 = vpop.f32.mrb[84].mxu0 }
 0x573   : >> { %v3325_v33 = vadd.f32 %v3324_v16, %v14865_v41  ;;  %v12291_v53 = vpop.f32.mrb[40].mxu1  ;;  %v3326_v36 = vpop.f32.mrb[85].mxu0 }
 0x574   : >> { %v2950_v38 = vadd.f32 %v14901_v11, %v12291_v53  ;;  %v3327_v24 = vadd.f32 %v3326_v36, %v14868_v23  ;;  %v2941_v54 = vpop.f32.mrb[41].mxu1  ;;  %v3328_v20 = vpop.f32.mrb[86].mxu0  ;;  %3984 = vmatprep.mubr.bf16.mxu1 %v3730_v29 }
 0x575   : >> { %v2942_v42 = vadd.f32 %v14901_v11, %v2941_v54  ;;  %v3329_v30 = vadd.f32 %v3328_v20, %v14865_v41  ;;  %v12292_v3 = vpop.f32.mrb[42].mxu1  ;;  %v3330_v51 = vpop.f32.mrb[87].mxu0  ;;  %3985 = vmatmul.mubr.bf16.gmra.mrb[76].mxu1 %v3729_v25  ;;  %v3613_v57 = vmax.f32 %v3325_v33, 0.0 }
 0x576   : >> { %v2953_v61 = vadd.f32 %v14901_v11, %v12292_v3  ;;  %v3331_v44 = vadd.f32 %v3330_v51, %v14868_v23  ;;  %v2944_v2 = vpop.f32.mrb[43].mxu1  ;;  %v3078_v22 = vmax.f32 %v2950_v38, 0.0  ;;  %v3614_v13 = vmax.f32 %v3327_v24, 0.0 }
 0x577   : >> { %v3615_v47 = vmax.f32 %v3329_v30, 0.0  ;;  %v2945_v34 = vadd.f32 %v14901_v11, %v2944_v2  ;;  %v3076_v1 = vmax.f32 %v2942_v42, 0.0 }
 0x578   : >> { %v3079_v21 = vmax.f32 %v2953_v61, 0.0  ;;  %v3616_v39 = vmax.f32 %v3331_v44, 0.0 }
 0x579   : >> { %v3731_v10 = vpack.c.bf16 %v3615_v47, %v3613_v57  ;;  %v3077_v60 = vmax.f32 %v2945_v34, 0.0 }
 0x57a   : >> { %v3121_v58 = vpack.c.bf16 %v3079_v21, %v3078_v22  ;;  %v3732_v5 = vpack.c.bf16 %v3616_v39, %v3614_v13  ;;  %v3334_v56 = vpop.f32.mrb[88].mxu0 }
 0x57b   : >> { %v3120_v59 = vpack.c.bf16 %v3077_v60, %v3076_v1  ;;  %v3335_v63 = vadd.f32 %v3334_v56, %v14865_v41  ;;  %v3336_v40 = vpop.f32.mrb[89].mxu0 }
 0x57c   : >> { %v3337_v4 = vadd.f32 %v3336_v40, %v14868_v23  ;;  %v3338_v6 = vpop.f32.mrb[90].mxu0  ;;  %3992 = vmatprep.mubr.bf16.mxu1 %v3732_v5 }
 0x57d   : >> { %v3339_v48 = vadd.f32 %v3338_v6, %v14865_v41  ;;  %v3340_v35 = vpop.f32.mrb[91].mxu0  ;;  %3473 = vmatmul.mubr.bf16.gmra.mrb[144].mxu0 %v3120_v59  ;;  %3993 = vmatmul.mubr.bf16.gmra.mrb[80].mxu1 %v3731_v10  ;;  %v3617_v17 = vmax.f32 %v3335_v63, 0.0 }
 0x57e   : >> { %v3341_v55 = vadd.f32 %v3340_v35, %v14868_v23  ;;  %3482 = vmatprep.mubr.bf16.mxu0 %v13322_v8  ;;  %v3618_v27 = vmax.f32 %v3337_v4, 0.0 }
 0x57f   : >> { %v3619_v43 = vmax.f32 %v3339_v48, 0.0 }
 0x580   : >> { %v3620_v31 = vmax.f32 %v3341_v55, 0.0 }
 0x581   : >> { %v3733_v26 = vpack.c.bf16 %v3619_v43, %v3617_v17 }
 0x582   : >> { %v3734_v19 = vpack.c.bf16 %v3620_v31, %v3618_v27  ;;  %v3344_v12 = vpop.f32.mrb[92].mxu0 }
 0x583   : >> { %v3345_v50 = vadd.f32 %v3344_v12, %v14865_v41  ;;  %v3346_v15 = vpop.f32.mrb[93].mxu0 }
 0x584   : >> { %v3347_v49 = vadd.f32 %v3346_v15, %v14868_v23  ;;  %v3348_v7 = vpop.f32.mrb[94].mxu0  ;;  %4000 = vmatprep.mubr.bf16.mxu1 %v3734_v19 }
 0x585   : >> { %v3349_v9 = vadd.f32 %v3348_v7, %v14865_v41  ;;  %v3350_v18 = vpop.f32.mrb[95].mxu0  ;;  %3483 = vmatmul.mubr.bf16.gmra.mrb[148].mxu0 %v3121_v58  ;;  %4001 = vmatmul.mubr.bf16.gmra.mrb[84].mxu1 %v3733_v26  ;;  %v3621_v37 = vmax.f32 %v3345_v50, 0.0 }
 0x586   : >> { %v3351_v62 = vadd.f32 %v3350_v18, %v14868_v23  ;;  %3492 = vmatprep.mubr.bf16.mxu0 %v13322_v8  ;;  %v3622_v25 = vmax.f32 %v3347_v49, 0.0 }
 0x587   : >> { %v3623_v52 = vmax.f32 %v3349_v9, 0.0 }
 0x588   : >> { %v3624_v29 = vmax.f32 %v3351_v62, 0.0 }
 0x589   : >> { %v3735_v16 = vpack.c.bf16 %v3623_v52, %v3621_v37 }
 0x58a   : >> { %v3736_v33 = vpack.c.bf16 %v3624_v29, %v3622_v25  ;;  %v3354_v53 = vpop.f32.mrb[96].mxu0 }
 0x58b   : >> { %v3355_v36 = vadd.f32 %v3354_v53, %v14865_v41  ;;  %v3356_v38 = vpop.f32.mrb[97].mxu0 }
 0x58c   : >> { %v3357_v24 = vadd.f32 %v3356_v38, %v14868_v23  ;;  %v3358_v54 = vpop.f32.mrb[98].mxu0  ;;  %4008 = vmatprep.mubr.bf16.mxu1 %v3736_v33 }
 0x58d   : >> { %v3359_v20 = vadd.f32 %v3358_v54, %v14865_v41  ;;  %v3360_v42 = vpop.f32.mrb[99].mxu0  ;;  %4009 = vmatmul.mubr.bf16.gmra.mrb[88].mxu1 %v3735_v16  ;;  %v3625_v3 = vmax.f32 %v3355_v36, 0.0 }
 0x58e   : >> { %v3361_v30 = vadd.f32 %v3360_v42, %v14868_v23  ;;  %v3626_v61 = vmax.f32 %v3357_v24, 0.0 }
 0x58f   : >> { %v3627_v51 = vmax.f32 %v3359_v20, 0.0 }
 0x590   : >> { %v3628_v44 = vmax.f32 %v3361_v30, 0.0 }
 0x591   : >> { %v3737_v2 = vpack.c.bf16 %v3627_v51, %v3625_v3 }
 0x592   : >> { %v3738_v57 = vpack.c.bf16 %v3628_v44, %v3626_v61  ;;  %v3364_v47 = vpop.f32.mrb[100].mxu0 }
 0x593   : >> { %v3365_v34 = vadd.f32 %v3364_v47, %v14865_v41  ;;  %v3366_v22 = vpop.f32.mrb[101].mxu0 }
 0x594   : >> { %v3367_v13 = vadd.f32 %v3366_v22, %v14868_v23  ;;  %v12295_v21 = vpop.f32.mrb[44].mxu1  ;;  %v3368_v39 = vpop.f32.mrb[102].mxu0  ;;  %4016 = vmatprep.mubr.bf16.mxu1 %v3738_v57 }
 0x595   : >> { %v2966_v1 = vadd.f32 %v14901_v11, %v12295_v21  ;;  %v3369_v10 = vadd.f32 %v3368_v39, %v14865_v41  ;;  %v2957_v60 = vpop.f32.mrb[45].mxu1  ;;  %v3370_v58 = vpop.f32.mrb[103].mxu0  ;;  %4017 = vmatmul.mubr.bf16.gmra.mrb[92].mxu1 %v3737_v2  ;;  %v3629_v63 = vmax.f32 %v3365_v34, 0.0 }
 0x596   : >> { %v2958_v5 = vadd.f32 %v14901_v11, %v2957_v60  ;;  %v3371_v56 = vadd.f32 %v3370_v58, %v14868_v23  ;;  %v12296_v59 = vpop.f32.mrb[46].mxu1  ;;  %v3630_v48 = vmax.f32 %v3367_v13, 0.0 }
 0x597   : >> { %v3631_v40 = vmax.f32 %v3369_v10, 0.0  ;;  %v2969_v4 = vadd.f32 %v14901_v11, %v12296_v59  ;;  %v2960_v6 = vpop.f32.mrb[47].mxu1  ;;  %v3082_v17 = vmax.f32 %v2966_v1, 0.0 }
 0x598   : >> { %v3632_v35 = vmax.f32 %v3371_v56, 0.0  ;;  %v2961_v55 = vadd.f32 %v14901_v11, %v2960_v6  ;;  %v3080_v31 = vmax.f32 %v2958_v5, 0.0 }
 0x599   : >> { %v3739_v43 = vpack.c.bf16 %v3631_v40, %v3629_v63  ;;  %v3083_v27 = vmax.f32 %v2969_v4, 0.0 }
 0x59a   : >> { %v3740_v26 = vpack.c.bf16 %v3632_v35, %v3630_v48  ;;  %v3081_v19 = vmax.f32 %v2961_v55, 0.0 }
 0x59b   : >> { %v3123_v12 = vpack.c.bf16 %v3083_v27, %v3082_v17 }
 0x59c   : >> { %v3122_v50 = vpack.c.bf16 %v3081_v19, %v3080_v31  ;;  %4024 = vmatprep.mubr.bf16.mxu1 %v3740_v26 }
 0x59d   : >> { %4025 = vmatmul.mubr.bf16.gmra.mrb[96].mxu1 %v3739_v43 }
 0x59e   : >> { %3493 = vmatmul.mubr.bf16.gmra.mrb[152].mxu0 %v3122_v50 }
 0x59f   : >> { %v3374_v15 = vpop.f32.mrb[104].mxu0  ;;  %3502 = vmatprep.mubr.bf16.mxu0 %v13322_v8 }
 0x5a0   : >> { %v3375_v49 = vadd.f32 %v3374_v15, %v14865_v41  ;;  %v3376_v7 = vpop.f32.mrb[105].mxu0 }
 0x5a1   : >> { %v3377_v9 = vadd.f32 %v3376_v7, %v14868_v23  ;;  %v3378_v18 = vpop.f32.mrb[106].mxu0 }
 0x5a2   : >> { %v3379_v62 = vadd.f32 %v3378_v18, %v14865_v41  ;;  %v3380_v37 = vpop.f32.mrb[107].mxu0  ;;  %v3633_v25 = vmax.f32 %v3375_v49, 0.0 }
 0x5a3   : >> { %v3381_v52 = vadd.f32 %v3380_v37, %v14868_v23  ;;  %v3634_v16 = vmax.f32 %v3377_v9, 0.0 }
 0x5a4   : >> { %v3635_v29 = vmax.f32 %v3379_v62, 0.0 }
 0x5a5   : >> { %v3636_v33 = vmax.f32 %v3381_v52, 0.0 }
 0x5a6   : >> { %v3741_v53 = vpack.c.bf16 %v3635_v29, %v3633_v25  ;;  %3503 = vmatmul.mubr.bf16.gmra.mrb[156].mxu0 %v3123_v12 }
 0x5a7   : >> { %v3742_v36 = vpack.c.bf16 %v3636_v33, %v3634_v16  ;;  %v3384_v38 = vpop.f32.mrb[108].mxu0  ;;  %3512 = vmatprep.mubr.bf16.mxu0 %v13322_v8 }
 0x5a8   : >> { %v3385_v24 = vadd.f32 %v3384_v38, %v14865_v41  ;;  %v3386_v54 = vpop.f32.mrb[109].mxu0 }
 0x5a9   : >> { %v3387_v20 = vadd.f32 %v3386_v54, %v14868_v23  ;;  %v3388_v42 = vpop.f32.mrb[110].mxu0  ;;  %4032 = vmatprep.mubr.bf16.mxu1 %v3742_v36 }
 0x5aa   : >> { %v3389_v30 = vadd.f32 %v3388_v42, %v14865_v41  ;;  %v3390_v3 = vpop.f32.mrb[111].mxu0  ;;  %4033 = vmatmul.mubr.bf16.gmra.mrb[100].mxu1 %v3741_v53  ;;  %v3637_v61 = vmax.f32 %v3385_v24, 0.0 }
 0x5ab   : >> { %v3391_v51 = vadd.f32 %v3390_v3, %v14868_v23  ;;  %v3638_v2 = vmax.f32 %v3387_v20, 0.0 }
 0x5ac   : >> { %v3639_v44 = vmax.f32 %v3389_v30, 0.0 }
 0x5ad   : >> { %v3640_v57 = vmax.f32 %v3391_v51, 0.0 }
 0x5ae   : >> { %v3743_v47 = vpack.c.bf16 %v3639_v44, %v3637_v61 }
 0x5af   : >> { %v3744_v34 = vpack.c.bf16 %v3640_v57, %v3638_v2 }
 0x5b1   : >> { %4040 = vmatprep.mubr.bf16.mxu1 %v3744_v34 }
 0x5b2   : >> { %4041 = vmatmul.mubr.bf16.gmra.mrb[104].mxu1 %v3743_v47 }
 0x5b9   : >> { %v12299_v22 = vpop.f32.mrb[48].mxu1 }
 0x5ba   : >> { %v2982_v13 = vadd.f32 %v14901_v11, %v12299_v22  ;;  %v2973_v21 = vpop.f32.mrb[49].mxu1 }
 0x5bb   : >> { %v2974_v39 = vadd.f32 %v14901_v11, %v2973_v21  ;;  %v12300_v1 = vpop.f32.mrb[50].mxu1 }
 0x5bc   : >> { %v2985_v10 = vadd.f32 %v14901_v11, %v12300_v1  ;;  %v2976_v60 = vpop.f32.mrb[51].mxu1  ;;  %v3086_v5 = vmax.f32 %v2982_v13, 0.0 }
 0x5bd   : >> { %v2977_v58 = vadd.f32 %v14901_v11, %v2976_v60  ;;  %v3084_v59 = vmax.f32 %v2974_v39, 0.0 }
 0x5be   : >> { %v3087_v56 = vmax.f32 %v2985_v10, 0.0 }
 0x5bf   : >> { %v3085_v63 = vmax.f32 %v2977_v58, 0.0 }
 0x5c0   : >> { %v3125_v40 = vpack.c.bf16 %v3087_v56, %v3086_v5 }
 0x5c1   : >> { %v3124_v4 = vpack.c.bf16 %v3085_v63, %v3084_v59 }
 0x5c3   : >> { %3513 = vmatmul.mubr.bf16.gmra.mrb[160].mxu0 %v3124_v4 }
 0x5c4   : >> { %v3394_v6 = vpop.f32.mrb[112].mxu0  ;;  %3522 = vmatprep.mubr.bf16.mxu0 %v13322_v8 }
 0x5c5   : >> { %v3395_v48 = vadd.f32 %v3394_v6, %v14865_v41  ;;  %v3396_v35 = vpop.f32.mrb[113].mxu0 }
 0x5c6   : >> { %v3397_v55 = vadd.f32 %v3396_v35, %v14868_v23  ;;  %v3398_v17 = vpop.f32.mrb[114].mxu0 }
 0x5c7   : >> { %v3399_v43 = vadd.f32 %v3398_v17, %v14865_v41  ;;  %v3400_v27 = vpop.f32.mrb[115].mxu0  ;;  %v3641_v26 = vmax.f32 %v3395_v48, 0.0 }
 0x5c8   : >> { %v3401_v31 = vadd.f32 %v3400_v27, %v14868_v23  ;;  %v3642_v12 = vmax.f32 %v3397_v55, 0.0 }
 0x5c9   : >> { %v3643_v19 = vmax.f32 %v3399_v43, 0.0 }
 0x5ca   : >> { %v3644_v50 = vmax.f32 %v3401_v31, 0.0 }
 0x5cb   : >> { %v3745_v15 = vpack.c.bf16 %v3643_v19, %v3641_v26  ;;  %3523 = vmatmul.mubr.bf16.gmra.mrb[164].mxu0 %v3125_v40 }
 0x5cc   : >> { %v3746_v49 = vpack.c.bf16 %v3644_v50, %v3642_v12  ;;  %v3404_v7 = vpop.f32.mrb[116].mxu0  ;;  %3532 = vmatprep.mubr.bf16.mxu0 %v13322_v8 }
 0x5cd   : >> { %v3405_v9 = vadd.f32 %v3404_v7, %v14865_v41  ;;  %v3406_v18 = vpop.f32.mrb[117].mxu0 }
 0x5ce   : >> { %v3407_v62 = vadd.f32 %v3406_v18, %v14868_v23  ;;  %v3408_v37 = vpop.f32.mrb[118].mxu0  ;;  %4048 = vmatprep.mubr.bf16.mxu1 %v3746_v49 }
 0x5cf   : >> { %v3409_v52 = vadd.f32 %v3408_v37, %v14865_v41  ;;  %v3410_v25 = vpop.f32.mrb[119].mxu0  ;;  %4049 = vmatmul.mubr.bf16.gmra.mrb[108].mxu1 %v3745_v15  ;;  %v3645_v16 = vmax.f32 %v3405_v9, 0.0 }
 0x5d0   : >> { %v3411_v29 = vadd.f32 %v3410_v25, %v14868_v23  ;;  %v3646_v53 = vmax.f32 %v3407_v62, 0.0 }
 0x5d1   : >> { %v3647_v33 = vmax.f32 %v3409_v52, 0.0 }
 0x5d2   : >> { %v3648_v36 = vmax.f32 %v3411_v29, 0.0 }
 0x5d3   : >> { %v3747_v38 = vpack.c.bf16 %v3647_v33, %v3645_v16 }
 0x5d4   : >> { %v3748_v24 = vpack.c.bf16 %v3648_v36, %v3646_v53 }
 0x5d6   : >> { %4056 = vmatprep.mubr.bf16.mxu1 %v3748_v24 }
 0x5d7   : >> { %4057 = vmatmul.mubr.bf16.gmra.mrb[112].mxu1 %v3747_v38 }
 0x5da   : >> { %v12303_v54 = vpop.f32.mrb[52].mxu1 }
 0x5db   : >> { %v2998_v20 = vadd.f32 %v14901_v11, %v12303_v54  ;;  %v2989_v42 = vpop.f32.mrb[53].mxu1 }
 0x5dc   : >> { %v2990_v30 = vadd.f32 %v14901_v11, %v2989_v42  ;;  %v12304_v3 = vpop.f32.mrb[54].mxu1 }
 0x5dd   : >> { %v3001_v51 = vadd.f32 %v14901_v11, %v12304_v3  ;;  %v2992_v61 = vpop.f32.mrb[55].mxu1  ;;  %v3090_v2 = vmax.f32 %v2998_v20, 0.0 }
 0x5de   : >> { %v2993_v44 = vadd.f32 %v14901_v11, %v2992_v61  ;;  %v3088_v47 = vmax.f32 %v2990_v30, 0.0 }
 0x5df   : >> { %v3091_v57 = vmax.f32 %v3001_v51, 0.0 }
 0x5e0   : >> { %v3089_v34 = vmax.f32 %v2993_v44, 0.0 }
 0x5e1   : >> { %v3127_v22 = vpack.c.bf16 %v3091_v57, %v3090_v2 }
 0x5e2   : >> { %v3126_v13 = vpack.c.bf16 %v3089_v34, %v3088_v47 }
 0x5e4   : >> { %3533 = vmatmul.mubr.bf16.gmra.mrb[168].mxu0 %v3126_v13 }
 0x5e5   : >> { %v3414_v21 = vpop.f32.mrb[120].mxu0  ;;  %3542 = vmatprep.mubr.bf16.mxu0 %v13322_v8 }
 0x5e6   : >> { %v3415_v39 = vadd.f32 %v3414_v21, %v14865_v41  ;;  %v3416_v1 = vpop.f32.mrb[121].mxu0 }
 0x5e7   : >> { %v3417_v10 = vadd.f32 %v3416_v1, %v14868_v23  ;;  %v3418_v60 = vpop.f32.mrb[122].mxu0 }
 0x5e8   : >> { %v3419_v58 = vadd.f32 %v3418_v60, %v14865_v41  ;;  %v3420_v5 = vpop.f32.mrb[123].mxu0  ;;  %v3649_v59 = vmax.f32 %v3415_v39, 0.0 }
 0x5e9   : >> { %v3421_v56 = vadd.f32 %v3420_v5, %v14868_v23  ;;  %v3650_v40 = vmax.f32 %v3417_v10, 0.0 }
 0x5ea   : >> { %v3651_v63 = vmax.f32 %v3419_v58, 0.0 }
 0x5eb   : >> { %v3652_v4 = vmax.f32 %v3421_v56, 0.0 }
 0x5ec   : >> { %v3749_v6 = vpack.c.bf16 %v3651_v63, %v3649_v59  ;;  %3543 = vmatmul.mubr.bf16.gmra.mrb[172].mxu0 %v3127_v22 }
 0x5ed   : >> { %v3750_v48 = vpack.c.bf16 %v3652_v4, %v3650_v40  ;;  %v3424_v35 = vpop.f32.mrb[124].mxu0  ;;  %3552 = vmatprep.mubr.bf16.mxu0 %v13322_v8 }
 0x5ee   : >> { %v3425_v55 = vadd.f32 %v3424_v35, %v14865_v41  ;;  %v3426_v17 = vpop.f32.mrb[125].mxu0 }
 0x5ef   : >> { %v3427_v43 = vadd.f32 %v3426_v17, %v14868_v23  ;;  %v3428_v27 = vpop.f32.mrb[126].mxu0  ;;  %4064 = vmatprep.mubr.bf16.mxu1 %v3750_v48 }
 0x5f0   : >> { %v3429_v31 = vadd.f32 %v3428_v27, %v14865_v41  ;;  %v3430_v26 = vpop.f32.mrb[127].mxu0  ;;  %4065 = vmatmul.mubr.bf16.gmra.mrb[116].mxu1 %v3749_v6  ;;  %v3653_v12 = vmax.f32 %v3425_v55, 0.0 }
 0x5f1   : >> { %v3431_v19 = vadd.f32 %v3430_v26, %v14868_v23  ;;  %v3654_v15 = vmax.f32 %v3427_v43, 0.0 }
 0x5f2   : >> { %v3655_v50 = vmax.f32 %v3429_v31, 0.0 }
 0x5f3   : >> { %v3656_v49 = vmax.f32 %v3431_v19, 0.0 }
 0x5f4   : >> { %v3751_v7 = vpack.c.bf16 %v3655_v50, %v3653_v12 }
 0x5f5   : >> { %v3752_v9 = vpack.c.bf16 %v3656_v49, %v3654_v15 }
 0x5f7   : >> { %4072 = vmatprep.mubr.bf16.mxu1 %v3752_v9 }
 0x5f8   : >> { %4073 = vmatmul.mubr.bf16.gmra.mrb[120].mxu1 %v3751_v7 }
 0x5ff   : >> { %v12307_v18 = vpop.f32.mrb[56].mxu1 }
 0x600   : >> { %v3014_v62 = vadd.f32 %v14901_v11, %v12307_v18  ;;  %v3005_v37 = vpop.f32.mrb[57].mxu1 }
 0x601   : >> { %v3006_v52 = vadd.f32 %v14901_v11, %v3005_v37  ;;  %v12308_v25 = vpop.f32.mrb[58].mxu1 }
 0x602   : >> { %v3017_v29 = vadd.f32 %v14901_v11, %v12308_v25  ;;  %v3008_v16 = vpop.f32.mrb[59].mxu1  ;;  %v3094_v53 = vmax.f32 %v3014_v62, 0.0 }
 0x603   : >> { %v3009_v33 = vadd.f32 %v14901_v11, %v3008_v16  ;;  %v3092_v38 = vmax.f32 %v3006_v52, 0.0 }
 0x604   : >> { %v3095_v36 = vmax.f32 %v3017_v29, 0.0 }
 0x605   : >> { %v3093_v24 = vmax.f32 %v3009_v33, 0.0 }
 0x606   : >> { %v3129_v54 = vpack.c.bf16 %v3095_v36, %v3094_v53 }
 0x607   : >> { %v3128_v20 = vpack.c.bf16 %v3093_v24, %v3092_v38 }
 0x609   : >> { %3553 = vmatmul.mubr.bf16.gmra.mrb[176].mxu0 %v3128_v20 }
 0x60a   : >> { %v3434_v42 = vpop.f32.mrb[128].mxu0  ;;  %3562 = vmatprep.mubr.bf16.mxu0 %v13322_v8 }
 0x60b   : >> { %v3435_v30 = vadd.f32 %v3434_v42, %v14865_v41  ;;  %v3436_v3 = vpop.f32.mrb[129].mxu0 }
 0x60c   : >> { %v3437_v51 = vadd.f32 %v3436_v3, %v14868_v23  ;;  %v3438_v61 = vpop.f32.mrb[130].mxu0 }
 0x60d   : >> { %v3439_v44 = vadd.f32 %v3438_v61, %v14865_v41  ;;  %v3440_v2 = vpop.f32.mrb[131].mxu0  ;;  %v3657_v47 = vmax.f32 %v3435_v30, 0.0 }
 0x60e   : >> { %v3441_v57 = vadd.f32 %v3440_v2, %v14868_v23  ;;  %v3658_v22 = vmax.f32 %v3437_v51, 0.0 }
 0x60f   : >> { %v3659_v34 = vmax.f32 %v3439_v44, 0.0 }
 0x610   : >> { %v3660_v13 = vmax.f32 %v3441_v57, 0.0 }
 0x611   : >> { %v3753_v21 = vpack.c.bf16 %v3659_v34, %v3657_v47  ;;  %3563 = vmatmul.mubr.bf16.gmra.mrb[180].mxu0 %v3129_v54 }
 0x612   : >> { %v3754_v39 = vpack.c.bf16 %v3660_v13, %v3658_v22  ;;  %v3444_v1 = vpop.f32.mrb[132].mxu0  ;;  %3572 = vmatprep.mubr.bf16.mxu0 %v13322_v8 }
 0x613   : >> { %v3445_v10 = vadd.f32 %v3444_v1, %v14865_v41  ;;  %v3446_v60 = vpop.f32.mrb[133].mxu0 }
 0x614   : >> { %v3447_v58 = vadd.f32 %v3446_v60, %v14868_v23  ;;  %v3448_v5 = vpop.f32.mrb[134].mxu0  ;;  %4080 = vmatprep.mubr.bf16.mxu1 %v3754_v39 }
 0x615   : >> { %v3449_v56 = vadd.f32 %v3448_v5, %v14865_v41  ;;  %v3450_v59 = vpop.f32.mrb[135].mxu0  ;;  %4081 = vmatmul.mubr.bf16.gmra.mrb[124].mxu1 %v3753_v21  ;;  %v3661_v40 = vmax.f32 %v3445_v10, 0.0  ;;  %v14998_v21 = vld [vmem:[#allocation16] ss:$0 sm:$0xff] }
 0x616   : >> { %v3451_v63 = vadd.f32 %v3450_v59, %v14868_v23  ;;  %v3662_v6 = vmax.f32 %v3447_v58, 0.0 }
 0x617   : >> { %v3663_v4 = vmax.f32 %v3449_v56, 0.0 }
 0x618   : >> { %v3664_v48 = vmax.f32 %v3451_v63, 0.0 }
 0x619   : >> { %v3755_v35 = vpack.c.bf16 %v3663_v4, %v3661_v40 }
 0x61a   : >> { %v3756_v55 = vpack.c.bf16 %v3664_v48, %v3662_v6 }
 0x61c   : >> { %4088 = vmatprep.mubr.bf16.mxu1 %v3756_v55 }
 0x61d   : >> { %4089 = vmatmul.mubr.bf16.gmra.mrb[128].mxu1 %v3755_v35 }
 0x620   : >> { %v12311_v17 = vpop.f32.mrb[60].mxu1 }
 0x621   : >> { %v3030_v43 = vadd.f32 %v14901_v11, %v12311_v17  ;;  %v3021_v27 = vpop.f32.mrb[61].mxu1 }
 0x622   : >> { %v3022_v31 = vadd.f32 %v14901_v11, %v3021_v27  ;;  %v12312_v26 = vpop.f32.mrb[62].mxu1 }
 0x623   : >> { %v3033_v19 = vadd.f32 %v14901_v11, %v12312_v26  ;;  %v3024_v12 = vpop.f32.mrb[63].mxu1  ;;  %v3098_v15 = vmax.f32 %v3030_v43, 0.0 }
 0x624   : >> { %v3025_v50 = vadd.f32 %v14901_v11, %v3024_v12  ;;  %v3096_v7 = vmax.f32 %v3022_v31, 0.0 }
 0x625   : >> { %v3099_v49 = vmax.f32 %v3033_v19, 0.0 }
 0x626   : >> { %v3097_v9 = vmax.f32 %v3025_v50, 0.0 }
 0x627   : >> { %v3131_v18 = vpack.c.bf16 %v3099_v49, %v3098_v15 }
 0x628   : >> { %v3130_v62 = vpack.c.bf16 %v3097_v9, %v3096_v7 }
 0x62a   : >> { %3573 = vmatmul.mubr.bf16.gmra.mrb[184].mxu0 %v3130_v62 }
 0x62b   : >> { %v3454_v37 = vpop.f32.mrb[136].mxu0  ;;  %3582 = vmatprep.mubr.bf16.mxu0 %v13322_v8 }
 0x62c   : >> { %v3455_v52 = vadd.f32 %v3454_v37, %v14865_v41  ;;  %v3456_v25 = vpop.f32.mrb[137].mxu0 }
 0x62d   : >> { %v3457_v29 = vadd.f32 %v3456_v25, %v14868_v23  ;;  %v3458_v16 = vpop.f32.mrb[138].mxu0 }
 0x62e   : >> { %v3459_v33 = vadd.f32 %v3458_v16, %v14865_v41  ;;  %v3460_v53 = vpop.f32.mrb[139].mxu0  ;;  %v3665_v36 = vmax.f32 %v3455_v52, 0.0 }
 0x62f   : >> { %v3461_v11 = vadd.f32 %v3460_v53, %v14868_v23  ;;  %v3666_v54 = vmax.f32 %v3457_v29, 0.0 }
 0x630   : >> { %v3667_v38 = vmax.f32 %v3459_v33, 0.0  ;;  %v3962_v24 = vpop.f32.mrb[64].mxu1 }
 0x631   : >> { %v3668_v20 = vmax.f32 %v3461_v11, 0.0  ;;  %v3964_v42 = vpop.f32.mrb[65].mxu1  ;;  %v3963_v48 = vadd.f32 %v14998_v21, %v3962_v24 }
 0x632   : >> { %v3757_v30 = vpack.c.bf16 %v3667_v38, %v3665_v36  ;;  %3583 = vmatmul.mubr.bf16.gmra.mrb[188].mxu0 %v3131_v18  ;;  %v3965_v8 = vpop.f32.mrb[66].mxu1 }
 0x633   : >> { %v3758_v3 = vpack.c.bf16 %v3668_v20, %v3666_v54  ;;  %v3464_v51 = vpop.f32.mrb[140].mxu0  ;;  %3952 = vmatprep.mubr.bf16.mxu0 %v14879_v46  ;;  %v3967_v61 = vpop.f32.mrb[67].mxu1  ;;  %v3966_v55 = vadd.f32 %v14998_v21, %v3965_v8  ;;  %v4211_v31 = vmax.f32 %v3963_v48, 0.0 }
 0x634   : >> { %v3465_v44 = vadd.f32 %v3464_v51, %v14865_v41  ;;  %v3466_v2 = vpop.f32.mrb[141].mxu0 }
 0x635   : >> { %v3467_v57 = vadd.f32 %v3466_v2, %v14868_v23  ;;  %v3468_v47 = vpop.f32.mrb[142].mxu0  ;;  %4096 = vmatprep.mubr.bf16.mxu1 %v3758_v3  ;;  %v4212_v50 = vmax.f32 %v3966_v55, 0.0  ;;  %v4276_v9 = vsel %vm4273_vm1, %v4211_v31, -inf }
 0x636   : >> { %v3469_v34 = vadd.f32 %v3468_v47, %v14865_v41  ;;  %v3470_v22 = vpop.f32.mrb[143].mxu0  ;;  %4097 = vmatmul.mubr.bf16.gmra.mrb[132].mxu1 %v3757_v30  ;;  %v3669_v39 = vmax.f32 %v3465_v44, 0.0 }
 0x637   : >> { %v3471_v13 = vadd.f32 %v3470_v22, %v14868_v23  ;;  %v3670_v46 = vmax.f32 %v3467_v57, 0.0  ;;  %v4277_v52 = vsel %vm4273_vm1, %v4212_v50, -inf }
 0x638   : >> { %v3671_v1 = vmax.f32 %v3469_v34, 0.0  ;;  %v3970_v10 = vpop.f32.mrb[68].mxu1 }
 0x639   : >> { %v3672_v60 = vmax.f32 %v3471_v13, 0.0  ;;  %v3971_v58 = vadd.f32 %v14998_v21, %v3970_v10  ;;  %v3972_v5 = vpop.f32.mrb[69].mxu1 }
 0x63a   : >> { %v3759_v56 = vpack.c.bf16 %v3671_v1, %v3669_v39  ;;  %3953 = vmatmul.mubr.bf16.vlgmr.msra.gmra.mrb[192].mxu0 %v14876_v14  ;;  %v3973_v59 = vpop.f32.mrb[70].mxu1 }
 0x63b   : >> { %v3760_v63 = vpack.c.bf16 %v3672_v60, %v3670_v46  ;;  %v4213_v40 = vmax.f32 %v3971_v58, 0.0  ;;  %v3974_v4 = vadd.f32 %v14998_v21, %v3973_v59  ;;  %v3975_v6 = vpop.f32.mrb[71].mxu1 }
 0x63d   : >> { %v4214_v35 = vmax.f32 %v3974_v4, 0.0  ;;  %4104 = vmatprep.mubr.bf16.mxu1 %v3760_v63  ;;  %v4278_v17 = vsel %vm4273_vm1, %v4213_v40, -inf }
 0x63e   : >> { %4105 = vmatmul.mubr.bf16.gmra.mrb[136].mxu1 %v3759_v56 }
 0x63f   : >> { %v4280_v43 = vsel %vm4273_vm1, %v4214_v35, -inf }
 0x640   : >> { %v4279_v27 = vmax.f32 %v4280_v43, %v4278_v17  ;;  %v3978_v14 = vpop.f32.mrb[72].mxu1 }
 0x641   : >> { %v3979_v26 = vadd.f32 %v14998_v21, %v3978_v14  ;;  %v3980_v19 = vpop.f32.mrb[73].mxu1 }
 0x642   : >> { %v3981_v12 = vpop.f32.mrb[74].mxu1 }
 0x643   : >> { %v4215_v15 = vmax.f32 %v3979_v26, 0.0  ;;  %v3982_v49 = vadd.f32 %v14998_v21, %v3981_v12  ;;  %v3983_v7 = vpop.f32.mrb[75].mxu1 }
 0x645   : >> { %v4282_v18 = vsel %vm4273_vm1, %v4215_v15, -inf  ;;  %v4216_v62 = vmax.f32 %v3982_v49, 0.0 }
 0x646   : >> { %v4283_v37 = vmax.f32 %v4276_v9, %v4282_v18 }
 0x647   : >> { %v4284_v25 = vsel %vm4273_vm1, %v4216_v62, -inf }
 0x648   : >> { %v4285_v29 = vmax.f32 %v4277_v52, %v4284_v25  ;;  %v3986_v16 = vpop.f32.mrb[76].mxu1 }
 0x649   : >> { %v3987_v33 = vadd.f32 %v14998_v21, %v3986_v16  ;;  %v3988_v53 = vpop.f32.mrb[77].mxu1 }
 0x64a   : >> { %v3989_v11 = vpop.f32.mrb[78].mxu1 }
 0x64b   : >> { %v4217_v36 = vmax.f32 %v3987_v33, 0.0  ;;  %v3990_v38 = vadd.f32 %v14998_v21, %v3989_v11  ;;  %v3991_v24 = vpop.f32.mrb[79].mxu1 }
 0x64d   : >> { %v4286_v54 = vsel %vm4273_vm1, %v4217_v36, -inf  ;;  %v4218_v20 = vmax.f32 %v3990_v38, 0.0 }
 0x64e   : >> { %v4287_v42 = vmax.f32 %v4279_v27, %v4286_v54 }
 0x64f   : >> { %v4288_v30 = vsel %vm4273_vm1, %v4218_v20, -inf }
 0x650   : >> { %v4295_v8 = vmax.f32 %v4287_v42, %v4288_v30  ;;  %v3474_v3 = vpop.f32.mrb[144].mxu0  ;;  %v3994_v51 = vpop.f32.mrb[80].mxu1 }
 0x651   : >> { %v3475_v61 = vadd.f32 %v3474_v3, %v14865_v41  ;;  %v3995_v44 = vadd.f32 %v14998_v21, %v3994_v51  ;;  %v3476_v2 = vpop.f32.mrb[145].mxu0  ;;  %v3996_v57 = vpop.f32.mrb[81].mxu1 }
 0x652   : >> { %v3477_v47 = vadd.f32 %v3476_v2, %v14868_v23  ;;  %v3478_v34 = vpop.f32.mrb[146].mxu0  ;;  %v3997_v22 = vpop.f32.mrb[82].mxu1 }
 0x653   : >> { %v4219_v13 = vmax.f32 %v3995_v44, 0.0  ;;  %v3479_v39 = vadd.f32 %v3478_v34, %v14865_v41  ;;  %v3998_v1 = vadd.f32 %v14998_v21, %v3997_v22  ;;  %v3480_v10 = vpop.f32.mrb[147].mxu0  ;;  %v3999_v46 = vpop.f32.mrb[83].mxu1  ;;  %v3673_v58 = vmax.f32 %v3475_v61, 0.0 }
 0x654   : >> { %v3481_v60 = vadd.f32 %v3480_v10, %v14868_v23  ;;  %v3674_v40 = vmax.f32 %v3477_v47, 0.0 }
 0x655   : >> { %v4290_v5 = vsel %vm4273_vm1, %v4219_v13, -inf  ;;  %v3675_v56 = vmax.f32 %v3479_v39, 0.0  ;;  %v4220_v59 = vmax.f32 %v3998_v1, 0.0 }
 0x656   : >> { %v15024_v63 = vmax.f32 %v4283_v37, %v4290_v5  ;;  %v3676_v4 = vmax.f32 %v3481_v60, 0.0 }
 0x657   : >> { %v3761_v6 = vpack.c.bf16 %v3675_v56, %v3673_v58  ;;  %v4292_v48 = vsel %vm4273_vm1, %v4220_v59, -inf }
 0x658   : >> { %v15027_v35 = vmax.f32 %v4285_v29, %v4292_v48  ;;  %v3762_v55 = vpack.c.bf16 %v3676_v4, %v3674_v40  ;;  %v3484_v17 = vpop.f32.mrb[148].mxu0  ;;  %v4002_v43 = vpop.f32.mrb[84].mxu1 }
 0x659   : >> { %v3485_v27 = vadd.f32 %v3484_v17, %v14865_v41  ;;  %v4003_v14 = vadd.f32 %v14998_v21, %v4002_v43  ;;  %v3486_v31 = vpop.f32.mrb[149].mxu0  ;;  %v4004_v26 = vpop.f32.mrb[85].mxu1 }
 0x65a   : >> { %v3487_v19 = vadd.f32 %v3486_v31, %v14868_v23  ;;  %v3488_v12 = vpop.f32.mrb[150].mxu0  ;;  %v4005_v50 = vpop.f32.mrb[86].mxu1  ;;  %4112 = vmatprep.mubr.bf16.mxu1 %v3762_v55 }
 0x65b   : >> { %v4221_v15 = vmax.f32 %v4003_v14, 0.0  ;;  %v3489_v49 = vadd.f32 %v3488_v12, %v14865_v41  ;;  %v4006_v7 = vadd.f32 %v14998_v21, %v4005_v50  ;;  %v3490_v9 = vpop.f32.mrb[151].mxu0  ;;  %v4007_v18 = vpop.f32.mrb[87].mxu1  ;;  %4113 = vmatmul.mubr.bf16.gmra.mrb[140].mxu1 %v3761_v6  ;;  %v3677_v37 = vmax.f32 %v3485_v27, 0.0 }
 0x65c   : >> { %v3491_v62 = vadd.f32 %v3490_v9, %v14868_v23  ;;  %v3678_v33 = vmax.f32 %v3487_v19, 0.0 }
 0x65d   : >> { %v4294_v52 = vsel %vm4273_vm1, %v4221_v15, -inf  ;;  %v3679_v25 = vmax.f32 %v3489_v49, 0.0  ;;  %v4222_v29 = vmax.f32 %v4006_v7, 0.0 }
 0x65e   : >> { %v4303_v16 = vmax.f32 %v4295_v8, %v4294_v52  ;;  %v3680_v53 = vmax.f32 %v3491_v62, 0.0 }
 0x65f   : >> { %v3763_v11 = vpack.c.bf16 %v3679_v25, %v3677_v37  ;;  %v4296_v36 = vsel %vm4273_vm1, %v4222_v29, -inf }
 0x660   : >> { %v4311_v38 = vmax.f32 %v4303_v16, %v4296_v36  ;;  %v3764_v24 = vpack.c.bf16 %v3680_v53, %v3678_v33  ;;  %v4010_v54 = vpop.f32.mrb[88].mxu1 }
 0x661   : >> { %v4011_v20 = vadd.f32 %v14998_v21, %v4010_v54  ;;  %v4012_v42 = vpop.f32.mrb[89].mxu1 }
 0x662   : >> { %v4013_v30 = vpop.f32.mrb[90].mxu1  ;;  %4120 = vmatprep.mubr.bf16.mxu1 %v3764_v24 }
 0x663   : >> { %v4223_v3 = vmax.f32 %v4011_v20, 0.0  ;;  %v4014_v51 = vadd.f32 %v14998_v21, %v4013_v30  ;;  %v4015_v61 = vpop.f32.mrb[91].mxu1  ;;  %4121 = vmatmul.mubr.bf16.gmra.mrb[144].mxu1 %v3763_v11 }
 0x665   : >> { %v4298_v8 = vsel %vm4273_vm1, %v4223_v3, -inf  ;;  %v4224_v44 = vmax.f32 %v4014_v51, 0.0 }
 0x666   : >> { %v4299_v2 = vmax.f32 %v15024_v63, %v4298_v8 }
 0x667   : >> { %v4300_v57 = vsel %vm4273_vm1, %v4224_v44, -inf }
 0x668   : >> { %v4301_v47 = vmax.f32 %v15027_v35, %v4300_v57  ;;  %v4018_v34 = vpop.f32.mrb[92].mxu1 }
 0x669   : >> { %v4019_v22 = vadd.f32 %v14998_v21, %v4018_v34  ;;  %v4020_v13 = vpop.f32.mrb[93].mxu1 }
 0x66a   : >> { %v4021_v39 = vpop.f32.mrb[94].mxu1 }
 0x66b   : >> { %v4225_v1 = vmax.f32 %v4019_v22, 0.0  ;;  %v4022_v10 = vadd.f32 %v14998_v21, %v4021_v39  ;;  %v4023_v46 = vpop.f32.mrb[95].mxu1 }
 0x66d   : >> { %v4302_v60 = vsel %vm4273_vm1, %v4225_v1, -inf  ;;  %v4226_v58 = vmax.f32 %v4022_v10, 0.0 }
 0x66e   : >> { %v4281_v5 = vmax.f32 %v4302_v60, %v4311_v38 }
 0x66f   : >> { %v4304_v56 = vsel %vm4273_vm1, %v4226_v58, -inf }
 0x670   : >> { %v4289_v59 = vmax.f32 %v4281_v5, %v4304_v56  ;;  %v4026_v63 = vpop.f32.mrb[96].mxu1 }
 0x671   : >> { %v4027_v40 = vadd.f32 %v14998_v21, %v4026_v63  ;;  %v3494_v4 = vpop.f32.mrb[152].mxu0  ;;  %v4028_v6 = vpop.f32.mrb[97].mxu1 }
 0x672   : >> { %v3495_v48 = vadd.f32 %v3494_v4, %v14865_v41  ;;  %v3496_v35 = vpop.f32.mrb[153].mxu0  ;;  %v4029_v55 = vpop.f32.mrb[98].mxu1 }
 0x673   : >> { %v4227_v17 = vmax.f32 %v4027_v40, 0.0  ;;  %v3497_v43 = vadd.f32 %v3496_v35, %v14868_v23  ;;  %v4030_v27 = vadd.f32 %v14998_v21, %v4029_v55  ;;  %v3498_v14 = vpop.f32.mrb[154].mxu0  ;;  %v4031_v31 = vpop.f32.mrb[99].mxu1 }
 0x674   : >> { %v3499_v26 = vadd.f32 %v3498_v14, %v14865_v41  ;;  %v3500_v19 = vpop.f32.mrb[155].mxu0  ;;  %v3681_v7 = vmax.f32 %v3495_v48, 0.0 }
 0x675   : >> { %v4306_v12 = vsel %vm4273_vm1, %v4227_v17, -inf  ;;  %v4228_v50 = vmax.f32 %v4030_v27, 0.0  ;;  %v3501_v15 = vadd.f32 %v3500_v19, %v14868_v23  ;;  %v3682_v18 = vmax.f32 %v3497_v43, 0.0 }
 0x676   : >> { %v15054_v49 = vmax.f32 %v4299_v2, %v4306_v12  ;;  %v3683_v9 = vmax.f32 %v3499_v26, 0.0 }
 0x677   : >> { %v4308_v62 = vsel %vm4273_vm1, %v4228_v50, -inf  ;;  %v3684_v37 = vmax.f32 %v3501_v15, 0.0 }
 0x678   : >> { %v15057_v52 = vmax.f32 %v4301_v47, %v4308_v62  ;;  %v3765_v25 = vpack.c.bf16 %v3683_v9, %v3681_v7 }
 0x679   : >> { %v3766_v29 = vpack.c.bf16 %v3684_v37, %v3682_v18  ;;  %v3504_v16 = vpop.f32.mrb[156].mxu0 }
 0x67a   : >> { %v3505_v33 = vadd.f32 %v3504_v16, %v14865_v41  ;;  %v3506_v53 = vpop.f32.mrb[157].mxu0 }
 0x67b   : >> { %v3507_v11 = vadd.f32 %v3506_v53, %v14868_v23  ;;  %v3508_v36 = vpop.f32.mrb[158].mxu0  ;;  %4128 = vmatprep.mubr.bf16.mxu1 %v3766_v29 }
 0x67c   : >> { %v3509_v38 = vadd.f32 %v3508_v36, %v14865_v41  ;;  %v3510_v24 = vpop.f32.mrb[159].mxu0  ;;  %4129 = vmatmul.mubr.bf16.gmra.mrb[148].mxu1 %v3765_v25  ;;  %v3685_v42 = vmax.f32 %v3505_v33, 0.0 }
 0x67d   : >> { %v3511_v54 = vadd.f32 %v3510_v24, %v14868_v23  ;;  %v4034_v20 = vpop.f32.mrb[100].mxu1  ;;  %v3686_v61 = vmax.f32 %v3507_v11, 0.0 }
 0x67e   : >> { %v3687_v30 = vmax.f32 %v3509_v38, 0.0  ;;  %v4035_v3 = vadd.f32 %v14998_v21, %v4034_v20  ;;  %v4036_v51 = vpop.f32.mrb[101].mxu1 }
 0x67f   : >> { %v3688_v8 = vmax.f32 %v3511_v54, 0.0  ;;  %v4037_v44 = vpop.f32.mrb[102].mxu1 }
 0x680   : >> { %v3767_v2 = vpack.c.bf16 %v3687_v30, %v3685_v42  ;;  %v4229_v57 = vmax.f32 %v4035_v3, 0.0  ;;  %v4038_v47 = vadd.f32 %v14998_v21, %v4037_v44  ;;  %v4039_v34 = vpop.f32.mrb[103].mxu1 }
 0x681   : >> { %v3768_v22 = vpack.c.bf16 %v3688_v8, %v3686_v61 }
 0x682   : >> { %v4310_v13 = vsel %vm4273_vm1, %v4229_v57, -inf  ;;  %v4230_v39 = vmax.f32 %v4038_v47, 0.0 }
 0x683   : >> { %v4297_v1 = vmax.f32 %v4289_v59, %v4310_v13  ;;  %4136 = vmatprep.mubr.bf16.mxu1 %v3768_v22 }
 0x684   : >> { %v4312_v10 = vsel %vm4273_vm1, %v4230_v39, -inf  ;;  %4137 = vmatmul.mubr.bf16.gmra.mrb[152].mxu1 %v3767_v2 }
 0x685   : >> { %v4305_v46 = vmax.f32 %v4297_v1, %v4312_v10  ;;  %v4042_v60 = vpop.f32.mrb[104].mxu1 }
 0x686   : >> { %v4043_v58 = vadd.f32 %v14998_v21, %v4042_v60  ;;  %v4044_v5 = vpop.f32.mrb[105].mxu1 }
 0x687   : >> { %v4045_v56 = vpop.f32.mrb[106].mxu1 }
 0x688   : >> { %v4231_v63 = vmax.f32 %v4043_v58, 0.0  ;;  %v4046_v40 = vadd.f32 %v14998_v21, %v4045_v56  ;;  %v4047_v4 = vpop.f32.mrb[107].mxu1 }
 0x68a   : >> { %v4314_v6 = vsel %vm4273_vm1, %v4231_v63, -inf  ;;  %v4232_v48 = vmax.f32 %v4046_v40, 0.0 }
 0x68b   : >> { %v4315_v35 = vmax.f32 %v15054_v49, %v4314_v6 }
 0x68c   : >> { %v4316_v59 = vsel %vm4273_vm1, %v4232_v48, -inf }
 0x68d   : >> { %v4317_v55 = vmax.f32 %v15057_v52, %v4316_v59 }
 0x696   : >> { %v3514_v17 = vpop.f32.mrb[160].mxu0 }
 0x697   : >> { %v3515_v43 = vadd.f32 %v3514_v17, %v14865_v41  ;;  %v3516_v27 = vpop.f32.mrb[161].mxu0 }
 0x698   : >> { %v3517_v14 = vadd.f32 %v3516_v27, %v14868_v23  ;;  %v3518_v31 = vpop.f32.mrb[162].mxu0 }
 0x699   : >> { %v3519_v26 = vadd.f32 %v3518_v31, %v14865_v41  ;;  %v3520_v19 = vpop.f32.mrb[163].mxu0  ;;  %v3689_v50 = vmax.f32 %v3515_v43, 0.0 }
 0x69a   : >> { %v3521_v12 = vadd.f32 %v3520_v19, %v14868_v23  ;;  %v3690_v7 = vmax.f32 %v3517_v14, 0.0 }
 0x69b   : >> { %v3691_v15 = vmax.f32 %v3519_v26, 0.0 }
 0x69c   : >> { %v3692_v49 = vmax.f32 %v3521_v12, 0.0 }
 0x69d   : >> { %v3769_v9 = vpack.c.bf16 %v3691_v15, %v3689_v50 }
 0x69e   : >> { %v3770_v18 = vpack.c.bf16 %v3692_v49, %v3690_v7  ;;  %v3524_v62 = vpop.f32.mrb[164].mxu0 }
 0x69f   : >> { %v3525_v37 = vadd.f32 %v3524_v62, %v14865_v41  ;;  %v3526_v52 = vpop.f32.mrb[165].mxu0 }
 0x6a0   : >> { %v3527_v25 = vadd.f32 %v3526_v52, %v14868_v23  ;;  %v3528_v29 = vpop.f32.mrb[166].mxu0  ;;  %4144 = vmatprep.mubr.bf16.mxu1 %v3770_v18 }
 0x6a1   : >> { %v3529_v16 = vadd.f32 %v3528_v29, %v14865_v41  ;;  %v3530_v33 = vpop.f32.mrb[167].mxu0  ;;  %4145 = vmatmul.mubr.bf16.gmra.mrb[156].mxu1 %v3769_v9  ;;  %v3693_v36 = vmax.f32 %v3525_v37, 0.0 }
 0x6a2   : >> { %v3531_v53 = vadd.f32 %v3530_v33, %v14868_v23  ;;  %v4050_v11 = vpop.f32.mrb[108].mxu1  ;;  %v3694_v20 = vmax.f32 %v3527_v25, 0.0 }
 0x6a3   : >> { %v3695_v38 = vmax.f32 %v3529_v16, 0.0  ;;  %v4051_v24 = vadd.f32 %v14998_v21, %v4050_v11  ;;  %v4052_v54 = vpop.f32.mrb[109].mxu1 }
 0x6a4   : >> { %v3696_v42 = vmax.f32 %v3531_v53, 0.0  ;;  %v4053_v30 = vpop.f32.mrb[110].mxu1 }
 0x6a5   : >> { %v3771_v3 = vpack.c.bf16 %v3695_v38, %v3693_v36  ;;  %v4233_v51 = vmax.f32 %v4051_v24, 0.0  ;;  %v4054_v61 = vadd.f32 %v14998_v21, %v4053_v30  ;;  %v4055_v8 = vpop.f32.mrb[111].mxu1 }
 0x6a6   : >> { %v3772_v44 = vpack.c.bf16 %v3696_v42, %v3694_v20 }
 0x6a7   : >> { %v4318_v2 = vsel %vm4273_vm1, %v4233_v51, -inf  ;;  %v4234_v57 = vmax.f32 %v4054_v61, 0.0 }
 0x6a8   : >> { %v4313_v47 = vmax.f32 %v4305_v46, %v4318_v2  ;;  %4152 = vmatprep.mubr.bf16.mxu1 %v3772_v44 }
 0x6a9   : >> { %v4320_v34 = vsel %vm4273_vm1, %v4234_v57, -inf  ;;  %4153 = vmatmul.mubr.bf16.gmra.mrb[160].mxu1 %v3771_v3 }
 0x6aa   : >> { %v4347_v22 = vmax.f32 %v4320_v34, %v4313_v47  ;;  %v4058_v13 = vpop.f32.mrb[112].mxu1 }
 0x6ab   : >> { %v4059_v39 = vadd.f32 %v14998_v21, %v4058_v13  ;;  %v4060_v1 = vpop.f32.mrb[113].mxu1 }
 0x6ac   : >> { %v4061_v10 = vpop.f32.mrb[114].mxu1 }
 0x6ad   : >> { %v4235_v60 = vmax.f32 %v4059_v39, 0.0  ;;  %v4062_v58 = vadd.f32 %v14998_v21, %v4061_v10  ;;  %v4063_v5 = vpop.f32.mrb[115].mxu1 }
 0x6af   : >> { %v4322_v56 = vsel %vm4273_vm1, %v4235_v60, -inf  ;;  %v4236_v63 = vmax.f32 %v4062_v58, 0.0 }
 0x6b0   : >> { %v15088_v40 = vmax.f32 %v4315_v35, %v4322_v56 }
 0x6b1   : >> { %v4324_v46 = vsel %vm4273_vm1, %v4236_v63, -inf }
 0x6b2   : >> { %v15091_v4 = vmax.f32 %v4317_v55, %v4324_v46 }
 0x6b7   : >> { %v3534_v6 = vpop.f32.mrb[168].mxu0 }
 0x6b8   : >> { %v3535_v48 = vadd.f32 %v3534_v6, %v14865_v41  ;;  %v3536_v59 = vpop.f32.mrb[169].mxu0 }
 0x6b9   : >> { %v3537_v17 = vadd.f32 %v3536_v59, %v14868_v23  ;;  %v3538_v43 = vpop.f32.mrb[170].mxu0 }
 0x6ba   : >> { %v3539_v27 = vadd.f32 %v3538_v43, %v14865_v41  ;;  %v3540_v14 = vpop.f32.mrb[171].mxu0  ;;  %v3697_v26 = vmax.f32 %v3535_v48, 0.0 }
 0x6bb   : >> { %v3541_v31 = vadd.f32 %v3540_v14, %v14868_v23  ;;  %v3698_v35 = vmax.f32 %v3537_v17, 0.0 }
 0x6bc   : >> { %v3699_v19 = vmax.f32 %v3539_v27, 0.0 }
 0x6bd   : >> { %v3700_v12 = vmax.f32 %v3541_v31, 0.0 }
 0x6be   : >> { %v3773_v50 = vpack.c.bf16 %v3699_v19, %v3697_v26 }
 0x6bf   : >> { %v3774_v15 = vpack.c.bf16 %v3700_v12, %v3698_v35  ;;  %v3544_v55 = vpop.f32.mrb[172].mxu0 }
 0x6c0   : >> { %v3545_v7 = vadd.f32 %v3544_v55, %v14865_v41  ;;  %v3546_v49 = vpop.f32.mrb[173].mxu0 }
 0x6c1   : >> { %v3547_v9 = vadd.f32 %v3546_v49, %v14868_v23  ;;  %v3548_v18 = vpop.f32.mrb[174].mxu0  ;;  %4160 = vmatprep.mubr.bf16.mxu1 %v3774_v15 }
 0x6c2   : >> { %v3549_v62 = vadd.f32 %v3548_v18, %v14865_v41  ;;  %v3550_v37 = vpop.f32.mrb[175].mxu0  ;;  %4161 = vmatmul.mubr.bf16.gmra.mrb[164].mxu1 %v3773_v50  ;;  %v3701_v29 = vmax.f32 %v3545_v7, 0.0 }
 0x6c3   : >> { %v3551_v52 = vadd.f32 %v3550_v37, %v14868_v23  ;;  %v4066_v25 = vpop.f32.mrb[116].mxu1  ;;  %v3702_v11 = vmax.f32 %v3547_v9, 0.0 }
 0x6c4   : >> { %v3703_v16 = vmax.f32 %v3549_v62, 0.0  ;;  %v4067_v33 = vadd.f32 %v14998_v21, %v4066_v25  ;;  %v4068_v53 = vpop.f32.mrb[117].mxu1 }
 0x6c5   : >> { %v3704_v36 = vmax.f32 %v3551_v52, 0.0  ;;  %v4069_v38 = vpop.f32.mrb[118].mxu1 }
 0x6c6   : >> { %v3775_v24 = vpack.c.bf16 %v3703_v16, %v3701_v29  ;;  %v4237_v54 = vmax.f32 %v4067_v33, 0.0  ;;  %v4070_v20 = vadd.f32 %v14998_v21, %v4069_v38  ;;  %v4071_v42 = vpop.f32.mrb[119].mxu1 }
 0x6c7   : >> { %v3776_v30 = vpack.c.bf16 %v3704_v36, %v3702_v11 }
 0x6c8   : >> { %v4326_v3 = vsel %vm4273_vm1, %v4237_v54, -inf  ;;  %v4238_v51 = vmax.f32 %v4070_v20, 0.0 }
 0x6c9   : >> { %v4349_v61 = vmax.f32 %v4326_v3, %v4347_v22  ;;  %4168 = vmatprep.mubr.bf16.mxu1 %v3776_v30 }
 0x6ca   : >> { %v4328_v8 = vsel %vm4273_vm1, %v4238_v51, -inf  ;;  %4169 = vmatmul.mubr.bf16.gmra.mrb[168].mxu1 %v3775_v24 }
 0x6cb   : >> { %v4319_v44 = vmax.f32 %v4328_v8, %v4349_v61  ;;  %v4074_v2 = vpop.f32.mrb[120].mxu1 }
 0x6cc   : >> { %v4075_v57 = vadd.f32 %v14998_v21, %v4074_v2  ;;  %v4076_v47 = vpop.f32.mrb[121].mxu1 }
 0x6cd   : >> { %v4077_v34 = vpop.f32.mrb[122].mxu1 }
 0x6ce   : >> { %v4239_v13 = vmax.f32 %v4075_v57, 0.0  ;;  %v4078_v39 = vadd.f32 %v14998_v21, %v4077_v34  ;;  %v4079_v1 = vpop.f32.mrb[123].mxu1 }
 0x6d0   : >> { %v4330_v10 = vsel %vm4273_vm1, %v4239_v13, -inf  ;;  %v4240_v60 = vmax.f32 %v4078_v39, 0.0 }
 0x6d1   : >> { %v4331_v58 = vmax.f32 %v15088_v40, %v4330_v10 }
 0x6d2   : >> { %v4332_v22 = vsel %vm4273_vm1, %v4240_v60, -inf }
 0x6d3   : >> { %v4333_v5 = vmax.f32 %v15091_v4, %v4332_v22 }
 0x6dc   : >> { %v3554_v56 = vpop.f32.mrb[176].mxu0 }
 0x6dd   : >> { %v3555_v63 = vadd.f32 %v3554_v56, %v14865_v41  ;;  %v3556_v46 = vpop.f32.mrb[177].mxu0 }
 0x6de   : >> { %v3557_v6 = vadd.f32 %v3556_v46, %v14868_v23  ;;  %v3558_v48 = vpop.f32.mrb[178].mxu0 }
 0x6df   : >> { %v3559_v59 = vadd.f32 %v3558_v48, %v14865_v41  ;;  %v3560_v17 = vpop.f32.mrb[179].mxu0  ;;  %v3705_v27 = vmax.f32 %v3555_v63, 0.0 }
 0x6e0   : >> { %v3561_v43 = vadd.f32 %v3560_v17, %v14868_v23  ;;  %v3706_v31 = vmax.f32 %v3557_v6, 0.0 }
 0x6e1   : >> { %v3707_v14 = vmax.f32 %v3559_v59, 0.0 }
 0x6e2   : >> { %v3708_v40 = vmax.f32 %v3561_v43, 0.0 }
 0x6e3   : >> { %v3777_v26 = vpack.c.bf16 %v3707_v14, %v3705_v27 }
 0x6e4   : >> { %v3778_v19 = vpack.c.bf16 %v3708_v40, %v3706_v31  ;;  %v3564_v35 = vpop.f32.mrb[180].mxu0 }
 0x6e5   : >> { %v3565_v4 = vadd.f32 %v3564_v35, %v14865_v41  ;;  %v3566_v12 = vpop.f32.mrb[181].mxu0 }
 0x6e6   : >> { %v3567_v50 = vadd.f32 %v3566_v12, %v14868_v23  ;;  %v3568_v15 = vpop.f32.mrb[182].mxu0  ;;  %4176 = vmatprep.mubr.bf16.mxu1 %v3778_v19 }
 0x6e7   : >> { %v3569_v55 = vadd.f32 %v3568_v15, %v14865_v41  ;;  %v3570_v7 = vpop.f32.mrb[183].mxu0  ;;  %4177 = vmatmul.mubr.bf16.gmra.mrb[172].mxu1 %v3777_v26  ;;  %v3709_v18 = vmax.f32 %v3565_v4, 0.0 }
 0x6e8   : >> { %v3571_v49 = vadd.f32 %v3570_v7, %v14868_v23  ;;  %v4082_v9 = vpop.f32.mrb[124].mxu1  ;;  %v3710_v25 = vmax.f32 %v3567_v50, 0.0 }
 0x6e9   : >> { %v3711_v62 = vmax.f32 %v3569_v55, 0.0  ;;  %v4083_v37 = vadd.f32 %v14998_v21, %v4082_v9  ;;  %v4084_v52 = vpop.f32.mrb[125].mxu1 }
 0x6ea   : >> { %v3712_v29 = vmax.f32 %v3571_v49, 0.0  ;;  %v4085_v16 = vpop.f32.mrb[126].mxu1 }
 0x6eb   : >> { %v3779_v33 = vpack.c.bf16 %v3711_v62, %v3709_v18  ;;  %v4241_v53 = vmax.f32 %v4083_v37, 0.0  ;;  %v4086_v11 = vadd.f32 %v14998_v21, %v4085_v16  ;;  %v4087_v36 = vpop.f32.mrb[127].mxu1 }
 0x6ec   : >> { %v3780_v38 = vpack.c.bf16 %v3712_v29, %v3710_v25 }
 0x6ed   : >> { %v4334_v24 = vsel %vm4273_vm1, %v4241_v53, -inf  ;;  %v4242_v54 = vmax.f32 %v4086_v11, 0.0 }
 0x6ee   : >> { %v4327_v20 = vmax.f32 %v4319_v44, %v4334_v24  ;;  %4184 = vmatprep.mubr.bf16.mxu1 %v3780_v38 }
 0x6ef   : >> { %v4336_v42 = vsel %vm4273_vm1, %v4242_v54, -inf  ;;  %4185 = vmatmul.mubr.bf16.gmra.mrb[176].mxu1 %v3779_v33 }
 0x6f0   : >> { %v4335_v30 = vmax.f32 %v4327_v20, %v4336_v42  ;;  %v4090_v3 = vpop.f32.mrb[128].mxu1 }
 0x6f1   : >> { %v4091_v51 = vadd.f32 %v14998_v21, %v4090_v3  ;;  %v4092_v61 = vpop.f32.mrb[129].mxu1 }
 0x6f2   : >> { %v4093_v8 = vpop.f32.mrb[130].mxu1 }
 0x6f3   : >> { %v4243_v2 = vmax.f32 %v4091_v51, 0.0  ;;  %v4094_v57 = vadd.f32 %v14998_v21, %v4093_v8  ;;  %v4095_v47 = vpop.f32.mrb[131].mxu1 }
 0x6f5   : >> { %v4338_v34 = vsel %vm4273_vm1, %v4243_v2, -inf  ;;  %v4244_v13 = vmax.f32 %v4094_v57, 0.0 }
 0x6f6   : >> { %v4339_v39 = vmax.f32 %v4331_v58, %v4338_v34 }
 0x6f7   : >> { %v4340_v44 = vsel %vm4273_vm1, %v4244_v13, -inf }
 0x6f8   : >> { %v4343_v1 = vmax.f32 %v4335_v30, %v4339_v39  ;;  %v4341_v10 = vmax.f32 %v4333_v5, %v4340_v44 }
 0x6fa   : >> { %v4351_v60 = vmax.f32 %v4343_v1, %v4341_v10 }
 0x6fd   : >> { %v3574_v22 = vpop.f32.mrb[184].mxu0 }
 0x6fe   : >> { %v3575_v56 = vadd.f32 %v3574_v22, %v14865_v41  ;;  %v3576_v63 = vpop.f32.mrb[185].mxu0 }
 0x6ff   : >> { %v3577_v46 = vadd.f32 %v3576_v63, %v14868_v23  ;;  %v3578_v6 = vpop.f32.mrb[186].mxu0 }
 0x700   : >> { %v3579_v48 = vadd.f32 %v3578_v6, %v14865_v41  ;;  %v3580_v59 = vpop.f32.mrb[187].mxu0  ;;  %v3713_v43 = vmax.f32 %v3575_v56, 0.0 }
 0x701   : >> { %v3581_v17 = vadd.f32 %v3580_v59, %v14868_v23  ;;  %v3714_v58 = vmax.f32 %v3577_v46, 0.0 }
 0x702   : >> { %v3715_v27 = vmax.f32 %v3579_v48, 0.0 }
 0x703   : >> { %v3716_v14 = vmax.f32 %v3581_v17, 0.0 }
 0x704   : >> { %v3781_v31 = vpack.c.bf16 %v3715_v27, %v3713_v43 }
 0x705   : >> { %v3782_v40 = vpack.c.bf16 %v3716_v14, %v3714_v58  ;;  %v3584_v5 = vpop.f32.mrb[188].mxu0 }
 0x706   : >> { %v3585_v26 = vadd.f32 %v3584_v5, %v14865_v41  ;;  %v3586_v19 = vpop.f32.mrb[189].mxu0 }
 0x707   : >> { %v3587_v35 = vadd.f32 %v3586_v19, %v14868_v23  ;;  %v3588_v4 = vpop.f32.mrb[190].mxu0  ;;  %4192 = vmatprep.mubr.bf16.mxu1 %v3782_v40 }
 0x708   : >> { %v3589_v12 = vadd.f32 %v3588_v4, %v14865_v41  ;;  %v3590_v50 = vpop.f32.mrb[191].mxu0  ;;  %4193 = vmatmul.mubr.bf16.gmra.mrb[180].mxu1 %v3781_v31  ;;  %v3717_v7 = vmax.f32 %v3585_v26, 0.0 }
 0x709   : >> { %v3591_v15 = vadd.f32 %v3590_v50, %v14868_v23  ;;  %v4098_v55 = vpop.f32.mrb[132].mxu1  ;;  %v3718_v62 = vmax.f32 %v3587_v35, 0.0 }
 0x70a   : >> { %v3719_v49 = vmax.f32 %v3589_v12, 0.0  ;;  %v4099_v9 = vadd.f32 %v14998_v21, %v4098_v55  ;;  %v4100_v18 = vpop.f32.mrb[133].mxu1 }
 0x70b   : >> { %v3720_v37 = vmax.f32 %v3591_v15, 0.0  ;;  %v4101_v52 = vpop.f32.mrb[134].mxu1 }
 0x70c   : >> { %v3783_v25 = vpack.c.bf16 %v3719_v49, %v3717_v7  ;;  %v4245_v29 = vmax.f32 %v4099_v9, 0.0  ;;  %v4102_v16 = vadd.f32 %v14998_v21, %v4101_v52  ;;  %v4103_v33 = vpop.f32.mrb[135].mxu1 }
 0x70d   : >> { %v3784_v53 = vpack.c.bf16 %v3720_v37, %v3718_v62  ;;  %v3954_v41 = vpop.f32.mrb[192].mxu0 }
 0x70e   : >> { %v4342_v11 = vsel %vm4273_vm1, %v4245_v29, -inf  ;;  %v4246_v36 = vmax.f32 %v4102_v16, 0.0  ;;  %v3955_v23 = vadd.f32 %v14998_v21, %v3954_v41  ;;  %v3956_v38 = vpop.f32.mrb[193].mxu0 }
 0x70f   : >> { %v4321_v24 = vmax.f32 %v4342_v11, %v4351_v60  ;;  %v3957_v54 = vpop.f32.mrb[194].mxu0  ;;  %4200 = vmatprep.mubr.bf16.mxu1 %v3784_v53 }
 0x710   : >> { %v4344_v20 = vsel %vm4273_vm1, %v4246_v36, -inf  ;;  %v4209_v42 = vmax.f32 %v3955_v23, 0.0  ;;  %v3958_v30 = vadd.f32 %v14998_v21, %v3957_v54  ;;  %v3959_v3 = vpop.f32.mrb[195].mxu0  ;;  %4201 = vmatmul.mubr.bf16.gmra.mrb[184].mxu1 %v3783_v25 }
 0x711   : >> { %v4329_v51 = vmax.f32 %v4321_v24, %v4344_v20  ;;  %v4106_v61 = vpop.f32.mrb[136].mxu1 }
 0x712   : >> { %v4274_v8 = vsel %vm4273_vm1, %v4209_v42, -inf  ;;  %v4210_v2 = vmax.f32 %v3958_v30, 0.0  ;;  %v4107_v57 = vadd.f32 %v14998_v21, %v4106_v61  ;;  %v4108_v47 = vpop.f32.mrb[137].mxu1 }
 0x713   : >> { %v4337_v34 = vmax.f32 %v4329_v51, %v4274_v8  ;;  %v4109_v13 = vpop.f32.mrb[138].mxu1 }
 0x714   : >> { %v4275_v39 = vsel %vm4273_vm1, %v4210_v2, -inf  ;;  %v4247_v44 = vmax.f32 %v4107_v57, 0.0  ;;  %v4110_v1 = vadd.f32 %v14998_v21, %v4109_v13  ;;  %v4111_v10 = vpop.f32.mrb[139].mxu1 }
 0x715   : >> { %v4345_v60 = vmax.f32 %v4337_v34, %v4275_v39 }
 0x716   : >> { %v4346_v22 = vsel %vm4273_vm1, %v4247_v44, -inf  ;;  %v4248_v56 = vmax.f32 %v4110_v1, 0.0 }
 0x717   : >> { %v4353_v63 = vmax.f32 %v4345_v60, %v4346_v22 }
 0x718   : >> { %v4348_v46 = vsel %vm4273_vm1, %v4248_v56, -inf }
 0x719   : >> { %v4355_v6 = vmax.f32 %v4348_v46, %v4353_v63 }
 0x72e   : >> { %v4114_v48 = vpop.f32.mrb[140].mxu1 }
 0x72f   : >> { %v4115_v59 = vadd.f32 %v14998_v21, %v4114_v48  ;;  %v4116_v17 = vpop.f32.mrb[141].mxu1 }
 0x730   : >> { %v4117_v43 = vpop.f32.mrb[142].mxu1 }
 0x731   : >> { %v4249_v27 = vmax.f32 %v4115_v59, 0.0  ;;  %v4118_v58 = vadd.f32 %v14998_v21, %v4117_v43  ;;  %v4119_v14 = vpop.f32.mrb[143].mxu1 }
 0x733   : >> { %v4350_v31 = vsel %vm4273_vm1, %v4249_v27, -inf  ;;  %v4250_v40 = vmax.f32 %v4118_v58, 0.0 }
 0x734   : >> { %v4357_v5 = vmax.f32 %v4350_v31, %v4355_v6 }
 0x735   : >> { %v4352_v26 = vsel %vm4273_vm1, %v4250_v40, -inf }
 0x736   : >> { %v4359_v19 = vmax.f32 %v4352_v26, %v4357_v5  ;;  %v4122_v35 = vpop.f32.mrb[144].mxu1 }
 0x737   : >> { %v4123_v4 = vadd.f32 %v14998_v21, %v4122_v35  ;;  %v4124_v12 = vpop.f32.mrb[145].mxu1 }
 0x738   : >> { %v4125_v50 = vpop.f32.mrb[146].mxu1 }
 0x739   : >> { %v4251_v15 = vmax.f32 %v4123_v4, 0.0  ;;  %v4126_v55 = vadd.f32 %v14998_v21, %v4125_v50  ;;  %v4127_v7 = vpop.f32.mrb[147].mxu1 }
 0x73a   : >> { %v12715_v7 = vld [vmem:[#allocation16] ss:$0 sm:$0xff] }
 0x73b   : >> { %v4354_v49 = vsel %vm4273_vm1, %v4251_v15, -inf  ;;  %v4252_v9 = vmax.f32 %v4126_v55, 0.0 }
 0x73c   : >> { %v4361_v18 = vmax.f32 %v4354_v49, %v4359_v19 }
 0x73d   : >> { %v4356_v62 = vsel %vm4273_vm1, %v4252_v9, -inf }
 0x73e   : >> { %v4363_v37 = vmax.f32 %v4356_v62, %v4361_v18 }
 0x74f   : >> { %v4130_v52 = vpop.f32.mrb[148].mxu1 }
 0x750   : >> { %v4131_v25 = vadd.f32 %v14998_v21, %v4130_v52  ;;  %v4132_v29 = vpop.f32.mrb[149].mxu1 }
 0x751   : >> { %v4133_v16 = vpop.f32.mrb[150].mxu1 }
 0x752   : >> { %v4253_v33 = vmax.f32 %v4131_v25, 0.0  ;;  %v4134_v53 = vadd.f32 %v14998_v21, %v4133_v16  ;;  %v4135_v41 = vpop.f32.mrb[151].mxu1 }
 0x754   : >> { %v4358_v11 = vsel %vm4273_vm1, %v4253_v33, -inf  ;;  %v4254_v36 = vmax.f32 %v4134_v53, 0.0 }
 0x755   : >> { %v4365_v23 = vmax.f32 %v4358_v11, %v4363_v37 }
 0x756   : >> { %v4360_v38 = vsel %vm4273_vm1, %v4254_v36, -inf }
 0x757   : >> { %v4367_v24 = vmax.f32 %v4360_v38, %v4365_v23  ;;  %v4138_v54 = vpop.f32.mrb[152].mxu1 }
 0x758   : >> { %v4139_v20 = vadd.f32 %v14998_v21, %v4138_v54  ;;  %v4140_v42 = vpop.f32.mrb[153].mxu1 }
 0x759   : >> { %v4141_v30 = vpop.f32.mrb[154].mxu1 }
 0x75a   : >> { %v4255_v3 = vmax.f32 %v4139_v20, 0.0  ;;  %v4142_v51 = vadd.f32 %v14998_v21, %v4141_v30  ;;  %v4143_v61 = vpop.f32.mrb[155].mxu1 }
 0x75c   : >> { %v4362_v8 = vsel %vm4273_vm1, %v4255_v3, -inf  ;;  %v4256_v2 = vmax.f32 %v4142_v51, 0.0 }
 0x75d   : >> { %v4369_v57 = vmax.f32 %v4362_v8, %v4367_v24 }
 0x75e   : >> { %v4364_v47 = vsel %vm4273_vm1, %v4256_v2, -inf }
 0x75f   : >> { %v4371_v34 = vmax.f32 %v4364_v47, %v4369_v57 }
 0x774   : >> { %v4146_v13 = vpop.f32.mrb[156].mxu1 }
 0x775   : >> { %v4147_v39 = vadd.f32 %v14998_v21, %v4146_v13  ;;  %v4148_v44 = vpop.f32.mrb[157].mxu1 }
 0x776   : >> { %v4149_v1 = vpop.f32.mrb[158].mxu1 }
 0x777   : >> { %v4257_v10 = vmax.f32 %v4147_v39, 0.0  ;;  %v4150_v60 = vadd.f32 %v14998_v21, %v4149_v1  ;;  %v4151_v22 = vpop.f32.mrb[159].mxu1 }
 0x779   : >> { %v4366_v56 = vsel %vm4273_vm1, %v4257_v10, -inf  ;;  %v4258_v63 = vmax.f32 %v4150_v60, 0.0 }
 0x77a   : >> { %v4373_v46 = vmax.f32 %v4366_v56, %v4371_v34 }
 0x77b   : >> { %v4368_v6 = vsel %vm4273_vm1, %v4258_v63, -inf }
 0x77c   : >> { %v4375_v48 = vmax.f32 %v4368_v6, %v4373_v46  ;;  %v4154_v59 = vpop.f32.mrb[160].mxu1 }
 0x77d   : >> { %v4155_v17 = vadd.f32 %v14998_v21, %v4154_v59  ;;  %v4156_v43 = vpop.f32.mrb[161].mxu1 }
 0x77e   : >> { %v4157_v27 = vpop.f32.mrb[162].mxu1 }
 0x77f   : >> { %v4259_v58 = vmax.f32 %v4155_v17, 0.0  ;;  %v4158_v14 = vadd.f32 %v14998_v21, %v4157_v27  ;;  %v4159_v31 = vpop.f32.mrb[163].mxu1 }
 0x781   : >> { %v4370_v40 = vsel %vm4273_vm1, %v4259_v58, -inf  ;;  %v4260_v5 = vmax.f32 %v4158_v14, 0.0 }
 0x782   : >> { %v4377_v26 = vmax.f32 %v4370_v40, %v4375_v48 }
 0x783   : >> { %v4372_v19 = vsel %vm4273_vm1, %v4260_v5, -inf }
 0x784   : >> { %v4379_v35 = vmax.f32 %v4372_v19, %v4377_v26 }
 0x795   : >> { %v4162_v4 = vpop.f32.mrb[164].mxu1 }
 0x796   : >> { %v4163_v12 = vadd.f32 %v14998_v21, %v4162_v4  ;;  %v4164_v50 = vpop.f32.mrb[165].mxu1 }
 0x797   : >> { %v4165_v15 = vpop.f32.mrb[166].mxu1 }
 0x798   : >> { %v4261_v55 = vmax.f32 %v4163_v12, 0.0  ;;  %v4166_v49 = vadd.f32 %v12715_v7, %v4165_v15  ;;  %v4167_v9 = vpop.f32.mrb[167].mxu1 }
 0x79a   : >> { %v4374_v18 = vsel %vm4273_vm1, %v4261_v55, -inf  ;;  %v4262_v62 = vmax.f32 %v4166_v49, 0.0 }
 0x79b   : >> { %v4381_v37 = vmax.f32 %v4374_v18, %v4379_v35 }
 0x79c   : >> { %v4376_v52 = vsel %vm4273_vm1, %v4262_v62, -inf }
 0x79d   : >> { %v4383_v25 = vmax.f32 %v4376_v52, %v4381_v37  ;;  %v4170_v29 = vpop.f32.mrb[168].mxu1 }
 0x79e   : >> { %v4171_v16 = vadd.f32 %v12715_v7, %v4170_v29  ;;  %v4172_v33 = vpop.f32.mrb[169].mxu1 }
 0x79f   : >> { %v4173_v53 = vpop.f32.mrb[170].mxu1 }
 0x7a0   : >> { %v4263_v41 = vmax.f32 %v4171_v16, 0.0  ;;  %v4174_v11 = vadd.f32 %v12715_v7, %v4173_v53  ;;  %v4175_v21 = vpop.f32.mrb[171].mxu1 }
 0x7a2   : >> { %v4378_v36 = vsel %vm4273_vm1, %v4263_v41, -inf  ;;  %v4264_v23 = vmax.f32 %v4174_v11, 0.0 }
 0x7a3   : >> { %v4385_v38 = vmax.f32 %v4378_v36, %v4383_v25 }
 0x7a4   : >> { %v4380_v24 = vsel %vm4273_vm1, %v4264_v23, -inf  ;;  %v12718_v23 = vld [vmem:[#allocation17] ss:$8 sps:$4 sm:$0xff] (%p750_p5)  }
 0x7a5   : >> { %v4387_v54 = vmax.f32 %v4380_v24, %v4385_v38  ;;  %v13323_v38 = vmov (%p750_p5), 0  }
 0x7a6   : > { %4469 = vmatprep.mubr.bf16.mxu0 (%p750_p5), %v13323_v38 }
 0x7ba   : >> { %v4178_v20 = vpop.f32.mrb[172].mxu1 }
 0x7bb   : >> { %v4179_v42 = vadd.f32 %v12715_v7, %v4178_v20  ;;  %v4180_v30 = vpop.f32.mrb[173].mxu1  ;;  %v12721_v20 = vld [vmem:[#allocation20] ss:$8 sps:$4 sm:$0xff] (%p750_p5)  }
 0x7bc   : >> { %v4181_v3 = vpop.f32.mrb[174].mxu1  ;;  %v12725_v30 = vld [vmem:[#allocation20 + $0x24] ss:$8 sps:$4 sm:$0xff] (%p750_p5)  }
 0x7bd   : >> { %v4265_v51 = vmax.f32 %v4179_v42, 0.0  ;;  %v4182_v61 = vadd.f32 %v12715_v7, %v4181_v3  ;;  %v4183_v8 = vpop.f32.mrb[175].mxu1  ;;  %v12722_v42 = vld [vmem:[#allocation20 + $0x14] ss:$8 sps:$4 sm:$0xff] (%p750_p5)   ;;  %v12727_v3 = vld [vmem:[#allocation20 + $0x20] ss:$8 sps:$4 sm:$0xff] (%p750_p5)  }
 0x7be   : > { %v12731_v8 = vld [vmem:[#allocation20 + $0x44] ss:$8 sps:$4 sm:$0xff] (%p750_p5)  }
 0x7bf   : >> { %v4382_v2 = vsel %vm4273_vm1, %v4265_v51, -inf  ;;  %v4266_v57 = vmax.f32 %v4182_v61, 0.0  ;;  %v12728_v51 = vld [vmem:[#allocation20 + $0x34] ss:$8 sps:$4 sm:$0xff] (%p750_p5)   ;;  %v12730_v61 = vld [vmem:[#allocation20 + $0x30] ss:$8 sps:$4 sm:$0xff] (%p750_p5)  }
 0x7c0   : >> { %v4389_v47 = vmax.f32 %v4382_v2, %v4387_v54  ;;  %v12719_v54 = vld [vmem:[#allocation20 + $0x4] ss:$8 sps:$4 sm:$0xff] (%p750_p5)   ;;  %v12733_v2 = vld [vmem:[#allocation20 + $0x40] ss:$8 sps:$4 sm:$0xff] (%p750_p5)  }
 0x7c1   : >> { %v4384_v34 = vsel %vm4273_vm1, %v4266_v57, -inf  ;;  %4686 = vmatprep.subr.bf16.mxu1 (%p750_p5), %v12719_v54  ;;  %v12734_v57 = vld [vmem:[#allocation20 + $0x54] ss:$8 sps:$4 sm:$0xff] (%p750_p5)   ;;  %v5043_v54 = vld [vmem:[#allocation23 + $0x9c0] sm:$0xff] (%p750_p5) }
 0x7c2   : >> { %v4391_v13 = vmax.f32 %v4384_v34, %v4389_v47  ;;  %v4186_v39 = vpop.f32.mrb[176].mxu1  ;;  %4687 = vmatpush1.bf16.msra.mxu1 (%p750_p5), %v12721_v20  ;;  %v12736_v47 = vld [vmem:[#allocation20 + $0x50] ss:$8 sps:$4 sm:$0xff] (%p750_p5)   ;;  %v12737_v34 = vld [vmem:[#allocation20 + $0x64] ss:$8 sps:$4 sm:$0xff] (%p750_p5)  }
 0x7c3   : >> { %v4187_v44 = vadd.f32 %v12715_v7, %v4186_v39  ;;  %v4188_v1 = vpop.f32.mrb[177].mxu1  ;;  %4688 = vmatprep.subr.bf16.mxu1 (%p750_p5), %v12722_v42  ;;  %v12740_v39 = vld [vmem:[#allocation20 + $0x74] ss:$8 sps:$4 sm:$0xff] (%p750_p5)  }
 0x7c4   : >> { %v4189_v10 = vpop.f32.mrb[178].mxu1  ;;  %v12743_v1 = vld [vmem:[#allocation20 + $0x84] ss:$8 sps:$4 sm:$0xff] (%p750_p5)  }
 0x7c5   : >> { %v4267_v60 = vmax.f32 %v4187_v44, 0.0  ;;  %v4190_v22 = vadd.f32 %v12715_v7, %v4189_v10  ;;  %v4191_v56 = vpop.f32.mrb[179].mxu1  ;;  %v12742_v44 = vld [vmem:[#allocation20 + $0x70] ss:$8 sps:$4 sm:$0xff] (%p750_p5)   ;;  %v12745_v10 = vld [vmem:[#allocation20 + $0x80] ss:$8 sps:$4 sm:$0xff] (%p750_p5)  }
 0x7c6   : > { %v12749_v56 = vld [vmem:[#allocation20 + $0xa4] ss:$8 sps:$4 sm:$0xff] (%p750_p5)  }
 0x7c7   : >> { %v4386_v63 = vsel %vm4273_vm1, %v4267_v60, -inf  ;;  %v4268_v46 = vmax.f32 %v4190_v22, 0.0  ;;  %v12746_v60 = vld [vmem:[#allocation20 + $0x94] ss:$8 sps:$4 sm:$0xff] (%p750_p5)   ;;  %v12748_v22 = vld [vmem:[#allocation20 + $0x90] ss:$8 sps:$4 sm:$0xff] (%p750_p5)  }
 0x7c8   : >> { %v4393_v6 = vmax.f32 %v4386_v63, %v4391_v13  ;;  %v12739_v13 = vld [vmem:[#allocation20 + $0x60] ss:$8 sps:$4 sm:$0xff] (%p750_p5)  }
 0x7c9   : >> { %v4388_v48 = vsel %vm4273_vm1, %v4268_v46, -inf  ;;  %v12751_v63 = vld [vmem:[#allocation20 + $0xa0] ss:$8 sps:$4 sm:$0xff] (%p750_p5)   ;;  %v12752_v46 = vld [vmem:[#allocation20 + $0xb4] ss:$8 sps:$4 sm:$0xff] (%p750_p5)  }
 0x7ca   : >> { %v4398_v59 = vmax.f32 %v4388_v48, %v4393_v6  ;;  %v12754_v6 = vld [vmem:[#allocation20 + $0xb0] ss:$8 sps:$4 sm:$0xff] (%p750_p5)   ;;  %v12755_v48 = vld [vmem:[#allocation20 + $0xc4] ss:$8 sps:$4 sm:$0xff] (%p750_p5)  }
 0x7db   : >> { %v4194_v17 = vpop.f32.mrb[180].mxu1 }
 0x7dc   : >> { %v4195_v43 = vadd.f32 %v12715_v7, %v4194_v17  ;;  %v4196_v27 = vpop.f32.mrb[181].mxu1  ;;  %v12758_v17 = vld [vmem:[#allocation20 + $0xd4] ss:$8 sps:$4 sm:$0xff] (%p750_p5)  }
 0x7dd   : >> { %v4197_v58 = vpop.f32.mrb[182].mxu1  ;;  %v12761_v27 = vld [vmem:[#allocation20 + $0xe4] ss:$8 sps:$4 sm:$0xff] (%p750_p5)  }
 0x7de   : >> { %v4269_v14 = vmax.f32 %v4195_v43, 0.0  ;;  %v4198_v31 = vadd.f32 %v12715_v7, %v4197_v58  ;;  %v4199_v40 = vpop.f32.mrb[183].mxu1  ;;  %v12760_v43 = vld [vmem:[#allocation20 + $0xd0] ss:$8 sps:$4 sm:$0xff] (%p750_p5)   ;;  %v12763_v58 = vld [vmem:[#allocation20 + $0xe0] ss:$8 sps:$4 sm:$0xff] (%p750_p5)  }
 0x7df   : > { %v4731_v40 = vld [vmem:[#allocation23] sm:$0xff] (%p750_p5) }
 0x7e0   : >> { %v4390_v5 = vsel %vm4273_vm1, %v4269_v14, -inf  ;;  %v4270_v26 = vmax.f32 %v4198_v31, 0.0  ;;  %v12764_v14 = vld [vmem:[#allocation20 + $0xf4] ss:$8 sps:$4 sm:$0xff] (%p750_p5)   ;;  %v12766_v31 = vld [vmem:[#allocation20 + $0xf0] ss:$8 sps:$4 sm:$0xff] (%p750_p5)  }
 0x7e1   : >> { %v4395_v19 = vmax.f32 %v4390_v5, %v4398_v59  ;;  %v12757_v59 = vld [vmem:[#allocation20 + $0xc0] ss:$8 sps:$4 sm:$0xff] (%p750_p5)  }
 0x7e2   : >> { %v4392_v35 = vsel %vm4273_vm1, %v4270_v26, -inf  ;;  %v4755_v5 = vld [vmem:[#allocation23 + $0xc0] sm:$0xff] (%p750_p5)  ;;  %v15191_v26 = vld [vmem:[#allocation23 + $0x8] sm:$0xff] (%p750_p5) }
 0x7e3   : >> { %v4397_v4 = vmax.f32 %v4392_v35, %v4395_v19  ;;  %v4202_v12 = vpop.f32.mrb[184].mxu1  ;;  %v11313_v19 = vcombine.low (%p750_p5), %v4731_v40, %v4755_v5  ;;  %v11314_v35 = vcombine.high (%p750_p5), %v4731_v40, %v4755_v5 }
 0x7e4   : >> { %v4203_v50 = vadd.f32 %v12715_v7, %v4202_v12  ;;  %v4204_v15 = vpop.f32.mrb[185].mxu1  ;;  %v4779_v12 = vld [vmem:[#allocation23 + $0x180] sm:$0xff] (%p750_p5) }
 0x7e5   : >> { %v4205_v55 = vpop.f32.mrb[186].mxu1 }
 0x7e6   : >> { %v4271_v49 = vmax.f32 %v4203_v50, 0.0  ;;  %v4206_v9 = vadd.f32 %v12715_v7, %v4205_v55  ;;  %v4207_v18 = vpop.f32.mrb[187].mxu1  ;;  %v12716_v7 = vld [vmem:[#allocation17 + $0x4] ss:$8 sps:$4 sm:$0xff] (%p750_p5)   ;;  %v4803_v50 = vld [vmem:[#allocation23 + $0x240] sm:$0xff] (%p750_p5) }
 0x7e7   : > { %4437 = vmatprep.subr.bf16.mxu0 (%p750_p5), %v12716_v7  ;;  %v4827_v18 = vld [vmem:[#allocation23 + $0x300] sm:$0xff] (%p750_p5) }
 0x7e8   : >> { %v4394_v62 = vsel %vm4273_vm1, %v4271_v49, -inf  ;;  %v4272_v37 = vmax.f32 %v4206_v9, 0.0  ;;  %4438 = vmatpush1.bf16.msra.mxu0 (%p750_p5), %v12718_v23  ;;  %v11362_v49 = vcombine.high (%p750_p5), %v4779_v12, %v4803_v50  ;;  %v11361_v9 = vcombine.low (%p750_p5), %v4779_v12, %v4803_v50  ;;  %v4995_v7 = vld [vmem:[#allocation23 + $0x840] sm:$0xff] (%p750_p5) }
 0x7e9   : >> { %v4399_v52 = vmax.f32 %v4394_v62, %v4397_v4  ;;  %v15193_v4 = vld [vmem:[#allocation23 + $0xc8] sm:$0xff] (%p750_p5)  ;;  %9591 = vmatprep.subr.bf16.mxu0 (%p750_p5), %v11314_v35  ;;  %v4851_v62 = vld [vmem:[#allocation23 + $0x3c0] sm:$0xff] (%p750_p5) }
 0x7ea   : >> { %v4396_v25 = vsel %vm4273_vm1, %v4272_v37, -inf  ;;  %v11315_v15 = vcombine.low (%p750_p5), %v15191_v26, %v15193_v4  ;;  %v11316_v55 = vcombine.high (%p750_p5), %v15191_v26, %v15193_v4  ;;  %v11410_v37 = vcombine.high (%p750_p5), %v4827_v18, %v4851_v62 }
 0x7eb   : >> { %v4400_v29 = vmax.f32 %v4396_v25, %v4399_v52  ;;  %v11409_v52 = vcombine.low (%p750_p5), %v4827_v18, %v4851_v62  ;;  %v4875_v25 = vld [vmem:[#allocation23 + $0x480] sm:$0xff] (%p750_p5)  ;;  %v4780_v62 = vld [vmem:[#allocation23 + $0x188] sm:$0xff] (%p750_p5) }
 0x7ed   : >> { %v4401_v16 = vrot.slane %v4400_v29, 4 }
 0x7ef   : >> { %v4402_v33 = vmax.f32 %v4400_v29, %v4401_v16  ;;  %v4899_v29 = vld [vmem:[#allocation23 + $0x540] sm:$0xff] (%p750_p5) }
 0x7f0   : > { %v11458_v16 = vcombine.high (%p750_p5), %v4875_v25, %v4899_v29 }
 0x7f1   : >> { %v4403_v53 = vrot.slane %v4402_v33, 2 }
 0x7f3   : >> { %v4404_v41 = vmax.f32 %v4402_v33, %v4403_v53  ;;  %v11457_v33 = vcombine.low (%p750_p5), %v4875_v25, %v4899_v29  ;;  %v4923_v53 = vld [vmem:[#allocation23 + $0x600] sm:$0xff] (%p750_p5) }
 0x7f5   : >> { %v4405_v11 = vrot.slane %v4404_v41, 1  ;;  %752 = sbr.rel (!%p750_p5) target bundleno = 444 (0x1bc), region = 192 }
 0x7f7   : >> { %v4406_v21 = vmax.f32 %v4404_v41, %v4405_v11  ;;  %v4947_v41 = vld [vmem:[#allocation23 + $0x6c0] sm:$0xff] (%p750_p5) }
 0x7f8   : > { %v11506_v11 = vcombine.high (%p750_p5), %v4923_v53, %v4947_v41 }
 0x7f9   : >> { %v4407_v36 = vmax.f32 %v13293_v0, %v4406_v21   ;;  %v11505_v21 = vcombine.low (%p750_p5), %v4923_v53, %v4947_v41 }
 0x7fb   : >> { %v15575_v0 = vmov %v4407_v36  ;;  %v4408_v24 = vpack.c.bf16 (%p750_p5), %v4407_v36, %v4407_v36  ;;  %v4971_v36 = vld [vmem:[#allocation23 + $0x780] sm:$0xff] (%p750_p5) }
 0x7fc   : > { %v12724_v0 = vld [vmem:[#allocation20 + $0x10] ss:$8 sps:$4 sm:$0xff]   ;;  %v11554_v23 = vcombine.high %v4971_v36, %v4995_v7  ;;  %v11553_v38 = vcombine.low %v4971_v36, %v4995_v7 }
 0x7fd   : > { %11280 = vmatmul.mubr.msk.bf16.vlgmr.msra.gmra.mrb[0].mxu0 %vm4273_vm1, %v4408_v24  ;;  %4689 = vmatpush1.bf16.msra.mxu1 %v12724_v0  ;;  %v5019_v24 = vld [vmem:[#allocation23 + $0x900] sm:$0xff] }
 0x7fe   : > { %4690 = vmatprep.subr.bf16.mxu1 %v12725_v30  ;;  %9592 = vmatpush1.bf16.msra.mxu0 %v11313_v19  ;;  %v11602_v20 = vcombine.high %v5019_v24, %v5043_v54  ;;  %v11601_v42 = vcombine.low %v5019_v24, %v5043_v54  ;;  %v5067_v0 = vld [vmem:[#allocation23 + $0xa80] sm:$0xff] }
 0x7ff   : > { %9593 = vmatprep.subr.bf16.mxu0 %v11362_v49  ;;  %v5091_v30 = vld [vmem:[#allocation23 + $0xb40] sm:$0xff] }
 0x801   : > { %4691 = vmatpush1.bf16.msra.mxu1 %v12727_v3  ;;  %v11650_v3 = vcombine.high %v5067_v0, %v5091_v30 }
 0x802   : > { %4692 = vmatprep.subr.bf16.mxu1 %v12728_v51  ;;  %9594 = vmatpush1.bf16.msra.mxu0 %v11361_v9  ;;  %v11649_v51 = vcombine.low %v5067_v0, %v5091_v30  ;;  %v5044_v0 = vld [vmem:[#allocation23 + $0x9c8] sm:$0xff] }
 0x803   : > { %9595 = vmatprep.subr.bf16.mxu0 %v11410_v37  ;;  %v4804_v37 = vld [vmem:[#allocation23 + $0x248] sm:$0xff] }
 0x804   : > { %v11364_v29 = vcombine.high %v4780_v62, %v4804_v37  ;;  %v11363_v53 = vcombine.low %v4780_v62, %v4804_v37  ;;  %v5451_v37 = vld [vmem:[#allocation23 + $0x1680] sm:$0xff] }
 0x805   : > { %4693 = vmatpush1.bf16.msra.mxu1 %v12730_v61  ;;  %v5115_v61 = vld [vmem:[#allocation23 + $0xc00] sm:$0xff] }
 0x806   : > { %4694 = vmatprep.subr.bf16.mxu1 %v12731_v8  ;;  %9596 = vmatpush1.bf16.msra.mxu0 %v11409_v52  ;;  %v5139_v8 = vld [vmem:[#allocation23 + $0xcc0] sm:$0xff] }
 0x807   : > { %9597 = vmatprep.subr.bf16.mxu0 %v11458_v16  ;;  %v4828_v16 = vld [vmem:[#allocation23 + $0x308] sm:$0xff] }
 0x809   : > { %4695 = vmatpush1.bf16.msra.mxu1 %v12733_v2  ;;  %v11698_v2 = vcombine.high %v5115_v61, %v5139_v8 }
 0x80a   : > { %4696 = vmatprep.subr.bf16.mxu1 %v12734_v57  ;;  %9598 = vmatpush1.bf16.msra.mxu0 %v11457_v33  ;;  %v11697_v57 = vcombine.low %v5115_v61, %v5139_v8  ;;  %v4852_v33 = vld [vmem:[#allocation23 + $0x3c8] sm:$0xff] }
 0x80b   : > { %9599 = vmatprep.subr.bf16.mxu0 %v11506_v11  ;;  %v11412_v41 = vcombine.high %v4828_v16, %v4852_v33  ;;  %v4876_v11 = vld [vmem:[#allocation23 + $0x488] sm:$0xff]  ;;  %v11411_v36 = vcombine.low %v4828_v16, %v4852_v33 }
 0x80c   : > { %v5092_v61 = vld [vmem:[#allocation23 + $0xb48] sm:$0xff] }
 0x80d   : > { %4697 = vmatpush1.bf16.msra.mxu1 %v12736_v47  ;;  %v5163_v47 = vld [vmem:[#allocation23 + $0xd80] sm:$0xff]  ;;  %v5476_v16 = vld [vmem:[#allocation23 + $0x1748] sm:$0xff] }
 0x80e   : > { %4698 = vmatprep.subr.bf16.mxu1 %v12737_v34  ;;  %9600 = vmatpush1.bf16.msra.mxu0 %v11505_v21  ;;  %v5187_v34 = vld [vmem:[#allocation23 + $0xe40] sm:$0xff]  ;;  %v4900_v21 = vld [vmem:[#allocation23 + $0x548] sm:$0xff] }
 0x80f   : > { %9601 = vmatprep.subr.bf16.mxu0 %v11554_v23  ;;  %v11460_v7 = vcombine.high %v4876_v11, %v4900_v21  ;;  %v4924_v23 = vld [vmem:[#allocation23 + $0x608] sm:$0xff]  ;;  %v11459_v24 = vcombine.low %v4876_v11, %v4900_v21  ;;  %v4733_v11 = vld [vmem:[#allocation23 + $0x10] sm:$0xff] }
 0x810   : > { %v4757_v21 = vld [vmem:[#allocation23 + $0xd0] sm:$0xff] }
 0x811   : > { %4699 = vmatpush1.bf16.msra.mxu1 %v12739_v13  ;;  %v11746_v13 = vcombine.high %v5163_v47, %v5187_v34 }
 0x812   : > { %4700 = vmatprep.subr.bf16.mxu1 %v12740_v39  ;;  %9602 = vmatpush1.bf16.msra.mxu0 %v11553_v38  ;;  %v11745_v39 = vcombine.low %v5163_v47, %v5187_v34  ;;  %v4948_v38 = vld [vmem:[#allocation23 + $0x6c8] sm:$0xff] }
 0x813   : > { %9603 = vmatprep.subr.bf16.mxu0 %v11602_v20  ;;  %v11508_v54 = vcombine.high %v4924_v23, %v4948_v38  ;;  %v4972_v20 = vld [vmem:[#allocation23 + $0x788] sm:$0xff]  ;;  %v11507_v26 = vcombine.low %v4924_v23, %v4948_v38  ;;  %v4758_v23 = vld [vmem:[#allocation23 + $0xd8] sm:$0xff]  ;;  %v11317_v38 = vcombine.low %v4733_v11, %v4757_v21 }
 0x814   : > { %v5140_v47 = vld [vmem:[#allocation23 + $0xcc8] sm:$0xff] }
 0x815   : > { %4701 = vmatpush1.bf16.msra.mxu1 %v12742_v44  ;;  %v5211_v44 = vld [vmem:[#allocation23 + $0xf00] sm:$0xff] }
 0x816   : > { %4702 = vmatprep.subr.bf16.mxu1 %v12743_v1  ;;  %9604 = vmatpush1.bf16.msra.mxu0 %v11601_v42  ;;  %v5235_v1 = vld [vmem:[#allocation23 + $0xfc0] sm:$0xff]  ;;  %v4996_v42 = vld [vmem:[#allocation23 + $0x848] sm:$0xff] }
 0x817   : > { %9605 = vmatprep.subr.bf16.mxu0 %v11650_v3  ;;  %v11556_v4 = vcombine.high %v4972_v20, %v4996_v42  ;;  %v11555_v30 = vcombine.low %v4972_v20, %v4996_v42  ;;  %v4514_v20 = vld [vmem:[#allocation22] sm:$0x3] }
 0x818   : > { %v4679_v42 = vrot.slane %v4514_v20, %v14856_v32 }
 0x819   : > { %4703 = vmatpush1.bf16.msra.mxu1 %v12745_v10  ;;  %v11794_v10 = vcombine.high %v5211_v44, %v5235_v1 }
 0x81a   : > { %4704 = vmatprep.subr.bf16.mxu1 %v12746_v60  ;;  %9606 = vmatpush1.bf16.msra.mxu0 %v11649_v51  ;;  %v11793_v60 = vcombine.low %v5211_v44, %v5235_v1  ;;  %v5068_v51 = vld [vmem:[#allocation23 + $0xa88] sm:$0xff] }
 0x81b   : > { %9607 = vmatprep.subr.bf16.mxu0 %v11698_v2  ;;  %v11652_v2 = vcombine.high %v5068_v51, %v5092_v61  ;;  %v11651_v34 = vcombine.low %v5068_v51, %v5092_v61  ;;  %v5188_v44 = vld [vmem:[#allocation23 + $0xe48] sm:$0xff] }
 0x81d   : > { %4705 = vmatpush1.bf16.msra.mxu1 %v12748_v22  ;;  %v5259_v22 = vld [vmem:[#allocation23 + $0x1080] sm:$0xff] }
 0x81e   : > { %4706 = vmatprep.subr.bf16.mxu1 %v12749_v56  ;;  %9608 = vmatpush1.bf16.msra.mxu0 %v11697_v57  ;;  %v5283_v56 = vld [vmem:[#allocation23 + $0x1140] sm:$0xff]  ;;  %v5116_v57 = vld [vmem:[#allocation23 + $0xc08] sm:$0xff] }
 0x81f   : > { %9609 = vmatprep.subr.bf16.mxu0 %v11746_v13  ;;  %v11700_v13 = vcombine.high %v5116_v57, %v5140_v47  ;;  %v11699_v1 = vcombine.low %v5116_v57, %v5140_v47  ;;  %v4805_v57 = vld [vmem:[#allocation23 + $0x250] sm:$0xff]  ;;  %v4782_v47 = vld [vmem:[#allocation23 + $0x198] sm:$0xff] }
 0x821   : > { %4707 = vmatpush1.bf16.msra.mxu1 %v12751_v63  ;;  %v11842_v63 = vcombine.high %v5259_v22, %v5283_v56 }
 0x822   : > { %4708 = vmatprep.subr.bf16.mxu1 %v12752_v46  ;;  %9610 = vmatpush1.bf16.msra.mxu0 %v11745_v39  ;;  %v11841_v46 = vcombine.low %v5259_v22, %v5283_v56  ;;  %v5164_v39 = vld [vmem:[#allocation23 + $0xd88] sm:$0xff] }
 0x823   : > { %9611 = vmatprep.subr.bf16.mxu0 %v11794_v10  ;;  %v11748_v10 = vcombine.high %v5164_v39, %v5188_v44  ;;  %v5236_v22 = vld [vmem:[#allocation23 + $0xfc8] sm:$0xff]  ;;  %v11747_v56 = vcombine.low %v5164_v39, %v5188_v44  ;;  %v4829_v44 = vld [vmem:[#allocation23 + $0x310] sm:$0xff] }
 0x825   : > { %4709 = vmatpush1.bf16.msra.mxu1 %v12754_v6  ;;  %v5307_v6 = vld [vmem:[#allocation23 + $0x1200] sm:$0xff] }
 0x826   : > { %4710 = vmatprep.subr.bf16.mxu1 %v12755_v48  ;;  %9612 = vmatpush1.bf16.msra.mxu0 %v11793_v60  ;;  %v5331_v48 = vld [vmem:[#allocation23 + $0x12c0] sm:$0xff]  ;;  %v5212_v60 = vld [vmem:[#allocation23 + $0xf08] sm:$0xff] }
 0x827   : > { %9613 = vmatprep.subr.bf16.mxu0 %v11842_v63  ;;  %v11796_v63 = vcombine.high %v5212_v60, %v5236_v22 }
 0x829   : > { %4711 = vmatpush1.bf16.msra.mxu1 %v12757_v59  ;;  %v11890_v59 = vcombine.high %v5307_v6, %v5331_v48 }
 0x82a   : > { %4712 = vmatprep.subr.bf16.mxu1 %v12758_v17  ;;  %9614 = vmatpush1.bf16.msra.mxu0 %v11841_v46  ;;  %v11889_v17 = vcombine.low %v5307_v6, %v5331_v48  ;;  %v5260_v46 = vld [vmem:[#allocation23 + $0x1088] sm:$0xff]  ;;  %v11795_v48 = vcombine.low %v5212_v60, %v5236_v22  ;;  %v4853_v60 = vld [vmem:[#allocation23 + $0x3d0] sm:$0xff]  ;;  %v4830_v22 = vld [vmem:[#allocation23 + $0x318] sm:$0xff] }
 0x82b   : > { %9615 = vmatprep.subr.bf16.mxu0 %v11890_v59  ;;  %v5284_v6 = vld [vmem:[#allocation23 + $0x1148] sm:$0xff] }
 0x82c   : > { %v11844_v59 = vcombine.high %v5260_v46, %v5284_v6 }
 0x82d   : > { %4713 = vmatpush1.bf16.msra.mxu1 %v12760_v43  ;;  %v5355_v43 = vld [vmem:[#allocation23 + $0x1380] sm:$0xff] }
 0x82e   : > { %4714 = vmatprep.subr.bf16.mxu1 %v12761_v27  ;;  %v5379_v27 = vld [vmem:[#allocation23 + $0x1440] sm:$0xff]  ;;  %9616 = vmatpush1.bf16.msra.mxu0 %v11889_v17  ;;  %v5308_v17 = vld [vmem:[#allocation23 + $0x1208] sm:$0xff] }
 0x831   : > { %4715 = vmatpush1.bf16.msra.mxu1 %v12763_v58  ;;  %v11938_v58 = vcombine.high %v5355_v43, %v5379_v27 }
 0x832   : > { %4716 = vmatprep.subr.bf16.mxu1 %v12764_v14  ;;  %v11937_v14 = vcombine.low %v5355_v43, %v5379_v27  ;;  %v5332_v43 = vld [vmem:[#allocation23 + $0x12c8] sm:$0xff]  ;;  %v11843_v27 = vcombine.low %v5260_v46, %v5284_v6  ;;  %v11414_v6 = vcombine.high %v4829_v44, %v4853_v60 }
 0x833   : > { %9617 = vmatprep.subr.bf16.mxu0 %v11938_v58  ;;  %v11892_v58 = vcombine.high %v5308_v17, %v5332_v43 }
 0x834   : > { %9618 = vmatpush1.bf16.msra.mxu0 %v11937_v14  ;;  %v5356_v14 = vld [vmem:[#allocation23 + $0x1388] sm:$0xff] }
 0x835   : > { %4717 = vmatpush1.bf16.msra.mxu1 %v12766_v31  ;;  %v4411_v31 = vld [vmem:[#allocation19] sm:$0x3] }
 0x836   : > { %9632 = vmatprep.subr.bf16.mxu1 %v11316_v55  ;;  %v4426_v40 = vrot.slane %v4411_v31, %v14856_v32  ;;  %v4430_v5 = vrot.slane %v4411_v31, %v14860_v45  ;;  %v5380_v31 = vld [vmem:[#allocation23 + $0x1448] sm:$0xff] }
 0x8d0   : > { %v4471_v19 = vpop.f32.mrb[0].mxu0 }
 0x8d1   : > { %v4472_v35 = vadd.f32 %v4471_v19, %v4426_v40  ;;  %v4473_v12 = vpop.f32.mrb[1].mxu0  ;;  %v11891_v40 = vcombine.low %v5308_v17, %v5332_v43  ;;  %v11939_v19 = vcombine.low %v5356_v14, %v5380_v31  ;;  %v4901_v17 = vld [vmem:[#allocation23 + $0x550] sm:$0xff]  ;;  %v4878_v43 = vld [vmem:[#allocation23 + $0x498] sm:$0xff] }
 0x8d2   : > { %v4474_v50 = vadd.f32 %v4473_v12, %v4430_v5  ;;  %v4475_v55 = vpop.f32.mrb[2].mxu0  ;;  %v11940_v5 = vcombine.high %v5356_v14, %v5380_v31  ;;  %v5427_v12 = vld [vmem:[#allocation23 + $0x15c0] sm:$0xff] }
 0x8d3   : > { %v4478_v49 = vmax.f32 %v4472_v35, 0.0  ;;  %v4476_v9 = vpop.f32.mrb[3].mxu0  ;;  %v5403_v35 = vld [vmem:[#allocation23 + $0x1500] sm:$0xff] }
 0x8d4   : > { %v4479_v18 = vmax.f32 %v4474_v50, 0.0  ;;  %v5404_v50 = vld [vmem:[#allocation23 + $0x1508] sm:$0xff]  ;;  %v11986_v55 = vcombine.high %v5403_v35, %v5427_v12  ;;  %v11985_v9 = vcombine.low %v5403_v35, %v5427_v12  ;;  %v4926_v35 = vld [vmem:[#allocation23 + $0x618] sm:$0xff] }
 0x8d5   : > { %v4480_v25 = vpack.c.bf16 %v4478_v49, %v4478_v49  ;;  %v5428_v49 = vld [vmem:[#allocation23 + $0x15c8] sm:$0xff]  ;;  %v4950_v12 = vld [vmem:[#allocation23 + $0x6d8] sm:$0xff] }
 0x8d6   : > { %v4481_v52 = vpack.c.bf16 %v4479_v18, %v4479_v18  ;;  %v11987_v18 = vcombine.low %v5404_v50, %v5428_v49  ;;  %v11988_v62 = vcombine.high %v5404_v50, %v5428_v49  ;;  %9619 = vmatprep.subr.bf16.mxu0 %v11986_v55 }
 0x8d7   : > { %9620 = vmatpush1.bf16.msra.mxu0 %v11985_v9  ;;  %v11512_v9 = vcombine.high %v4926_v35, %v4950_v12 }
 0x8d8   : > { %4718 = vmatprep.mubr.bf16.mxu1 %v4481_v52  ;;  %v5475_v52 = vld [vmem:[#allocation23 + $0x1740] sm:$0xff] }
 0x8d9   : > { %4719 = vmatmul.mubr.bf16.vlgmr.msra.gmra.mrb[0].mxu1 %v4480_v25  ;;  %v5452_v25 = vld [vmem:[#allocation23 + $0x1688] sm:$0xff]  ;;  %v12033_v33 = vcombine.low %v5451_v37, %v5475_v52 }
 0x8da   : > { %9633 = vmatpush1.bf16.msra.mxu1 %v11315_v15  ;;  %v5020_v15 = vld [vmem:[#allocation23 + $0x908] sm:$0xff] }
 0x8db   : > { %9634 = vmatprep.subr.bf16.mxu1 %v11364_v29  ;;  %v11604_v3 = vcombine.high %v5020_v15, %v5044_v0  ;;  %v11603_v8 = vcombine.low %v5020_v15, %v5044_v0  ;;  %v12034_v29 = vcombine.high %v5451_v37, %v5475_v52  ;;  %v4974_v37 = vld [vmem:[#allocation23 + $0x798] sm:$0xff] }
 0x8dc   : > { %v4998_v52 = vld [vmem:[#allocation23 + $0x858] sm:$0xff] }
 0x8dd   : > { %9621 = vmatprep.subr.bf16.mxu0 %v12034_v29  ;;  %v11511_v29 = vcombine.low %v4926_v35, %v4950_v12 }
 0x8de   : > { %9635 = vmatpush1.bf16.msra.mxu1 %v11363_v53  ;;  %v12035_v53 = vcombine.low %v5452_v25, %v5476_v16  ;;  %9622 = vmatpush1.bf16.msra.mxu0 %v12033_v33  ;;  %v11560_v33 = vcombine.high %v4974_v37, %v4998_v52 }
 0x8df   : > { %9636 = vmatprep.subr.bf16.mxu1 %v11412_v41  ;;  %v12036_v41 = vcombine.high %v5452_v25, %v5476_v16 }
 0x8e2   : > { %9637 = vmatpush1.bf16.msra.mxu1 %v11411_v36  ;;  %v4734_v36 = vld [vmem:[#allocation23 + $0x18] sm:$0xff] }
 0x8e3   : > { %9638 = vmatprep.subr.bf16.mxu1 %v11460_v7  ;;  %v11318_v7 = vcombine.high %v4733_v11, %v4757_v21  ;;  %v5022_v11 = vld [vmem:[#allocation23 + $0x918] sm:$0xff] }
 0x8e4   : > { %v5046_v21 = vld [vmem:[#allocation23 + $0x9d8] sm:$0xff] }
 0x8e5   : > { %9673 = vmatprep.subr.bf16.mxu0 %v11318_v7  ;;  %v11559_v7 = vcombine.low %v4974_v37, %v4998_v52 }
 0x8e6   : > { %9639 = vmatpush1.bf16.msra.mxu1 %v11459_v24  ;;  %v11319_v24 = vcombine.low %v4734_v36, %v4758_v23 }
 0x8e7   : > { %9640 = vmatprep.subr.bf16.mxu1 %v11508_v54  ;;  %v11320_v54 = vcombine.high %v4734_v36, %v4758_v23 }
 0x8ea   : > { %9641 = vmatpush1.bf16.msra.mxu1 %v11507_v26  ;;  %v4683_v26 = vrot.slane %v4514_v20, %v14860_v45  ;;  %v5070_v20 = vld [vmem:[#allocation23 + $0xa98] sm:$0xff] }
 0x8eb   : > { %9642 = vmatprep.subr.bf16.mxu1 %v11556_v4 }
 0x8ee   : > { %9643 = vmatpush1.bf16.msra.mxu1 %v11555_v30 }
 0x8ef   : > { %9644 = vmatprep.subr.bf16.mxu1 %v11604_v3 }
 0x8f2   : > { %9645 = vmatpush1.bf16.msra.mxu1 %v11603_v8 }
 0x8f3   : > { %9646 = vmatprep.subr.bf16.mxu1 %v11652_v2  ;;  %v4781_v2 = vld [vmem:[#allocation23 + $0x190] sm:$0xff] }
 0x8f6   : > { %9647 = vmatpush1.bf16.msra.mxu1 %v11651_v34  ;;  %v4806_v34 = vld [vmem:[#allocation23 + $0x258] sm:$0xff] }
 0x8f7   : > { %9648 = vmatprep.subr.bf16.mxu1 %v11700_v13  ;;  %v11367_v46 = vcombine.low %v4782_v47, %v4806_v34 }
 0x8fa   : > { %9649 = vmatpush1.bf16.msra.mxu1 %v11699_v1  ;;  %v11366_v1 = vcombine.high %v4781_v2, %v4805_v57 }
 0x8fb   : > { %9650 = vmatprep.subr.bf16.mxu1 %v11748_v10  ;;  %v11368_v10 = vcombine.high %v4782_v47, %v4806_v34  ;;  %v5165_v34 = vld [vmem:[#allocation23 + $0xd90] sm:$0xff] }
 0x8fe   : > { %9651 = vmatpush1.bf16.msra.mxu1 %v11747_v56  ;;  %v4854_v56 = vld [vmem:[#allocation23 + $0x3d8] sm:$0xff] }
 0x8ff   : > { %9652 = vmatprep.subr.bf16.mxu1 %v11796_v63  ;;  %v11365_v63 = vcombine.low %v4781_v2, %v4805_v57  ;;  %v11415_v14 = vcombine.low %v4830_v22, %v4854_v56 }
 0x902   : > { %9653 = vmatpush1.bf16.msra.mxu1 %v11795_v48  ;;  %v11416_v48 = vcombine.high %v4830_v22, %v4854_v56 }
 0x903   : > { %9654 = vmatprep.subr.bf16.mxu1 %v11844_v59  ;;  %v4877_v59 = vld [vmem:[#allocation23 + $0x490] sm:$0xff] }
 0x904   : > { %v11462_v31 = vcombine.high %v4877_v59, %v4901_v17  ;;  %v11461_v50 = vcombine.low %v4877_v59, %v4901_v17  ;;  %v5238_v59 = vld [vmem:[#allocation23 + $0xfd8] sm:$0xff] }
 0x906   : > { %9655 = vmatpush1.bf16.msra.mxu1 %v11843_v27  ;;  %v4902_v27 = vld [vmem:[#allocation23 + $0x558] sm:$0xff] }
 0x907   : > { %9656 = vmatprep.subr.bf16.mxu1 %v11892_v58  ;;  %v11413_v58 = vcombine.low %v4829_v44, %v4853_v60  ;;  %v11463_v55 = vcombine.low %v4878_v43, %v4902_v27  ;;  %v5189_v44 = vld [vmem:[#allocation23 + $0xe50] sm:$0xff] }
 0x908   : > { %v11750_v56 = vcombine.high %v5165_v34, %v5189_v44  ;;  %v11749_v17 = vcombine.low %v5165_v34, %v5189_v44  ;;  %v4760_v34 = vld [vmem:[#allocation23 + $0xe8] sm:$0xff] }
 0x90a   : > { %9657 = vmatpush1.bf16.msra.mxu1 %v11891_v40  ;;  %v11464_v40 = vcombine.high %v4878_v43, %v4902_v27 }
 0x90b   : > { %9658 = vmatprep.subr.bf16.mxu1 %v11940_v5  ;;  %v4925_v5 = vld [vmem:[#allocation23 + $0x610] sm:$0xff] }
 0x90e   : > { %9659 = vmatpush1.bf16.msra.mxu1 %v11939_v19  ;;  %v4949_v19 = vld [vmem:[#allocation23 + $0x6d0] sm:$0xff] }
 0x90f   : > { %9660 = vmatprep.subr.bf16.mxu1 %v11988_v62  ;;  %v11510_v49 = vcombine.high %v4925_v5, %v4949_v19  ;;  %v4997_v62 = vld [vmem:[#allocation23 + $0x850] sm:$0xff]  ;;  %v11509_v25 = vcombine.low %v4925_v5, %v4949_v19  ;;  %v5286_v5 = vld [vmem:[#allocation23 + $0x1158] sm:$0xff] }
 0x912   : > { %9661 = vmatpush1.bf16.msra.mxu1 %v11987_v18  ;;  %v4973_v18 = vld [vmem:[#allocation23 + $0x790] sm:$0xff] }
 0x913   : > { %9662 = vmatprep.subr.bf16.mxu1 %v12036_v41  ;;  %v11558_v16 = vcombine.high %v4973_v18, %v4997_v62  ;;  %v5045_v41 = vld [vmem:[#allocation23 + $0x9d0] sm:$0xff]  ;;  %v11557_v36 = vcombine.low %v4973_v18, %v4997_v62  ;;  %v5334_v18 = vld [vmem:[#allocation23 + $0x12d8] sm:$0xff] }
 0x916   : > { %9663 = vmatpush1.bf16.msra.mxu1 %v12035_v53  ;;  %v5021_v53 = vld [vmem:[#allocation23 + $0x910] sm:$0xff] }
 0x917   : > { %9714 = vmatprep.subr.bf16.mxu1 %v11320_v54  ;;  %v11606_v23 = vcombine.high %v5021_v53, %v5045_v41  ;;  %v5093_v54 = vld [vmem:[#allocation23 + $0xb50] sm:$0xff] }
 0x9ac   : > { %v4720_v4 = vpop.f32.mrb[0].mxu1 }
 0x9ad   : > { %v4721_v15 = vadd.f32 %v4720_v4, %v4679_v42  ;;  %v4722_v0 = vpop.f32.mrb[1].mxu1  ;;  %v5094_v42 = vld [vmem:[#allocation23 + $0xb58] sm:$0xff]  ;;  %v11607_v4 = vcombine.low %v5022_v11, %v5046_v21 }
 0x9ae   : > { %v4723_v30 = vadd.f32 %v4722_v0, %v4683_v26  ;;  %v4724_v3 = vpop.f32.mrb[2].mxu1  ;;  %v11605_v26 = vcombine.low %v5021_v53, %v5045_v41  ;;  %v11656_v0 = vcombine.high %v5070_v20, %v5094_v42  ;;  %v11655_v2 = vcombine.low %v5070_v20, %v5094_v42  ;;  %v5382_v53 = vld [vmem:[#allocation23 + $0x1458] sm:$0xff] }
 0x9af   : > { %v4727_v51 = vmax.f32 %v4721_v15, 0.0  ;;  %v4725_v61 = vpop.f32.mrb[3].mxu1  ;;  %v5141_v3 = vld [vmem:[#allocation23 + $0xcd0] sm:$0xff] }
 0x9b0   : > { %v4728_v8 = vmax.f32 %v4723_v30, 0.0  ;;  %v5117_v30 = vld [vmem:[#allocation23 + $0xc10] sm:$0xff]  ;;  %v5142_v61 = vld [vmem:[#allocation23 + $0xcd8] sm:$0xff] }
 0x9b1   : > { %v15208_v39 = vpack.c.bf16 %v4727_v51, %v4727_v51  ;;  %v5118_v51 = vld [vmem:[#allocation23 + $0xc18] sm:$0xff]  ;;  %v11702_v57 = vcombine.high %v5117_v30, %v5141_v3  ;;  %v11701_v60 = vcombine.low %v5117_v30, %v5141_v3 }
 0x9b2   : > { %v15206_v13 = vpack.c.bf16 %v4728_v8, %v4728_v8  ;;  %v11704_v47 = vcombine.high %v5118_v51, %v5142_v61  ;;  %v11703_v22 = vcombine.low %v5118_v51, %v5142_v61  ;;  %v5478_v30 = vld [vmem:[#allocation23 + $0x1758] sm:$0xff] }
 0x9b4   : > { %9623 = vmatprep.mubr.bf16.mxu0 %v15206_v13  ;;  %9664 = vmatprep.mubr.bf16.mxu1 %v15206_v13 }
 0x9b5   : > { %9624 = vmatmul.mubr.bf16.vlgmr.msra.gmra.mrb[4].mxu0 %v15208_v39  ;;  %9665 = vmatmul.mubr.bf16.vlgmr.msra.gmra.mrb[4].mxu1 %v15208_v39 }
 0x9b6   : > { %9674 = vmatpush1.bf16.msra.mxu0 %v11317_v38  ;;  %9715 = vmatpush1.bf16.msra.mxu1 %v11319_v24  ;;  %v11608_v38 = vcombine.high %v5022_v11, %v5046_v21  ;;  %v5069_v24 = vld [vmem:[#allocation23 + $0xa90] sm:$0xff] }
 0x9b7   : > { %9705 = vmatprep.mubr.bf16.mxu0 %v15206_v13  ;;  %9746 = vmatprep.mubr.bf16.mxu1 %v15206_v13  ;;  %v11654_v15 = vcombine.high %v5069_v24, %v5093_v54  ;;  %v11653_v8 = vcombine.low %v5069_v24, %v5093_v54  ;;  %v5430_v24 = vld [vmem:[#allocation23 + $0x15d8] sm:$0xff] }
 0x9b8   : > { %9675 = vmatprep.subr.bf16.mxu0 %v11366_v1  ;;  %9716 = vmatprep.subr.bf16.mxu1 %v11368_v10  ;;  %v5166_v1 = vld [vmem:[#allocation23 + $0xd98] sm:$0xff] }
 0x9b9   : > { %v5190_v10 = vld [vmem:[#allocation23 + $0xe58] sm:$0xff] }
 0x9ba   : > { %9676 = vmatpush1.bf16.msra.mxu0 %v11365_v63  ;;  %9717 = vmatpush1.bf16.msra.mxu1 %v11367_v46  ;;  %v11752_v63 = vcombine.high %v5166_v1, %v5190_v10  ;;  %v5213_v46 = vld [vmem:[#allocation23 + $0xf10] sm:$0xff]  ;;  %v11751_v43 = vcombine.low %v5166_v1, %v5190_v10 }
 0x9bb   : > { %9677 = vmatprep.subr.bf16.mxu0 %v11414_v6  ;;  %9718 = vmatprep.subr.bf16.mxu1 %v11416_v48  ;;  %v5237_v6 = vld [vmem:[#allocation23 + $0xfd0] sm:$0xff]  ;;  %v5214_v48 = vld [vmem:[#allocation23 + $0xf18] sm:$0xff] }
 0x9bc   : > { %v11798_v27 = vcombine.high %v5213_v46, %v5237_v6  ;;  %v11797_v19 = vcombine.low %v5213_v46, %v5237_v6  ;;  %v11799_v35 = vcombine.low %v5214_v48, %v5238_v59  ;;  %v4808_v46 = vld [vmem:[#allocation23 + $0x268] sm:$0xff] }
 0x9be   : > { %9678 = vmatpush1.bf16.msra.mxu0 %v11413_v58  ;;  %9719 = vmatpush1.bf16.msra.mxu1 %v11415_v14  ;;  %v11800_v58 = vcombine.high %v5214_v48, %v5238_v59  ;;  %v5261_v14 = vld [vmem:[#allocation23 + $0x1090] sm:$0xff] }
 0x9bf   : > { %9679 = vmatprep.subr.bf16.mxu0 %v11462_v31  ;;  %9720 = vmatprep.subr.bf16.mxu1 %v11464_v40  ;;  %v5285_v31 = vld [vmem:[#allocation23 + $0x1150] sm:$0xff]  ;;  %v5262_v40 = vld [vmem:[#allocation23 + $0x1098] sm:$0xff] }
 0x9c0   : > { %v11846_v12 = vcombine.high %v5261_v14, %v5285_v31  ;;  %v11845_v62 = vcombine.low %v5261_v14, %v5285_v31  ;;  %v11847_v37 = vcombine.low %v5262_v40, %v5286_v5  ;;  %v4856_v14 = vld [vmem:[#allocation23 + $0x3e8] sm:$0xff] }
 0x9c2   : > { %9680 = vmatpush1.bf16.msra.mxu0 %v11461_v50  ;;  %9721 = vmatpush1.bf16.msra.mxu1 %v11463_v55  ;;  %v11848_v50 = vcombine.high %v5262_v40, %v5286_v5  ;;  %v5309_v55 = vld [vmem:[#allocation23 + $0x1210] sm:$0xff] }
 0x9c3   : > { %9681 = vmatprep.subr.bf16.mxu0 %v11510_v49  ;;  %9722 = vmatprep.subr.bf16.mxu1 %v11512_v9  ;;  %v5333_v49 = vld [vmem:[#allocation23 + $0x12d0] sm:$0xff]  ;;  %v5310_v9 = vld [vmem:[#allocation23 + $0x1218] sm:$0xff] }
 0x9c4   : > { %v11894_v52 = vcombine.high %v5309_v55, %v5333_v49  ;;  %v11893_v41 = vcombine.low %v5309_v55, %v5333_v49  ;;  %v11895_v11 = vcombine.low %v5310_v9, %v5334_v18  ;;  %v4904_v55 = vld [vmem:[#allocation23 + $0x568] sm:$0xff] }
 0x9c6   : > { %9682 = vmatpush1.bf16.msra.mxu0 %v11509_v25  ;;  %9723 = vmatpush1.bf16.msra.mxu1 %v11511_v29  ;;  %v11896_v25 = vcombine.high %v5310_v9, %v5334_v18  ;;  %v5357_v29 = vld [vmem:[#allocation23 + $0x1390] sm:$0xff] }
 0x9c7   : > { %9683 = vmatprep.subr.bf16.mxu0 %v11558_v16  ;;  %9724 = vmatprep.subr.bf16.mxu1 %v11560_v33  ;;  %v5381_v16 = vld [vmem:[#allocation23 + $0x1450] sm:$0xff]  ;;  %v5358_v33 = vld [vmem:[#allocation23 + $0x1398] sm:$0xff] }
 0x9c8   : > { %v11942_v21 = vcombine.high %v5357_v29, %v5381_v16  ;;  %v11941_v54 = vcombine.low %v5357_v29, %v5381_v16  ;;  %v11943_v20 = vcombine.low %v5358_v33, %v5382_v53  ;;  %v4952_v29 = vld [vmem:[#allocation23 + $0x6e8] sm:$0xff] }
 0x9ca   : > { %9684 = vmatpush1.bf16.msra.mxu0 %v11557_v36  ;;  %9725 = vmatpush1.bf16.msra.mxu1 %v11559_v7  ;;  %v11944_v36 = vcombine.high %v5358_v33, %v5382_v53  ;;  %v5405_v7 = vld [vmem:[#allocation23 + $0x1510] sm:$0xff] }
 0x9cb   : > { %9685 = vmatprep.subr.bf16.mxu0 %v11606_v23  ;;  %9726 = vmatprep.subr.bf16.mxu1 %v11608_v38  ;;  %v5429_v23 = vld [vmem:[#allocation23 + $0x15d0] sm:$0xff]  ;;  %v5406_v38 = vld [vmem:[#allocation23 + $0x1518] sm:$0xff] }
 0x9cc   : > { %v11990_v42 = vcombine.high %v5405_v7, %v5429_v23  ;;  %v11989_v3 = vcombine.low %v5405_v7, %v5429_v23  ;;  %v11991_v51 = vcombine.low %v5406_v38, %v5430_v24  ;;  %v5000_v7 = vld [vmem:[#allocation23 + $0x868] sm:$0xff] }
 0x9ce   : > { %9686 = vmatpush1.bf16.msra.mxu0 %v11605_v26  ;;  %9727 = vmatpush1.bf16.msra.mxu1 %v11607_v4  ;;  %v11992_v26 = vcombine.high %v5406_v38, %v5430_v24  ;;  %v5453_v4 = vld [vmem:[#allocation23 + $0x1690] sm:$0xff] }
 0x9cf   : > { %9687 = vmatprep.subr.bf16.mxu0 %v11654_v15  ;;  %9728 = vmatprep.subr.bf16.mxu1 %v11656_v0  ;;  %v5477_v15 = vld [vmem:[#allocation23 + $0x1750] sm:$0xff]  ;;  %v5454_v0 = vld [vmem:[#allocation23 + $0x1698] sm:$0xff] }
 0x9d0   : > { %v12038_v61 = vcombine.high %v5453_v4, %v5477_v15  ;;  %v12037_v44 = vcombine.low %v5453_v4, %v5477_v15  ;;  %v12039_v1 = vcombine.low %v5454_v0, %v5478_v30  ;;  %v5048_v4 = vld [vmem:[#allocation23 + $0x9e8] sm:$0xff] }
 0x9d2   : > { %9688 = vmatpush1.bf16.msra.mxu0 %v11653_v8  ;;  %9729 = vmatpush1.bf16.msra.mxu1 %v11655_v2  ;;  %v12040_v8 = vcombine.high %v5454_v0, %v5478_v30  ;;  %v4735_v2 = vld [vmem:[#allocation23 + $0x20] sm:$0xff] }
 0x9d3   : > { %9689 = vmatprep.subr.bf16.mxu0 %v11702_v57  ;;  %9730 = vmatprep.subr.bf16.mxu1 %v11704_v47  ;;  %v4759_v57 = vld [vmem:[#allocation23 + $0xe0] sm:$0xff]  ;;  %v4736_v47 = vld [vmem:[#allocation23 + $0x28] sm:$0xff] }
 0x9d4   : > { %v11322_v10 = vcombine.high %v4735_v2, %v4759_v57  ;;  %v11321_v6 = vcombine.low %v4735_v2, %v4759_v57  ;;  %v11323_v48 = vcombine.low %v4736_v47, %v4760_v34  ;;  %v5096_v2 = vld [vmem:[#allocation23 + $0xb68] sm:$0xff] }
 0x9d6   : > { %9690 = vmatpush1.bf16.msra.mxu0 %v11701_v60  ;;  %9731 = vmatpush1.bf16.msra.mxu1 %v11703_v22  ;;  %v11324_v60 = vcombine.high %v4736_v47, %v4760_v34  ;;  %v4783_v22 = vld [vmem:[#allocation23 + $0x1a0] sm:$0xff] }
 0x9d7   : > { %9691 = vmatprep.subr.bf16.mxu0 %v11750_v56  ;;  %9732 = vmatprep.subr.bf16.mxu1 %v11752_v63  ;;  %v4807_v56 = vld [vmem:[#allocation23 + $0x260] sm:$0xff]  ;;  %v4784_v63 = vld [vmem:[#allocation23 + $0x1a8] sm:$0xff] }
 0x9d8   : > { %v11370_v59 = vcombine.high %v4783_v22, %v4807_v56  ;;  %v11369_v31 = vcombine.low %v4783_v22, %v4807_v56  ;;  %v11371_v40 = vcombine.low %v4784_v63, %v4808_v46  ;;  %v5144_v22 = vld [vmem:[#allocation23 + $0xce8] sm:$0xff] }
 0x9da   : > { %9692 = vmatpush1.bf16.msra.mxu0 %v11749_v17  ;;  %9733 = vmatpush1.bf16.msra.mxu1 %v11751_v43  ;;  %v11372_v17 = vcombine.high %v4784_v63, %v4808_v46  ;;  %v4831_v43 = vld [vmem:[#allocation23 + $0x320] sm:$0xff] }
 0x9db   : > { %9693 = vmatprep.subr.bf16.mxu0 %v11798_v27  ;;  %9734 = vmatprep.subr.bf16.mxu1 %v11800_v58  ;;  %v4855_v27 = vld [vmem:[#allocation23 + $0x3e0] sm:$0xff]  ;;  %v4832_v58 = vld [vmem:[#allocation23 + $0x328] sm:$0xff] }
 0x9dc   : > { %v11418_v5 = vcombine.high %v4831_v43, %v4855_v27  ;;  %v11417_v49 = vcombine.low %v4831_v43, %v4855_v27  ;;  %v11419_v9 = vcombine.low %v4832_v58, %v4856_v14  ;;  %v5192_v43 = vld [vmem:[#allocation23 + $0xe68] sm:$0xff] }
 0x9de   : > { %9694 = vmatpush1.bf16.msra.mxu0 %v11797_v19  ;;  %9735 = vmatpush1.bf16.msra.mxu1 %v11799_v35  ;;  %v11420_v19 = vcombine.high %v4832_v58, %v4856_v14  ;;  %v4879_v35 = vld [vmem:[#allocation23 + $0x4a0] sm:$0xff] }
 0x9df   : > { %9695 = vmatprep.subr.bf16.mxu0 %v11846_v12  ;;  %9736 = vmatprep.subr.bf16.mxu1 %v11848_v50  ;;  %v4903_v12 = vld [vmem:[#allocation23 + $0x560] sm:$0xff]  ;;  %v4880_v50 = vld [vmem:[#allocation23 + $0x4a8] sm:$0xff] }
 0x9e0   : > { %v11466_v18 = vcombine.high %v4879_v35, %v4903_v12  ;;  %v11465_v16 = vcombine.low %v4879_v35, %v4903_v12  ;;  %v11467_v33 = vcombine.low %v4880_v50, %v4904_v55  ;;  %v5240_v35 = vld [vmem:[#allocation23 + $0xfe8] sm:$0xff] }
 0x9e2   : > { %9696 = vmatpush1.bf16.msra.mxu0 %v11845_v62  ;;  %9737 = vmatpush1.bf16.msra.mxu1 %v11847_v37  ;;  %v11468_v62 = vcombine.high %v4880_v50, %v4904_v55  ;;  %v4927_v37 = vld [vmem:[#allocation23 + $0x620] sm:$0xff] }
 0x9e3   : > { %9697 = vmatprep.subr.bf16.mxu0 %v11894_v52  ;;  %9738 = vmatprep.subr.bf16.mxu1 %v11896_v25  ;;  %v4951_v52 = vld [vmem:[#allocation23 + $0x6e0] sm:$0xff]  ;;  %v4928_v25 = vld [vmem:[#allocation23 + $0x628] sm:$0xff] }
 0x9e4   : > { %v11514_v53 = vcombine.high %v4927_v37, %v4951_v52  ;;  %v11513_v23 = vcombine.low %v4927_v37, %v4951_v52  ;;  %v11515_v38 = vcombine.low %v4928_v25, %v4952_v29  ;;  %v5288_v37 = vld [vmem:[#allocation23 + $0x1168] sm:$0xff] }
 0x9e6   : > { %9698 = vmatpush1.bf16.msra.mxu0 %v11893_v41  ;;  %9739 = vmatpush1.bf16.msra.mxu1 %v11895_v11  ;;  %v11516_v41 = vcombine.high %v4928_v25, %v4952_v29  ;;  %v4975_v11 = vld [vmem:[#allocation23 + $0x7a0] sm:$0xff] }
 0x9e7   : > { %9699 = vmatprep.subr.bf16.mxu0 %v11942_v21  ;;  %9740 = vmatprep.subr.bf16.mxu1 %v11944_v36  ;;  %v4999_v21 = vld [vmem:[#allocation23 + $0x860] sm:$0xff]  ;;  %v4976_v36 = vld [vmem:[#allocation23 + $0x7a8] sm:$0xff] }
 0x9e8   : > { %v11562_v24 = vcombine.high %v4975_v11, %v4999_v21  ;;  %v11561_v15 = vcombine.low %v4975_v11, %v4999_v21  ;;  %v11563_v0 = vcombine.low %v4976_v36, %v5000_v7  ;;  %v5336_v11 = vld [vmem:[#allocation23 + $0x12e8] sm:$0xff] }
 0x9ea   : > { %9700 = vmatpush1.bf16.msra.mxu0 %v11941_v54  ;;  %9741 = vmatpush1.bf16.msra.mxu1 %v11943_v20  ;;  %v11564_v54 = vcombine.high %v4976_v36, %v5000_v7  ;;  %v5023_v20 = vld [vmem:[#allocation23 + $0x920] sm:$0xff] }
 0x9eb   : > { %9701 = vmatprep.subr.bf16.mxu0 %v11990_v42  ;;  %9742 = vmatprep.subr.bf16.mxu1 %v11992_v26  ;;  %v5047_v42 = vld [vmem:[#allocation23 + $0x9e0] sm:$0xff]  ;;  %v5024_v26 = vld [vmem:[#allocation23 + $0x928] sm:$0xff] }
 0x9ec   : > { %v11610_v30 = vcombine.high %v5023_v20, %v5047_v42  ;;  %v11609_v57 = vcombine.low %v5023_v20, %v5047_v42  ;;  %v11611_v47 = vcombine.low %v5024_v26, %v5048_v4  ;;  %v5384_v20 = vld [vmem:[#allocation23 + $0x1468] sm:$0xff] }
 0x9ee   : > { %9702 = vmatpush1.bf16.msra.mxu0 %v11989_v3  ;;  %9743 = vmatpush1.bf16.msra.mxu1 %v11991_v51  ;;  %v11612_v3 = vcombine.high %v5024_v26, %v5048_v4  ;;  %v5071_v51 = vld [vmem:[#allocation23 + $0xaa0] sm:$0xff] }
 0x9ef   : > { %9703 = vmatprep.subr.bf16.mxu0 %v12038_v61  ;;  %9744 = vmatprep.subr.bf16.mxu1 %v12040_v8  ;;  %v5095_v61 = vld [vmem:[#allocation23 + $0xb60] sm:$0xff]  ;;  %v5072_v8 = vld [vmem:[#allocation23 + $0xaa8] sm:$0xff] }
 0x9f0   : > { %v11658_v34 = vcombine.high %v5071_v51, %v5095_v61  ;;  %v11657_v56 = vcombine.low %v5071_v51, %v5095_v61  ;;  %v11659_v63 = vcombine.low %v5072_v8, %v5096_v2  ;;  %v5432_v51 = vld [vmem:[#allocation23 + $0x15e8] sm:$0xff] }
 0x9f2   : > { %9704 = vmatpush1.bf16.msra.mxu0 %v12037_v44  ;;  %9745 = vmatpush1.bf16.msra.mxu1 %v12039_v1  ;;  %v11660_v44 = vcombine.high %v5072_v8, %v5096_v2  ;;  %v5119_v1 = vld [vmem:[#allocation23 + $0xc20] sm:$0xff] }
 0x9f3   : > { %9755 = vmatprep.subr.bf16.mxu0 %v11322_v10  ;;  %9796 = vmatprep.subr.bf16.mxu1 %v11324_v60  ;;  %v5143_v10 = vld [vmem:[#allocation23 + $0xce0] sm:$0xff]  ;;  %v5120_v60 = vld [vmem:[#allocation23 + $0xc28] sm:$0xff] }
 0x9f4   : > { %v11706_v46 = vcombine.high %v5119_v1, %v5143_v10  ;;  %v11705_v27 = vcombine.low %v5119_v1, %v5143_v10  ;;  %v11707_v58 = vcombine.low %v5120_v60, %v5144_v22  ;;  %v5480_v1 = vld [vmem:[#allocation23 + $0x1768] sm:$0xff] }
 0x9f5   : > { %9706 = vmatmul.mubr.bf16.vlgmr.msra.gmra.mrb[8].mxu0 %v15208_v39  ;;  %9747 = vmatmul.mubr.bf16.vlgmr.msra.gmra.mrb[8].mxu1 %v15208_v39 }
 0x9f6   : > { %9756 = vmatpush1.bf16.msra.mxu0 %v11321_v6  ;;  %9787 = vmatprep.mubr.bf16.mxu0 %v15206_v13  ;;  %v11708_v6 = vcombine.high %v5120_v60, %v5144_v22 }
 0x9f7   : > { %9797 = vmatpush1.bf16.msra.mxu1 %v11323_v48  ;;  %9828 = vmatprep.mubr.bf16.mxu1 %v15206_v13  ;;  %v5167_v48 = vld [vmem:[#allocation23 + $0xda0] sm:$0xff] }
 0x9f8   : > { %9757 = vmatprep.subr.bf16.mxu0 %v11370_v59  ;;  %9798 = vmatprep.subr.bf16.mxu1 %v11372_v17  ;;  %v5191_v59 = vld [vmem:[#allocation23 + $0xe60] sm:$0xff]  ;;  %v5168_v17 = vld [vmem:[#allocation23 + $0xda8] sm:$0xff] }
 0x9f9   : > { %v11754_v14 = vcombine.high %v5167_v48, %v5191_v59  ;;  %v11753_v12 = vcombine.low %v5167_v48, %v5191_v59  ;;  %v11755_v50 = vcombine.low %v5168_v17, %v5192_v43  ;;  %v4762_v48 = vld [vmem:[#allocation23 + $0xf8] sm:$0xff] }
 0x9fa   : > { %9758 = vmatpush1.bf16.msra.mxu0 %v11369_v31  ;;  %v11756_v31 = vcombine.high %v5168_v17, %v5192_v43 }
 0x9fb   : > { %9799 = vmatpush1.bf16.msra.mxu1 %v11371_v40  ;;  %9759 = vmatprep.subr.bf16.mxu0 %v11418_v5  ;;  %v5215_v40 = vld [vmem:[#allocation23 + $0xf20] sm:$0xff] }
 0x9fc   : > { %9800 = vmatprep.subr.bf16.mxu1 %v11420_v19  ;;  %v5239_v5 = vld [vmem:[#allocation23 + $0xfe0] sm:$0xff]  ;;  %v5216_v19 = vld [vmem:[#allocation23 + $0xf28] sm:$0xff] }
 0x9fd   : > { %v11802_v55 = vcombine.high %v5215_v40, %v5239_v5  ;;  %v11801_v52 = vcombine.low %v5215_v40, %v5239_v5  ;;  %v11803_v25 = vcombine.low %v5216_v19, %v5240_v35  ;;  %v4786_v40 = vld [vmem:[#allocation23 + $0x1b8] sm:$0xff] }
 0x9fe   : > { %9760 = vmatpush1.bf16.msra.mxu0 %v11417_v49  ;;  %v11804_v49 = vcombine.high %v5216_v19, %v5240_v35  ;;  %v4810_v5 = vld [vmem:[#allocation23 + $0x278] sm:$0xff] }
 0x9ff   : > { %9801 = vmatpush1.bf16.msra.mxu1 %v11419_v9  ;;  %9761 = vmatprep.subr.bf16.mxu0 %v11466_v18  ;;  %v5263_v9 = vld [vmem:[#allocation23 + $0x10a0] sm:$0xff] }
 0xa00   : > { %9802 = vmatprep.subr.bf16.mxu1 %v11468_v62  ;;  %v5287_v18 = vld [vmem:[#allocation23 + $0x1160] sm:$0xff]  ;;  %v5264_v62 = vld [vmem:[#allocation23 + $0x10a8] sm:$0xff] }
 0xa01   : > { %v11850_v29 = vcombine.high %v5263_v9, %v5287_v18  ;;  %v11849_v21 = vcombine.low %v5263_v9, %v5287_v18  ;;  %v11851_v36 = vcombine.low %v5264_v62, %v5288_v37  ;;  %v4858_v9 = vld [vmem:[#allocation23 + $0x3f8] sm:$0xff] }
 0xa02   : > { %9762 = vmatpush1.bf16.msra.mxu0 %v11465_v16  ;;  %v11852_v16 = vcombine.high %v5264_v62, %v5288_v37  ;;  %v11375_v62 = vcombine.low %v4786_v40, %v4810_v5 }
 0xa03   : > { %9803 = vmatpush1.bf16.msra.mxu1 %v11467_v33  ;;  %9763 = vmatprep.subr.bf16.mxu0 %v11514_v53  ;;  %v5311_v33 = vld [vmem:[#allocation23 + $0x1220] sm:$0xff] }
 0xa04   : > { %9804 = vmatprep.subr.bf16.mxu1 %v11516_v41  ;;  %v5335_v53 = vld [vmem:[#allocation23 + $0x12e0] sm:$0xff]  ;;  %v5312_v41 = vld [vmem:[#allocation23 + $0x1228] sm:$0xff] }
 0xa05   : > { %v11898_v7 = vcombine.high %v5311_v33, %v5335_v53  ;;  %v11897_v42 = vcombine.low %v5311_v33, %v5335_v53  ;;  %v11899_v26 = vcombine.low %v5312_v41, %v5336_v11  ;;  %v4906_v33 = vld [vmem:[#allocation23 + $0x578] sm:$0xff] }
 0xa06   : > { %9764 = vmatpush1.bf16.msra.mxu0 %v11513_v23  ;;  %v11900_v23 = vcombine.high %v5312_v41, %v5336_v11 }
 0xa07   : > { %9805 = vmatpush1.bf16.msra.mxu1 %v11515_v38  ;;  %9765 = vmatprep.subr.bf16.mxu0 %v11562_v24  ;;  %v5359_v38 = vld [vmem:[#allocation23 + $0x13a0] sm:$0xff] }
 0xa08   : > { %9806 = vmatprep.subr.bf16.mxu1 %v11564_v54  ;;  %v5383_v24 = vld [vmem:[#allocation23 + $0x1460] sm:$0xff]  ;;  %v5360_v54 = vld [vmem:[#allocation23 + $0x13a8] sm:$0xff] }
 0xa09   : > { %v11946_v4 = vcombine.high %v5359_v38, %v5383_v24  ;;  %v11945_v61 = vcombine.low %v5359_v38, %v5383_v24  ;;  %v11947_v8 = vcombine.low %v5360_v54, %v5384_v20  ;;  %v4954_v38 = vld [vmem:[#allocation23 + $0x6f8] sm:$0xff] }
 0xa0a   : > { %9766 = vmatpush1.bf16.msra.mxu0 %v11561_v15  ;;  %v11948_v15 = vcombine.high %v5360_v54, %v5384_v20 }
 0xa0b   : > { %9807 = vmatpush1.bf16.msra.mxu1 %v11563_v0  ;;  %9767 = vmatprep.subr.bf16.mxu0 %v11610_v30  ;;  %v5407_v0 = vld [vmem:[#allocation23 + $0x1520] sm:$0xff] }
 0xa0c   : > { %9808 = vmatprep.subr.bf16.mxu1 %v11612_v3  ;;  %v5431_v30 = vld [vmem:[#allocation23 + $0x15e0] sm:$0xff]  ;;  %v5408_v3 = vld [vmem:[#allocation23 + $0x1528] sm:$0xff] }
 0xa0d   : > { %v11994_v2 = vcombine.high %v5407_v0, %v5431_v30  ;;  %v11993_v10 = vcombine.low %v5407_v0, %v5431_v30  ;;  %v11995_v60 = vcombine.low %v5408_v3, %v5432_v51  ;;  %v5002_v0 = vld [vmem:[#allocation23 + $0x878] sm:$0xff] }
 0xa0e   : > { %9768 = vmatpush1.bf16.msra.mxu0 %v11609_v57  ;;  %v11996_v57 = vcombine.high %v5408_v3, %v5432_v51 }
 0xa0f   : > { %9809 = vmatpush1.bf16.msra.mxu1 %v11611_v47  ;;  %9769 = vmatprep.subr.bf16.mxu0 %v11658_v34  ;;  %v5455_v47 = vld [vmem:[#allocation23 + $0x16a0] sm:$0xff] }
 0xa10   : > { %9810 = vmatprep.subr.bf16.mxu1 %v11660_v44  ;;  %v5479_v34 = vld [vmem:[#allocation23 + $0x1760] sm:$0xff]  ;;  %v5456_v44 = vld [vmem:[#allocation23 + $0x16a8] sm:$0xff] }
 0xa11   : > { %v12042_v22 = vcombine.high %v5455_v47, %v5479_v34  ;;  %v12041_v59 = vcombine.low %v5455_v47, %v5479_v34  ;;  %v12043_v17 = vcombine.low %v5456_v44, %v5480_v1  ;;  %v5050_v47 = vld [vmem:[#allocation23 + $0x9f8] sm:$0xff] }
 0xa12   : > { %9770 = vmatpush1.bf16.msra.mxu0 %v11657_v56  ;;  %v12044_v56 = vcombine.high %v5456_v44, %v5480_v1 }
 0xa13   : > { %9811 = vmatpush1.bf16.msra.mxu1 %v11659_v63  ;;  %9771 = vmatprep.subr.bf16.mxu0 %v11706_v46  ;;  %v4737_v63 = vld [vmem:[#allocation23 + $0x30] sm:$0xff] }
 0xa14   : > { %9812 = vmatprep.subr.bf16.mxu1 %v11708_v6  ;;  %v4761_v46 = vld [vmem:[#allocation23 + $0xf0] sm:$0xff]  ;;  %v4738_v6 = vld [vmem:[#allocation23 + $0x38] sm:$0xff] }
 0xa15   : > { %v11326_v43 = vcombine.high %v4737_v63, %v4761_v46  ;;  %v11327_v19 = vcombine.low %v4738_v6, %v4762_v48 }
 0xa16   : > { %9772 = vmatpush1.bf16.msra.mxu0 %v11705_v27  ;;  %v11328_v27 = vcombine.high %v4738_v6, %v4762_v48 }
 0xa17   : > { %9813 = vmatpush1.bf16.msra.mxu1 %v11707_v58  ;;  %9773 = vmatprep.subr.bf16.mxu0 %v11754_v14  ;;  %v4785_v58 = vld [vmem:[#allocation23 + $0x1b0] sm:$0xff] }
 0xa18   : > { %9814 = vmatprep.subr.bf16.mxu1 %v11756_v31  ;;  %v4809_v14 = vld [vmem:[#allocation23 + $0x270] sm:$0xff]  ;;  %v11325_v31 = vcombine.low %v4737_v63, %v4761_v46  ;;  %v5098_v63 = vld [vmem:[#allocation23 + $0xb78] sm:$0xff] }
 0xa19   : > { %v11374_v35 = vcombine.high %v4785_v58, %v4809_v14  ;;  %v11373_v18 = vcombine.low %v4785_v58, %v4809_v14  ;;  %v5146_v58 = vld [vmem:[#allocation23 + $0xcf8] sm:$0xff] }
 0xa1a   : > { %9774 = vmatpush1.bf16.msra.mxu0 %v11753_v12  ;;  %v4833_v12 = vld [vmem:[#allocation23 + $0x330] sm:$0xff] }
 0xa1b   : > { %9815 = vmatpush1.bf16.msra.mxu1 %v11755_v50  ;;  %9775 = vmatprep.subr.bf16.mxu0 %v11802_v55  ;;  %v4857_v50 = vld [vmem:[#allocation23 + $0x3f0] sm:$0xff]  ;;  %v11376_v55 = vcombine.high %v4786_v40, %v4810_v5 }
 0xa1c   : > { %9816 = vmatprep.subr.bf16.mxu1 %v11804_v49  ;;  %v4834_v49 = vld [vmem:[#allocation23 + $0x338] sm:$0xff]  ;;  %v11422_v37 = vcombine.high %v4833_v12, %v4857_v50  ;;  %v11421_v53 = vcombine.low %v4833_v12, %v4857_v50 }
 0xa1d   : > { %v11423_v41 = vcombine.low %v4834_v49, %v4858_v9  ;;  %v5170_v12 = vld [vmem:[#allocation23 + $0xdb8] sm:$0xff] }
 0xa1e   : > { %9776 = vmatpush1.bf16.msra.mxu0 %v11801_v52  ;;  %v11424_v52 = vcombine.high %v4834_v49, %v4858_v9  ;;  %v5194_v50 = vld [vmem:[#allocation23 + $0xe78] sm:$0xff] }
 0xa1f   : > { %9817 = vmatpush1.bf16.msra.mxu1 %v11803_v25  ;;  %9777 = vmatprep.subr.bf16.mxu0 %v11850_v29  ;;  %v4881_v25 = vld [vmem:[#allocation23 + $0x4b0] sm:$0xff] }
 0xa20   : > { %9818 = vmatprep.subr.bf16.mxu1 %v11852_v16  ;;  %v4905_v29 = vld [vmem:[#allocation23 + $0x570] sm:$0xff]  ;;  %v4882_v16 = vld [vmem:[#allocation23 + $0x4b8] sm:$0xff] }
 0xa21   : > { %v11470_v11 = vcombine.high %v4881_v25, %v4905_v29  ;;  %v11469_v24 = vcombine.low %v4881_v25, %v4905_v29  ;;  %v11471_v54 = vcombine.low %v4882_v16, %v4906_v33  ;;  %v5242_v25 = vld [vmem:[#allocation23 + $0xff8] sm:$0xff] }
 0xa22   : > { %9778 = vmatpush1.bf16.msra.mxu0 %v11849_v21  ;;  %v11472_v21 = vcombine.high %v4882_v16, %v4906_v33  ;;  %v11759_v16 = vcombine.low %v5170_v12, %v5194_v50 }
 0xa23   : > { %9819 = vmatpush1.bf16.msra.mxu1 %v11851_v36  ;;  %9779 = vmatprep.subr.bf16.mxu0 %v11898_v7  ;;  %v4929_v36 = vld [vmem:[#allocation23 + $0x630] sm:$0xff] }
 0xa24   : > { %9820 = vmatprep.subr.bf16.mxu1 %v11900_v23  ;;  %v4953_v7 = vld [vmem:[#allocation23 + $0x6f0] sm:$0xff]  ;;  %v4930_v23 = vld [vmem:[#allocation23 + $0x638] sm:$0xff] }
 0xa25   : > { %v11518_v20 = vcombine.high %v4929_v36, %v4953_v7  ;;  %v11517_v30 = vcombine.low %v4929_v36, %v4953_v7  ;;  %v11519_v3 = vcombine.low %v4930_v23, %v4954_v38  ;;  %v5290_v36 = vld [vmem:[#allocation23 + $0x1178] sm:$0xff] }
 0xa26   : > { %9780 = vmatpush1.bf16.msra.mxu0 %v11897_v42  ;;  %v11520_v42 = vcombine.high %v4930_v23, %v4954_v38 }
 0xa27   : > { %9821 = vmatpush1.bf16.msra.mxu1 %v11899_v26  ;;  %9781 = vmatprep.subr.bf16.mxu0 %v11946_v4  ;;  %v4977_v26 = vld [vmem:[#allocation23 + $0x7b0] sm:$0xff] }
 0xa28   : > { %9822 = vmatprep.subr.bf16.mxu1 %v11948_v15  ;;  %v5001_v4 = vld [vmem:[#allocation23 + $0x870] sm:$0xff]  ;;  %v4978_v15 = vld [vmem:[#allocation23 + $0x7b8] sm:$0xff] }
 0xa29   : > { %v11566_v51 = vcombine.high %v4977_v26, %v5001_v4  ;;  %v11565_v34 = vcombine.low %v4977_v26, %v5001_v4  ;;  %v11567_v44 = vcombine.low %v4978_v15, %v5002_v0  ;;  %v5338_v26 = vld [vmem:[#allocation23 + $0x12f8] sm:$0xff] }
 0xa2a   : > { %9782 = vmatpush1.bf16.msra.mxu0 %v11945_v61  ;;  %v11568_v61 = vcombine.high %v4978_v15, %v5002_v0 }
 0xa2b   : > { %9823 = vmatpush1.bf16.msra.mxu1 %v11947_v8  ;;  %9783 = vmatprep.subr.bf16.mxu0 %v11994_v2  ;;  %v5025_v8 = vld [vmem:[#allocation23 + $0x930] sm:$0xff] }
 0xa2c   : > { %9824 = vmatprep.subr.bf16.mxu1 %v11996_v57  ;;  %v5049_v2 = vld [vmem:[#allocation23 + $0x9f0] sm:$0xff]  ;;  %v5026_v57 = vld [vmem:[#allocation23 + $0x938] sm:$0xff] }
 0xa2d   : > { %v11614_v1 = vcombine.high %v5025_v8, %v5049_v2  ;;  %v11613_v46 = vcombine.low %v5025_v8, %v5049_v2  ;;  %v11615_v6 = vcombine.low %v5026_v57, %v5050_v47  ;;  %v5386_v8 = vld [vmem:[#allocation23 + $0x1478] sm:$0xff] }
 0xa2e   : > { %9784 = vmatpush1.bf16.msra.mxu0 %v11993_v10  ;;  %v11616_v10 = vcombine.high %v5026_v57, %v5050_v47 }
 0xa2f   : > { %9825 = vmatpush1.bf16.msra.mxu1 %v11995_v60  ;;  %9785 = vmatprep.subr.bf16.mxu0 %v12042_v22  ;;  %v5073_v60 = vld [vmem:[#allocation23 + $0xab0] sm:$0xff] }
 0xa30   : > { %9826 = vmatprep.subr.bf16.mxu1 %v12044_v56  ;;  %v5097_v22 = vld [vmem:[#allocation23 + $0xb70] sm:$0xff]  ;;  %v5074_v56 = vld [vmem:[#allocation23 + $0xab8] sm:$0xff] }
 0xa31   : > { %v11662_v48 = vcombine.high %v5073_v60, %v5097_v22  ;;  %v11661_v14 = vcombine.low %v5073_v60, %v5097_v22  ;;  %v5434_v60 = vld [vmem:[#allocation23 + $0x15f8] sm:$0xff] }
 0xa32   : > { %9786 = vmatpush1.bf16.msra.mxu0 %v12041_v59  ;;  %v11664_v59 = vcombine.high %v5074_v56, %v5098_v63 }
 0xa33   : > { %9827 = vmatpush1.bf16.msra.mxu1 %v12043_v17  ;;  %9837 = vmatprep.subr.bf16.mxu0 %v11326_v43  ;;  %v5121_v17 = vld [vmem:[#allocation23 + $0xc30] sm:$0xff] }
 0xa34   : > { %9878 = vmatprep.subr.bf16.mxu1 %v11328_v27  ;;  %v5145_v43 = vld [vmem:[#allocation23 + $0xcf0] sm:$0xff]  ;;  %v5122_v27 = vld [vmem:[#allocation23 + $0xc38] sm:$0xff] }
 0xa35   : > { %9788 = vmatmul.mubr.bf16.vlgmr.msra.gmra.mrb[12].mxu0 %v15208_v39  ;;  %v11710_v40 = vcombine.high %v5121_v17, %v5145_v43  ;;  %v11712_v5 = vcombine.high %v5122_v27, %v5146_v58  ;;  %v11711_v49 = vcombine.low %v5122_v27, %v5146_v58 }
 0xa36   : > { %9829 = vmatmul.mubr.bf16.vlgmr.msra.gmra.mrb[12].mxu1 %v15208_v39  ;;  %9838 = vmatpush1.bf16.msra.mxu0 %v11325_v31  ;;  %v11663_v31 = vcombine.low %v5074_v56, %v5098_v63 }
 0xa37   : > { %9869 = vmatprep.mubr.bf16.mxu0 %v15206_v13  ;;  %9879 = vmatpush1.bf16.msra.mxu1 %v11327_v19  ;;  %v5169_v19 = vld [vmem:[#allocation23 + $0xdb0] sm:$0xff] }
 0xa38   : > { %9910 = vmatprep.mubr.bf16.mxu1 %v15206_v13  ;;  %9839 = vmatprep.subr.bf16.mxu0 %v11374_v35  ;;  %v5193_v35 = vld [vmem:[#allocation23 + $0xe70] sm:$0xff] }
 0xa39   : > { %9880 = vmatprep.subr.bf16.mxu1 %v11376_v55  ;;  %v11709_v55 = vcombine.low %v5121_v17, %v5145_v43  ;;  %v11758_v9 = vcombine.high %v5169_v19, %v5193_v35  ;;  %v11757_v29 = vcombine.low %v5169_v19, %v5193_v35  ;;  %v5482_v17 = vld [vmem:[#allocation23 + $0x1778] sm:$0xff]  ;;  %v4764_v19 = vld [vmem:[#allocation23 + $0x108] sm:$0xff] }
 0xa3a   : > { %9840 = vmatpush1.bf16.msra.mxu0 %v11373_v18  ;;  %v11760_v18 = vcombine.high %v5170_v12, %v5194_v50 }
 0xa3b   : > { %9881 = vmatpush1.bf16.msra.mxu1 %v11375_v62  ;;  %9841 = vmatprep.subr.bf16.mxu0 %v11422_v37  ;;  %v5217_v62 = vld [vmem:[#allocation23 + $0xf30] sm:$0xff] }
 0xa3c   : > { %9882 = vmatprep.subr.bf16.mxu1 %v11424_v52  ;;  %v5241_v37 = vld [vmem:[#allocation23 + $0xff0] sm:$0xff]  ;;  %v5218_v52 = vld [vmem:[#allocation23 + $0xf38] sm:$0xff] }
 0xa3d   : > { %v11806_v33 = vcombine.high %v5217_v62, %v5241_v37  ;;  %v11805_v7 = vcombine.low %v5217_v62, %v5241_v37  ;;  %v11807_v23 = vcombine.low %v5218_v52, %v5242_v25  ;;  %v4788_v62 = vld [vmem:[#allocation23 + $0x1c8] sm:$0xff] }
 0xa3e   : > { %9842 = vmatpush1.bf16.msra.mxu0 %v11421_v53  ;;  %v11808_v53 = vcombine.high %v5218_v52, %v5242_v25  ;;  %v4812_v37 = vld [vmem:[#allocation23 + $0x288] sm:$0xff] }
 0xa3f   : > { %9883 = vmatpush1.bf16.msra.mxu1 %v11423_v41  ;;  %9843 = vmatprep.subr.bf16.mxu0 %v11470_v11  ;;  %v5265_v41 = vld [vmem:[#allocation23 + $0x10b0] sm:$0xff] }
 0xa40   : > { %9884 = vmatprep.subr.bf16.mxu1 %v11472_v21  ;;  %v5289_v11 = vld [vmem:[#allocation23 + $0x1170] sm:$0xff]  ;;  %v5266_v21 = vld [vmem:[#allocation23 + $0x10b8] sm:$0xff] }
 0xa41   : > { %v11854_v38 = vcombine.high %v5265_v41, %v5289_v11  ;;  %v11853_v4 = vcombine.low %v5265_v41, %v5289_v11  ;;  %v11855_v15 = vcombine.low %v5266_v21, %v5290_v36  ;;  %v4860_v41 = vld [vmem:[#allocation23 + $0x408] sm:$0xff] }
 0xa42   : > { %9844 = vmatpush1.bf16.msra.mxu0 %v11469_v24  ;;  %v11856_v24 = vcombine.high %v5266_v21, %v5290_v36  ;;  %v11379_v21 = vcombine.low %v4788_v62, %v4812_v37 }
 0xa43   : > { %9885 = vmatpush1.bf16.msra.mxu1 %v11471_v54  ;;  %9845 = vmatprep.subr.bf16.mxu0 %v11518_v20  ;;  %v5313_v54 = vld [vmem:[#allocation23 + $0x1230] sm:$0xff] }
 0xa44   : > { %9886 = vmatprep.subr.bf16.mxu1 %v11520_v42  ;;  %v5337_v20 = vld [vmem:[#allocation23 + $0x12f0] sm:$0xff]  ;;  %v5314_v42 = vld [vmem:[#allocation23 + $0x1238] sm:$0xff] }
 0xa45   : > { %v11902_v0 = vcombine.high %v5313_v54, %v5337_v20  ;;  %v11901_v2 = vcombine.low %v5313_v54, %v5337_v20  ;;  %v11903_v57 = vcombine.low %v5314_v42, %v5338_v26  ;;  %v4908_v54 = vld [vmem:[#allocation23 + $0x588] sm:$0xff] }
 0xa46   : > { %9846 = vmatpush1.bf16.msra.mxu0 %v11517_v30  ;;  %v11904_v30 = vcombine.high %v5314_v42, %v5338_v26 }
 0xa47   : > { %9887 = vmatpush1.bf16.msra.mxu1 %v11519_v3  ;;  %9847 = vmatprep.subr.bf16.mxu0 %v11566_v51  ;;  %v5361_v3 = vld [vmem:[#allocation23 + $0x13b0] sm:$0xff] }
 0xa48   : > { %9888 = vmatprep.subr.bf16.mxu1 %v11568_v61  ;;  %v5385_v51 = vld [vmem:[#allocation23 + $0x1470] sm:$0xff]  ;;  %v5362_v61 = vld [vmem:[#allocation23 + $0x13b8] sm:$0xff] }
 0xa49   : > { %v11950_v47 = vcombine.high %v5361_v3, %v5385_v51  ;;  %v11949_v22 = vcombine.low %v5361_v3, %v5385_v51  ;;  %v11951_v56 = vcombine.low %v5362_v61, %v5386_v8  ;;  %v4956_v3 = vld [vmem:[#allocation23 + $0x708] sm:$0xff] }
 0xa4a   : > { %9848 = vmatpush1.bf16.msra.mxu0 %v11565_v34  ;;  %v11952_v34 = vcombine.high %v5362_v61, %v5386_v8 }
 0xa4b   : > { %9889 = vmatpush1.bf16.msra.mxu1 %v11567_v44  ;;  %9849 = vmatprep.subr.bf16.mxu0 %v11614_v1  ;;  %v5409_v44 = vld [vmem:[#allocation23 + $0x1530] sm:$0xff] }
 0xa4c   : > { %9890 = vmatprep.subr.bf16.mxu1 %v11616_v10  ;;  %v5433_v1 = vld [vmem:[#allocation23 + $0x15f0] sm:$0xff]  ;;  %v5410_v10 = vld [vmem:[#allocation23 + $0x1538] sm:$0xff] }
 0xa4d   : > { %v11998_v63 = vcombine.high %v5409_v44, %v5433_v1  ;;  %v11997_v43 = vcombine.low %v5409_v44, %v5433_v1  ;;  %v11999_v27 = vcombine.low %v5410_v10, %v5434_v60  ;;  %v4980_v44 = vld [vmem:[#allocation23 + $0x7c8] sm:$0xff] }
 0xa4e   : > { %9850 = vmatpush1.bf16.msra.mxu0 %v11613_v46  ;;  %v12000_v46 = vcombine.high %v5410_v10, %v5434_v60  ;;  %v5004_v1 = vld [vmem:[#allocation23 + $0x888] sm:$0xff]  ;;  %v15231_v60 = vld [vmem:[#allocation25] sm:$0xff] }
 0xa4f   : > { %9891 = vmatpush1.bf16.msra.mxu1 %v11615_v6  ;;  %9851 = vmatprep.subr.bf16.mxu0 %v11662_v48  ;;  %v5457_v6 = vld [vmem:[#allocation23 + $0x16b0] sm:$0xff] }
 0xa50   : > { %9892 = vmatprep.subr.bf16.mxu1 %v11664_v59  ;;  %v5481_v48 = vld [vmem:[#allocation23 + $0x1770] sm:$0xff]  ;;  %v5458_v59 = vld [vmem:[#allocation23 + $0x16b8] sm:$0xff] }
 0xa51   : > { %v12046_v58 = vcombine.high %v5457_v6, %v5481_v48  ;;  %v12045_v35 = vcombine.low %v5457_v6, %v5481_v48  ;;  %v12047_v12 = vcombine.low %v5458_v59, %v5482_v17  ;;  %v11572_v48 = vcombine.high %v4980_v44, %v5004_v1 }
 0xa52   : > { %9852 = vmatpush1.bf16.msra.mxu0 %v11661_v14  ;;  %v12048_v14 = vcombine.high %v5458_v59, %v5482_v17  ;;  %v5027_v59 = vld [vmem:[#allocation23 + $0x940] sm:$0xff] }
 0xa53   : > { %9893 = vmatpush1.bf16.msra.mxu1 %v11663_v31  ;;  %9853 = vmatprep.subr.bf16.mxu0 %v11710_v40  ;;  %v4739_v31 = vld [vmem:[#allocation23 + $0x40] sm:$0xff] }
 0xa54   : > { %9894 = vmatprep.subr.bf16.mxu1 %v11712_v5  ;;  %v4763_v40 = vld [vmem:[#allocation23 + $0x100] sm:$0xff]  ;;  %v4740_v5 = vld [vmem:[#allocation23 + $0x48] sm:$0xff] }
 0xa55   : > { %v11330_v50 = vcombine.high %v4739_v31, %v4763_v40  ;;  %v11331_v52 = vcombine.low %v4740_v5, %v4764_v19  ;;  %v5051_v17 = vld [vmem:[#allocation23 + $0xa00] sm:$0xff] }
 0xa56   : > { %9854 = vmatpush1.bf16.msra.mxu0 %v11709_v55  ;;  %v11332_v55 = vcombine.high %v4740_v5, %v4764_v19 }
 0xa57   : > { %9895 = vmatpush1.bf16.msra.mxu1 %v11711_v49  ;;  %9855 = vmatprep.subr.bf16.mxu0 %v11758_v9  ;;  %v4787_v49 = vld [vmem:[#allocation23 + $0x1c0] sm:$0xff] }
 0xa58   : > { %9896 = vmatprep.subr.bf16.mxu1 %v11760_v18  ;;  %v4811_v9 = vld [vmem:[#allocation23 + $0x280] sm:$0xff]  ;;  %v11329_v18 = vcombine.low %v4739_v31, %v4763_v40  ;;  %v9358_v40 = vrot.slane %v15231_v60, %v14860_v45 }
 0xa59   : > { %v11378_v25 = vcombine.high %v4787_v49, %v4811_v9  ;;  %v11377_v11 = vcombine.low %v4787_v49, %v4811_v9  ;;  %v5075_v9 = vld [vmem:[#allocation23 + $0xac0] sm:$0xff] }
 0xa5a   : > { %9856 = vmatpush1.bf16.msra.mxu0 %v11757_v29  ;;  %v4835_v29 = vld [vmem:[#allocation23 + $0x340] sm:$0xff] }
 0xa5b   : > { %9897 = vmatpush1.bf16.msra.mxu1 %v11759_v16  ;;  %9857 = vmatprep.subr.bf16.mxu0 %v11806_v33  ;;  %v4859_v16 = vld [vmem:[#allocation23 + $0x400] sm:$0xff]  ;;  %v11380_v33 = vcombine.high %v4788_v62, %v4812_v37 }
 0xa5c   : > { %9898 = vmatprep.subr.bf16.mxu1 %v11808_v53  ;;  %v4836_v53 = vld [vmem:[#allocation23 + $0x348] sm:$0xff]  ;;  %v11426_v36 = vcombine.high %v4835_v29, %v4859_v16  ;;  %v11425_v20 = vcombine.low %v4835_v29, %v4859_v16 }
 0xa5d   : > { %v11427_v42 = vcombine.low %v4836_v53, %v4860_v41  ;;  %v5076_v29 = vld [vmem:[#allocation23 + $0xac8] sm:$0xff] }
 0xa5e   : > { %9858 = vmatpush1.bf16.msra.mxu0 %v11805_v7  ;;  %v11428_v7 = vcombine.high %v4836_v53, %v4860_v41  ;;  %v5100_v16 = vld [vmem:[#allocation23 + $0xb88] sm:$0xff] }
 0xa5f   : > { %9899 = vmatpush1.bf16.msra.mxu1 %v11807_v23  ;;  %9859 = vmatprep.subr.bf16.mxu0 %v11854_v38  ;;  %v4883_v23 = vld [vmem:[#allocation23 + $0x4c0] sm:$0xff] }
 0xa60   : > { %9900 = vmatprep.subr.bf16.mxu1 %v11856_v24  ;;  %v4907_v38 = vld [vmem:[#allocation23 + $0x580] sm:$0xff]  ;;  %v4884_v24 = vld [vmem:[#allocation23 + $0x4c8] sm:$0xff] }
 0xa61   : > { %v11474_v26 = vcombine.high %v4883_v23, %v4907_v38  ;;  %v11473_v51 = vcombine.low %v4883_v23, %v4907_v38  ;;  %v11475_v61 = vcombine.low %v4884_v24, %v4908_v54 }
 0xa62   : > { %9860 = vmatpush1.bf16.msra.mxu0 %v11853_v4  ;;  %v11476_v4 = vcombine.high %v4884_v24, %v4908_v54 }
 0xa63   : > { %9901 = vmatpush1.bf16.msra.mxu1 %v11855_v15  ;;  %9861 = vmatprep.subr.bf16.mxu0 %v11902_v0  ;;  %v4931_v15 = vld [vmem:[#allocation23 + $0x640] sm:$0xff] }
 0xa64   : > { %9902 = vmatprep.subr.bf16.mxu1 %v11904_v30  ;;  %v4955_v0 = vld [vmem:[#allocation23 + $0x700] sm:$0xff]  ;;  %v4932_v30 = vld [vmem:[#allocation23 + $0x648] sm:$0xff] }
 0xa65   : > { %v11522_v8 = vcombine.high %v4931_v15, %v4955_v0  ;;  %v11521_v10 = vcombine.low %v4931_v15, %v4955_v0  ;;  %v5124_v15 = vld [vmem:[#allocation23 + $0xc48] sm:$0xff] }
 0xa66   : > { %9862 = vmatpush1.bf16.msra.mxu0 %v11901_v2  ;;  %v11524_v2 = vcombine.high %v4932_v30, %v4956_v3  ;;  %v5148_v0 = vld [vmem:[#allocation23 + $0xd08] sm:$0xff] }
 0xa67   : > { %9903 = vmatpush1.bf16.msra.mxu1 %v11903_v57  ;;  %9863 = vmatprep.subr.bf16.mxu0 %v11950_v47  ;;  %v4979_v57 = vld [vmem:[#allocation23 + $0x7c0] sm:$0xff] }
 0xa68   : > { %9904 = vmatprep.subr.bf16.mxu1 %v11952_v34  ;;  %v5003_v47 = vld [vmem:[#allocation23 + $0x880] sm:$0xff]  ;;  %v15229_v34 = vsub.s32 2, %v14851_v28 }
 0xa69   : > { %v11570_v6 = vcombine.high %v4979_v57, %v5003_v47  ;;  %v11569_v31 = vcombine.low %v4979_v57, %v5003_v47  ;;  %v11716_v57 = vcombine.high %v5124_v15, %v5148_v0  ;;  %v5171_v47 = vld [vmem:[#allocation23 + $0xdc0] sm:$0xff] }
 0xa6a   : > { %9864 = vmatpush1.bf16.msra.mxu0 %v11949_v22  ;;  %v13324_v22 = vmov 1966171168  }
 0xa6b   : > { %9905 = vmatpush1.bf16.msra.mxu1 %v11951_v56  ;;  %9865 = vmatprep.subr.bf16.mxu0 %v11998_v63  ;;  %v10628_v56 = vunpack.c.l.s4 %v13324_v22  ;;  %v15234_v63 = vsub.s32 3, %v14851_v28 }
 0xa6c   : > { %9906 = vmatprep.subr.bf16.mxu1 %v12000_v46  ;;  %v11523_v46 = vcombine.low %v4932_v30, %v4956_v3 }
 0xa6d   : > { %v10629_v5 = vunpack.c.0.s8 %v10628_v56  ;;  %v9366_v19 = vrot.slane %v15231_v60, %v15234_v63  ;;  %v11715_v56 = vcombine.low %v5124_v15, %v5148_v0 }
 0xa6e   : > { %9866 = vmatpush1.bf16.msra.mxu0 %v11997_v43  ;;  %v9354_v43 = vrot.slane %v15231_v60, %v14856_v32 }
 0xa6f   : > { %9907 = vmatpush1.bf16.msra.mxu1 %v11999_v27  ;;  %9867 = vmatprep.subr.bf16.mxu0 %v12046_v58  ;;  %v9362_v27 = vrot.slane %v15231_v60, %v15229_v34  ;;  %v5028_v58 = vld [vmem:[#allocation23 + $0x948] sm:$0xff]  ;;  %v15245_v53 = vsub.s32 %v10629_v5, %v14851_v28  ;;  %v5291_v5 = vld [vmem:[#allocation23 + $0x1180] sm:$0xff] }
 0xa70   : > { %9908 = vmatprep.subr.bf16.mxu1 %v12048_v14  ;;  %v5052_v14 = vld [vmem:[#allocation23 + $0xa08] sm:$0xff] }
 0xa71   : > { %v11620_v49 = vcombine.high %v5028_v58, %v5052_v14  ;;  %v11619_v38 = vcombine.low %v5028_v58, %v5052_v14 }
 0xa72   : > { %9868 = vmatpush1.bf16.msra.mxu0 %v12045_v35  ;;  %v11571_v35 = vcombine.low %v4980_v44, %v5004_v1  ;;  %v5195_v44 = vld [vmem:[#allocation23 + $0xe80] sm:$0xff]  ;;  %v5172_v1 = vld [vmem:[#allocation23 + $0xdc8] sm:$0xff] }
 0xa73   : > { %9909 = vmatpush1.bf16.msra.mxu1 %v12047_v12  ;;  %9919 = vmatprep.subr.bf16.mxu0 %v11330_v50  ;;  %v11618_v12 = vcombine.high %v5027_v59, %v5051_v17 }
 0xa74   : > { %9960 = vmatprep.subr.bf16.mxu1 %v11332_v55 }
 0xa75   : > { %9870 = vmatmul.mubr.bf16.vlgmr.msra.gmra.mrb[16].mxu0 %v15208_v39 }
 0xa76   : > { %9911 = vmatmul.mubr.bf16.vlgmr.msra.gmra.mrb[16].mxu1 %v15208_v39  ;;  %9920 = vmatpush1.bf16.msra.mxu0 %v11329_v18  ;;  %v5099_v18 = vld [vmem:[#allocation23 + $0xb80] sm:$0xff] }
 0xa77   : > { %9951 = vmatprep.mubr.bf16.mxu0 %v15206_v13  ;;  %9961 = vmatpush1.bf16.msra.mxu1 %v11331_v52  ;;  %v11666_v24 = vcombine.high %v5075_v9, %v5099_v18 }
 0xa78   : > { %9992 = vmatprep.mubr.bf16.mxu1 %v15206_v13  ;;  %9921 = vmatprep.subr.bf16.mxu0 %v11378_v25 }
 0xa79   : > { %9962 = vmatprep.subr.bf16.mxu1 %v11380_v33 }
 0xa7a   : > { %9922 = vmatpush1.bf16.msra.mxu0 %v11377_v11 }
 0xa7b   : > { %9963 = vmatpush1.bf16.msra.mxu1 %v11379_v21  ;;  %9923 = vmatprep.subr.bf16.mxu0 %v11426_v36  ;;  %v11617_v36 = vcombine.low %v5027_v59, %v5051_v17  ;;  %v5243_v59 = vld [vmem:[#allocation23 + $0x1000] sm:$0xff]  ;;  %v5220_v17 = vld [vmem:[#allocation23 + $0xf48] sm:$0xff] }
 0xa7c   : > { %9964 = vmatprep.subr.bf16.mxu1 %v11428_v7 }
 0xa7e   : > { %9924 = vmatpush1.bf16.msra.mxu0 %v11425_v20 }
 0xa7f   : > { %9965 = vmatpush1.bf16.msra.mxu1 %v11427_v42  ;;  %9925 = vmatprep.subr.bf16.mxu0 %v11474_v26  ;;  %v11668_v42 = vcombine.high %v5076_v29, %v5100_v16  ;;  %v5123_v26 = vld [vmem:[#allocation23 + $0xc40] sm:$0xff] }
 0xa80   : > { %9966 = vmatprep.subr.bf16.mxu1 %v11476_v4  ;;  %v5147_v4 = vld [vmem:[#allocation23 + $0xd00] sm:$0xff] }
 0xa81   : > { %v11713_v22 = vcombine.low %v5123_v26, %v5147_v4 }
 0xa82   : > { %9926 = vmatpush1.bf16.msra.mxu0 %v11473_v51  ;;  %v11665_v51 = vcombine.low %v5075_v9, %v5099_v18  ;;  %v5315_v9 = vld [vmem:[#allocation23 + $0x1240] sm:$0xff] }
 0xa83   : > { %9967 = vmatpush1.bf16.msra.mxu1 %v11475_v61  ;;  %9927 = vmatprep.subr.bf16.mxu0 %v11522_v8  ;;  %v11667_v61 = vcombine.low %v5076_v29, %v5100_v16  ;;  %v11714_v8 = vcombine.high %v5123_v26, %v5147_v4  ;;  %v5339_v18 = vld [vmem:[#allocation23 + $0x1300] sm:$0xff] }
 0xa84   : > { %9968 = vmatprep.subr.bf16.mxu1 %v11524_v2  ;;  %v11906_v29 = vcombine.high %v5315_v9, %v5339_v18 }
 0xa86   : > { %9928 = vmatpush1.bf16.msra.mxu0 %v11521_v10  ;;  %v5196_v10 = vld [vmem:[#allocation23 + $0xe88] sm:$0xff] }
 0xa87   : > { %9969 = vmatpush1.bf16.msra.mxu1 %v11523_v46  ;;  %9929 = vmatprep.subr.bf16.mxu0 %v11570_v6  ;;  %v11762_v46 = vcombine.high %v5171_v47, %v5195_v44  ;;  %v11764_v6 = vcombine.high %v5172_v1, %v5196_v10  ;;  %v11763_v58 = vcombine.low %v5172_v1, %v5196_v10 }
 0xa88   : > { %v9625_v50 = vpop.f32.mrb[4].mxu0  ;;  %v9666_v55 = vpop.f32.mrb[4].mxu1  ;;  %9970 = vmatprep.subr.bf16.mxu1 %v11572_v48  ;;  %v5219_v48 = vld [vmem:[#allocation23 + $0xf40] sm:$0xff] }
 0xa89   : > { %v9626_v62 = vadd.f32 %v9625_v50, %v9354_v43  ;;  %v9667_v37 = vadd.f32 %v9666_v55, %v9362_v27  ;;  %v9627_v52 = vpop.f32.mrb[5].mxu0  ;;  %v9668_v25 = vpop.f32.mrb[5].mxu1  ;;  %v5244_v43 = vld [vmem:[#allocation23 + $0x1008] sm:$0xff]  ;;  %v11761_v27 = vcombine.low %v5171_v47, %v5195_v44  ;;  %v11810_v14 = vcombine.high %v5219_v48, %v5243_v59 }
 0xa8a   : > { %v9628_v33 = vadd.f32 %v9627_v52, %v9358_v40  ;;  %v9669_v41 = vadd.f32 %v9668_v25, %v9366_v19  ;;  %9930 = vmatpush1.bf16.msra.mxu0 %v11569_v31  ;;  %v9629_v11 = vpop.f32.mrb[6].mxu0  ;;  %v9670_v21 = vpop.f32.mrb[6].mxu1  ;;  %v11812_v31 = vcombine.high %v5220_v17, %v5244_v43  ;;  %v5267_v40 = vld [vmem:[#allocation23 + $0x10c0] sm:$0xff]  ;;  %v5268_v19 = vld [vmem:[#allocation23 + $0x10c8] sm:$0xff]  ;;  %v11811_v50 = vcombine.low %v5220_v17, %v5244_v43 }
 0xa8b   : > { %9971 = vmatpush1.bf16.msra.mxu1 %v11571_v35  ;;  %v9630_v7 = vpop.f32.mrb[7].mxu0  ;;  %v9671_v23 = vpop.f32.mrb[7].mxu1  ;;  %9931 = vmatprep.subr.bf16.mxu0 %v11618_v12  ;;  %v5292_v35 = vld [vmem:[#allocation23 + $0x1188] sm:$0xff]  ;;  %v11809_v12 = vcombine.low %v5219_v48, %v5243_v59  ;;  %v11858_v55 = vcombine.high %v5267_v40, %v5291_v5  ;;  %v11857_v52 = vcombine.low %v5267_v40, %v5291_v5  ;;  %v4814_v40 = vld [vmem:[#allocation23 + $0x298] sm:$0xff] }
 0xa8c   : > { %v10623_v54 = vcombine.low %v9626_v62, %v9628_v33  ;;  %v10624_v20 = vcombine.low %v9667_v37, %v9669_v41  ;;  %9972 = vmatprep.subr.bf16.mxu1 %v11620_v49  ;;  %v11860_v49 = vcombine.high %v5268_v19, %v5292_v35  ;;  %v5316_v62 = vld [vmem:[#allocation23 + $0x1248] sm:$0xff]  ;;  %v11859_v25 = vcombine.low %v5268_v19, %v5292_v35  ;;  %v5363_v33 = vld [vmem:[#allocation23 + $0x13c0] sm:$0xff]  ;;  %v4837_v35 = vld [vmem:[#allocation23 + $0x350] sm:$0xff] }
 0xa8d   : > { %v5340_v37 = vld [vmem:[#allocation23 + $0x1308] sm:$0xff]  ;;  %v5387_v41 = vld [vmem:[#allocation23 + $0x1480] sm:$0xff] }
 0xa8e   : > { %v15248_v30 = vrot.slane %v10623_v54, %v15245_v53  ;;  %v15251_v3 = vrot.slane %v10624_v20, %v15245_v53  ;;  %9932 = vmatpush1.bf16.msra.mxu0 %v11617_v36  ;;  %v11908_v16 = vcombine.high %v5316_v62, %v5340_v37  ;;  %v5364_v11 = vld [vmem:[#allocation23 + $0x13c8] sm:$0xff]  ;;  %v11905_v36 = vcombine.low %v5315_v9, %v5339_v18  ;;  %v5435_v54 = vld [vmem:[#allocation23 + $0x1600] sm:$0xff] }
 0xa8f   : > { %9973 = vmatpush1.bf16.msra.mxu1 %v11619_v38  ;;  %9933 = vmatprep.subr.bf16.mxu0 %v11666_v24  ;;  %v5388_v21 = vld [vmem:[#allocation23 + $0x1488] sm:$0xff]  ;;  %v11907_v7 = vcombine.low %v5316_v62, %v5340_v37  ;;  %v11954_v23 = vcombine.high %v5363_v33, %v5387_v41  ;;  %v5411_v24 = vld [vmem:[#allocation23 + $0x1540] sm:$0xff]  ;;  %v11953_v26 = vcombine.low %v5363_v33, %v5387_v41 }
 0xa90   : > { %v10655_v2 = vcombine.low %v15248_v30, %v15251_v3  ;;  %9974 = vmatprep.subr.bf16.mxu1 %v11668_v42  ;;  %v11956_v38 = vcombine.high %v5364_v11, %v5388_v21  ;;  %v5412_v20 = vld [vmem:[#allocation23 + $0x1548] sm:$0xff]  ;;  %v11955_v4 = vcombine.low %v5364_v11, %v5388_v21  ;;  %v12002_v15 = vcombine.high %v5411_v24, %v5435_v54 }
 0xa91   : > { %v5436_v42 = vld [vmem:[#allocation23 + $0x1608] sm:$0xff]  ;;  %v12001_v47 = vcombine.low %v5411_v24, %v5435_v54 }
 0xa92   : > { %9934 = vmatpush1.bf16.msra.mxu0 %v11665_v51  ;;  %v12004_v0 = vcombine.high %v5412_v20, %v5436_v42  ;;  %v5459_v51 = vld [vmem:[#allocation23 + $0x16c0] sm:$0xff]  ;;  %v12003_v44 = vcombine.low %v5412_v20, %v5436_v42 }
 0xa93   : > { %9975 = vmatpush1.bf16.msra.mxu1 %v11667_v61  ;;  %9935 = vmatprep.subr.bf16.mxu0 %v11714_v8  ;;  %v5483_v61 = vld [vmem:[#allocation23 + $0x1780] sm:$0xff]  ;;  %v5460_v8 = vld [vmem:[#allocation23 + $0x16c8] sm:$0xff] }
 0xa94   : > { %9976 = vmatprep.subr.bf16.mxu1 %v11716_v57  ;;  %v5484_v57 = vld [vmem:[#allocation23 + $0x1788] sm:$0xff]  ;;  %v12050_v1 = vcombine.high %v5459_v51, %v5483_v61  ;;  %v12049_v48 = vcombine.low %v5459_v51, %v5483_v61  ;;  %v4982_v51 = vld [vmem:[#allocation23 + $0x7d8] sm:$0xff] }
 0xa95   : > { %v12052_v10 = vcombine.high %v5460_v8, %v5484_v57  ;;  %v12051_v59 = vcombine.low %v5460_v8, %v5484_v57  ;;  %v5006_v61 = vld [vmem:[#allocation23 + $0x898] sm:$0xff]  ;;  %v15266_v57 = vsub.s32 5, %v14851_v28 }
 0xa96   : > { %9936 = vmatpush1.bf16.msra.mxu0 %v11713_v22  ;;  %v4741_v22 = vld [vmem:[#allocation23 + $0x50] sm:$0xff] }
 0xa97   : > { %9977 = vmatpush1.bf16.msra.mxu1 %v11715_v56  ;;  %9937 = vmatprep.subr.bf16.mxu0 %v11762_v46  ;;  %v4765_v56 = vld [vmem:[#allocation23 + $0x110] sm:$0xff]  ;;  %v4742_v46 = vld [vmem:[#allocation23 + $0x58] sm:$0xff] }
 0xa98   : > { %9978 = vmatprep.subr.bf16.mxu1 %v11764_v6  ;;  %v4766_v6 = vld [vmem:[#allocation23 + $0x118] sm:$0xff]  ;;  %v11334_v17 = vcombine.high %v4741_v22, %v4765_v56 }
 0xa99   : > { %v11336_v43 = vcombine.high %v4742_v46, %v4766_v6  ;;  %v11335_v5 = vcombine.low %v4742_v46, %v4766_v6 }
 0xa9a   : > { %9938 = vmatpush1.bf16.msra.mxu0 %v11761_v27  ;;  %v4789_v27 = vld [vmem:[#allocation23 + $0x1d0] sm:$0xff] }
 0xa9b   : > { %9979 = vmatpush1.bf16.msra.mxu1 %v11763_v58  ;;  %9939 = vmatprep.subr.bf16.mxu0 %v11810_v14  ;;  %v4813_v58 = vld [vmem:[#allocation23 + $0x290] sm:$0xff]  ;;  %v11333_v14 = vcombine.low %v4741_v22, %v4765_v56 }
 0xa9c   : > { %9980 = vmatprep.subr.bf16.mxu1 %v11812_v31  ;;  %v4790_v31 = vld [vmem:[#allocation23 + $0x1d8] sm:$0xff]  ;;  %v11382_v19 = vcombine.high %v4789_v27, %v4813_v58  ;;  %v11381_v9 = vcombine.low %v4789_v27, %v4813_v58  ;;  %v5029_v22 = vld [vmem:[#allocation23 + $0x950] sm:$0xff]  ;;  %v11575_v27 = vcombine.low %v4982_v51, %v5006_v61 }
 0xa9d   : > { %v11383_v18 = vcombine.low %v4790_v31, %v4814_v40  ;;  %v5053_v56 = vld [vmem:[#allocation23 + $0xa10] sm:$0xff] }
 0xa9e   : > { %9940 = vmatpush1.bf16.msra.mxu0 %v11809_v12  ;;  %v4861_v12 = vld [vmem:[#allocation23 + $0x410] sm:$0xff]  ;;  %v11622_v58 = vcombine.high %v5029_v22, %v5053_v56 }
 0xa9f   : > { %9981 = vmatpush1.bf16.msra.mxu1 %v11811_v50  ;;  %9941 = vmatprep.subr.bf16.mxu0 %v11858_v55  ;;  %v11384_v50 = vcombine.high %v4790_v31, %v4814_v40  ;;  %v4838_v55 = vld [vmem:[#allocation23 + $0x358] sm:$0xff]  ;;  %v11430_v62 = vcombine.high %v4837_v35, %v4861_v12  ;;  %v11429_v33 = vcombine.low %v4837_v35, %v4861_v12 }
 0xaa0   : > { %9982 = vmatprep.subr.bf16.mxu1 %v11860_v49  ;;  %v4862_v49 = vld [vmem:[#allocation23 + $0x418] sm:$0xff] }
 0xaa1   : > { %v11432_v37 = vcombine.high %v4838_v55, %v4862_v49  ;;  %v11431_v41 = vcombine.low %v4838_v55, %v4862_v49  ;;  %v5078_v49 = vld [vmem:[#allocation23 + $0xad8] sm:$0xff] }
 0xaa2   : > { %9942 = vmatpush1.bf16.msra.mxu0 %v11857_v52  ;;  %v4885_v52 = vld [vmem:[#allocation23 + $0x4d0] sm:$0xff] }
 0xaa3   : > { %9983 = vmatpush1.bf16.msra.mxu1 %v11859_v25  ;;  %9943 = vmatprep.subr.bf16.mxu0 %v11906_v29  ;;  %v4909_v25 = vld [vmem:[#allocation23 + $0x590] sm:$0xff]  ;;  %v4886_v29 = vld [vmem:[#allocation23 + $0x4d8] sm:$0xff] }
 0xaa4   : > { %9984 = vmatprep.subr.bf16.mxu1 %v11908_v16  ;;  %v4910_v16 = vld [vmem:[#allocation23 + $0x598] sm:$0xff]  ;;  %v11478_v11 = vcombine.high %v4885_v52, %v4909_v25  ;;  %v11477_v24 = vcombine.low %v4885_v52, %v4909_v25  ;;  %v11621_v52 = vcombine.low %v5029_v22, %v5053_v56 }
 0xaa5   : > { %v11480_v21 = vcombine.high %v4886_v29, %v4910_v16  ;;  %v11479_v54 = vcombine.low %v4886_v29, %v4910_v16 }
 0xaa6   : > { %9944 = vmatpush1.bf16.msra.mxu0 %v11905_v36  ;;  %v4933_v36 = vld [vmem:[#allocation23 + $0x650] sm:$0xff] }
 0xaa7   : > { %9985 = vmatpush1.bf16.msra.mxu1 %v11907_v7  ;;  %9945 = vmatprep.subr.bf16.mxu0 %v11954_v23  ;;  %v4957_v7 = vld [vmem:[#allocation23 + $0x710] sm:$0xff]  ;;  %v4934_v23 = vld [vmem:[#allocation23 + $0x658] sm:$0xff] }
 0xaa8   : > { %9986 = vmatprep.subr.bf16.mxu1 %v11956_v38  ;;  %v4958_v38 = vld [vmem:[#allocation23 + $0x718] sm:$0xff]  ;;  %v11526_v20 = vcombine.high %v4933_v36, %v4957_v7  ;;  %v11525_v8 = vcombine.low %v4933_v36, %v4957_v7  ;;  %v5125_v36 = vld [vmem:[#allocation23 + $0xc50] sm:$0xff] }
 0xaa9   : > { %v11528_v42 = vcombine.high %v4934_v23, %v4958_v38  ;;  %v5149_v7 = vld [vmem:[#allocation23 + $0xd10] sm:$0xff] }
 0xaaa   : > { %9946 = vmatpush1.bf16.msra.mxu0 %v11953_v26  ;;  %v4981_v26 = vld [vmem:[#allocation23 + $0x7d0] sm:$0xff]  ;;  %v11717_v56 = vcombine.low %v5125_v36, %v5149_v7 }
 0xaab   : > { %9987 = vmatpush1.bf16.msra.mxu1 %v11955_v4  ;;  %9947 = vmatprep.subr.bf16.mxu0 %v12002_v15  ;;  %v5005_v4 = vld [vmem:[#allocation23 + $0x890] sm:$0xff]  ;;  %v15260_v15 = vsub.s32 4, %v14851_v28 }
 0xaac   : > { %9988 = vmatprep.subr.bf16.mxu1 %v12004_v0  ;;  %v15263_v0 = vsub.s32 6, %v14851_v28 }
 0xaad   : > { %v9370_v46 = vrot.slane %v15231_v60, %v15260_v15 }
 0xaae   : > { %9948 = vmatpush1.bf16.msra.mxu0 %v12001_v47  ;;  %v15269_v47 = vsub.s32 7, %v14851_v28  ;;  %v9378_v6 = vrot.slane %v15231_v60, %v15263_v0  ;;  %v9374_v28 = vrot.slane %v15231_v60, %v15266_v57 }
 0xaaf   : > { %9989 = vmatpush1.bf16.msra.mxu1 %v12003_v44  ;;  %9949 = vmatprep.subr.bf16.mxu0 %v12050_v1  ;;  %v11527_v44 = vcombine.low %v4934_v23, %v4958_v38  ;;  %v11574_v1 = vcombine.high %v4981_v26, %v5005_v4  ;;  %v5126_v23 = vld [vmem:[#allocation23 + $0xc58] sm:$0xff] }
 0xab0   : > { %9990 = vmatprep.subr.bf16.mxu1 %v12052_v10  ;;  %v11576_v10 = vcombine.high %v4982_v51, %v5006_v61  ;;  %v5150_v38 = vld [vmem:[#allocation23 + $0xd18] sm:$0xff]  ;;  %v5173_v61 = vld [vmem:[#allocation23 + $0xdd0] sm:$0xff] }
 0xab1   : > { %v11720_v51 = vcombine.high %v5126_v23, %v5150_v38 }
 0xab2   : > { %9950 = vmatpush1.bf16.msra.mxu0 %v12049_v48  ;;  %v5030_v48 = vld [vmem:[#allocation23 + $0x958] sm:$0xff] }
 0xab3   : > { %9991 = vmatpush1.bf16.msra.mxu1 %v12051_v59  ;;  %10001 = vmatprep.subr.bf16.mxu0 %v11334_v17  ;;  %v5054_v59 = vld [vmem:[#allocation23 + $0xa18] sm:$0xff]  ;;  %v9382_v17 = vrot.slane %v15231_v60, %v15269_v47 }
 0xab4   : > { %10042 = vmatprep.subr.bf16.mxu1 %v11336_v43  ;;  %v11573_v43 = vcombine.low %v4981_v26, %v5005_v4  ;;  %v11624_v40 = vcombine.high %v5030_v48, %v5054_v59  ;;  %v11623_v16 = vcombine.low %v5030_v48, %v5054_v59  ;;  %v11718_v26 = vcombine.high %v5125_v36, %v5149_v7  ;;  %v5413_v7 = vld [vmem:[#allocation23 + $0x1550] sm:$0xff] }
 0xab5   : > { %9952 = vmatmul.mubr.bf16.vlgmr.msra.gmra.mrb[20].mxu0 %v15208_v39 }
 0xab6   : > { %9993 = vmatmul.mubr.bf16.vlgmr.msra.gmra.mrb[20].mxu1 %v15208_v39  ;;  %10002 = vmatpush1.bf16.msra.mxu0 %v11333_v14 }
 0xab7   : > { %10033 = vmatprep.mubr.bf16.mxu0 %v15206_v13  ;;  %10043 = vmatpush1.bf16.msra.mxu1 %v11335_v5  ;;  %v5077_v5 = vld [vmem:[#allocation23 + $0xad0] sm:$0xff] }
 0xab8   : > { %10074 = vmatprep.mubr.bf16.mxu1 %v15206_v13  ;;  %10003 = vmatprep.subr.bf16.mxu0 %v11382_v19  ;;  %v5101_v19 = vld [vmem:[#allocation23 + $0xb90] sm:$0xff] }
 0xab9   : > { %10044 = vmatprep.subr.bf16.mxu1 %v11384_v50 }
 0xaba   : > { %10004 = vmatpush1.bf16.msra.mxu0 %v11381_v9  ;;  %v5102_v9 = vld [vmem:[#allocation23 + $0xb98] sm:$0xff] }
 0xabb   : > { %10045 = vmatpush1.bf16.msra.mxu1 %v11383_v18  ;;  %10005 = vmatprep.subr.bf16.mxu0 %v11430_v62 }
 0xabc   : > { %10046 = vmatprep.subr.bf16.mxu1 %v11432_v37 }
 0xabe   : > { %10006 = vmatpush1.bf16.msra.mxu0 %v11429_v33  ;;  %v11670_v33 = vcombine.high %v5077_v5, %v5101_v19 }
 0xabf   : > { %10047 = vmatpush1.bf16.msra.mxu1 %v11431_v41  ;;  %10007 = vmatprep.subr.bf16.mxu0 %v11478_v11 }
 0xac0   : > { %10048 = vmatprep.subr.bf16.mxu1 %v11480_v21  ;;  %v11672_v21 = vcombine.high %v5078_v49, %v5102_v9 }
 0xac2   : > { %10008 = vmatpush1.bf16.msra.mxu0 %v11477_v24 }
 0xac3   : > { %10049 = vmatpush1.bf16.msra.mxu1 %v11479_v54  ;;  %10009 = vmatprep.subr.bf16.mxu0 %v11526_v20  ;;  %v11669_v20 = vcombine.low %v5077_v5, %v5101_v19  ;;  %v5294_v5 = vld [vmem:[#allocation23 + $0x1198] sm:$0xff] }
 0xac4   : > { %10050 = vmatprep.subr.bf16.mxu1 %v11528_v42  ;;  %v11671_v42 = vcombine.low %v5078_v49, %v5102_v9  ;;  %v5341_v49 = vld [vmem:[#allocation23 + $0x1310] sm:$0xff]  ;;  %v5318_v9 = vld [vmem:[#allocation23 + $0x1258] sm:$0xff] }
 0xac6   : > { %10010 = vmatpush1.bf16.msra.mxu0 %v11525_v8  ;;  %v5197_v8 = vld [vmem:[#allocation23 + $0xe90] sm:$0xff] }
 0xac7   : > { %10051 = vmatpush1.bf16.msra.mxu1 %v11527_v44  ;;  %10011 = vmatprep.subr.bf16.mxu0 %v11574_v1  ;;  %v5174_v44 = vld [vmem:[#allocation23 + $0xdd8] sm:$0xff]  ;;  %v11765_v30 = vcombine.low %v5173_v61, %v5197_v8 }
 0xac8   : > { %v9707_v14 = vpop.f32.mrb[8].mxu0  ;;  %v9748_v31 = vpop.f32.mrb[8].mxu1  ;;  %10052 = vmatprep.subr.bf16.mxu1 %v11576_v10  ;;  %v5198_v1 = vld [vmem:[#allocation23 + $0xe98] sm:$0xff]  ;;  %v10663_v10 = vrot.slane %v10655_v2, %v15245_v53 }
 0xac9   : > { %v9708_v35 = vadd.f32 %v9707_v14, %v9370_v46  ;;  %v9749_v12 = vadd.f32 %v9748_v31, %v9378_v6  ;;  %v9709_v50 = vpop.f32.mrb[9].mxu0  ;;  %v9750_v55 = vpop.f32.mrb[9].mxu1  ;;  %v11719_v46 = vcombine.low %v5126_v23, %v5150_v38  ;;  %v11766_v6 = vcombine.high %v5173_v61, %v5197_v8  ;;  %v5269_v14 = vld [vmem:[#allocation23 + $0x10d0] sm:$0xff]  ;;  %v5414_v38 = vld [vmem:[#allocation23 + $0x1558] sm:$0xff] }
 0xaca   : > { %v9710_v18 = vadd.f32 %v9709_v50, %v9374_v28  ;;  %v9751_v62 = vadd.f32 %v9750_v55, %v9382_v17  ;;  %v9711_v60 = vpop.f32.mrb[10].mxu0  ;;  %v9752_v37 = vpop.f32.mrb[10].mxu1  ;;  %10012 = vmatpush1.bf16.msra.mxu0 %v11573_v43  ;;  %v11768_v59 = vcombine.high %v5174_v44, %v5198_v1  ;;  %v5221_v28 = vld [vmem:[#allocation23 + $0xf50] sm:$0xff]  ;;  %v5222_v43 = vld [vmem:[#allocation23 + $0xf58] sm:$0xff]  ;;  %v11767_v3 = vcombine.low %v5174_v44, %v5198_v1 }
 0xacb   : > { %10053 = vmatpush1.bf16.msra.mxu1 %v11575_v27  ;;  %v9712_v25 = vpop.f32.mrb[11].mxu0  ;;  %v9753_v29 = vpop.f32.mrb[11].mxu1  ;;  %10013 = vmatprep.subr.bf16.mxu0 %v11622_v58  ;;  %v5245_v17 = vld [vmem:[#allocation23 + $0x1010] sm:$0xff]  ;;  %v5246_v27 = vld [vmem:[#allocation23 + $0x1018] sm:$0xff] }
 0xacc   : > { %v10625_v41 = vcombine.low %v9708_v35, %v9710_v18  ;;  %v10626_v11 = vcombine.low %v9749_v12, %v9751_v62  ;;  %10054 = vmatprep.subr.bf16.mxu1 %v11624_v40  ;;  %v11814_v2 = vcombine.high %v5221_v28, %v5245_v17  ;;  %v11816_v58 = vcombine.high %v5222_v43, %v5246_v27  ;;  %v5293_v31 = vld [vmem:[#allocation23 + $0x1190] sm:$0xff]  ;;  %v5270_v40 = vld [vmem:[#allocation23 + $0x10d8] sm:$0xff] }
 0xacd   : > { %v11813_v19 = vcombine.low %v5221_v28, %v5245_v17  ;;  %v11815_v35 = vcombine.low %v5222_v43, %v5246_v27  ;;  %v11862_v12 = vcombine.high %v5269_v14, %v5293_v31  ;;  %v11864_v50 = vcombine.high %v5270_v40, %v5294_v5  ;;  %v5317_v55 = vld [vmem:[#allocation23 + $0x1250] sm:$0xff]  ;;  %v5342_v18 = vld [vmem:[#allocation23 + $0x1318] sm:$0xff]  ;;  %v4791_v27 = vld [vmem:[#allocation23 + $0x1e0] sm:$0xff] }
 0xace   : > { %v10647_v24 = vrot.slane %v10625_v41, %v15245_v53  ;;  %v10654_v54 = vrot.slane %v10626_v11, %v15245_v53  ;;  %10014 = vmatpush1.bf16.msra.mxu0 %v11621_v52  ;;  %v11861_v62 = vcombine.low %v5269_v14, %v5293_v31  ;;  %v11863_v60 = vcombine.low %v5270_v40, %v5294_v5  ;;  %v5365_v25 = vld [vmem:[#allocation23 + $0x13d0] sm:$0xff]  ;;  %v5462_v61 = vld [vmem:[#allocation23 + $0x16d8] sm:$0xff]  ;;  %v4839_v40 = vld [vmem:[#allocation23 + $0x360] sm:$0xff] }
 0xacf   : > { %10055 = vmatpush1.bf16.msra.mxu1 %v11623_v16  ;;  %10015 = vmatprep.subr.bf16.mxu0 %v11670_v33  ;;  %v11910_v37 = vcombine.high %v5317_v55, %v5341_v49  ;;  %v11912_v52 = vcombine.high %v5318_v9, %v5342_v18  ;;  %v5389_v29 = vld [vmem:[#allocation23 + $0x1490] sm:$0xff]  ;;  %v5366_v16 = vld [vmem:[#allocation23 + $0x13d8] sm:$0xff]  ;;  %v11909_v41 = vcombine.low %v5317_v55, %v5341_v49  ;;  %v4863_v5 = vld [vmem:[#allocation23 + $0x420] sm:$0xff] }
 0xad0   : > { %v10656_v4 = vcombine.low %v10647_v24, %v10654_v54  ;;  %10056 = vmatprep.subr.bf16.mxu1 %v11672_v21  ;;  %v5390_v33 = vld [vmem:[#allocation23 + $0x1498] sm:$0xff]  ;;  %v11911_v11 = vcombine.low %v5318_v9, %v5342_v18  ;;  %v11958_v21 = vcombine.high %v5365_v25, %v5389_v29  ;;  %v5437_v23 = vld [vmem:[#allocation23 + $0x1610] sm:$0xff]  ;;  %v11957_v54 = vcombine.low %v5365_v25, %v5389_v29  ;;  %v4887_v18 = vld [vmem:[#allocation23 + $0x4e0] sm:$0xff] }
 0xad1   : > { %v11960_v36 = vcombine.high %v5366_v16, %v5390_v33  ;;  %v5438_v24 = vld [vmem:[#allocation23 + $0x1618] sm:$0xff]  ;;  %v12005_v44 = vcombine.low %v5413_v7, %v5437_v23  ;;  %v11434_v49 = vcombine.high %v4839_v40, %v4863_v5 }
 0xad2   : > { %v10670_v22 = vrot.slane %v10656_v4, %v15245_v53  ;;  %10016 = vmatpush1.bf16.msra.mxu0 %v11669_v20  ;;  %v11959_v20 = vcombine.low %v5366_v16, %v5390_v33  ;;  %v5461_v4 = vld [vmem:[#allocation23 + $0x16d0] sm:$0xff]  ;;  %v5486_v8 = vld [vmem:[#allocation23 + $0x1798] sm:$0xff]  ;;  %v12007_v1 = vcombine.low %v5414_v38, %v5438_v24  ;;  %v4935_v33 = vld [vmem:[#allocation23 + $0x660] sm:$0xff] }
 0xad3   : > { %10057 = vmatpush1.bf16.msra.mxu1 %v11671_v42  ;;  %10017 = vmatprep.subr.bf16.mxu0 %v11718_v26  ;;  %v12006_v42 = vcombine.high %v5413_v7, %v5437_v23  ;;  %v12008_v26 = vcombine.high %v5414_v38, %v5438_v24  ;;  %v12055_v28 = vcombine.low %v5462_v61, %v5486_v8  ;;  %v4983_v24 = vld [vmem:[#allocation23 + $0x7e0] sm:$0xff] }
 0xad4   : > { %v10671_v48 = vcombine.low %v10663_v10, %v10670_v22  ;;  %10058 = vmatprep.subr.bf16.mxu1 %v11720_v51  ;;  %v5485_v51 = vld [vmem:[#allocation23 + $0x1790] sm:$0xff]  ;;  %v12056_v22 = vcombine.high %v5462_v61, %v5486_v8 }
 0xad5   : > { %v12054_v10 = vcombine.high %v5461_v4, %v5485_v51 }
 0xad6   : > { %10923 = vst [vmem:[%s13829_s24] sm:$0xff] %v10671_v48  ;;  %10018 = vmatpush1.bf16.msra.mxu0 %v11717_v56  ;;  %v4743_v56 = vld [vmem:[#allocation23 + $0x60] sm:$0xff]  ;;  %v4768_v48 = vld [vmem:[#allocation23 + $0x128] sm:$0xff] }
 0xad7   : > { %10059 = vmatpush1.bf16.msra.mxu1 %v11719_v46  ;;  %10019 = vmatprep.subr.bf16.mxu0 %v11766_v6  ;;  %v4767_v46 = vld [vmem:[#allocation23 + $0x120] sm:$0xff]  ;;  %v4744_v6 = vld [vmem:[#allocation23 + $0x68] sm:$0xff] }
 0xad8   : > { %10060 = vmatprep.subr.bf16.mxu1 %v11768_v59  ;;  %v12053_v59 = vcombine.low %v5461_v4, %v5485_v51  ;;  %v11338_v17 = vcombine.high %v4743_v56, %v4767_v46  ;;  %v11340_v43 = vcombine.high %v4744_v6, %v4768_v48  ;;  %v11339_v14 = vcombine.low %v4744_v6, %v4768_v48  ;;  %v15291_v4 = vld [vmem:[#allocation25 + $0x8] sm:$0xff] }
 0xad9   : > { %v9390_v6 = vrot.slane %v15291_v4, %v14860_v45 }
 0xada   : > { %10020 = vmatpush1.bf16.msra.mxu0 %v11765_v30  ;;  %v4815_v30 = vld [vmem:[#allocation23 + $0x2a0] sm:$0xff] }
 0xadb   : > { %10061 = vmatpush1.bf16.msra.mxu1 %v11767_v3  ;;  %10021 = vmatprep.subr.bf16.mxu0 %v11814_v2  ;;  %v11337_v3 = vcombine.low %v4743_v56, %v4767_v46  ;;  %v4792_v2 = vld [vmem:[#allocation23 + $0x1e8] sm:$0xff]  ;;  %v11386_v31 = vcombine.high %v4791_v27, %v4815_v30  ;;  %v9394_v46 = vrot.slane %v15291_v4, %v15229_v34 }
 0xadc   : > { %10062 = vmatprep.subr.bf16.mxu1 %v11816_v58  ;;  %v4816_v58 = vld [vmem:[#allocation23 + $0x2a8] sm:$0xff] }
 0xadd   : > { %v11387_v55 = vcombine.low %v4792_v2, %v4816_v58  ;;  %v5056_v56 = vld [vmem:[#allocation23 + $0xa28] sm:$0xff] }
 0xade   : > { %10022 = vmatpush1.bf16.msra.mxu0 %v11813_v19  ;;  %v11388_v19 = vcombine.high %v4792_v2, %v4816_v58 }
 0xadf   : > { %10063 = vmatpush1.bf16.msra.mxu1 %v11815_v35  ;;  %10023 = vmatprep.subr.bf16.mxu0 %v11862_v12  ;;  %v4840_v35 = vld [vmem:[#allocation23 + $0x368] sm:$0xff] }
 0xae0   : > { %10064 = vmatprep.subr.bf16.mxu1 %v11864_v50  ;;  %v4864_v12 = vld [vmem:[#allocation23 + $0x428] sm:$0xff]  ;;  %v11385_v50 = vcombine.low %v4791_v27, %v4815_v30  ;;  %v5079_v30 = vld [vmem:[#allocation23 + $0xae0] sm:$0xff] }
 0xae1   : > { %v11436_v9 = vcombine.high %v4840_v35, %v4864_v12  ;;  %v11435_v25 = vcombine.low %v4840_v35, %v4864_v12 }
 0xae2   : > { %10024 = vmatpush1.bf16.msra.mxu0 %v11861_v62  ;;  %v4911_v62 = vld [vmem:[#allocation23 + $0x5a0] sm:$0xff] }
 0xae3   : > { %10065 = vmatpush1.bf16.msra.mxu1 %v11863_v60  ;;  %10025 = vmatprep.subr.bf16.mxu0 %v11910_v37  ;;  %v4888_v60 = vld [vmem:[#allocation23 + $0x4e8] sm:$0xff]  ;;  %v11482_v29 = vcombine.high %v4887_v18, %v4911_v62 }
 0xae4   : > { %10066 = vmatprep.subr.bf16.mxu1 %v11912_v52  ;;  %v4912_v37 = vld [vmem:[#allocation23 + $0x5a8] sm:$0xff]  ;;  %v11433_v52 = vcombine.low %v4839_v40, %v4863_v5 }
 0xae5   : > { %v11484_v16 = vcombine.high %v4888_v60, %v4912_v37  ;;  %v11483_v7 = vcombine.low %v4888_v60, %v4912_v37  ;;  %v5104_v40 = vld [vmem:[#allocation23 + $0xba8] sm:$0xff] }
 0xae6   : > { %10026 = vmatpush1.bf16.msra.mxu0 %v11909_v41  ;;  %v4959_v41 = vld [vmem:[#allocation23 + $0x720] sm:$0xff] }
 0xae7   : > { %10067 = vmatpush1.bf16.msra.mxu1 %v11911_v11  ;;  %10027 = vmatprep.subr.bf16.mxu0 %v11958_v21  ;;  %v4936_v11 = vld [vmem:[#allocation23 + $0x668] sm:$0xff]  ;;  %v11530_v23 = vcombine.high %v4935_v33, %v4959_v41 }
 0xae8   : > { %10068 = vmatprep.subr.bf16.mxu1 %v11960_v36  ;;  %v4960_v21 = vld [vmem:[#allocation23 + $0x728] sm:$0xff]  ;;  %v11481_v36 = vcombine.low %v4887_v18, %v4911_v62 }
 0xae9   : > { %v11532_v38 = vcombine.high %v4936_v11, %v4960_v21  ;;  %v11531_v51 = vcombine.low %v4936_v11, %v4960_v21 }
 0xaea   : > { %10028 = vmatpush1.bf16.msra.mxu0 %v11957_v54  ;;  %v5007_v54 = vld [vmem:[#allocation23 + $0x8a0] sm:$0xff] }
 0xaeb   : > { %10069 = vmatpush1.bf16.msra.mxu1 %v11959_v20  ;;  %10029 = vmatprep.subr.bf16.mxu0 %v12006_v42  ;;  %v4984_v20 = vld [vmem:[#allocation23 + $0x7e8] sm:$0xff]  ;;  %v11578_v61 = vcombine.high %v4983_v24, %v5007_v54  ;;  %v11577_v48 = vcombine.low %v4983_v24, %v5007_v54  ;;  %v5175_v24 = vld [vmem:[#allocation23 + $0xde0] sm:$0xff] }
 0xaec   : > { %10070 = vmatprep.subr.bf16.mxu1 %v12008_v26  ;;  %v5008_v42 = vld [vmem:[#allocation23 + $0x8a8] sm:$0xff]  ;;  %v11529_v26 = vcombine.low %v4935_v33, %v4959_v41  ;;  %v5199_v54 = vld [vmem:[#allocation23 + $0xea0] sm:$0xff] }
 0xaed   : > { %v11580_v8 = vcombine.high %v4984_v20, %v5008_v42  ;;  %v5128_v33 = vld [vmem:[#allocation23 + $0xc68] sm:$0xff] }
 0xaee   : > { %10030 = vmatpush1.bf16.msra.mxu0 %v12005_v44  ;;  %v5031_v44 = vld [vmem:[#allocation23 + $0x960] sm:$0xff]  ;;  %v5152_v41 = vld [vmem:[#allocation23 + $0xd28] sm:$0xff] }
 0xaef   : > { %10071 = vmatpush1.bf16.msra.mxu1 %v12007_v1  ;;  %10031 = vmatprep.subr.bf16.mxu0 %v12054_v10  ;;  %v5055_v1 = vld [vmem:[#allocation23 + $0xa20] sm:$0xff]  ;;  %v9386_v10 = vrot.slane %v15291_v4, %v14856_v32 }
 0xaf0   : > { %10072 = vmatprep.subr.bf16.mxu1 %v12056_v22  ;;  %v5032_v22 = vld [vmem:[#allocation23 + $0x968] sm:$0xff] }
 0xaf1   : > { %v11628_v27 = vcombine.high %v5032_v22, %v5056_v56  ;;  %v11627_v18 = vcombine.low %v5032_v22, %v5056_v56  ;;  %v5224_v22 = vld [vmem:[#allocation23 + $0xf68] sm:$0xff] }
 0xaf2   : > { %10032 = vmatpush1.bf16.msra.mxu0 %v12053_v59  ;;  %v9398_v59 = vrot.slane %v15291_v4, %v15234_v63  ;;  %v5248_v56 = vld [vmem:[#allocation23 + $0x1028] sm:$0xff] }
 0xaf3   : > { %10073 = vmatpush1.bf16.msra.mxu1 %v12055_v28  ;;  %10083 = vmatprep.subr.bf16.mxu0 %v11338_v17  ;;  %v11579_v28 = vcombine.low %v4984_v20, %v5008_v42  ;;  %v11626_v17 = vcombine.high %v5031_v44, %v5055_v1  ;;  %v5176_v42 = vld [vmem:[#allocation23 + $0xde8] sm:$0xff] }
 0xaf4   : > { %10124 = vmatprep.subr.bf16.mxu1 %v11340_v43 }
 0xaf5   : > { %10034 = vmatmul.mubr.bf16.vlgmr.msra.gmra.mrb[24].mxu0 %v15208_v39 }
 0xaf6   : > { %10075 = vmatmul.mubr.bf16.vlgmr.msra.gmra.mrb[24].mxu1 %v15208_v39  ;;  %10084 = vmatpush1.bf16.msra.mxu0 %v11337_v3  ;;  %v5103_v3 = vld [vmem:[#allocation23 + $0xba0] sm:$0xff] }
 0xaf7   : > { %10115 = vmatprep.mubr.bf16.mxu0 %v15206_v13  ;;  %10125 = vmatpush1.bf16.msra.mxu1 %v11339_v14  ;;  %v11674_v62 = vcombine.high %v5079_v30, %v5103_v3  ;;  %v11673_v21 = vcombine.low %v5079_v30, %v5103_v3  ;;  %v11819_v3 = vcombine.low %v5224_v22, %v5248_v56 }
 0xaf8   : > { %10156 = vmatprep.mubr.bf16.mxu1 %v15206_v13  ;;  %10085 = vmatprep.subr.bf16.mxu0 %v11386_v31  ;;  %v5080_v31 = vld [vmem:[#allocation23 + $0xae8] sm:$0xff] }
 0xaf9   : > { %10126 = vmatprep.subr.bf16.mxu1 %v11388_v19 }
 0xafa   : > { %10086 = vmatpush1.bf16.msra.mxu0 %v11385_v50  ;;  %v11625_v50 = vcombine.low %v5031_v44, %v5055_v1  ;;  %v5223_v1 = vld [vmem:[#allocation23 + $0xf60] sm:$0xff] }
 0xafb   : > { %10127 = vmatpush1.bf16.msra.mxu1 %v11387_v55  ;;  %10087 = vmatprep.subr.bf16.mxu0 %v11434_v49 }
 0xafc   : > { %10128 = vmatprep.subr.bf16.mxu1 %v11436_v9 }
 0xafe   : > { %10088 = vmatpush1.bf16.msra.mxu0 %v11433_v52  ;;  %v11676_v52 = vcombine.high %v5080_v31, %v5104_v40 }
 0xaff   : > { %10129 = vmatpush1.bf16.msra.mxu1 %v11435_v25  ;;  %10089 = vmatprep.subr.bf16.mxu0 %v11482_v29  ;;  %v5127_v25 = vld [vmem:[#allocation23 + $0xc60] sm:$0xff] }
 0xb00   : > { %10130 = vmatprep.subr.bf16.mxu1 %v11484_v16  ;;  %v5151_v29 = vld [vmem:[#allocation23 + $0xd20] sm:$0xff] }
 0xb02   : > { %10090 = vmatpush1.bf16.msra.mxu0 %v11481_v36 }
 0xb03   : > { %10131 = vmatpush1.bf16.msra.mxu1 %v11483_v7  ;;  %10091 = vmatprep.subr.bf16.mxu0 %v11530_v23  ;;  %v11675_v7 = vcombine.low %v5080_v31, %v5104_v40  ;;  %v11722_v23 = vcombine.high %v5127_v25, %v5151_v29  ;;  %v5343_v31 = vld [vmem:[#allocation23 + $0x1320] sm:$0xff]  ;;  %v5320_v40 = vld [vmem:[#allocation23 + $0x1268] sm:$0xff] }
 0xb04   : > { %10132 = vmatprep.subr.bf16.mxu1 %v11532_v38  ;;  %v11724_v38 = vcombine.high %v5128_v33, %v5152_v41 }
 0xb06   : > { %10092 = vmatpush1.bf16.msra.mxu0 %v11529_v26  ;;  %v5200_v26 = vld [vmem:[#allocation23 + $0xea8] sm:$0xff] }
 0xb07   : > { %10133 = vmatpush1.bf16.msra.mxu1 %v11531_v51  ;;  %10093 = vmatprep.subr.bf16.mxu0 %v11578_v61  ;;  %v11721_v51 = vcombine.low %v5127_v25, %v5151_v29  ;;  %v11723_v61 = vcombine.low %v5128_v33, %v5152_v41  ;;  %v11772_v44 = vcombine.high %v5176_v42, %v5200_v26  ;;  %v5415_v25 = vld [vmem:[#allocation23 + $0x1560] sm:$0xff]  ;;  %v5440_v33 = vld [vmem:[#allocation23 + $0x1628] sm:$0xff] }
 0xb08   : > { %v9789_v43 = vpop.f32.mrb[12].mxu0  ;;  %10134 = vmatprep.subr.bf16.mxu1 %v11580_v8  ;;  %v11770_v8 = vcombine.high %v5175_v24, %v5199_v54  ;;  %v5439_v29 = vld [vmem:[#allocation23 + $0x1620] sm:$0xff] }
 0xb09   : > { %v9790_v2 = vadd.f32 %v9789_v43, %v9386_v10  ;;  %v9830_v58 = vpop.f32.mrb[12].mxu1  ;;  %v9791_v14 = vpop.f32.mrb[13].mxu0  ;;  %v5247_v10 = vld [vmem:[#allocation23 + $0x1020] sm:$0xff]  ;;  %v5272_v43 = vld [vmem:[#allocation23 + $0x10e8] sm:$0xff] }
 0xb0a   : > { %v9831_v5 = vadd.f32 %v9830_v58, %v9394_v46  ;;  %v9792_v19 = vadd.f32 %v9791_v14, %v9390_v6  ;;  %v9832_v35 = vpop.f32.mrb[13].mxu1  ;;  %v9793_v12 = vpop.f32.mrb[14].mxu0  ;;  %10094 = vmatpush1.bf16.msra.mxu0 %v11577_v48  ;;  %v11769_v46 = vcombine.low %v5175_v24, %v5199_v54  ;;  %v11771_v6 = vcombine.low %v5176_v42, %v5200_v26  ;;  %v5319_v14 = vld [vmem:[#allocation23 + $0x1260] sm:$0xff]  ;;  %v5464_v54 = vld [vmem:[#allocation23 + $0x16e8] sm:$0xff] }
 0xb0b   : > { %v9833_v55 = vadd.f32 %v9832_v35, %v9398_v59  ;;  %v9834_v49 = vpop.f32.mrb[14].mxu1  ;;  %10135 = vmatpush1.bf16.msra.mxu1 %v11579_v28  ;;  %v9794_v9 = vpop.f32.mrb[15].mxu0  ;;  %10095 = vmatprep.subr.bf16.mxu0 %v11626_v17  ;;  %v11818_v48 = vcombine.high %v5223_v1, %v5247_v10  ;;  %v11820_v59 = vcombine.high %v5224_v22, %v5248_v56  ;;  %v5271_v28 = vld [vmem:[#allocation23 + $0x10e0] sm:$0xff]  ;;  %v5488_v42 = vld [vmem:[#allocation23 + $0x17a8] sm:$0xff]  ;;  %v4770_v22 = vld [vmem:[#allocation23 + $0x138] sm:$0xff] }
 0xb0c   : > { %v10672_v60 = vcombine.low %v9790_v2, %v9792_v19  ;;  %v9835_v37 = vpop.f32.mrb[15].mxu1  ;;  %10136 = vmatprep.subr.bf16.mxu1 %v11628_v27  ;;  %v5295_v17 = vld [vmem:[#allocation23 + $0x11a0] sm:$0xff]  ;;  %v5296_v27 = vld [vmem:[#allocation23 + $0x11a8] sm:$0xff]  ;;  %v11817_v30 = vcombine.low %v5223_v1, %v5247_v10  ;;  %v11914_v12 = vcombine.high %v5319_v14, %v5343_v31  ;;  %v12009_v26 = vcombine.low %v5415_v25, %v5439_v29  ;;  %v4769_v1 = vld [vmem:[#allocation23 + $0x130] sm:$0xff] }
 0xb0d   : > { %v10673_v16 = vcombine.low %v9831_v5, %v9833_v55  ;;  %v11866_v2 = vcombine.high %v5271_v28, %v5295_v17  ;;  %v11868_v58 = vcombine.high %v5272_v43, %v5296_v27  ;;  %v5344_v5 = vld [vmem:[#allocation23 + $0x1328] sm:$0xff]  ;;  %v11865_v19 = vcombine.low %v5271_v28, %v5295_v17  ;;  %v5367_v55 = vld [vmem:[#allocation23 + $0x13e0] sm:$0xff]  ;;  %v4746_v10 = vld [vmem:[#allocation23 + $0x78] sm:$0xff] }
 0xb0e   : > { %v15302_v11 = vrot.slane %v10672_v60, %v15245_v53  ;;  %10096 = vmatpush1.bf16.msra.mxu0 %v11625_v50  ;;  %v11867_v35 = vcombine.low %v5272_v43, %v5296_v27  ;;  %v11916_v50 = vcombine.high %v5320_v40, %v5344_v5  ;;  %v5391_v49 = vld [vmem:[#allocation23 + $0x14a0] sm:$0xff]  ;;  %v5368_v9 = vld [vmem:[#allocation23 + $0x13e8] sm:$0xff]  ;;  %v11915_v60 = vcombine.low %v5320_v40, %v5344_v5  ;;  %v4817_v28 = vld [vmem:[#allocation23 + $0x2b0] sm:$0xff] }
 0xb0f   : > { %v15305_v36 = vrot.slane %v10673_v16, %v15245_v53  ;;  %10137 = vmatpush1.bf16.msra.mxu1 %v11627_v18  ;;  %10097 = vmatprep.subr.bf16.mxu0 %v11674_v62  ;;  %v5392_v18 = vld [vmem:[#allocation23 + $0x14a8] sm:$0xff]  ;;  %v11913_v62 = vcombine.low %v5319_v14, %v5343_v31  ;;  %v11962_v37 = vcombine.high %v5367_v55, %v5391_v49  ;;  %v5487_v24 = vld [vmem:[#allocation23 + $0x17a0] sm:$0xff]  ;;  %v4794_v43 = vld [vmem:[#allocation23 + $0x1f8] sm:$0xff] }
 0xb10   : > { %10138 = vmatprep.subr.bf16.mxu1 %v11676_v52  ;;  %v11964_v52 = vcombine.high %v5368_v9, %v5392_v18  ;;  %v5416_v16 = vld [vmem:[#allocation23 + $0x1568] sm:$0xff]  ;;  %v11961_v41 = vcombine.low %v5367_v55, %v5391_v49  ;;  %v4818_v27 = vld [vmem:[#allocation23 + $0x2b8] sm:$0xff]  ;;  %v4913_v55 = vld [vmem:[#allocation23 + $0x5b0] sm:$0xff] }
 0xb11   : > { %v10704_v20 = vcombine.low %v15302_v11, %v15305_v36  ;;  %v11392_v14 = vcombine.high %v4794_v43, %v4818_v27  ;;  %v4842_v31 = vld [vmem:[#allocation23 + $0x378] sm:$0xff] }
 0xb12   : > { %10098 = vmatpush1.bf16.msra.mxu0 %v11673_v21  ;;  %v11963_v21 = vcombine.low %v5368_v9, %v5392_v18  ;;  %v4866_v40 = vld [vmem:[#allocation23 + $0x438] sm:$0xff] }
 0xb13   : > { %10139 = vmatpush1.bf16.msra.mxu1 %v11675_v7  ;;  %10099 = vmatprep.subr.bf16.mxu0 %v11722_v23  ;;  %v12010_v7 = vcombine.high %v5415_v25, %v5439_v29  ;;  %v12012_v23 = vcombine.high %v5416_v16, %v5440_v33  ;;  %v4890_v49 = vld [vmem:[#allocation23 + $0x4f8] sm:$0xff]  ;;  %v4961_v25 = vld [vmem:[#allocation23 + $0x730] sm:$0xff] }
 0xb14   : > { %10140 = vmatprep.subr.bf16.mxu1 %v11724_v38  ;;  %v5463_v38 = vld [vmem:[#allocation23 + $0x16e0] sm:$0xff]  ;;  %v4914_v9 = vld [vmem:[#allocation23 + $0x5b8] sm:$0xff] }
 0xb15   : > { %v12057_v56 = vcombine.low %v5463_v38, %v5487_v24  ;;  %v4938_v29 = vld [vmem:[#allocation23 + $0x678] sm:$0xff] }
 0xb16   : > { %10100 = vmatpush1.bf16.msra.mxu0 %v11721_v51  ;;  %v12011_v51 = vcombine.low %v5416_v16, %v5440_v33  ;;  %v4962_v16 = vld [vmem:[#allocation23 + $0x738] sm:$0xff] }
 0xb17   : > { %10141 = vmatpush1.bf16.msra.mxu1 %v11723_v61  ;;  %10101 = vmatprep.subr.bf16.mxu0 %v11770_v8  ;;  %v12058_v61 = vcombine.high %v5463_v38, %v5487_v24  ;;  %v12060_v8 = vcombine.high %v5464_v54, %v5488_v42  ;;  %v5009_v38 = vld [vmem:[#allocation23 + $0x8b0] sm:$0xff]  ;;  %v4986_v24 = vld [vmem:[#allocation23 + $0x7f8] sm:$0xff] }
 0xb18   : > { %10142 = vmatprep.subr.bf16.mxu1 %v11772_v44  ;;  %v4745_v44 = vld [vmem:[#allocation23 + $0x70] sm:$0xff] }
 0xb19   : > { %v11341_v17 = vcombine.low %v4745_v44, %v4769_v1 }
 0xb1a   : > { %10102 = vmatpush1.bf16.msra.mxu0 %v11769_v46  ;;  %v12059_v46 = vcombine.low %v5464_v54, %v5488_v42  ;;  %v5010_v54 = vld [vmem:[#allocation23 + $0x8b8] sm:$0xff] }
 0xb1b   : > { %10143 = vmatpush1.bf16.msra.mxu1 %v11771_v6  ;;  %10103 = vmatprep.subr.bf16.mxu0 %v11818_v48  ;;  %v11342_v6 = vcombine.high %v4745_v44, %v4769_v1  ;;  %v11344_v48 = vcombine.high %v4746_v10, %v4770_v22  ;;  %v5057_v44 = vld [vmem:[#allocation23 + $0xa30] sm:$0xff]  ;;  %v9402_v1 = vrot.slane %v15291_v4, %v15260_v15 }
 0xb1c   : > { %10144 = vmatprep.subr.bf16.mxu1 %v11820_v59  ;;  %v4793_v59 = vld [vmem:[#allocation23 + $0x1f0] sm:$0xff] }
 0xb1d   : > { %v11389_v5 = vcombine.low %v4793_v59, %v4817_v28 }
 0xb1e   : > { %10104 = vmatpush1.bf16.msra.mxu0 %v11817_v30  ;;  %v11343_v30 = vcombine.low %v4746_v10, %v4770_v22  ;;  %v5034_v10 = vld [vmem:[#allocation23 + $0x978] sm:$0xff] }
 0xb1f   : > { %10145 = vmatpush1.bf16.msra.mxu1 %v11819_v3  ;;  %10105 = vmatprep.subr.bf16.mxu0 %v11866_v2  ;;  %v11390_v3 = vcombine.high %v4793_v59, %v4817_v28  ;;  %v4841_v2 = vld [vmem:[#allocation23 + $0x370] sm:$0xff]  ;;  %v5058_v22 = vld [vmem:[#allocation23 + $0xa38] sm:$0xff]  ;;  %v11583_v59 = vcombine.low %v4986_v24, %v5010_v54 }
 0xb20   : > { %10146 = vmatprep.subr.bf16.mxu1 %v11868_v58  ;;  %v4865_v58 = vld [vmem:[#allocation23 + $0x430] sm:$0xff] }
 0xb21   : > { %v11437_v18 = vcombine.low %v4841_v2, %v4865_v58 }
 0xb22   : > { %10106 = vmatpush1.bf16.msra.mxu0 %v11865_v19  ;;  %v11391_v19 = vcombine.low %v4794_v43, %v4818_v27  ;;  %v11632_v43 = vcombine.high %v5034_v10, %v5058_v22  ;;  %v5081_v27 = vld [vmem:[#allocation23 + $0xaf0] sm:$0xff] }
 0xb23   : > { %10147 = vmatpush1.bf16.msra.mxu1 %v11867_v35  ;;  %10107 = vmatprep.subr.bf16.mxu0 %v11914_v12  ;;  %v11438_v35 = vcombine.high %v4841_v2, %v4865_v58  ;;  %v11440_v12 = vcombine.high %v4842_v31, %v4866_v40 }
 0xb24   : > { %10148 = vmatprep.subr.bf16.mxu1 %v11916_v50  ;;  %v4889_v50 = vld [vmem:[#allocation23 + $0x4f0] sm:$0xff] }
 0xb25   : > { %v11485_v33 = vcombine.low %v4889_v50, %v4913_v55 }
 0xb26   : > { %10108 = vmatpush1.bf16.msra.mxu0 %v11913_v62  ;;  %v11439_v62 = vcombine.low %v4842_v31, %v4866_v40  ;;  %v5106_v31 = vld [vmem:[#allocation23 + $0xbb8] sm:$0xff] }
 0xb27   : > { %10149 = vmatpush1.bf16.msra.mxu1 %v11915_v60  ;;  %10109 = vmatprep.subr.bf16.mxu0 %v11962_v37  ;;  %v11486_v60 = vcombine.high %v4889_v50, %v4913_v55  ;;  %v11488_v37 = vcombine.high %v4890_v49, %v4914_v9 }
 0xb28   : > { %10150 = vmatprep.subr.bf16.mxu1 %v11964_v52  ;;  %v4937_v52 = vld [vmem:[#allocation23 + $0x670] sm:$0xff] }
 0xb29   : > { %v11533_v42 = vcombine.low %v4937_v52, %v4961_v25 }
 0xb2a   : > { %10110 = vmatpush1.bf16.msra.mxu0 %v11961_v41  ;;  %v11487_v41 = vcombine.low %v4890_v49, %v4914_v9  ;;  %v11631_v49 = vcombine.low %v5034_v10, %v5058_v22 }
 0xb2b   : > { %10151 = vmatpush1.bf16.msra.mxu1 %v11963_v21  ;;  %10111 = vmatprep.subr.bf16.mxu0 %v12010_v7  ;;  %v11534_v21 = vcombine.high %v4937_v52, %v4961_v25  ;;  %v11536_v7 = vcombine.high %v4938_v29, %v4962_v16  ;;  %v5153_v52 = vld [vmem:[#allocation23 + $0xd30] sm:$0xff] }
 0xb2c   : > { %10152 = vmatprep.subr.bf16.mxu1 %v12012_v23  ;;  %v4985_v23 = vld [vmem:[#allocation23 + $0x7f0] sm:$0xff] }
 0xb2e   : > { %10112 = vmatpush1.bf16.msra.mxu0 %v12009_v26  ;;  %v11535_v26 = vcombine.low %v4938_v29, %v4962_v16  ;;  %v5130_v29 = vld [vmem:[#allocation23 + $0xc78] sm:$0xff] }
 0xb2f   : > { %10153 = vmatpush1.bf16.msra.mxu1 %v12011_v51  ;;  %10113 = vmatprep.subr.bf16.mxu0 %v12058_v61  ;;  %v11582_v51 = vcombine.high %v4985_v23, %v5009_v38  ;;  %v11584_v61 = vcombine.high %v4986_v24, %v5010_v54  ;;  %v5154_v16 = vld [vmem:[#allocation23 + $0xd38] sm:$0xff]  ;;  %v5177_v24 = vld [vmem:[#allocation23 + $0xdf0] sm:$0xff] }
 0xb30   : > { %10154 = vmatprep.subr.bf16.mxu1 %v12060_v8  ;;  %v5033_v8 = vld [vmem:[#allocation23 + $0x970] sm:$0xff] }
 0xb31   : > { %v11630_v28 = vcombine.high %v5033_v8, %v5057_v44  ;;  %v5201_v54 = vld [vmem:[#allocation23 + $0xeb0] sm:$0xff] }
 0xb32   : > { %10114 = vmatpush1.bf16.msra.mxu0 %v12057_v56  ;;  %v9410_v56 = vrot.slane %v15291_v4, %v15263_v0  ;;  %v11774_v10 = vcombine.high %v5177_v24, %v5201_v54 }
 0xb33   : > { %10155 = vmatpush1.bf16.msra.mxu1 %v12059_v46  ;;  %10165 = vmatprep.subr.bf16.mxu0 %v11342_v6  ;;  %v9406_v46 = vrot.slane %v15291_v4, %v15266_v57  ;;  %v11581_v6 = vcombine.low %v4985_v23, %v5009_v38  ;;  %v11728_v38 = vcombine.high %v5130_v29, %v5154_v16 }
 0xb34   : > { %10206 = vmatprep.subr.bf16.mxu1 %v11344_v48  ;;  %v9414_v48 = vrot.slane %v15291_v4, %v15269_v47 }
 0xb35   : > { %10116 = vmatmul.mubr.bf16.vlgmr.msra.gmra.mrb[28].mxu0 %v15208_v39 }
 0xb36   : > { %10157 = vmatmul.mubr.bf16.vlgmr.msra.gmra.mrb[28].mxu1 %v15208_v39  ;;  %10166 = vmatpush1.bf16.msra.mxu0 %v11341_v17 }
 0xb37   : > { %10197 = vmatprep.mubr.bf16.mxu0 %v15206_v13  ;;  %10207 = vmatpush1.bf16.msra.mxu1 %v11343_v30  ;;  %v5105_v30 = vld [vmem:[#allocation23 + $0xbb0] sm:$0xff] }
 0xb38   : > { %10238 = vmatprep.mubr.bf16.mxu1 %v15206_v13  ;;  %10167 = vmatprep.subr.bf16.mxu0 %v11390_v3  ;;  %v11678_v9 = vcombine.high %v5081_v27, %v5105_v30 }
 0xb39   : > { %10208 = vmatprep.subr.bf16.mxu1 %v11392_v14  ;;  %v5082_v14 = vld [vmem:[#allocation23 + $0xaf8] sm:$0xff] }
 0xb3a   : > { %10168 = vmatpush1.bf16.msra.mxu0 %v11389_v5 }
 0xb3b   : > { %10209 = vmatpush1.bf16.msra.mxu1 %v11391_v19  ;;  %10169 = vmatprep.subr.bf16.mxu0 %v11438_v35 }
 0xb3c   : > { %10210 = vmatprep.subr.bf16.mxu1 %v11440_v12  ;;  %v11629_v12 = vcombine.low %v5033_v8, %v5057_v44  ;;  %v11727_v8 = vcombine.low %v5130_v29, %v5154_v16  ;;  %v10712_v44 = vrot.slane %v10704_v20, %v15245_v53  ;;  %v5273_v20 = vld [vmem:[#allocation23 + $0x10f0] sm:$0xff]  ;;  %v5418_v16 = vld [vmem:[#allocation23 + $0x1578] sm:$0xff] }
 0xb3d   : > { %v5441_v29 = vld [vmem:[#allocation23 + $0x1630] sm:$0xff] }
 0xb3e   : > { %10170 = vmatpush1.bf16.msra.mxu0 %v11437_v18 }
 0xb3f   : > { %10211 = vmatpush1.bf16.msra.mxu1 %v11439_v62  ;;  %10171 = vmatprep.subr.bf16.mxu0 %v11486_v60  ;;  %v11680_v60 = vcombine.high %v5082_v14, %v5106_v31 }
 0xb40   : > { %10212 = vmatprep.subr.bf16.mxu1 %v11488_v37  ;;  %v5129_v37 = vld [vmem:[#allocation23 + $0xc70] sm:$0xff] }
 0xb41   : > { %v11726_v23 = vcombine.high %v5129_v37, %v5153_v52 }
 0xb42   : > { %10172 = vmatpush1.bf16.msra.mxu0 %v11485_v33 }
 0xb43   : > { %10213 = vmatpush1.bf16.msra.mxu1 %v11487_v41  ;;  %10173 = vmatprep.subr.bf16.mxu0 %v11534_v21  ;;  %v11677_v41 = vcombine.low %v5081_v27, %v5105_v30  ;;  %v5274_v27 = vld [vmem:[#allocation23 + $0x10f8] sm:$0xff] }
 0xb44   : > { %10214 = vmatprep.subr.bf16.mxu1 %v11536_v7  ;;  %v11679_v7 = vcombine.low %v5082_v14, %v5106_v31  ;;  %v5298_v30 = vld [vmem:[#allocation23 + $0x11b8] sm:$0xff]  ;;  %v5321_v31 = vld [vmem:[#allocation23 + $0x1270] sm:$0xff] }
 0xb45   : > { %v11872_v14 = vcombine.high %v5274_v27, %v5298_v30 }
 0xb46   : > { %10174 = vmatpush1.bf16.msra.mxu0 %v11533_v42 }
 0xb47   : > { %10215 = vmatpush1.bf16.msra.mxu1 %v11535_v26  ;;  %10175 = vmatprep.subr.bf16.mxu0 %v11582_v51  ;;  %v5178_v26 = vld [vmem:[#allocation23 + $0xdf8] sm:$0xff] }
 0xb48   : > { %v9871_v17 = vpop.f32.mrb[16].mxu0  ;;  %10216 = vmatprep.subr.bf16.mxu1 %v11584_v61  ;;  %v5202_v51 = vld [vmem:[#allocation23 + $0xeb8] sm:$0xff]  ;;  %v11725_v61 = vcombine.low %v5129_v37, %v5153_v52 }
 0xb49   : > { %v9872_v3 = vadd.f32 %v9871_v17, %v9402_v1  ;;  %v9912_v2 = vpop.f32.mrb[16].mxu1  ;;  %v9873_v58 = vpop.f32.mrb[17].mxu0  ;;  %v11776_v22 = vcombine.high %v5178_v26, %v5202_v51  ;;  %v11775_v17 = vcombine.low %v5178_v26, %v5202_v51 }
 0xb4a   : > { %v9913_v40 = vadd.f32 %v9912_v2, %v9410_v56  ;;  %v9874_v5 = vadd.f32 %v9873_v58, %v9406_v46  ;;  %v9914_v19 = vpop.f32.mrb[17].mxu1  ;;  %v9875_v35 = vpop.f32.mrb[18].mxu0  ;;  %10176 = vmatpush1.bf16.msra.mxu0 %v11581_v6  ;;  %v5225_v56 = vld [vmem:[#allocation23 + $0xf70] sm:$0xff] }
 0xb4b   : > { %v9915_v4 = vadd.f32 %v9914_v19, %v9414_v48  ;;  %v9916_v50 = vpop.f32.mrb[18].mxu1  ;;  %10217 = vmatpush1.bf16.msra.mxu1 %v11583_v59  ;;  %v9876_v55 = vpop.f32.mrb[19].mxu0  ;;  %10177 = vmatprep.subr.bf16.mxu0 %v11630_v28  ;;  %v5249_v46 = vld [vmem:[#allocation23 + $0x1030] sm:$0xff]  ;;  %v5226_v48 = vld [vmem:[#allocation23 + $0xf78] sm:$0xff]  ;;  %v11773_v28 = vcombine.low %v5177_v24, %v5201_v54 }
 0xb4c   : > { %v10674_v18 = vcombine.low %v9872_v3, %v9874_v5  ;;  %v9917_v62 = vpop.f32.mrb[19].mxu1  ;;  %10218 = vmatprep.subr.bf16.mxu1 %v11632_v43  ;;  %v5250_v59 = vld [vmem:[#allocation23 + $0x1038] sm:$0xff]  ;;  %v11822_v11 = vcombine.high %v5225_v56, %v5249_v46  ;;  %v5297_v43 = vld [vmem:[#allocation23 + $0x11b0] sm:$0xff]  ;;  %v11821_v3 = vcombine.low %v5225_v56, %v5249_v46 }
 0xb4d   : > { %v10675_v25 = vcombine.low %v9913_v40, %v9915_v4  ;;  %v11824_v36 = vcombine.high %v5226_v48, %v5250_v59  ;;  %v11823_v2 = vcombine.low %v5226_v48, %v5250_v59  ;;  %v11870_v58 = vcombine.high %v5273_v20, %v5297_v43  ;;  %v5345_v40 = vld [vmem:[#allocation23 + $0x1330] sm:$0xff]  ;;  %v5322_v5 = vld [vmem:[#allocation23 + $0x1278] sm:$0xff]  ;;  %v4795_v59 = vld [vmem:[#allocation23 + $0x200] sm:$0xff] }
 0xb4e   : > { %v10696_v33 = vrot.slane %v10674_v18, %v15245_v53  ;;  %10178 = vmatpush1.bf16.msra.mxu0 %v11629_v12  ;;  %v5346_v19 = vld [vmem:[#allocation23 + $0x1338] sm:$0xff]  ;;  %v11869_v35 = vcombine.low %v5273_v20, %v5297_v43  ;;  %v11871_v12 = vcombine.low %v5274_v27, %v5298_v30  ;;  %v11918_v4 = vcombine.high %v5321_v31, %v5345_v40  ;;  %v5369_v55 = vld [vmem:[#allocation23 + $0x13f0] sm:$0xff]  ;;  %v4843_v27 = vld [vmem:[#allocation23 + $0x380] sm:$0xff] }
 0xb4f   : > { %v10703_v21 = vrot.slane %v10675_v25, %v15245_v53  ;;  %10219 = vmatpush1.bf16.msra.mxu1 %v11631_v49  ;;  %10179 = vmatprep.subr.bf16.mxu0 %v11678_v9  ;;  %v11920_v50 = vcombine.high %v5322_v5, %v5346_v19  ;;  %v5393_v49 = vld [vmem:[#allocation23 + $0x14b0] sm:$0xff]  ;;  %v5370_v9 = vld [vmem:[#allocation23 + $0x13f8] sm:$0xff]  ;;  %v11917_v62 = vcombine.low %v5321_v31, %v5345_v40  ;;  %v4867_v30 = vld [vmem:[#allocation23 + $0x440] sm:$0xff] }
 0xb50   : > { %10220 = vmatprep.subr.bf16.mxu1 %v11680_v60  ;;  %v5394_v18 = vld [vmem:[#allocation23 + $0x14b8] sm:$0xff]  ;;  %v11919_v60 = vcombine.low %v5322_v5, %v5346_v19  ;;  %v11966_v37 = vcombine.high %v5369_v55, %v5393_v49  ;;  %v5417_v25 = vld [vmem:[#allocation23 + $0x1570] sm:$0xff]  ;;  %v11442_v40 = vcombine.high %v4843_v27, %v4867_v30  ;;  %v4891_v19 = vld [vmem:[#allocation23 + $0x500] sm:$0xff] }
 0xb51   : > { %v10705_v42 = vcombine.low %v10696_v33, %v10703_v21  ;;  %v11968_v52 = vcombine.high %v5370_v9, %v5394_v18  ;;  %v5442_v33 = vld [vmem:[#allocation23 + $0x1638] sm:$0xff]  ;;  %v11967_v21 = vcombine.low %v5370_v9, %v5394_v18  ;;  %v5489_v24 = vld [vmem:[#allocation23 + $0x17b0] sm:$0xff]  ;;  %v12013_v26 = vcombine.low %v5417_v25, %v5441_v29  ;;  %v4939_v18 = vld [vmem:[#allocation23 + $0x680] sm:$0xff] }
 0xb52   : > { %10180 = vmatpush1.bf16.msra.mxu0 %v11677_v41  ;;  %v11965_v41 = vcombine.low %v5369_v55, %v5393_v49  ;;  %v5466_v54 = vld [vmem:[#allocation23 + $0x16f8] sm:$0xff]  ;;  %v12015_v51 = vcombine.low %v5418_v16, %v5442_v33 }
 0xb53   : > { %v10719_v1 = vrot.slane %v10705_v42, %v15245_v53  ;;  %10221 = vmatpush1.bf16.msra.mxu1 %v11679_v7  ;;  %10181 = vmatprep.subr.bf16.mxu0 %v11726_v23  ;;  %v12014_v7 = vcombine.high %v5417_v25, %v5441_v29  ;;  %v12016_v23 = vcombine.high %v5418_v16, %v5442_v33  ;;  %v5490_v42 = vld [vmem:[#allocation23 + $0x17b8] sm:$0xff]  ;;  %v4987_v33 = vld [vmem:[#allocation23 + $0x800] sm:$0xff] }
 0xb54   : > { %10222 = vmatprep.subr.bf16.mxu1 %v11728_v38  ;;  %v5465_v38 = vld [vmem:[#allocation23 + $0x16f0] sm:$0xff]  ;;  %v12063_v46 = vcombine.low %v5466_v54, %v5490_v42 }
 0xb55   : > { %v10720_v6 = vcombine.low %v10712_v44, %v10719_v1  ;;  %v4747_v44 = vld [vmem:[#allocation23 + $0x80] sm:$0xff]  ;;  %v12061_v56 = vcombine.low %v5465_v38, %v5489_v24 }
 0xb56   : > { %10182 = vmatpush1.bf16.msra.mxu0 %v11725_v61  ;;  %v12062_v61 = vcombine.high %v5465_v38, %v5489_v24  ;;  %v4771_v1 = vld [vmem:[#allocation23 + $0x140] sm:$0xff]  ;;  %v15333_v38 = vld [vmem:[#allocation25 + $0x10] sm:$0xff] }
 0xb57   : > { %10924 = vst [vmem:[%s13829_s24 + $0x8] sm:$0xff] %v10720_v6  ;;  %10223 = vmatpush1.bf16.msra.mxu1 %v11727_v8  ;;  %10183 = vmatprep.subr.bf16.mxu0 %v11774_v10  ;;  %v12064_v8 = vcombine.high %v5466_v54, %v5490_v42  ;;  %v4748_v10 = vld [vmem:[#allocation23 + $0x88] sm:$0xff]  ;;  %v11346_v6 = vcombine.high %v4747_v44, %v4771_v1 }
 0xb58   : > { %10224 = vmatprep.subr.bf16.mxu1 %v11776_v22  ;;  %v4772_v22 = vld [vmem:[#allocation23 + $0x148] sm:$0xff] }
 0xb59   : > { %v11348_v48 = vcombine.high %v4748_v10, %v4772_v22  ;;  %v11347_v20 = vcombine.low %v4748_v10, %v4772_v22  ;;  %v9422_v10 = vrot.slane %v15333_v38, %v14860_v45 }
 0xb5a   : > { %10184 = vmatpush1.bf16.msra.mxu0 %v11773_v28  ;;  %v4819_v28 = vld [vmem:[#allocation23 + $0x2c0] sm:$0xff] }
 0xb5b   : > { %10225 = vmatpush1.bf16.msra.mxu1 %v11775_v17  ;;  %10185 = vmatprep.subr.bf16.mxu0 %v11822_v11  ;;  %v11345_v17 = vcombine.low %v4747_v44, %v4771_v1  ;;  %v4796_v11 = vld [vmem:[#allocation23 + $0x208] sm:$0xff]  ;;  %v11394_v43 = vcombine.high %v4795_v59, %v4819_v28  ;;  %v9426_v1 = vrot.slane %v15333_v38, %v15229_v34 }
 0xb5c   : > { %10226 = vmatprep.subr.bf16.mxu1 %v11824_v36  ;;  %v4820_v36 = vld [vmem:[#allocation23 + $0x2c8] sm:$0xff] }
 0xb5d   : > { %v11395_v31 = vcombine.low %v4796_v11, %v4820_v36  ;;  %v5060_v44 = vld [vmem:[#allocation23 + $0xa48] sm:$0xff] }
 0xb5e   : > { %10186 = vmatpush1.bf16.msra.mxu0 %v11821_v3  ;;  %v11396_v3 = vcombine.high %v4796_v11, %v4820_v36 }
 0xb5f   : > { %10227 = vmatpush1.bf16.msra.mxu1 %v11823_v2  ;;  %10187 = vmatprep.subr.bf16.mxu0 %v11870_v58  ;;  %v4844_v2 = vld [vmem:[#allocation23 + $0x388] sm:$0xff] }
 0xb60   : > { %10228 = vmatprep.subr.bf16.mxu1 %v11872_v14  ;;  %v4868_v58 = vld [vmem:[#allocation23 + $0x448] sm:$0xff]  ;;  %v11393_v14 = vcombine.low %v4795_v59, %v4819_v28  ;;  %v5083_v28 = vld [vmem:[#allocation23 + $0xb00] sm:$0xff] }
 0xb61   : > { %v11444_v5 = vcombine.high %v4844_v2, %v4868_v58  ;;  %v11443_v55 = vcombine.low %v4844_v2, %v4868_v58 }
 0xb62   : > { %10188 = vmatpush1.bf16.msra.mxu0 %v11869_v35  ;;  %v4915_v35 = vld [vmem:[#allocation23 + $0x5c0] sm:$0xff] }
 0xb63   : > { %10229 = vmatpush1.bf16.msra.mxu1 %v11871_v12  ;;  %10189 = vmatprep.subr.bf16.mxu0 %v11918_v4  ;;  %v4892_v12 = vld [vmem:[#allocation23 + $0x508] sm:$0xff]  ;;  %v11490_v49 = vcombine.high %v4891_v19, %v4915_v35 }
 0xb64   : > { %10230 = vmatprep.subr.bf16.mxu1 %v11920_v50  ;;  %v4916_v4 = vld [vmem:[#allocation23 + $0x5c8] sm:$0xff]  ;;  %v11441_v50 = vcombine.low %v4843_v27, %v4867_v30 }
 0xb65   : > { %v11492_v9 = vcombine.high %v4892_v12, %v4916_v4  ;;  %v11491_v25 = vcombine.low %v4892_v12, %v4916_v4  ;;  %v5108_v27 = vld [vmem:[#allocation23 + $0xbc8] sm:$0xff] }
 0xb66   : > { %10190 = vmatpush1.bf16.msra.mxu0 %v11917_v62  ;;  %v4963_v62 = vld [vmem:[#allocation23 + $0x740] sm:$0xff] }
 0xb67   : > { %10231 = vmatpush1.bf16.msra.mxu1 %v11919_v60  ;;  %10191 = vmatprep.subr.bf16.mxu0 %v11966_v37  ;;  %v4940_v60 = vld [vmem:[#allocation23 + $0x688] sm:$0xff]  ;;  %v11538_v29 = vcombine.high %v4939_v18, %v4963_v62 }
 0xb68   : > { %10232 = vmatprep.subr.bf16.mxu1 %v11968_v52  ;;  %v4964_v37 = vld [vmem:[#allocation23 + $0x748] sm:$0xff]  ;;  %v11489_v52 = vcombine.low %v4891_v19, %v4915_v35 }
 0xb69   : > { %v11540_v16 = vcombine.high %v4940_v60, %v4964_v37  ;;  %v11539_v24 = vcombine.low %v4940_v60, %v4964_v37 }
 0xb6a   : > { %10192 = vmatpush1.bf16.msra.mxu0 %v11965_v41  ;;  %v5011_v41 = vld [vmem:[#allocation23 + $0x8c0] sm:$0xff] }
 0xb6b   : > { %10233 = vmatpush1.bf16.msra.mxu1 %v11967_v21  ;;  %10193 = vmatprep.subr.bf16.mxu0 %v12014_v7  ;;  %v4988_v21 = vld [vmem:[#allocation23 + $0x808] sm:$0xff]  ;;  %v11586_v54 = vcombine.high %v4987_v33, %v5011_v41  ;;  %v11585_v22 = vcombine.low %v4987_v33, %v5011_v41  ;;  %v5179_v33 = vld [vmem:[#allocation23 + $0xe00] sm:$0xff] }
 0xb6c   : > { %10234 = vmatprep.subr.bf16.mxu1 %v12016_v23  ;;  %v5012_v7 = vld [vmem:[#allocation23 + $0x8c8] sm:$0xff]  ;;  %v11537_v23 = vcombine.low %v4939_v18, %v4963_v62  ;;  %v5203_v41 = vld [vmem:[#allocation23 + $0xec0] sm:$0xff] }
 0xb6d   : > { %v11588_v42 = vcombine.high %v4988_v21, %v5012_v7  ;;  %v5132_v18 = vld [vmem:[#allocation23 + $0xc88] sm:$0xff] }
 0xb6e   : > { %10194 = vmatpush1.bf16.msra.mxu0 %v12013_v26  ;;  %v5035_v26 = vld [vmem:[#allocation23 + $0x980] sm:$0xff]  ;;  %v5156_v62 = vld [vmem:[#allocation23 + $0xd48] sm:$0xff] }
 0xb6f   : > { %10235 = vmatpush1.bf16.msra.mxu1 %v12015_v51  ;;  %10195 = vmatprep.subr.bf16.mxu0 %v12062_v61  ;;  %v5059_v51 = vld [vmem:[#allocation23 + $0xa40] sm:$0xff]  ;;  %v9418_v61 = vrot.slane %v15333_v38, %v14856_v32 }
 0xb70   : > { %10236 = vmatprep.subr.bf16.mxu1 %v12064_v8  ;;  %v5036_v8 = vld [vmem:[#allocation23 + $0x988] sm:$0xff] }
 0xb71   : > { %v11636_v59 = vcombine.high %v5036_v8, %v5060_v44  ;;  %v11635_v19 = vcombine.low %v5036_v8, %v5060_v44  ;;  %v5228_v8 = vld [vmem:[#allocation23 + $0xf88] sm:$0xff] }
 0xb72   : > { %10196 = vmatpush1.bf16.msra.mxu0 %v12061_v56  ;;  %v9430_v56 = vrot.slane %v15333_v38, %v15234_v63  ;;  %v5252_v44 = vld [vmem:[#allocation23 + $0x1048] sm:$0xff] }
 0xb73   : > { %10237 = vmatpush1.bf16.msra.mxu1 %v12063_v46  ;;  %10247 = vmatprep.subr.bf16.mxu0 %v11346_v6  ;;  %v11587_v46 = vcombine.low %v4988_v21, %v5012_v7  ;;  %v11634_v6 = vcombine.high %v5035_v26, %v5059_v51  ;;  %v5180_v7 = vld [vmem:[#allocation23 + $0xe08] sm:$0xff] }
 0xb74   : > { %10288 = vmatprep.subr.bf16.mxu1 %v11348_v48 }
 0xb75   : > { %10198 = vmatmul.mubr.bf16.vlgmr.msra.gmra.mrb[32].mxu0 %v15208_v39 }
 0xb76   : > { %10239 = vmatmul.mubr.bf16.vlgmr.msra.gmra.mrb[32].mxu1 %v15208_v39  ;;  %10248 = vmatpush1.bf16.msra.mxu0 %v11345_v17  ;;  %v5107_v17 = vld [vmem:[#allocation23 + $0xbc0] sm:$0xff] }
 0xb77   : > { %10279 = vmatprep.mubr.bf16.mxu0 %v15206_v13  ;;  %10289 = vmatpush1.bf16.msra.mxu1 %v11347_v20  ;;  %v11682_v35 = vcombine.high %v5083_v28, %v5107_v17  ;;  %v11681_v37 = vcombine.low %v5083_v28, %v5107_v17  ;;  %v11827_v17 = vcombine.low %v5228_v8, %v5252_v44 }
 0xb78   : > { %10320 = vmatprep.mubr.bf16.mxu1 %v15206_v13  ;;  %10249 = vmatprep.subr.bf16.mxu0 %v11394_v43  ;;  %v5084_v43 = vld [vmem:[#allocation23 + $0xb08] sm:$0xff] }
 0xb79   : > { %10290 = vmatprep.subr.bf16.mxu1 %v11396_v3 }
 0xb7a   : > { %10250 = vmatpush1.bf16.msra.mxu0 %v11393_v14  ;;  %v11633_v14 = vcombine.low %v5035_v26, %v5059_v51  ;;  %v5227_v51 = vld [vmem:[#allocation23 + $0xf80] sm:$0xff] }
 0xb7b   : > { %10291 = vmatpush1.bf16.msra.mxu1 %v11395_v31  ;;  %10251 = vmatprep.subr.bf16.mxu0 %v11442_v40 }
 0xb7c   : > { %10292 = vmatprep.subr.bf16.mxu1 %v11444_v5 }
 0xb7e   : > { %10252 = vmatpush1.bf16.msra.mxu0 %v11441_v50  ;;  %v11684_v50 = vcombine.high %v5084_v43, %v5108_v27 }
 0xb7f   : > { %10293 = vmatpush1.bf16.msra.mxu1 %v11443_v55  ;;  %10253 = vmatprep.subr.bf16.mxu0 %v11490_v49  ;;  %v5131_v55 = vld [vmem:[#allocation23 + $0xc80] sm:$0xff] }
 0xb80   : > { %10294 = vmatprep.subr.bf16.mxu1 %v11492_v9  ;;  %v5155_v49 = vld [vmem:[#allocation23 + $0xd40] sm:$0xff] }
 0xb82   : > { %10254 = vmatpush1.bf16.msra.mxu0 %v11489_v52 }
 0xb83   : > { %10295 = vmatpush1.bf16.msra.mxu1 %v11491_v25  ;;  %10255 = vmatprep.subr.bf16.mxu0 %v11538_v29  ;;  %v11683_v25 = vcombine.low %v5084_v43, %v5108_v27  ;;  %v11730_v29 = vcombine.high %v5131_v55, %v5155_v49  ;;  %v5347_v43 = vld [vmem:[#allocation23 + $0x1340] sm:$0xff]  ;;  %v5324_v27 = vld [vmem:[#allocation23 + $0x1288] sm:$0xff] }
 0xb84   : > { %10296 = vmatprep.subr.bf16.mxu1 %v11540_v16  ;;  %v11732_v16 = vcombine.high %v5132_v18, %v5156_v62 }
 0xb86   : > { %10256 = vmatpush1.bf16.msra.mxu0 %v11537_v23  ;;  %v5204_v23 = vld [vmem:[#allocation23 + $0xec8] sm:$0xff] }
 0xb87   : > { %10297 = vmatpush1.bf16.msra.mxu1 %v11539_v24  ;;  %10257 = vmatprep.subr.bf16.mxu0 %v11586_v54  ;;  %v11729_v24 = vcombine.low %v5131_v55, %v5155_v49  ;;  %v11731_v54 = vcombine.low %v5132_v18, %v5156_v62  ;;  %v11780_v26 = vcombine.high %v5180_v7, %v5204_v23  ;;  %v5419_v55 = vld [vmem:[#allocation23 + $0x1580] sm:$0xff]  ;;  %v5444_v18 = vld [vmem:[#allocation23 + $0x1648] sm:$0xff] }
 0xb88   : > { %v9953_v48 = vpop.f32.mrb[20].mxu0  ;;  %10298 = vmatprep.subr.bf16.mxu1 %v11588_v42  ;;  %v11778_v42 = vcombine.high %v5179_v33, %v5203_v41  ;;  %v5443_v49 = vld [vmem:[#allocation23 + $0x1640] sm:$0xff] }
 0xb89   : > { %v9954_v11 = vadd.f32 %v9953_v48, %v9418_v61  ;;  %v9994_v36 = vpop.f32.mrb[20].mxu1  ;;  %v9955_v20 = vpop.f32.mrb[21].mxu0  ;;  %v5251_v61 = vld [vmem:[#allocation23 + $0x1040] sm:$0xff]  ;;  %v5276_v48 = vld [vmem:[#allocation23 + $0x1108] sm:$0xff] }
 0xb8a   : > { %v9995_v30 = vadd.f32 %v9994_v36, %v9426_v1  ;;  %v9956_v3 = vadd.f32 %v9955_v20, %v9422_v10  ;;  %v9996_v2 = vpop.f32.mrb[21].mxu1  ;;  %v9957_v58 = vpop.f32.mrb[22].mxu0  ;;  %10258 = vmatpush1.bf16.msra.mxu0 %v11585_v22  ;;  %v11777_v1 = vcombine.low %v5179_v33, %v5203_v41  ;;  %v11779_v10 = vcombine.low %v5180_v7, %v5204_v23  ;;  %v5323_v20 = vld [vmem:[#allocation23 + $0x1280] sm:$0xff]  ;;  %v5468_v41 = vld [vmem:[#allocation23 + $0x1708] sm:$0xff] }
 0xb8b   : > { %v9997_v31 = vadd.f32 %v9996_v2, %v9430_v56  ;;  %v9998_v40 = vpop.f32.mrb[22].mxu1  ;;  %10299 = vmatpush1.bf16.msra.mxu1 %v11587_v46  ;;  %v9958_v5 = vpop.f32.mrb[23].mxu0  ;;  %10259 = vmatprep.subr.bf16.mxu0 %v11634_v6  ;;  %v11826_v22 = vcombine.high %v5227_v51, %v5251_v61  ;;  %v11828_v56 = vcombine.high %v5228_v8, %v5252_v44  ;;  %v5275_v46 = vld [vmem:[#allocation23 + $0x1100] sm:$0xff]  ;;  %v5492_v7 = vld [vmem:[#allocation23 + $0x17c8] sm:$0xff]  ;;  %v4774_v8 = vld [vmem:[#allocation23 + $0x158] sm:$0xff] }
 0xb8c   : > { %v10721_v12 = vcombine.low %v9954_v11, %v9956_v3  ;;  %v9999_v4 = vpop.f32.mrb[23].mxu1  ;;  %10300 = vmatprep.subr.bf16.mxu1 %v11636_v59  ;;  %v5299_v6 = vld [vmem:[#allocation23 + $0x11c0] sm:$0xff]  ;;  %v5300_v59 = vld [vmem:[#allocation23 + $0x11c8] sm:$0xff]  ;;  %v11825_v28 = vcombine.low %v5227_v51, %v5251_v61  ;;  %v11922_v58 = vcombine.high %v5323_v20, %v5347_v43  ;;  %v12017_v23 = vcombine.low %v5419_v55, %v5443_v49  ;;  %v4773_v51 = vld [vmem:[#allocation23 + $0x150] sm:$0xff] }
 0xb8d   : > { %v10722_v9 = vcombine.low %v9995_v30, %v9997_v31  ;;  %v11874_v11 = vcombine.high %v5275_v46, %v5299_v6  ;;  %v11876_v36 = vcombine.high %v5276_v48, %v5300_v59  ;;  %v5348_v30 = vld [vmem:[#allocation23 + $0x1348] sm:$0xff]  ;;  %v11873_v3 = vcombine.low %v5275_v46, %v5299_v6  ;;  %v5371_v31 = vld [vmem:[#allocation23 + $0x1400] sm:$0xff]  ;;  %v4750_v61 = vld [vmem:[#allocation23 + $0x98] sm:$0xff] }
 0xb8e   : > { %v15344_v60 = vrot.slane %v10721_v12, %v15245_v53  ;;  %10260 = vmatpush1.bf16.msra.mxu0 %v11633_v14  ;;  %v11875_v2 = vcombine.low %v5276_v48, %v5300_v59  ;;  %v11924_v14 = vcombine.high %v5324_v27, %v5348_v30  ;;  %v5395_v40 = vld [vmem:[#allocation23 + $0x14c0] sm:$0xff]  ;;  %v5372_v5 = vld [vmem:[#allocation23 + $0x1408] sm:$0xff]  ;;  %v11923_v12 = vcombine.low %v5324_v27, %v5348_v30  ;;  %v4821_v46 = vld [vmem:[#allocation23 + $0x2d0] sm:$0xff] }
 0xb8f   : > { %v15347_v52 = vrot.slane %v10722_v9, %v15245_v53  ;;  %10301 = vmatpush1.bf16.msra.mxu1 %v11635_v19  ;;  %10261 = vmatprep.subr.bf16.mxu0 %v11682_v35  ;;  %v5396_v19 = vld [vmem:[#allocation23 + $0x14c8] sm:$0xff]  ;;  %v11921_v35 = vcombine.low %v5323_v20, %v5347_v43  ;;  %v11970_v4 = vcombine.high %v5371_v31, %v5395_v40  ;;  %v5491_v33 = vld [vmem:[#allocation23 + $0x17c0] sm:$0xff]  ;;  %v4798_v48 = vld [vmem:[#allocation23 + $0x218] sm:$0xff] }
 0xb90   : > { %10302 = vmatprep.subr.bf16.mxu1 %v11684_v50  ;;  %v11972_v50 = vcombine.high %v5372_v5, %v5396_v19  ;;  %v5420_v9 = vld [vmem:[#allocation23 + $0x1588] sm:$0xff]  ;;  %v11969_v62 = vcombine.low %v5371_v31, %v5395_v40  ;;  %v4822_v59 = vld [vmem:[#allocation23 + $0x2d8] sm:$0xff]  ;;  %v4917_v31 = vld [vmem:[#allocation23 + $0x5d0] sm:$0xff] }
 0xb91   : > { %v10753_v21 = vcombine.low %v15344_v60, %v15347_v52  ;;  %v11400_v20 = vcombine.high %v4798_v48, %v4822_v59  ;;  %v4846_v43 = vld [vmem:[#allocation23 + $0x398] sm:$0xff] }
 0xb92   : > { %10262 = vmatpush1.bf16.msra.mxu0 %v11681_v37  ;;  %v11971_v37 = vcombine.low %v5372_v5, %v5396_v19  ;;  %v4870_v27 = vld [vmem:[#allocation23 + $0x458] sm:$0xff] }
 0xb93   : > { %10303 = vmatpush1.bf16.msra.mxu1 %v11683_v25  ;;  %10263 = vmatprep.subr.bf16.mxu0 %v11730_v29  ;;  %v12018_v25 = vcombine.high %v5419_v55, %v5443_v49  ;;  %v12020_v29 = vcombine.high %v5420_v9, %v5444_v18  ;;  %v4894_v40 = vld [vmem:[#allocation23 + $0x518] sm:$0xff]  ;;  %v4965_v55 = vld [vmem:[#allocation23 + $0x750] sm:$0xff] }
 0xb94   : > { %10304 = vmatprep.subr.bf16.mxu1 %v11732_v16  ;;  %v5467_v16 = vld [vmem:[#allocation23 + $0x1700] sm:$0xff]  ;;  %v4918_v5 = vld [vmem:[#allocation23 + $0x5d8] sm:$0xff] }
 0xb95   : > { %v12065_v44 = vcombine.low %v5467_v16, %v5491_v33  ;;  %v4942_v49 = vld [vmem:[#allocation23 + $0x698] sm:$0xff] }
 0xb96   : > { %10264 = vmatpush1.bf16.msra.mxu0 %v11729_v24  ;;  %v12019_v24 = vcombine.low %v5420_v9, %v5444_v18  ;;  %v4966_v9 = vld [vmem:[#allocation23 + $0x758] sm:$0xff] }
 0xb97   : > { %10305 = vmatpush1.bf16.msra.mxu1 %v11731_v54  ;;  %10265 = vmatprep.subr.bf16.mxu0 %v11778_v42  ;;  %v12066_v54 = vcombine.high %v5467_v16, %v5491_v33  ;;  %v12068_v42 = vcombine.high %v5468_v41, %v5492_v7  ;;  %v5013_v16 = vld [vmem:[#allocation23 + $0x8d0] sm:$0xff]  ;;  %v4990_v33 = vld [vmem:[#allocation23 + $0x818] sm:$0xff] }
 0xb98   : > { %10306 = vmatprep.subr.bf16.mxu1 %v11780_v26  ;;  %v4749_v26 = vld [vmem:[#allocation23 + $0x90] sm:$0xff] }
 0xb99   : > { %v11349_v6 = vcombine.low %v4749_v26, %v4773_v51 }
 0xb9a   : > { %10266 = vmatpush1.bf16.msra.mxu0 %v11777_v1  ;;  %v12067_v1 = vcombine.low %v5468_v41, %v5492_v7  ;;  %v5014_v41 = vld [vmem:[#allocation23 + $0x8d8] sm:$0xff] }
 0xb9b   : > { %10307 = vmatpush1.bf16.msra.mxu1 %v11779_v10  ;;  %10267 = vmatprep.subr.bf16.mxu0 %v11826_v22  ;;  %v11350_v10 = vcombine.high %v4749_v26, %v4773_v51  ;;  %v11352_v22 = vcombine.high %v4750_v61, %v4774_v8  ;;  %v5061_v26 = vld [vmem:[#allocation23 + $0xa50] sm:$0xff]  ;;  %v9434_v51 = vrot.slane %v15333_v38, %v15260_v15 }
 0xb9c   : > { %10308 = vmatprep.subr.bf16.mxu1 %v11828_v56  ;;  %v4797_v56 = vld [vmem:[#allocation23 + $0x210] sm:$0xff] }
 0xb9d   : > { %v11397_v30 = vcombine.low %v4797_v56, %v4821_v46 }
 0xb9e   : > { %10268 = vmatpush1.bf16.msra.mxu0 %v11825_v28  ;;  %v11351_v28 = vcombine.low %v4750_v61, %v4774_v8  ;;  %v5038_v61 = vld [vmem:[#allocation23 + $0x998] sm:$0xff] }
 0xb9f   : > { %10309 = vmatpush1.bf16.msra.mxu1 %v11827_v17  ;;  %10269 = vmatprep.subr.bf16.mxu0 %v11874_v11  ;;  %v11398_v17 = vcombine.high %v4797_v56, %v4821_v46  ;;  %v4845_v11 = vld [vmem:[#allocation23 + $0x390] sm:$0xff]  ;;  %v5062_v8 = vld [vmem:[#allocation23 + $0xa58] sm:$0xff]  ;;  %v11591_v56 = vcombine.low %v4990_v33, %v5014_v41 }
 0xba0   : > { %10310 = vmatprep.subr.bf16.mxu1 %v11876_v36  ;;  %v4869_v36 = vld [vmem:[#allocation23 + $0x450] sm:$0xff] }
 0xba1   : > { %v11445_v19 = vcombine.low %v4845_v11, %v4869_v36 }
 0xba2   : > { %10270 = vmatpush1.bf16.msra.mxu0 %v11873_v3  ;;  %v11399_v3 = vcombine.low %v4798_v48, %v4822_v59  ;;  %v11640_v48 = vcombine.high %v5038_v61, %v5062_v8  ;;  %v5085_v59 = vld [vmem:[#allocation23 + $0xb10] sm:$0xff] }
 0xba3   : > { %10311 = vmatpush1.bf16.msra.mxu1 %v11875_v2  ;;  %10271 = vmatprep.subr.bf16.mxu0 %v11922_v58  ;;  %v11446_v2 = vcombine.high %v4845_v11, %v4869_v36  ;;  %v11448_v58 = vcombine.high %v4846_v43, %v4870_v27 }
 0xba4   : > { %10312 = vmatprep.subr.bf16.mxu1 %v11924_v14  ;;  %v4893_v14 = vld [vmem:[#allocation23 + $0x510] sm:$0xff] }
 0xba5   : > { %v11493_v18 = vcombine.low %v4893_v14, %v4917_v31 }
 0xba6   : > { %10272 = vmatpush1.bf16.msra.mxu0 %v11921_v35  ;;  %v11447_v35 = vcombine.low %v4846_v43, %v4870_v27  ;;  %v5110_v43 = vld [vmem:[#allocation23 + $0xbd8] sm:$0xff] }
 0xba7   : > { %10313 = vmatpush1.bf16.msra.mxu1 %v11923_v12  ;;  %10273 = vmatprep.subr.bf16.mxu0 %v11970_v4  ;;  %v11494_v12 = vcombine.high %v4893_v14, %v4917_v31  ;;  %v11496_v4 = vcombine.high %v4894_v40, %v4918_v5 }
 0xba8   : > { %10314 = vmatprep.subr.bf16.mxu1 %v11972_v50  ;;  %v4941_v50 = vld [vmem:[#allocation23 + $0x690] sm:$0xff] }
 0xba9   : > { %v11541_v7 = vcombine.low %v4941_v50, %v4965_v55 }
 0xbaa   : > { %10274 = vmatpush1.bf16.msra.mxu0 %v11969_v62  ;;  %v11495_v62 = vcombine.low %v4894_v40, %v4918_v5  ;;  %v11639_v40 = vcombine.low %v5038_v61, %v5062_v8 }
 0xbab   : > { %10315 = vmatpush1.bf16.msra.mxu1 %v11971_v37  ;;  %10275 = vmatprep.subr.bf16.mxu0 %v12018_v25  ;;  %v11542_v37 = vcombine.high %v4941_v50, %v4965_v55  ;;  %v11544_v25 = vcombine.high %v4942_v49, %v4966_v9  ;;  %v5157_v50 = vld [vmem:[#allocation23 + $0xd50] sm:$0xff] }
 0xbac   : > { %10316 = vmatprep.subr.bf16.mxu1 %v12020_v29  ;;  %v4989_v29 = vld [vmem:[#allocation23 + $0x810] sm:$0xff] }
 0xbae   : > { %10276 = vmatpush1.bf16.msra.mxu0 %v12017_v23  ;;  %v11543_v23 = vcombine.low %v4942_v49, %v4966_v9  ;;  %v5134_v49 = vld [vmem:[#allocation23 + $0xc98] sm:$0xff] }
 0xbaf   : > { %10317 = vmatpush1.bf16.msra.mxu1 %v12019_v24  ;;  %10277 = vmatprep.subr.bf16.mxu0 %v12066_v54  ;;  %v11590_v24 = vcombine.high %v4989_v29, %v5013_v16  ;;  %v11592_v54 = vcombine.high %v4990_v33, %v5014_v41  ;;  %v5158_v9 = vld [vmem:[#allocation23 + $0xd58] sm:$0xff]  ;;  %v5181_v33 = vld [vmem:[#allocation23 + $0xe10] sm:$0xff] }
 0xbb0   : > { %10318 = vmatprep.subr.bf16.mxu1 %v12068_v42  ;;  %v5037_v42 = vld [vmem:[#allocation23 + $0x990] sm:$0xff] }
 0xbb1   : > { %v11638_v46 = vcombine.high %v5037_v42, %v5061_v26  ;;  %v5205_v41 = vld [vmem:[#allocation23 + $0xed0] sm:$0xff] }
 0xbb2   : > { %10278 = vmatpush1.bf16.msra.mxu0 %v12065_v44  ;;  %v9442_v44 = vrot.slane %v15333_v38, %v15263_v0  ;;  %v11782_v61 = vcombine.high %v5181_v33, %v5205_v41 }
 0xbb3   : > { %10319 = vmatpush1.bf16.msra.mxu1 %v12067_v1  ;;  %10329 = vmatprep.subr.bf16.mxu0 %v11350_v10  ;;  %v9438_v1 = vrot.slane %v15333_v38, %v15266_v57  ;;  %v11589_v10 = vcombine.low %v4989_v29, %v5013_v16  ;;  %v11736_v16 = vcombine.high %v5134_v49, %v5158_v9 }
 0xbb4   : > { %10370 = vmatprep.subr.bf16.mxu1 %v11352_v22  ;;  %v9446_v22 = vrot.slane %v15333_v38, %v15269_v47 }
 0xbb5   : > { %10280 = vmatmul.mubr.bf16.vlgmr.msra.gmra.mrb[36].mxu0 %v15208_v39 }
 0xbb6   : > { %10321 = vmatmul.mubr.bf16.vlgmr.msra.gmra.mrb[36].mxu1 %v15208_v39  ;;  %10330 = vmatpush1.bf16.msra.mxu0 %v11349_v6 }
 0xbb7   : > { %10361 = vmatprep.mubr.bf16.mxu0 %v15206_v13  ;;  %10371 = vmatpush1.bf16.msra.mxu1 %v11351_v28  ;;  %v5109_v28 = vld [vmem:[#allocation23 + $0xbd0] sm:$0xff] }
 0xbb8   : > { %10402 = vmatprep.mubr.bf16.mxu1 %v15206_v13  ;;  %10331 = vmatprep.subr.bf16.mxu0 %v11398_v17  ;;  %v11686_v5 = vcombine.high %v5085_v59, %v5109_v28 }
 0xbb9   : > { %10372 = vmatprep.subr.bf16.mxu1 %v11400_v20  ;;  %v5086_v20 = vld [vmem:[#allocation23 + $0xb18] sm:$0xff] }
 0xbba   : > { %10332 = vmatpush1.bf16.msra.mxu0 %v11397_v30 }
 0xbbb   : > { %10373 = vmatpush1.bf16.msra.mxu1 %v11399_v3  ;;  %10333 = vmatprep.subr.bf16.mxu0 %v11446_v2 }
 0xbbc   : > { %10374 = vmatprep.subr.bf16.mxu1 %v11448_v58  ;;  %v11637_v58 = vcombine.low %v5037_v42, %v5061_v26  ;;  %v11735_v42 = vcombine.low %v5134_v49, %v5158_v9  ;;  %v10761_v26 = vrot.slane %v10753_v21, %v15245_v53  ;;  %v5277_v21 = vld [vmem:[#allocation23 + $0x1110] sm:$0xff]  ;;  %v5422_v9 = vld [vmem:[#allocation23 + $0x1598] sm:$0xff] }
 0xbbd   : > { %v5445_v49 = vld [vmem:[#allocation23 + $0x1650] sm:$0xff] }
 0xbbe   : > { %10334 = vmatpush1.bf16.msra.mxu0 %v11445_v19 }
 0xbbf   : > { %10375 = vmatpush1.bf16.msra.mxu1 %v11447_v35  ;;  %10335 = vmatprep.subr.bf16.mxu0 %v11494_v12  ;;  %v11688_v12 = vcombine.high %v5086_v20, %v5110_v43 }
 0xbc0   : > { %10376 = vmatprep.subr.bf16.mxu1 %v11496_v4  ;;  %v5133_v4 = vld [vmem:[#allocation23 + $0xc90] sm:$0xff] }
 0xbc1   : > { %v11734_v29 = vcombine.high %v5133_v4, %v5157_v50 }
 0xbc2   : > { %10336 = vmatpush1.bf16.msra.mxu0 %v11493_v18 }
 0xbc3   : > { %10377 = vmatpush1.bf16.msra.mxu1 %v11495_v62  ;;  %10337 = vmatprep.subr.bf16.mxu0 %v11542_v37  ;;  %v11685_v62 = vcombine.low %v5085_v59, %v5109_v28  ;;  %v5278_v59 = vld [vmem:[#allocation23 + $0x1118] sm:$0xff] }
 0xbc4   : > { %10378 = vmatprep.subr.bf16.mxu1 %v11544_v25  ;;  %v11687_v25 = vcombine.low %v5086_v20, %v5110_v43  ;;  %v5302_v28 = vld [vmem:[#allocation23 + $0x11d8] sm:$0xff]  ;;  %v5325_v43 = vld [vmem:[#allocation23 + $0x1290] sm:$0xff] }
 0xbc5   : > { %v11880_v20 = vcombine.high %v5278_v59, %v5302_v28 }
 0xbc6   : > { %10338 = vmatpush1.bf16.msra.mxu0 %v11541_v7 }
 0xbc7   : > { %10379 = vmatpush1.bf16.msra.mxu1 %v11543_v23  ;;  %10339 = vmatprep.subr.bf16.mxu0 %v11590_v24  ;;  %v5182_v23 = vld [vmem:[#allocation23 + $0xe18] sm:$0xff] }
 0xbc8   : > { %v10035_v6 = vpop.f32.mrb[24].mxu0  ;;  %10380 = vmatprep.subr.bf16.mxu1 %v11592_v54  ;;  %v5206_v24 = vld [vmem:[#allocation23 + $0xed8] sm:$0xff]  ;;  %v11733_v54 = vcombine.low %v5133_v4, %v5157_v50 }
 0xbc9   : > { %v10036_v17 = vadd.f32 %v10035_v6, %v9434_v51  ;;  %v10076_v11 = vpop.f32.mrb[24].mxu1  ;;  %v10037_v36 = vpop.f32.mrb[25].mxu0  ;;  %v11784_v8 = vcombine.high %v5182_v23, %v5206_v24  ;;  %v11783_v6 = vcombine.low %v5182_v23, %v5206_v24 }
 0xbca   : > { %v10077_v27 = vadd.f32 %v10076_v11, %v9442_v44  ;;  %v10038_v30 = vadd.f32 %v10037_v36, %v9438_v1  ;;  %v10078_v3 = vpop.f32.mrb[25].mxu1  ;;  %v10039_v2 = vpop.f32.mrb[26].mxu0  ;;  %10340 = vmatpush1.bf16.msra.mxu0 %v11589_v10  ;;  %v5229_v44 = vld [vmem:[#allocation23 + $0xf90] sm:$0xff] }
 0xbcb   : > { %v10079_v38 = vadd.f32 %v10078_v3, %v9446_v22  ;;  %v10080_v14 = vpop.f32.mrb[26].mxu1  ;;  %10381 = vmatpush1.bf16.msra.mxu1 %v11591_v56  ;;  %v10040_v31 = vpop.f32.mrb[27].mxu0  ;;  %10341 = vmatprep.subr.bf16.mxu0 %v11638_v46  ;;  %v5253_v1 = vld [vmem:[#allocation23 + $0x1050] sm:$0xff]  ;;  %v5230_v22 = vld [vmem:[#allocation23 + $0xf98] sm:$0xff]  ;;  %v11781_v46 = vcombine.low %v5181_v33, %v5205_v41 }
 0xbcc   : > { %v10723_v19 = vcombine.low %v10036_v17, %v10038_v30  ;;  %v10081_v35 = vpop.f32.mrb[27].mxu1  ;;  %10382 = vmatprep.subr.bf16.mxu1 %v11640_v48  ;;  %v5254_v56 = vld [vmem:[#allocation23 + $0x1058] sm:$0xff]  ;;  %v11830_v60 = vcombine.high %v5229_v44, %v5253_v1  ;;  %v5301_v48 = vld [vmem:[#allocation23 + $0x11d0] sm:$0xff]  ;;  %v11829_v17 = vcombine.low %v5229_v44, %v5253_v1 }
 0xbcd   : > { %v10724_v55 = vcombine.low %v10077_v27, %v10079_v38  ;;  %v11832_v52 = vcombine.high %v5230_v22, %v5254_v56  ;;  %v11831_v11 = vcombine.low %v5230_v22, %v5254_v56  ;;  %v11878_v36 = vcombine.high %v5277_v21, %v5301_v48  ;;  %v5349_v27 = vld [vmem:[#allocation23 + $0x1350] sm:$0xff]  ;;  %v5326_v30 = vld [vmem:[#allocation23 + $0x1298] sm:$0xff]  ;;  %v4799_v56 = vld [vmem:[#allocation23 + $0x220] sm:$0xff] }
 0xbce   : > { %v10745_v18 = vrot.slane %v10723_v19, %v15245_v53  ;;  %10342 = vmatpush1.bf16.msra.mxu0 %v11637_v58  ;;  %v5350_v3 = vld [vmem:[#allocation23 + $0x1358] sm:$0xff]  ;;  %v11877_v2 = vcombine.low %v5277_v21, %v5301_v48  ;;  %v11879_v58 = vcombine.low %v5278_v59, %v5302_v28  ;;  %v11926_v38 = vcombine.high %v5325_v43, %v5349_v27  ;;  %v5373_v31 = vld [vmem:[#allocation23 + $0x1410] sm:$0xff]  ;;  %v4847_v59 = vld [vmem:[#allocation23 + $0x3a0] sm:$0xff] }
 0xbcf   : > { %v10752_v37 = vrot.slane %v10724_v55, %v15245_v53  ;;  %10383 = vmatpush1.bf16.msra.mxu1 %v11639_v40  ;;  %10343 = vmatprep.subr.bf16.mxu0 %v11686_v5  ;;  %v11928_v14 = vcombine.high %v5326_v30, %v5350_v3  ;;  %v5397_v40 = vld [vmem:[#allocation23 + $0x14d0] sm:$0xff]  ;;  %v5374_v5 = vld [vmem:[#allocation23 + $0x1418] sm:$0xff]  ;;  %v11925_v35 = vcombine.low %v5325_v43, %v5349_v27  ;;  %v4871_v28 = vld [vmem:[#allocation23 + $0x460] sm:$0xff] }
 0xbd0   : > { %10384 = vmatprep.subr.bf16.mxu1 %v11688_v12  ;;  %v5398_v19 = vld [vmem:[#allocation23 + $0x14d8] sm:$0xff]  ;;  %v11927_v12 = vcombine.low %v5326_v30, %v5350_v3  ;;  %v11974_v4 = vcombine.high %v5373_v31, %v5397_v40  ;;  %v5421_v55 = vld [vmem:[#allocation23 + $0x1590] sm:$0xff]  ;;  %v11450_v27 = vcombine.high %v4847_v59, %v4871_v28  ;;  %v4895_v3 = vld [vmem:[#allocation23 + $0x520] sm:$0xff] }
 0xbd1   : > { %v10754_v7 = vcombine.low %v10745_v18, %v10752_v37  ;;  %v11976_v50 = vcombine.high %v5374_v5, %v5398_v19  ;;  %v5446_v18 = vld [vmem:[#allocation23 + $0x1658] sm:$0xff]  ;;  %v11975_v37 = vcombine.low %v5374_v5, %v5398_v19  ;;  %v5493_v33 = vld [vmem:[#allocation23 + $0x17d0] sm:$0xff]  ;;  %v12021_v23 = vcombine.low %v5421_v55, %v5445_v49  ;;  %v4943_v19 = vld [vmem:[#allocation23 + $0x6a0] sm:$0xff] }
 0xbd2   : > { %10344 = vmatpush1.bf16.msra.mxu0 %v11685_v62  ;;  %v11973_v62 = vcombine.low %v5373_v31, %v5397_v40  ;;  %v5470_v41 = vld [vmem:[#allocation23 + $0x1718] sm:$0xff]  ;;  %v12023_v24 = vcombine.low %v5422_v9, %v5446_v18 }
 0xbd3   : > { %v10768_v51 = vrot.slane %v10754_v7, %v15245_v53  ;;  %10385 = vmatpush1.bf16.msra.mxu1 %v11687_v25  ;;  %10345 = vmatprep.subr.bf16.mxu0 %v11734_v29  ;;  %v12022_v25 = vcombine.high %v5421_v55, %v5445_v49  ;;  %v12024_v29 = vcombine.high %v5422_v9, %v5446_v18  ;;  %v5494_v7 = vld [vmem:[#allocation23 + $0x17d8] sm:$0xff]  ;;  %v4991_v18 = vld [vmem:[#allocation23 + $0x820] sm:$0xff] }
 0xbd4   : > { %10386 = vmatprep.subr.bf16.mxu1 %v11736_v16  ;;  %v5469_v16 = vld [vmem:[#allocation23 + $0x1710] sm:$0xff]  ;;  %v12071_v1 = vcombine.low %v5470_v41, %v5494_v7 }
 0xbd5   : > { %v10769_v10 = vcombine.low %v10761_v26, %v10768_v51  ;;  %v4751_v26 = vld [vmem:[#allocation23 + $0xa0] sm:$0xff]  ;;  %v12069_v44 = vcombine.low %v5469_v16, %v5493_v33 }
 0xbd6   : > { %10346 = vmatpush1.bf16.msra.mxu0 %v11733_v54  ;;  %v12070_v54 = vcombine.high %v5469_v16, %v5493_v33  ;;  %v4775_v51 = vld [vmem:[#allocation23 + $0x160] sm:$0xff]  ;;  %v15375_v16 = vld [vmem:[#allocation25 + $0x18] sm:$0xff] }
 0xbd7   : > { %10925 = vst [vmem:[%s13829_s24 + $0x10] sm:$0xff] %v10769_v10  ;;  %10387 = vmatpush1.bf16.msra.mxu1 %v11735_v42  ;;  %10347 = vmatprep.subr.bf16.mxu0 %v11782_v61  ;;  %v12072_v42 = vcombine.high %v5470_v41, %v5494_v7  ;;  %v4752_v61 = vld [vmem:[#allocation23 + $0xa8] sm:$0xff]  ;;  %v11354_v10 = vcombine.high %v4751_v26, %v4775_v51 }
 0xbd8   : > { %10388 = vmatprep.subr.bf16.mxu1 %v11784_v8  ;;  %v4776_v8 = vld [vmem:[#allocation23 + $0x168] sm:$0xff] }
 0xbd9   : > { %v11356_v22 = vcombine.high %v4752_v61, %v4776_v8  ;;  %v11355_v21 = vcombine.low %v4752_v61, %v4776_v8  ;;  %v9454_v61 = vrot.slane %v15375_v16, %v14860_v45 }
 0xbda   : > { %10348 = vmatpush1.bf16.msra.mxu0 %v11781_v46  ;;  %v4823_v46 = vld [vmem:[#allocation23 + $0x2e0] sm:$0xff] }
 0xbdb   : > { %10389 = vmatpush1.bf16.msra.mxu1 %v11783_v6  ;;  %10349 = vmatprep.subr.bf16.mxu0 %v11830_v60  ;;  %v11353_v6 = vcombine.low %v4751_v26, %v4775_v51  ;;  %v4800_v60 = vld [vmem:[#allocation23 + $0x228] sm:$0xff]  ;;  %v11402_v48 = vcombine.high %v4799_v56, %v4823_v46  ;;  %v9458_v51 = vrot.slane %v15375_v16, %v15229_v34 }
 0xbdc   : > { %10390 = vmatprep.subr.bf16.mxu1 %v11832_v52  ;;  %v4824_v52 = vld [vmem:[#allocation23 + $0x2e8] sm:$0xff] }
 0xbdd   : > { %v11403_v43 = vcombine.low %v4800_v60, %v4824_v52  ;;  %v5064_v26 = vld [vmem:[#allocation23 + $0xa68] sm:$0xff] }
 0xbde   : > { %10350 = vmatpush1.bf16.msra.mxu0 %v11829_v17  ;;  %v11404_v17 = vcombine.high %v4800_v60, %v4824_v52 }
 0xbdf   : > { %10391 = vmatpush1.bf16.msra.mxu1 %v11831_v11  ;;  %10351 = vmatprep.subr.bf16.mxu0 %v11878_v36  ;;  %v4848_v11 = vld [vmem:[#allocation23 + $0x3a8] sm:$0xff] }
 0xbe0   : > { %10392 = vmatprep.subr.bf16.mxu1 %v11880_v20  ;;  %v4872_v36 = vld [vmem:[#allocation23 + $0x468] sm:$0xff]  ;;  %v11401_v20 = vcombine.low %v4799_v56, %v4823_v46  ;;  %v5087_v46 = vld [vmem:[#allocation23 + $0xb20] sm:$0xff] }
 0xbe1   : > { %v11452_v30 = vcombine.high %v4848_v11, %v4872_v36  ;;  %v11451_v31 = vcombine.low %v4848_v11, %v4872_v36 }
 0xbe2   : > { %10352 = vmatpush1.bf16.msra.mxu0 %v11877_v2  ;;  %v4919_v2 = vld [vmem:[#allocation23 + $0x5e0] sm:$0xff] }
 0xbe3   : > { %10393 = vmatpush1.bf16.msra.mxu1 %v11879_v58  ;;  %10353 = vmatprep.subr.bf16.mxu0 %v11926_v38  ;;  %v4896_v58 = vld [vmem:[#allocation23 + $0x528] sm:$0xff]  ;;  %v11498_v40 = vcombine.high %v4895_v3, %v4919_v2 }
 0xbe4   : > { %10394 = vmatprep.subr.bf16.mxu1 %v11928_v14  ;;  %v4920_v38 = vld [vmem:[#allocation23 + $0x5e8] sm:$0xff]  ;;  %v11449_v14 = vcombine.low %v4847_v59, %v4871_v28 }
 0xbe5   : > { %v11500_v5 = vcombine.high %v4896_v58, %v4920_v38  ;;  %v11499_v55 = vcombine.low %v4896_v58, %v4920_v38  ;;  %v5112_v59 = vld [vmem:[#allocation23 + $0xbe8] sm:$0xff] }
 0xbe6   : > { %10354 = vmatpush1.bf16.msra.mxu0 %v11925_v35  ;;  %v4967_v35 = vld [vmem:[#allocation23 + $0x760] sm:$0xff] }
 0xbe7   : > { %10395 = vmatpush1.bf16.msra.mxu1 %v11927_v12  ;;  %10355 = vmatprep.subr.bf16.mxu0 %v11974_v4  ;;  %v4944_v12 = vld [vmem:[#allocation23 + $0x6a8] sm:$0xff]  ;;  %v11546_v49 = vcombine.high %v4943_v19, %v4967_v35 }
 0xbe8   : > { %10396 = vmatprep.subr.bf16.mxu1 %v11976_v50  ;;  %v4968_v4 = vld [vmem:[#allocation23 + $0x768] sm:$0xff]  ;;  %v11497_v50 = vcombine.low %v4895_v3, %v4919_v2 }
 0xbe9   : > { %v11548_v9 = vcombine.high %v4944_v12, %v4968_v4  ;;  %v11547_v33 = vcombine.low %v4944_v12, %v4968_v4 }
 0xbea   : > { %10356 = vmatpush1.bf16.msra.mxu0 %v11973_v62  ;;  %v5015_v62 = vld [vmem:[#allocation23 + $0x8e0] sm:$0xff] }
 0xbeb   : > { %10397 = vmatpush1.bf16.msra.mxu1 %v11975_v37  ;;  %10357 = vmatprep.subr.bf16.mxu0 %v12022_v25  ;;  %v4992_v37 = vld [vmem:[#allocation23 + $0x828] sm:$0xff]  ;;  %v11594_v41 = vcombine.high %v4991_v18, %v5015_v62  ;;  %v11593_v8 = vcombine.low %v4991_v18, %v5015_v62  ;;  %v5183_v18 = vld [vmem:[#allocation23 + $0xe20] sm:$0xff] }
 0xbec   : > { %10398 = vmatprep.subr.bf16.mxu1 %v12024_v29  ;;  %v5016_v25 = vld [vmem:[#allocation23 + $0x8e8] sm:$0xff]  ;;  %v11545_v29 = vcombine.low %v4943_v19, %v4967_v35  ;;  %v5207_v62 = vld [vmem:[#allocation23 + $0xee0] sm:$0xff] }
 0xbed   : > { %v11596_v7 = vcombine.high %v4992_v37, %v5016_v25  ;;  %v5136_v19 = vld [vmem:[#allocation23 + $0xca8] sm:$0xff] }
 0xbee   : > { %10358 = vmatpush1.bf16.msra.mxu0 %v12021_v23  ;;  %v5039_v23 = vld [vmem:[#allocation23 + $0x9a0] sm:$0xff]  ;;  %v5160_v35 = vld [vmem:[#allocation23 + $0xd68] sm:$0xff] }
 0xbef   : > { %10399 = vmatpush1.bf16.msra.mxu1 %v12023_v24  ;;  %10359 = vmatprep.subr.bf16.mxu0 %v12070_v54  ;;  %v5063_v24 = vld [vmem:[#allocation23 + $0xa60] sm:$0xff]  ;;  %v9450_v54 = vrot.slane %v15375_v16, %v14856_v32 }
 0xbf0   : > { %10400 = vmatprep.subr.bf16.mxu1 %v12072_v42  ;;  %v5040_v42 = vld [vmem:[#allocation23 + $0x9a8] sm:$0xff] }
 0xbf1   : > { %v11644_v56 = vcombine.high %v5040_v42, %v5064_v26  ;;  %v11643_v3 = vcombine.low %v5040_v42, %v5064_v26  ;;  %v5232_v42 = vld [vmem:[#allocation23 + $0xfa8] sm:$0xff] }
 0xbf2   : > { %10360 = vmatpush1.bf16.msra.mxu0 %v12069_v44  ;;  %v9462_v44 = vrot.slane %v15375_v16, %v15234_v63  ;;  %v5256_v26 = vld [vmem:[#allocation23 + $0x1068] sm:$0xff] }
 0xbf3   : > { %10401 = vmatpush1.bf16.msra.mxu1 %v12071_v1  ;;  %10411 = vmatprep.subr.bf16.mxu0 %v11354_v10  ;;  %v11595_v1 = vcombine.low %v4992_v37, %v5016_v25  ;;  %v11642_v10 = vcombine.high %v5039_v23, %v5063_v24  ;;  %v5184_v25 = vld [vmem:[#allocation23 + $0xe28] sm:$0xff] }
 0xbf4   : > { %10452 = vmatprep.subr.bf16.mxu1 %v11356_v22 }
 0xbf5   : > { %10362 = vmatmul.mubr.bf16.vlgmr.msra.gmra.mrb[40].mxu0 %v15208_v39 }
 0xbf6   : > { %10403 = vmatmul.mubr.bf16.vlgmr.msra.gmra.mrb[40].mxu1 %v15208_v39  ;;  %10412 = vmatpush1.bf16.msra.mxu0 %v11353_v6  ;;  %v5111_v6 = vld [vmem:[#allocation23 + $0xbe0] sm:$0xff] }
 0xbf7   : > { %10443 = vmatprep.mubr.bf16.mxu0 %v15206_v13  ;;  %10453 = vmatpush1.bf16.msra.mxu1 %v11355_v21  ;;  %v11690_v2 = vcombine.high %v5087_v46, %v5111_v6  ;;  %v11689_v4 = vcombine.low %v5087_v46, %v5111_v6  ;;  %v11835_v6 = vcombine.low %v5232_v42, %v5256_v26 }
 0xbf8   : > { %10484 = vmatprep.mubr.bf16.mxu1 %v15206_v13  ;;  %10413 = vmatprep.subr.bf16.mxu0 %v11402_v48  ;;  %v5088_v48 = vld [vmem:[#allocation23 + $0xb28] sm:$0xff] }
 0xbf9   : > { %10454 = vmatprep.subr.bf16.mxu1 %v11404_v17 }
 0xbfa   : > { %10414 = vmatpush1.bf16.msra.mxu0 %v11401_v20  ;;  %v11641_v20 = vcombine.low %v5039_v23, %v5063_v24  ;;  %v5231_v24 = vld [vmem:[#allocation23 + $0xfa0] sm:$0xff] }
 0xbfb   : > { %10455 = vmatpush1.bf16.msra.mxu1 %v11403_v43  ;;  %10415 = vmatprep.subr.bf16.mxu0 %v11450_v27 }
 0xbfc   : > { %10456 = vmatprep.subr.bf16.mxu1 %v11452_v30 }
 0xbfe   : > { %10416 = vmatpush1.bf16.msra.mxu0 %v11449_v14  ;;  %v11692_v14 = vcombine.high %v5088_v48, %v5112_v59 }
 0xbff   : > { %10457 = vmatpush1.bf16.msra.mxu1 %v11451_v31  ;;  %10417 = vmatprep.subr.bf16.mxu0 %v11498_v40  ;;  %v5135_v31 = vld [vmem:[#allocation23 + $0xca0] sm:$0xff] }
 0xc00   : > { %10458 = vmatprep.subr.bf16.mxu1 %v11500_v5  ;;  %v5159_v40 = vld [vmem:[#allocation23 + $0xd60] sm:$0xff] }
 0xc02   : > { %10418 = vmatpush1.bf16.msra.mxu0 %v11497_v50 }
 0xc03   : > { %10459 = vmatpush1.bf16.msra.mxu1 %v11499_v55  ;;  %10419 = vmatprep.subr.bf16.mxu0 %v11546_v49  ;;  %v11691_v55 = vcombine.low %v5088_v48, %v5112_v59  ;;  %v11738_v49 = vcombine.high %v5135_v31, %v5159_v40  ;;  %v5351_v48 = vld [vmem:[#allocation23 + $0x1360] sm:$0xff]  ;;  %v5328_v59 = vld [vmem:[#allocation23 + $0x12a8] sm:$0xff] }
 0xc04   : > { %10460 = vmatprep.subr.bf16.mxu1 %v11548_v9  ;;  %v11740_v9 = vcombine.high %v5136_v19, %v5160_v35 }
 0xc06   : > { %10420 = vmatpush1.bf16.msra.mxu0 %v11545_v29  ;;  %v5208_v29 = vld [vmem:[#allocation23 + $0xee8] sm:$0xff] }
 0xc07   : > { %10461 = vmatpush1.bf16.msra.mxu1 %v11547_v33  ;;  %10421 = vmatprep.subr.bf16.mxu0 %v11594_v41  ;;  %v11737_v33 = vcombine.low %v5135_v31, %v5159_v40  ;;  %v11739_v41 = vcombine.low %v5136_v19, %v5160_v35  ;;  %v11788_v23 = vcombine.high %v5184_v25, %v5208_v29  ;;  %v5423_v31 = vld [vmem:[#allocation23 + $0x15a0] sm:$0xff]  ;;  %v5448_v19 = vld [vmem:[#allocation23 + $0x1668] sm:$0xff] }
 0xc08   : > { %v10117_v22 = vpop.f32.mrb[28].mxu0  ;;  %10462 = vmatprep.subr.bf16.mxu1 %v11596_v7  ;;  %v11786_v7 = vcombine.high %v5183_v18, %v5207_v62  ;;  %v5447_v40 = vld [vmem:[#allocation23 + $0x1660] sm:$0xff] }
 0xc09   : > { %v10118_v60 = vadd.f32 %v10117_v22, %v9450_v54  ;;  %v10158_v52 = vpop.f32.mrb[28].mxu1  ;;  %v10119_v21 = vpop.f32.mrb[29].mxu0  ;;  %v5255_v54 = vld [vmem:[#allocation23 + $0x1060] sm:$0xff]  ;;  %v5280_v22 = vld [vmem:[#allocation23 + $0x1128] sm:$0xff] }
 0xc0a   : > { %v10159_v28 = vadd.f32 %v10158_v52, %v9458_v51  ;;  %v10120_v17 = vadd.f32 %v10119_v21, %v9454_v61  ;;  %v10160_v11 = vpop.f32.mrb[29].mxu1  ;;  %v10121_v36 = vpop.f32.mrb[30].mxu0  ;;  %10422 = vmatpush1.bf16.msra.mxu0 %v11593_v8  ;;  %v11785_v51 = vcombine.low %v5183_v18, %v5207_v62  ;;  %v11787_v61 = vcombine.low %v5184_v25, %v5208_v29  ;;  %v5327_v21 = vld [vmem:[#allocation23 + $0x12a0] sm:$0xff]  ;;  %v5472_v62 = vld [vmem:[#allocation23 + $0x1728] sm:$0xff] }
 0xc0b   : > { %v10161_v43 = vadd.f32 %v10160_v11, %v9462_v44  ;;  %v10162_v27 = vpop.f32.mrb[30].mxu1  ;;  %10463 = vmatpush1.bf16.msra.mxu1 %v11595_v1  ;;  %v10122_v30 = vpop.f32.mrb[31].mxu0  ;;  %10423 = vmatprep.subr.bf16.mxu0 %v11642_v10  ;;  %v11834_v8 = vcombine.high %v5231_v24, %v5255_v54  ;;  %v11836_v44 = vcombine.high %v5232_v42, %v5256_v26  ;;  %v5279_v1 = vld [vmem:[#allocation23 + $0x1120] sm:$0xff]  ;;  %v5496_v25 = vld [vmem:[#allocation23 + $0x17e8] sm:$0xff]  ;;  %v4778_v42 = vld [vmem:[#allocation23 + $0x178] sm:$0xff] }
 0xc0c   : > { %v10770_v58 = vcombine.low %v10118_v60, %v10120_v17  ;;  %v10163_v38 = vpop.f32.mrb[31].mxu1  ;;  %10464 = vmatprep.subr.bf16.mxu1 %v11644_v56  ;;  %v5303_v10 = vld [vmem:[#allocation23 + $0x11e0] sm:$0xff]  ;;  %v5304_v56 = vld [vmem:[#allocation23 + $0x11e8] sm:$0xff]  ;;  %v11833_v46 = vcombine.low %v5231_v24, %v5255_v54  ;;  %v11930_v36 = vcombine.high %v5327_v21, %v5351_v48  ;;  %v12025_v29 = vcombine.low %v5423_v31, %v5447_v40  ;;  %v4777_v24 = vld [vmem:[#allocation23 + $0x170] sm:$0xff] }
 0xc0d   : > { %v10771_v5 = vcombine.low %v10159_v28, %v10161_v43  ;;  %v11882_v60 = vcombine.high %v5279_v1, %v5303_v10  ;;  %v11884_v52 = vcombine.high %v5280_v22, %v5304_v56  ;;  %v5352_v28 = vld [vmem:[#allocation23 + $0x1368] sm:$0xff]  ;;  %v11881_v17 = vcombine.low %v5279_v1, %v5303_v10  ;;  %v5375_v43 = vld [vmem:[#allocation23 + $0x1420] sm:$0xff]  ;;  %v4754_v54 = vld [vmem:[#allocation23 + $0xb8] sm:$0xff] }
 0xc0e   : > { %v15386_v12 = vrot.slane %v10770_v58, %v15245_v53  ;;  %10424 = vmatpush1.bf16.msra.mxu0 %v11641_v20  ;;  %v11883_v11 = vcombine.low %v5280_v22, %v5304_v56  ;;  %v11932_v20 = vcombine.high %v5328_v59, %v5352_v28  ;;  %v5399_v27 = vld [vmem:[#allocation23 + $0x14e0] sm:$0xff]  ;;  %v5376_v30 = vld [vmem:[#allocation23 + $0x1428] sm:$0xff]  ;;  %v11931_v58 = vcombine.low %v5328_v59, %v5352_v28  ;;  %v4825_v1 = vld [vmem:[#allocation23 + $0x2f0] sm:$0xff] }
 0xc0f   : > { %v15389_v50 = vrot.slane %v10771_v5, %v15245_v53  ;;  %10465 = vmatpush1.bf16.msra.mxu1 %v11643_v3  ;;  %10425 = vmatprep.subr.bf16.mxu0 %v11690_v2  ;;  %v5400_v3 = vld [vmem:[#allocation23 + $0x14e8] sm:$0xff]  ;;  %v11929_v2 = vcombine.low %v5327_v21, %v5351_v48  ;;  %v11978_v38 = vcombine.high %v5375_v43, %v5399_v27  ;;  %v5495_v18 = vld [vmem:[#allocation23 + $0x17e0] sm:$0xff]  ;;  %v4802_v22 = vld [vmem:[#allocation23 + $0x238] sm:$0xff] }
 0xc10   : > { %10466 = vmatprep.subr.bf16.mxu1 %v11692_v14  ;;  %v11980_v14 = vcombine.high %v5376_v30, %v5400_v3  ;;  %v5424_v5 = vld [vmem:[#allocation23 + $0x15a8] sm:$0xff]  ;;  %v11977_v35 = vcombine.low %v5375_v43, %v5399_v27  ;;  %v4826_v56 = vld [vmem:[#allocation23 + $0x2f8] sm:$0xff]  ;;  %v4921_v43 = vld [vmem:[#allocation23 + $0x5f0] sm:$0xff] }
 0xc11   : > { %v10802_v37 = vcombine.low %v15386_v12, %v15389_v50  ;;  %v11408_v21 = vcombine.high %v4802_v22, %v4826_v56  ;;  %v4850_v48 = vld [vmem:[#allocation23 + $0x3b8] sm:$0xff] }
 0xc12   : > { %10426 = vmatpush1.bf16.msra.mxu0 %v11689_v4  ;;  %v11979_v4 = vcombine.low %v5376_v30, %v5400_v3  ;;  %v4874_v59 = vld [vmem:[#allocation23 + $0x478] sm:$0xff] }
 0xc13   : > { %10467 = vmatpush1.bf16.msra.mxu1 %v11691_v55  ;;  %10427 = vmatprep.subr.bf16.mxu0 %v11738_v49  ;;  %v12026_v55 = vcombine.high %v5423_v31, %v5447_v40  ;;  %v12028_v49 = vcombine.high %v5424_v5, %v5448_v19  ;;  %v4898_v27 = vld [vmem:[#allocation23 + $0x538] sm:$0xff]  ;;  %v4969_v31 = vld [vmem:[#allocation23 + $0x770] sm:$0xff] }
 0xc14   : > { %10468 = vmatprep.subr.bf16.mxu1 %v11740_v9  ;;  %v5471_v9 = vld [vmem:[#allocation23 + $0x1720] sm:$0xff]  ;;  %v4922_v30 = vld [vmem:[#allocation23 + $0x5f8] sm:$0xff] }
 0xc15   : > { %v12073_v26 = vcombine.low %v5471_v9, %v5495_v18  ;;  %v4946_v40 = vld [vmem:[#allocation23 + $0x6b8] sm:$0xff] }
 0xc16   : > { %10428 = vmatpush1.bf16.msra.mxu0 %v11737_v33  ;;  %v12027_v33 = vcombine.low %v5424_v5, %v5448_v19  ;;  %v4970_v5 = vld [vmem:[#allocation23 + $0x778] sm:$0xff]  ;;  %v11503_v19 = vcombine.low %v4898_v27, %v4922_v30 }
 0xc17   : > { %10469 = vmatpush1.bf16.msra.mxu1 %v11739_v41  ;;  %10429 = vmatprep.subr.bf16.mxu0 %v11786_v7  ;;  %v12074_v41 = vcombine.high %v5471_v9, %v5495_v18  ;;  %v12076_v7 = vcombine.high %v5472_v62, %v5496_v25  ;;  %v4994_v9 = vld [vmem:[#allocation23 + $0x838] sm:$0xff] }
 0xc18   : > { %10470 = vmatprep.subr.bf16.mxu1 %v11788_v23  ;;  %v4753_v23 = vld [vmem:[#allocation23 + $0xb0] sm:$0xff]  ;;  %v5018_v18 = vld [vmem:[#allocation23 + $0x8f8] sm:$0xff] }
 0xc19   : > { %v11357_v10 = vcombine.low %v4753_v23, %v4777_v24 }
 0xc1a   : > { %10430 = vmatpush1.bf16.msra.mxu0 %v11785_v51  ;;  %v12075_v51 = vcombine.low %v5472_v62, %v5496_v25  ;;  %v11551_v25 = vcombine.low %v4946_v40, %v4970_v5 }
 0xc1b   : > { %10471 = vmatpush1.bf16.msra.mxu1 %v11787_v61  ;;  %10431 = vmatprep.subr.bf16.mxu0 %v11834_v8  ;;  %v11358_v61 = vcombine.high %v4753_v23, %v4777_v24  ;;  %v11360_v8 = vcombine.high %v4754_v54, %v4778_v42  ;;  %v9466_v23 = vrot.slane %v15375_v16, %v15260_v15  ;;  %v5042_v24 = vld [vmem:[#allocation23 + $0x9b8] sm:$0xff] }
 0xc1c   : > { %10472 = vmatprep.subr.bf16.mxu1 %v11836_v44  ;;  %v4801_v44 = vld [vmem:[#allocation23 + $0x230] sm:$0xff] }
 0xc1d   : > { %v11405_v28 = vcombine.low %v4801_v44, %v4825_v1 }
 0xc1e   : > { %10432 = vmatpush1.bf16.msra.mxu0 %v11833_v46  ;;  %v11359_v46 = vcombine.low %v4754_v54, %v4778_v42  ;;  %v5066_v54 = vld [vmem:[#allocation23 + $0xa78] sm:$0xff]  ;;  %v9474_v42 = vrot.slane %v15375_v16, %v15263_v0 }
 0xc1f   : > { %10473 = vmatpush1.bf16.msra.mxu1 %v11835_v6  ;;  %10433 = vmatprep.subr.bf16.mxu0 %v11882_v60  ;;  %v11406_v6 = vcombine.high %v4801_v44, %v4825_v1  ;;  %v4849_v60 = vld [vmem:[#allocation23 + $0x3b0] sm:$0xff] }
 0xc20   : > { %10474 = vmatprep.subr.bf16.mxu1 %v11884_v52  ;;  %v4873_v52 = vld [vmem:[#allocation23 + $0x470] sm:$0xff] }
 0xc21   : > { %v11453_v3 = vcombine.low %v4849_v60, %v4873_v52 }
 0xc22   : > { %10434 = vmatpush1.bf16.msra.mxu0 %v11881_v17  ;;  %v11407_v17 = vcombine.low %v4802_v22, %v4826_v56  ;;  %v5089_v22 = vld [vmem:[#allocation23 + $0xb30] sm:$0xff] }
 0xc23   : > { %10475 = vmatpush1.bf16.msra.mxu1 %v11883_v11  ;;  %10435 = vmatprep.subr.bf16.mxu0 %v11930_v36  ;;  %v11454_v11 = vcombine.high %v4849_v60, %v4873_v52  ;;  %v11456_v36 = vcombine.high %v4850_v48, %v4874_v59  ;;  %v5113_v56 = vld [vmem:[#allocation23 + $0xbf0] sm:$0xff]  ;;  %v5090_v52 = vld [vmem:[#allocation23 + $0xb38] sm:$0xff] }
 0xc24   : > { %10476 = vmatprep.subr.bf16.mxu1 %v11932_v20  ;;  %v4897_v20 = vld [vmem:[#allocation23 + $0x530] sm:$0xff] }
 0xc26   : > { %10436 = vmatpush1.bf16.msra.mxu0 %v11929_v2  ;;  %v11455_v2 = vcombine.low %v4850_v48, %v4874_v59 }
 0xc27   : > { %10477 = vmatpush1.bf16.msra.mxu1 %v11931_v58  ;;  %10437 = vmatprep.subr.bf16.mxu0 %v11978_v38  ;;  %v11502_v58 = vcombine.high %v4897_v20, %v4921_v43  ;;  %v11504_v38 = vcombine.high %v4898_v27, %v4922_v30  ;;  %v11694_v27 = vcombine.high %v5089_v22, %v5113_v56 }
 0xc28   : > { %10478 = vmatprep.subr.bf16.mxu1 %v11980_v14  ;;  %v4945_v14 = vld [vmem:[#allocation23 + $0x6b0] sm:$0xff] }
 0xc29   : > { %v11549_v62 = vcombine.low %v4945_v14, %v4969_v31 }
 0xc2a   : > { %10438 = vmatpush1.bf16.msra.mxu0 %v11977_v35  ;;  %v11550_v35 = vcombine.high %v4945_v14, %v4969_v31  ;;  %v5138_v31 = vld [vmem:[#allocation23 + $0xcb8] sm:$0xff] }
 0xc2b   : > { %10479 = vmatpush1.bf16.msra.mxu1 %v11979_v4  ;;  %10439 = vmatprep.subr.bf16.mxu0 %v12026_v55  ;;  %v11552_v4 = vcombine.high %v4946_v40, %v4970_v5  ;;  %v4993_v55 = vld [vmem:[#allocation23 + $0x830] sm:$0xff]  ;;  %v5162_v40 = vld [vmem:[#allocation23 + $0xd78] sm:$0xff] }
 0xc2c   : > { %10480 = vmatprep.subr.bf16.mxu1 %v12028_v49  ;;  %v5017_v49 = vld [vmem:[#allocation23 + $0x8f0] sm:$0xff] }
 0xc2e   : > { %10440 = vmatpush1.bf16.msra.mxu0 %v12025_v29  ;;  %v11598_v29 = vcombine.high %v4993_v55, %v5017_v49 }
 0xc2f   : > { %10481 = vmatpush1.bf16.msra.mxu1 %v12027_v33  ;;  %10441 = vmatprep.subr.bf16.mxu0 %v12074_v41  ;;  %v11600_v33 = vcombine.high %v4994_v9, %v5018_v18  ;;  %v5041_v41 = vld [vmem:[#allocation23 + $0x9b0] sm:$0xff] }
 0xc30   : > { %10482 = vmatprep.subr.bf16.mxu1 %v12076_v7  ;;  %v5065_v7 = vld [vmem:[#allocation23 + $0xa70] sm:$0xff] }
 0xc31   : > { %v11646_v44 = vcombine.high %v5041_v41, %v5065_v7 }
 0xc32   : > { %10442 = vmatpush1.bf16.msra.mxu0 %v12073_v26  ;;  %v9470_v26 = vrot.slane %v15375_v16, %v15266_v57 }
 0xc33   : > { %10483 = vmatpush1.bf16.msra.mxu1 %v12075_v51  ;;  %10493 = vmatprep.subr.bf16.mxu0 %v11358_v61  ;;  %v11597_v51 = vcombine.low %v4993_v55, %v5017_v49  ;;  %v9478_v61 = vrot.slane %v15375_v16, %v15269_v47  ;;  %v11744_v55 = vcombine.high %v5138_v31, %v5162_v40  ;;  %v5185_v49 = vld [vmem:[#allocation23 + $0xe30] sm:$0xff] }
 0xc34   : > { %10534 = vmatprep.subr.bf16.mxu1 %v11360_v8  ;;  %v11599_v8 = vcombine.low %v4994_v9, %v5018_v18  ;;  %v5209_v9 = vld [vmem:[#allocation23 + $0xef0] sm:$0xff] }
 0xc35   : > { %10444 = vmatmul.mubr.bf16.vlgmr.msra.gmra.mrb[44].mxu0 %v15208_v39 }
 0xc36   : > { %10485 = vmatmul.mubr.bf16.vlgmr.msra.gmra.mrb[44].mxu1 %v15208_v39  ;;  %10494 = vmatpush1.bf16.msra.mxu0 %v11357_v10  ;;  %v11648_v10 = vcombine.high %v5042_v24, %v5066_v54 }
 0xc37   : > { %10525 = vmatprep.mubr.bf16.mxu0 %v15206_v13  ;;  %10535 = vmatpush1.bf16.msra.mxu1 %v11359_v46 }
 0xc38   : > { %10566 = vmatprep.mubr.bf16.mxu1 %v15206_v13  ;;  %10495 = vmatprep.subr.bf16.mxu0 %v11406_v6  ;;  %v11501_v13 = vcombine.low %v4897_v20, %v4921_v43  ;;  %v11647_v43 = vcombine.low %v5042_v24, %v5066_v54  ;;  %v5233_v54 = vld [vmem:[#allocation23 + $0xfb0] sm:$0xff] }
 0xc39   : > { %10536 = vmatprep.subr.bf16.mxu1 %v11408_v21  ;;  %v5114_v21 = vld [vmem:[#allocation23 + $0xbf8] sm:$0xff] }
 0xc3a   : > { %10496 = vmatpush1.bf16.msra.mxu0 %v11405_v28 }
 0xc3b   : > { %10537 = vmatpush1.bf16.msra.mxu1 %v11407_v17  ;;  %10497 = vmatprep.subr.bf16.mxu0 %v11454_v11  ;;  %v11645_v11 = vcombine.low %v5041_v41, %v5065_v7  ;;  %v10810_v41 = vrot.slane %v10802_v37, %v15245_v53  ;;  %v5281_v37 = vld [vmem:[#allocation23 + $0x1130] sm:$0xff] }
 0xc3c   : > { %10538 = vmatprep.subr.bf16.mxu1 %v11456_v36 }
 0xc3e   : > { %10498 = vmatpush1.bf16.msra.mxu0 %v11453_v3 }
 0xc3f   : > { %10539 = vmatpush1.bf16.msra.mxu1 %v11455_v2  ;;  %10499 = vmatprep.subr.bf16.mxu0 %v11502_v58  ;;  %v11696_v2 = vcombine.high %v5090_v52, %v5114_v21  ;;  %v5137_v58 = vld [vmem:[#allocation23 + $0xcb0] sm:$0xff] }
 0xc40   : > { %10540 = vmatprep.subr.bf16.mxu1 %v11504_v38  ;;  %v5161_v38 = vld [vmem:[#allocation23 + $0xd70] sm:$0xff] }
 0xc42   : > { %10500 = vmatpush1.bf16.msra.mxu0 %v11501_v13  ;;  %v11693_v13 = vcombine.low %v5089_v22, %v5113_v56  ;;  %v5306_v22 = vld [vmem:[#allocation23 + $0x11f8] sm:$0xff] }
 0xc43   : > { %10541 = vmatpush1.bf16.msra.mxu1 %v11503_v19  ;;  %10501 = vmatprep.subr.bf16.mxu0 %v11550_v35  ;;  %v11695_v35 = vcombine.low %v5090_v52, %v5114_v21  ;;  %v5329_v52 = vld [vmem:[#allocation23 + $0x12b0] sm:$0xff] }
 0xc44   : > { %10542 = vmatprep.subr.bf16.mxu1 %v11552_v4  ;;  %v11742_v4 = vcombine.high %v5137_v58, %v5161_v38  ;;  %v5353_v21 = vld [vmem:[#allocation23 + $0x1370] sm:$0xff] }
 0xc46   : > { %10502 = vmatpush1.bf16.msra.mxu0 %v11549_v62  ;;  %v5186_v62 = vld [vmem:[#allocation23 + $0xe38] sm:$0xff] }
 0xc47   : > { %10543 = vmatpush1.bf16.msra.mxu1 %v11551_v25  ;;  %10503 = vmatprep.subr.bf16.mxu0 %v11598_v29  ;;  %v5210_v25 = vld [vmem:[#allocation23 + $0xef8] sm:$0xff]  ;;  %v11741_v29 = vcombine.low %v5137_v58, %v5161_v38  ;;  %v5425_v38 = vld [vmem:[#allocation23 + $0x15b0] sm:$0xff] }
 0xc48   : > { %v10199_v1 = vpop.f32.mrb[32].mxu0  ;;  %10544 = vmatprep.subr.bf16.mxu1 %v11600_v33  ;;  %v11743_v33 = vcombine.low %v5138_v31, %v5162_v40  ;;  %v11792_v24 = vcombine.high %v5186_v62, %v5210_v25  ;;  %v5426_v31 = vld [vmem:[#allocation23 + $0x15b8] sm:$0xff] }
 0xc49   : > { %v10200_v46 = vadd.f32 %v10199_v1, %v9466_v23  ;;  %v10240_v6 = vpop.f32.mrb[32].mxu1  ;;  %v10201_v60 = vpop.f32.mrb[33].mxu0  ;;  %v11790_v23 = vcombine.high %v5185_v49, %v5209_v9  ;;  %v5305_v1 = vld [vmem:[#allocation23 + $0x11f0] sm:$0xff]  ;;  %v5450_v40 = vld [vmem:[#allocation23 + $0x1678] sm:$0xff] }
 0xc4a   : > { %v10241_v48 = vadd.f32 %v10240_v6, %v9474_v42  ;;  %v10202_v59 = vadd.f32 %v10201_v60, %v9470_v26  ;;  %v10242_v28 = vpop.f32.mrb[33].mxu1  ;;  %v10203_v17 = vpop.f32.mrb[34].mxu0  ;;  %10504 = vmatpush1.bf16.msra.mxu0 %v11597_v51  ;;  %v5257_v42 = vld [vmem:[#allocation23 + $0x1070] sm:$0xff]  ;;  %v5234_v51 = vld [vmem:[#allocation23 + $0xfb8] sm:$0xff]  ;;  %v11886_v6 = vcombine.high %v5281_v37, %v5305_v1 }
 0xc4b   : > { %v10243_v16 = vadd.f32 %v10242_v28, %v9478_v61  ;;  %v10244_v36 = vpop.f32.mrb[34].mxu1  ;;  %10545 = vmatpush1.bf16.msra.mxu1 %v11599_v8  ;;  %v10204_v20 = vpop.f32.mrb[35].mxu0  ;;  %10505 = vmatprep.subr.bf16.mxu0 %v11646_v44  ;;  %v5258_v61 = vld [vmem:[#allocation23 + $0x1078] sm:$0xff]  ;;  %v11789_v8 = vcombine.low %v5185_v49, %v5209_v9  ;;  %v11791_v44 = vcombine.low %v5186_v62, %v5210_v25 }
 0xc4c   : > { %v10772_v30 = vcombine.low %v10200_v46, %v10202_v59  ;;  %v10245_v3 = vpop.f32.mrb[35].mxu1  ;;  %10546 = vmatprep.subr.bf16.mxu1 %v11648_v10  ;;  %v11838_v12 = vcombine.high %v5233_v54, %v5257_v42  ;;  %v11840_v50 = vcombine.high %v5234_v51, %v5258_v61  ;;  %v5282_v10 = vld [vmem:[#allocation23 + $0x1138] sm:$0xff]  ;;  %v11837_v56 = vcombine.low %v5233_v54, %v5257_v42  ;;  %v5377_v36 = vld [vmem:[#allocation23 + $0x1430] sm:$0xff] }
 0xc4d   : > { %v10773_v14 = vcombine.low %v10241_v48, %v10243_v16  ;;  %v11839_v46 = vcombine.low %v5234_v51, %v5258_v61  ;;  %v11888_v60 = vcombine.high %v5282_v10, %v5306_v22  ;;  %v5330_v48 = vld [vmem:[#allocation23 + $0x12b8] sm:$0xff]  ;;  %v11885_v28 = vcombine.low %v5281_v37, %v5305_v1  ;;  %v5401_v20 = vld [vmem:[#allocation23 + $0x14f0] sm:$0xff] }
 0xc4e   : > { %v10794_v5 = vrot.slane %v10772_v30, %v15245_v53  ;;  %10506 = vmatpush1.bf16.msra.mxu0 %v11645_v11  ;;  %v5354_v59 = vld [vmem:[#allocation23 + $0x1378] sm:$0xff]  ;;  %v11887_v17 = vcombine.low %v5282_v10, %v5306_v22  ;;  %v11934_v11 = vcombine.high %v5329_v52, %v5353_v21  ;;  %v11933_v30 = vcombine.low %v5329_v52, %v5353_v21 }
 0xc4f   : > { %v10801_v19 = vrot.slane %v10773_v14, %v15245_v53  ;;  %10547 = vmatpush1.bf16.msra.mxu1 %v11647_v43  ;;  %10507 = vmatprep.subr.bf16.mxu0 %v11694_v27  ;;  %v11936_v16 = vcombine.high %v5330_v48, %v5354_v59  ;;  %v5378_v43 = vld [vmem:[#allocation23 + $0x1438] sm:$0xff]  ;;  %v11935_v3 = vcombine.low %v5330_v48, %v5354_v59  ;;  %v5449_v14 = vld [vmem:[#allocation23 + $0x1670] sm:$0xff] }
 0xc50   : > { %10548 = vmatprep.subr.bf16.mxu1 %v11696_v2  ;;  %v5402_v27 = vld [vmem:[#allocation23 + $0x14f8] sm:$0xff]  ;;  %v11982_v2 = vcombine.high %v5377_v36, %v5401_v20  ;;  %v12031_v62 = vcombine.low %v5426_v31, %v5450_v40 }
 0xc51   : > { %v10803_v18 = vcombine.low %v10794_v5, %v10801_v19  ;;  %v11984_v58 = vcombine.high %v5378_v43, %v5402_v27  ;;  %v11981_v5 = vcombine.low %v5377_v36, %v5401_v20  ;;  %v12030_v19 = vcombine.high %v5425_v38, %v5449_v14  ;;  %v5474_v49 = vld [vmem:[#allocation23 + $0x1738] sm:$0xff] }
 0xc52   : > { %10508 = vmatpush1.bf16.msra.mxu0 %v11693_v13  ;;  %v11983_v13 = vcombine.low %v5378_v43, %v5402_v27  ;;  %v5498_v9 = vld [vmem:[#allocation23 + $0x17f8] sm:$0xff] }
 0xc53   : > { %v10817_v7 = vrot.slane %v10803_v18, %v15245_v53  ;;  %10549 = vmatpush1.bf16.msra.mxu1 %v11695_v35  ;;  %10509 = vmatprep.subr.bf16.mxu0 %v11742_v4  ;;  %v12032_v35 = vcombine.high %v5426_v31, %v5450_v40  ;;  %v5473_v4 = vld [vmem:[#allocation23 + $0x1730] sm:$0xff]  ;;  %v12029_v18 = vcombine.low %v5425_v38, %v5449_v14 }
 0xc54   : > { %10550 = vmatprep.subr.bf16.mxu1 %v11744_v55  ;;  %v5497_v55 = vld [vmem:[#allocation23 + $0x17f0] sm:$0xff] }
 0xc55   : > { %v10818_v26 = vcombine.low %v10810_v41, %v10817_v7  ;;  %v12078_v25 = vcombine.high %v5473_v4, %v5497_v55  ;;  %v12079_v41 = vcombine.low %v5474_v49, %v5498_v9  ;;  %v5503_v7 = vld [vmem:[#allocation25 + $0x20] sm:$0xff] }
 0xc56   : > { %10510 = vmatpush1.bf16.msra.mxu0 %v11741_v29  ;;  %v12080_v29 = vcombine.high %v5474_v49, %v5498_v9  ;;  %v9486_v54 = vrot.slane %v5503_v7, %v14860_v45  ;;  %v9494_v42 = vrot.slane %v5503_v7, %v15234_v63  ;;  %v9498_v21 = vrot.slane %v5503_v7, %v15260_v15 }
 0xc57   : > { %10926 = vst [vmem:[%s13829_s24 + $0x18] sm:$0xff] %v10818_v26  ;;  %10551 = vmatpush1.bf16.msra.mxu1 %v11743_v33  ;;  %10511 = vmatprep.subr.bf16.mxu0 %v11790_v23  ;;  %v12077_v33 = vcombine.low %v5473_v4, %v5497_v55  ;;  %v9482_v23 = vrot.slane %v5503_v7, %v14856_v32  ;;  %v5504_v55 = vld [vmem:[#allocation25 + $0x28] sm:$0xff] }
 0xc58   : > { %10552 = vmatprep.subr.bf16.mxu1 %v11792_v24  ;;  %v9490_v24 = vrot.slane %v5503_v7, %v15229_v34  ;;  %v9506_v48 = vrot.slane %v5503_v7, %v15263_v0  ;;  %v9502_v59 = vrot.slane %v5503_v7, %v15266_v57  ;;  %v9514_v49 = vrot.slane %v5504_v55, %v14856_v32 }
 0xc59   : > { %v9522_v9 = vrot.slane %v5504_v55, %v15229_v34 }
 0xc5a   : > { %10512 = vmatpush1.bf16.msra.mxu0 %v11789_v8 }
 0xc5b   : > { %10553 = vmatpush1.bf16.msra.mxu1 %v11791_v44  ;;  %10513 = vmatprep.subr.bf16.mxu0 %v11838_v12 }
 0xc5c   : > { %10554 = vmatprep.subr.bf16.mxu1 %v11840_v50 }
 0xc5e   : > { %10514 = vmatpush1.bf16.msra.mxu0 %v11837_v56 }
 0xc5f   : > { %10555 = vmatpush1.bf16.msra.mxu1 %v11839_v46  ;;  %10515 = vmatprep.subr.bf16.mxu0 %v11886_v6 }
 0xc60   : > { %10556 = vmatprep.subr.bf16.mxu1 %v11888_v60 }
 0xc62   : > { %10516 = vmatpush1.bf16.msra.mxu0 %v11885_v28  ;;  %v9510_v28 = vrot.slane %v5503_v7, %v15269_v47 }
 0xc63   : > { %10557 = vmatpush1.bf16.msra.mxu1 %v11887_v17  ;;  %10517 = vmatprep.subr.bf16.mxu0 %v11934_v11 }
 0xc64   : > { %10558 = vmatprep.subr.bf16.mxu1 %v11936_v16 }
 0xc66   : > { %10518 = vmatpush1.bf16.msra.mxu0 %v11933_v30 }
 0xc67   : > { %10559 = vmatpush1.bf16.msra.mxu1 %v11935_v3  ;;  %10519 = vmatprep.subr.bf16.mxu0 %v11982_v2 }
 0xc68   : > { %10560 = vmatprep.subr.bf16.mxu1 %v11984_v58 }
 0xc6a   : > { %10520 = vmatpush1.bf16.msra.mxu0 %v11981_v5 }
 0xc6b   : > { %10561 = vmatpush1.bf16.msra.mxu1 %v11983_v13  ;;  %10521 = vmatprep.subr.bf16.mxu0 %v12030_v19 }
 0xc6c   : > { %10562 = vmatprep.subr.bf16.mxu1 %v12032_v35 }
 0xc6e   : > { %10522 = vmatpush1.bf16.msra.mxu0 %v12029_v18  ;;  %v9518_v18 = vrot.slane %v5504_v55, %v14860_v45 }
 0xc6f   : > { %10563 = vmatpush1.bf16.msra.mxu1 %v12031_v62  ;;  %10523 = vmatprep.subr.bf16.mxu0 %v12078_v25  ;;  %v9526_v62 = vrot.slane %v5504_v55, %v15234_v63  ;;  %v9530_v63 = vrot.slane %v5504_v55, %v15260_v15 }
 0xc70   : > { %10564 = vmatprep.subr.bf16.mxu1 %v12080_v29 }
 0xc72   : > { %10524 = vmatpush1.bf16.msra.mxu0 %v12077_v33 }
 0xc73   : > { %10565 = vmatpush1.bf16.msra.mxu1 %v12079_v41 }
 0xc75   : > { %10526 = vmatmul.mubr.bf16.vlgmr.msra.gmra.mrb[48].mxu0 %v15208_v39 }
 0xc76   : > { %10567 = vmatmul.mubr.bf16.vlgmr.msra.gmra.mrb[48].mxu1 %v15208_v39 }
 0xc88   : > { %v10281_v26 = vpop.f32.mrb[36].mxu0 }
 0xc89   : > { %v10282_v51 = vadd.f32 %v10281_v26, %v9482_v23  ;;  %v10322_v61 = vpop.f32.mrb[36].mxu1  ;;  %v10283_v8 = vpop.f32.mrb[37].mxu0 }
 0xc8a   : > { %v10323_v44 = vadd.f32 %v10322_v61, %v9490_v24  ;;  %v10284_v12 = vadd.f32 %v10283_v8, %v9486_v54  ;;  %v10324_v50 = vpop.f32.mrb[37].mxu1  ;;  %v10285_v37 = vpop.f32.mrb[38].mxu0 }
 0xc8b   : > { %v10325_v1 = vadd.f32 %v10324_v50, %v9494_v42  ;;  %v10326_v10 = vpop.f32.mrb[38].mxu1  ;;  %v10286_v39 = vpop.f32.mrb[39].mxu0  ;;  %v9534_v50 = vrot.slane %v5504_v55, %v15266_v57  ;;  %v9542_v37 = vrot.slane %v5504_v55, %v15269_v47 }
 0xc8c   : > { %v10819_v22 = vcombine.low %v10282_v51, %v10284_v12  ;;  %v10327_v56 = vpop.f32.mrb[39].mxu1  ;;  %v9538_v12 = vrot.slane %v5504_v55, %v15263_v0 }
 0xc8d   : > { %v10820_v46 = vcombine.low %v10323_v44, %v10325_v1 }
 0xc8e   : > { %v10829_v6 = vrot.slane %v10819_v22, %v15245_v53 }
 0xc8f   : > { %v10836_v60 = vrot.slane %v10820_v46, %v15245_v53 }
 0xc91   : > { %v10851_v52 = vcombine.low %v10829_v6, %v10836_v60 }
 0xc93   : > { %v10859_v19 = vrot.slane %v10851_v52, %v15245_v53 }
 0xcc8   : > { %v10363_v17 = vpop.f32.mrb[40].mxu0 }
 0xcc9   : > { %v10364_v11 = vadd.f32 %v10363_v17, %v9498_v21  ;;  %v10404_v16 = vpop.f32.mrb[40].mxu1  ;;  %v10365_v36 = vpop.f32.mrb[41].mxu0 }
 0xcca   : > { %v10405_v20 = vadd.f32 %v10404_v16, %v9506_v48  ;;  %v10366_v43 = vadd.f32 %v10365_v36, %v9502_v59  ;;  %v10406_v27 = vpop.f32.mrb[41].mxu1  ;;  %v10367_v30 = vpop.f32.mrb[42].mxu0 }
 0xccb   : > { %v10407_v3 = vadd.f32 %v10406_v27, %v9510_v28  ;;  %v10408_v2 = vpop.f32.mrb[42].mxu1  ;;  %v10368_v58 = vpop.f32.mrb[43].mxu0 }
 0xccc   : > { %v10821_v38 = vcombine.low %v10364_v11, %v10366_v43  ;;  %v10409_v14 = vpop.f32.mrb[43].mxu1 }
 0xccd   : > { %v10822_v31 = vcombine.low %v10405_v20, %v10407_v3 }
 0xcce   : > { %v10843_v40 = vrot.slane %v10821_v38, %v15245_v53 }
 0xccf   : > { %v10850_v5 = vrot.slane %v10822_v31, %v15245_v53 }
 0xcd1   : > { %v10852_v13 = vcombine.low %v10843_v40, %v10850_v5 }
 0xcd3   : > { %v10866_v35 = vrot.slane %v10852_v13, %v15245_v53 }
 0xcd5   : > { %v10867_v4 = vcombine.low %v10859_v19, %v10866_v35 }
 0xcd7   : > { %10927 = vst [vmem:[%s13829_s24 + $0x20] sm:$0xff] %v10867_v4 }
 0xd08   : > { %v10445_v25 = vpop.f32.mrb[44].mxu0 }
 0xd09   : > { %v10446_v29 = vadd.f32 %v10445_v25, %v9514_v49  ;;  %v10486_v33 = vpop.f32.mrb[44].mxu1  ;;  %v10447_v41 = vpop.f32.mrb[45].mxu0 }
 0xd0a   : > { %v10487_v7 = vadd.f32 %v10486_v33, %v9522_v9  ;;  %v10448_v23 = vadd.f32 %v10447_v41, %v9518_v18  ;;  %v10488_v24 = vpop.f32.mrb[45].mxu1  ;;  %v10449_v54 = vpop.f32.mrb[46].mxu0 }
 0xd0b   : > { %v10489_v42 = vadd.f32 %v10488_v24, %v9526_v62  ;;  %v10490_v26 = vpop.f32.mrb[46].mxu1  ;;  %v10450_v51 = vpop.f32.mrb[47].mxu0 }
 0xd0c   : > { %v10868_v61 = vcombine.low %v10446_v29, %v10448_v23  ;;  %v10491_v8 = vpop.f32.mrb[47].mxu1 }
 0xd0d   : > { %v10869_v32 = vcombine.low %v10487_v7, %v10489_v42 }
 0xd0e   : > { %v10878_v34 = vrot.slane %v10868_v61, %v15245_v53 }
 0xd0f   : > { %v10885_v45 = vrot.slane %v10869_v32, %v15245_v53 }
 0xd11   : > { %v10900_v44 = vcombine.low %v10878_v34, %v10885_v45 }
 0xd13   : > { %v10908_v17 = vrot.slane %v10900_v44, %v15245_v53 }
 0xd48   : > { %v10527_v1 = vpop.f32.mrb[48].mxu0 }
 0xd49   : > { %v10528_v10 = vadd.f32 %v10527_v1, %v9530_v63  ;;  %v10568_v39 = vpop.f32.mrb[48].mxu1  ;;  %v10529_v22 = vpop.f32.mrb[49].mxu0 }
 0xd4a   : > { %v10569_v56 = vadd.f32 %v10568_v39, %v9538_v12  ;;  %v10530_v46 = vadd.f32 %v10529_v22, %v9534_v50  ;;  %v10570_v6 = vpop.f32.mrb[49].mxu1  ;;  %v10531_v60 = vpop.f32.mrb[50].mxu0 }
 0xd4b   : > { %v10571_v52 = vadd.f32 %v10570_v6, %v9542_v37  ;;  %v10572_v21 = vpop.f32.mrb[50].mxu1  ;;  %v10532_v15 = vpop.f32.mrb[51].mxu0 }
 0xd4c   : > { %v10870_v0 = vcombine.low %v10528_v10, %v10530_v46  ;;  %v10573_v48 = vpop.f32.mrb[51].mxu1 }
 0xd4d   : > { %v10871_v57 = vcombine.low %v10569_v56, %v10571_v52 }
 0xd4e   : > { %v10892_v47 = vrot.slane %v10870_v0, %v15245_v53 }
 0xd4f   : > { %v10899_v59 = vrot.slane %v10871_v57, %v15245_v53 }
 0xd51   : > { %v10901_v28 = vcombine.low %v10892_v47, %v10899_v59 }
 0xd53   : > { %v10915_v11 = vrot.slane %v10901_v28, %v15245_v53 }
 0xd55   : > { %v10916_v16 = vcombine.low %v10908_v17, %v10915_v11 }
 0xd57   : > { %10928 = vst [vmem:[%s13829_s24 + $0x28] sm:$0xff] %v10916_v16 }
 0xd58   : > { %13200 = shalt.err (!%p13197_p8)
}
 0xd59   : > { %s13201_s21 = scalar_lea.hbm %s15449_s1, 768  ;;  %s13205_s26 = scalar_lea.hbm %s15577_s29, 1536 }
 0xd5a   : > { %p13202_p11 = scmp.ne.s32.totalorder %s15449_s1, %s13201_s21  ;;  %p13206_p0 = scmp.lt.u32.totalorder %s15449_s1, %s15577_s29 }
 0xd5b   : > { %p13207_p6 = scmp.lt.u32.totalorder %s13205_s26, %s13201_s21  ;;  %p13209_p9 = scmp.lt.u32.totalorder %s13201_s21, %s15449_s1 }
 0xd5c   : > { %p13203_p13 = pnand %p13202_p11, %p15578_p12 }
 0xd5d   : > { %p13208_p5 = por %p13207_p6, %p13206_p0 }
 0xd5e   : > { %p13204_p1 = pneg %p13203_p13 }
 0xd5f   : > { %p13210_p10 = por %p13209_p9, %p13208_p5 }
 0xd61   : > { %p13211_p2 = pnand %p13210_p10, %p13204_p1 }
 0xd63   : > { %13214 = shalt.err (!%p13211_p2)
}
 0xd64   : > { %12407 = dma.vmem_to_hbm [thread:$0]  (%p15578_p12), %s15451_s8, 768, %s15449_s1, %s10930_s11  }
 0xd65 PF: > { %s15579_s22 = sld [smem:[#allocation38_spill]]  ;;  %s15580_s27 = sld [smem:[#allocation36_spill]] }
 0xd66   : > { %s15581_s19 = sld [smem:[#allocation42_spill]] }
 0xd6b   : > { %p12489_p3 = scmp.ge.s32.totalorder %s15579_s22, 2  ;;  %s10956_s18 = sand.u32 1, %s15580_s27  }
 0xd6c   : > { %p15582_p4 = scmp.ne.s32.totalorder %s15581_s19, 0  ;;  %s10957_s28 = scalar_lea.sflag [#allocation4], %s10956_s18 }
 0xd6e   : > { %p12456_p7 = pnand %p12489_p3, %p15582_p4 }
 0xd70   : > { %13272 = dma.done.wait (!%p12456_p7), %s10957_s28, 768  }
 0xd71   : > { %13274 = vsyncadd (!%p12456_p7), %s10957_s28, 4294966528  ;;  %s15583_s27 = sld [smem:[#allocation39_spill]]  ;;  %s15584_s20 = sld [smem:[#allocation37_spill]] }
 0xd72   : > { %s15585_s26 = sld [smem:[#allocation40_spill]]  ;;  %s15586_s24 = smov %s13281_s25 }
 0xd77   : > { %p35_p8 = scmp.ge.s32.totalorder %s15583_s27, 4   ;;  %s15587_s25 = smov %s15584_s20 }
 0xd79   :  { %37 = sbr.rel (!%p35_p8) target bundleno = 21 (0x15), region = 203 }
 0xd80   :  { %10962 = vsyncpa [#allocation3], 1 }
 0xd81   :  { %10964 = vsyncpa [#allocation3 + $0x1], 1 }
 0xd82   :  { %10965 = vsyncpa [#allocation6], 1 }
 0xd83   :  { %10966 = vsyncpa [#allocation9], 1 }
 0xd84   :  { %10967 = vsyncpa [#allocation12], 1 }
 0xd85   :  { %10968 = vsyncpa [#allocation15], 1 }
 0xd86   :  { %10969 = vsyncpa [#allocation18], 1 }
 0xd87   :  { %10970 = vsyncpa [#allocation21], 1 }
 0xd88   :  { %10971 = vsyncpa [#allocation24], 1 }
 0xd89   :  { %10972 = vsyncpa [#allocation4], 1 }
 0xd8a   :  { %10974 = vsyncpa [#allocation4 + $0x1], 1 }

</bundles_post_ra>
